<compile_context>
chip_gen: v6e
topology: v6e:2x2x1
jax: 0.10.0
libtpu: 0.0.40
codegen_flags: <defaults>
</compile_context>

<pallas_src>
import functools

import jax
import jax.numpy as jnp
from jax.experimental import pallas as pl
from jax.experimental.pallas import tpu as pltpu


def _round_up(x, m):
    return ((x + m - 1) // m) * m


def _device_defaults():
    """Per-generation defaults: (default row tile tm, scoped VMEM limit bytes)."""
    kind = ""
    try:
        kind = jax.devices()[0].device_kind.lower()
    except Exception:
        pass

    vmem_phys = None
    try:
        vmem_phys = int(pltpu.get_tpu_info().vmem_capacity_bytes)
    except Exception:
        pass
    if vmem_phys is None:
        # Conservative guess by device kind; unknown -> assume the small (v7x) VMEM.
        vmem_phys = (64 << 20) if ("v7" in kind or "7x" in kind) else (128 << 20)
        if not kind:
            vmem_phys = 64 << 20

    if "v6" in kind:
        tm = 1024   # v6e needs ~680 FLOP/byte vs 918 TF/s & ~1.4 TB/s HBM
    elif "v7" in kind or "7x" in kind:
        tm = 512    # v7x: 3.2 TB/s HBM but only 64 MiB VMEM per TC
    else:
        tm = 512    # v5e / unknown: ~240 FLOP/byte already saturates

    # Leave headroom for compiler scratch / double buffers:
    #   128 MiB parts -> 112 MiB, 64 MiB parts (v7x) -> 48 MiB.
    vmem_limit = max(32 << 20, min(vmem_phys - (16 << 20), 112 << 20))
    return tm, vmem_limit


def _vmem_estimate(tm, th, dim, w_itemsize, x_itemsize, o_itemsize):
    """Rough VMEM footprint of one grid step (double-buffered I/O + scratch)."""
    return (2 * tm * dim * x_itemsize          # x tile (double-buffered)
            + 2 * tm * dim * o_itemsize        # out tile (double-buffered)
            + tm * dim * 4                     # f32 accumulator scratch
            + 2 * dim * 2 * th * w_itemsize    # fused [w1|w3] tile (double-buffered)
            + 2 * th * dim * w_itemsize)       # w2^T tile (double-buffered)


def _ffn_kernel(x_ref, w13_ref, w2_ref, o_ref, acc_ref, *, th):
    """Grid: (m_pad // tm, hidden_pad // th).  Axis 1 is the hidden reduction.

    x_ref:   (tm, dim)       activation tile (resident across the hidden axis)
    w13_ref: (dim, 2*th)     interleaved hidden slice: [:, :th]=w1^T, [:, th:]=w3^T
    w2_ref:  (th, dim)       hidden slice of w2^T
    o_ref:   (tm, dim)       output tile
    acc_ref: (tm, dim)       f32 accumulator scratch
    """
    h_idx = pl.program_id(1)

    @pl.when(h_idx == 0)
    def _():
        acc_ref[...] = jnp.zeros_like(acc_ref)

    x = x_ref[...]                               # native dtype, no upcast
    # Single fused MXU matmul for w1 and w3, f32 accumulation.
    h13 = jnp.dot(x, w13_ref[...], preferred_element_type=jnp.float32)  # (tm, 2*th)
    h1 = h13[:, :th]
    h3 = h13[:, th:]
    # SwiGLU gate in f32: sigmoid -> EUP, multiplies -> VPU (free filler under MXU).
    h = (h1 * jax.nn.sigmoid(h1)) * h3
    w2 = w2_ref[...]
    acc_ref[...] += jnp.dot(h.astype(w2.dtype), w2,
                            preferred_element_type=jnp.float32)

    @pl.when(h_idx == pl.num_programs(1) - 1)
    def _():
        o_ref[...] = acc_ref[...].astype(o_ref.dtype)


@functools.partial(jax.jit, static_argnames=("tm", "th", "vmem_limit"))
def _feedforward_pallas(x, w13, w2t, *, tm, th, vmem_limit):
    """x: [..., dim]; w13: [dim, 2*hidden_pad] (interleaved); w2t: [hidden_pad, dim]."""
    orig_shape = x.shape
    dim = orig_shape[-1]
    hidden_pad = w13.shape[1] // 2

    M = 1
    for s in orig_shape[:-1]:
        M *= s

    # Row tile: multiple of 128 (MXU / bf16 sublane friendly), no larger than
    # needed to cover M, shrunk if the tiles would not fit the VMEM budget.
    tm = max(128, min(_round_up(tm, 128), _round_up(M, 128)))
    w_isz = jnp.dtype(w13.dtype).itemsize
    x_isz = jnp.dtype(x.dtype).itemsize
    while tm > 128 and _vmem_estimate(tm, th, dim, w_isz, x_isz, x_isz) > vmem_limit:
        tm -= 128

    m_pad = _round_up(M, tm)
    x2d = x.reshape(M, dim)
    if m_pad != M:
        x2d = jnp.pad(x2d, ((0, m_pad - M), (0, 0)))   # zero rows -> zero output rows

    grid = (m_pad // tm, hidden_pad // th)
    kernel = functools.partial(_ffn_kernel, th=th)

    out2d = pl.pallas_call(
        kernel,
        out_shape=jax.ShapeDtypeStruct((m_pad, dim), x.dtype),
        grid_spec=pltpu.PrefetchScalarGridSpec(
            num_scalar_prefetch=0,
            grid=grid,
            in_specs=[
                pl.BlockSpec((tm, dim), lambda i, h: (i, 0)),       # x tile (resident over h)
                pl.BlockSpec((dim, 2 * th), lambda i, h: (0, h)),   # fused [w1|w3] hidden slice
                pl.BlockSpec((th, dim), lambda i, h: (h, 0)),       # w2^T hidden slice
            ],
            out_specs=pl.BlockSpec((tm, dim), lambda i, h: (i, 0)),
            scratch_shapes=[pltpu.VMEM((tm, dim), jnp.float32)],
        ),
        compiler_params=pltpu.CompilerParams(
            dimension_semantics=("parallel", "arbitrary"),
            vmem_limit_bytes=vmem_limit,
        ),
    )(x2d, w13, w2t)

    if m_pad != M:
        out2d = out2d[:M]
    return out2d.reshape(orig_shape)


def _pack_ffn_weights(w1, w2, w3, th):
    """Pack PyTorch-layout weights once: w1/w3 [hidden, dim], w2 [dim, hidden]."""
    hidden, dim = w1.shape
    hidden_pad = _round_up(hidden, th)
    w1t, w2t, w3t = w1.T, w2.T, w3.T        # [dim,hidden], [hidden,dim], [dim,hidden]
    if hidden_pad != hidden:
        pad = hidden_pad - hidden
        # Zero-padded hidden columns/rows contribute exactly 0 to the output.
        w1t = jnp.pad(w1t, ((0, 0), (0, pad)))
        w3t = jnp.pad(w3t, ((0, 0), (0, pad)))
        w2t = jnp.pad(w2t, ((0, pad), (0, 0)))
    n_h = hidden_pad // th
    # Interleave per hidden tile: block h covers cols [h*2*th, (h+1)*2*th) where
    # the first th cols are the w1^T tile and the last th cols the w3^T tile, so
    # one (dim, 2*th) BlockSpec fetches both and one MXU matmul covers both.
    w13 = jnp.concatenate(
        [w1t.reshape(dim, n_h, th), w3t.reshape(dim, n_h, th)], axis=-1
    ).reshape(dim, 2 * hidden_pad)
    return w13, w2t


def make_feedforward(w1, w2, w3, *, tm=None, th=None):
    """Build the SwiGLU FFN callable from PyTorch [out, in]-layout weights.

    w1, w3: [hidden, dim]  (nn.Linear(dim, hidden).weight)
    w2:     [dim, hidden]  (nn.Linear(hidden, dim).weight)

    Weight transposition / fusion happens ONCE here, outside the hot path.
    For the fast path on real models, pass bf16 weights (and bf16 x): MXU
    operands stay bf16 with f32 accumulation inside the kernel.
    """
    hidden, dim = w1.shape
    tm_default, vmem_limit = _device_defaults()
    if tm is None:
        tm = tm_default
    itemsize = jnp.dtype(w1.dtype).itemsize

    if th is None:
        if 3 * dim * hidden * itemsize <= vmem_limit // 2:
            # Weights fully resident: block indices constant over the whole
            # grid -> weights are DMA'd from HBM exactly once.
            th = _round_up(hidden, 128)
        else:
            th = 512
            while th > 128 and 2 * (3 * dim * th * itemsize) > vmem_limit // 2:
                th -= 128
    th = max(128, min(_round_up(th, 128), _round_up(hidden, 128)))

    w13, w2t = _pack_ffn_weights(w1, w2, w3, th)

    def ffn(x):
        return _feedforward_pallas(x, w13, w2t, tm=tm, th=th, vmem_limit=vmem_limit)

    return ffn


def _trunc_normal(key, shape, std):
    # mirrors torch.nn.init.trunc_normal_(mean=0, std=std, a=-2, b=2) scaled by std
    return std * jax.random.truncated_normal(key, -2.0, 2.0, shape, jnp.float32)


def _ffn_ref(x, w1, w2, w3):
    # pure-JAX reference in PyTorch [out, in] weight layout
    h1 = x @ w1.T
    h3 = x @ w3.T
    return (jax.nn.silu(h1) * h3) @ w2.T


if __name__ == "__main__":
    # Module config (lane-dense: dim is a multiple of 128)
    dim = 256
    hidden_dim_arg = 1024
    multiple_of = 128
    hidden = int(2 * hidden_dim_arg / 3)                                  # 682
    hidden = multiple_of * ((hidden + multiple_of - 1) // multiple_of)    # 768

    # Deterministic parameter init (matches init_weights with init_std=0.02)
    key = jax.random.PRNGKey(0)
    kx, k1, k2, k3 = jax.random.split(key, 4)
    w1 = _trunc_normal(k1, (hidden, dim), 0.02)   # nn.Linear(dim, hidden)
    w2 = _trunc_normal(k2, (dim, hidden), 0.02)   # nn.Linear(hidden, dim)
    w3 = _trunc_normal(k3, (hidden, dim), 0.02)   # nn.Linear(dim, hidden)

    # --- f32, weights fully resident (th = hidden): grid (m_tiles, 1)
    x = jax.random.normal(kx, (2, 128, dim), jnp.float32)
    ffn = make_feedforward(w1, w2, w3)
    out = jax.block_until_ready(ffn(x))
    ref = _ffn_ref(x, w1, w2, w3)
    assert out.shape == ref.shape
    # tolerance covers XLA's default (non-HIGHEST) f32 matmul precision on TPU
    assert jnp.allclose(out, ref, atol=1e-3, rtol=2e-2), "f32 (resident) mismatch vs reference"

    # --- f32, forced hidden-axis streaming (th=256 -> 3 hidden tiles, exercises accumulation)
    ffn_stream = make_feedforward(w1, w2, w3, tm=128, th=256)
    out_s = jax.block_until_ready(ffn_stream(x))
    assert jnp.allclose(out_s, ref, atol=1e-3, rtol=2e-2), "f32 (streamed) mismatch vs reference"

    # --- bf16 (MXU-native operands), M=200 exercises the row-padding path
    xb = jax.random.normal(kx, (2, 100, dim), jnp.float32).astype(jnp.bfloat16)
    w1b, w2b, w3b = (w.astype(jnp.bfloat16) for w in (w1, w2, w3))
    ffn_b = make_feedforward(w1b, w2b, w3b)
    outb = jax.block_until_ready(ffn_b(xb))
    refb = _ffn_ref(xb.astype(jnp.float32),
                    w1b.astype(jnp.float32), w2b.astype(jnp.float32),
                    w3b.astype(jnp.float32))
    assert outb.shape == refb.shape
    assert jnp.allclose(outb.astype(jnp.float32), refb, atol=2e-2, rtol=5e-2), \
        "bf16 mismatch vs reference"

    print("KERNEL_OK")
</pallas_src>

<mosaic_0001>
module attributes {stable_mosaic.version = 11 : i64} {
  func.func @_ffn_kernel(%arg0: i32, %arg1: i32, %arg2: memref<256x256xf32, #tpu.memory_space<vmem>>, %arg3: memref<256x1536xf32, #tpu.memory_space<vmem>>, %arg4: memref<768x256xf32, #tpu.memory_space<vmem>>, %arg5: memref<256x256xf32, #tpu.memory_space<vmem>>, %arg6: memref<256x256xf32, #tpu.memory_space<vmem>>) attributes {dimension_semantics = [#tpu.dimension_semantics<parallel>, #tpu.dimension_semantics<arbitrary>], iteration_bounds = array<i64: 1, 1>, scalar_prefetch = 0 : i64, scratch_operands = 1 : i64, tpu.core_type = #tpu.core_type<tc>, window_params = [{transform_indices = @transform_0, window_bounds = array<i64: 256, 256>}, {transform_indices = @transform_1, window_bounds = array<i64: 256, 1536>}, {transform_indices = @transform_2, window_bounds = array<i64: 768, 256>}, {transform_indices = @transform_3, window_bounds = array<i64: 256, 256>}]} {
    %c0_i32 = arith.constant 0 : i32
    %0 = arith.cmpi eq, %arg1, %c0_i32 : i32
    %1 = arith.extui %0 : i1 to i32
    %c0_i32_0 = arith.constant 0 : i32
    %2 = arith.cmpi ne, %1, %c0_i32_0 : i32
    scf.if %2 {
      %cst_14 = arith.constant 0.000000e+00 : f32
      %23 = vector.broadcast %cst_14 : f32 to vector<256x256xf32>
      %c0_15 = arith.constant 0 : index
      %c0_16 = arith.constant 0 : index
      %24 = vector.load %arg6[%c0_15, %c0_16] : memref<256x256xf32, #tpu.memory_space<vmem>>, vector<256x256xf32>
      tpu.vector_store %arg6[%c0_15, %c0_16], %23 {strides = array<i32>} : memref<256x256xf32, #tpu.memory_space<vmem>>, vector<256x256xf32>,
    } else {
    }
    %c0 = arith.constant 0 : index
    %c0_1 = arith.constant 0 : index
    %3 = vector.load %arg2[%c0, %c0_1] : memref<256x256xf32, #tpu.memory_space<vmem>>, vector<256x256xf32>
    %c0_2 = arith.constant 0 : index
    %c0_3 = arith.constant 0 : index
    %4 = vector.load %arg3[%c0_2, %c0_3] : memref<256x1536xf32, #tpu.memory_space<vmem>>, vector<256x1536xf32>
    %cst = arith.constant dense<0.000000e+00> : vector<256x1536xf32>
    %5 = tpu.matmul %3, %4, %cst {dimension_numbers = #tpu.dot_dimension_numbers<[1], [0], [0], [1], [0, 0, 1, 1], [], []>} : vector<256x256xf32>, vector<256x1536xf32>, vector<256x1536xf32> -> vector<256x1536xf32>
    %6 = vector.extract_strided_slice %5 {offsets = [0, 0], sizes = [256, 768], strides = [1, 1]} : vector<256x1536xf32> to vector<256x768xf32>
    %7 = vector.extract_strided_slice %5 {offsets = [0, 768], sizes = [256, 768], strides = [1, 1]} : vector<256x1536xf32> to vector<256x768xf32>
    %8 = arith.negf %6 : vector<256x768xf32>
    %9 = math.exp %8 : vector<256x768xf32>
    %cst_4 = arith.constant 1.000000e+00 : f32
    %10 = vector.broadcast %cst_4 : f32 to vector<256x768xf32>
    %11 = arith.addf %10, %9 : vector<256x768xf32>
    %12 = arith.divf %10, %11 : vector<256x768xf32>
    %13 = arith.mulf %6, %12 : vector<256x768xf32>
    %14 = arith.mulf %13, %7 : vector<256x768xf32>
    %c0_5 = arith.constant 0 : index
    %c0_6 = arith.constant 0 : index
    %15 = vector.load %arg4[%c0_5, %c0_6] : memref<768x256xf32, #tpu.memory_space<vmem>>, vector<768x256xf32>
    %c0_7 = arith.constant 0 : index
    %c0_8 = arith.constant 0 : index
    %16 = vector.load %arg6[%c0_7, %c0_8] : memref<256x256xf32, #tpu.memory_space<vmem>>, vector<256x256xf32>
    %cst_9 = arith.constant dense<0.000000e+00> : vector<256x256xf32>
    %17 = tpu.matmul %14, %15, %cst_9 {dimension_numbers = #tpu.dot_dimension_numbers<[1], [0], [0], [1], [0, 0, 1, 1], [], []>} : vector<256x768xf32>, vector<768x256xf32>, vector<256x256xf32> -> vector<256x256xf32>
    %18 = arith.addf %16, %17 : vector<256x256xf32>
    %c0_10 = arith.constant 0 : index
    %c0_11 = arith.constant 0 : index
    %19 = vector.load %arg6[%c0_10, %c0_11] : memref<256x256xf32, #tpu.memory_space<vmem>>, vector<256x256xf32>
    tpu.vector_store %arg6[%c0_10, %c0_11], %18 {strides = array<i32>} : memref<256x256xf32, #tpu.memory_space<vmem>>, vector<256x256xf32>,
    %c0_i32_12 = arith.constant 0 : i32
    %20 = arith.cmpi eq, %arg1, %c0_i32_12 : i32
    %21 = arith.extui %20 : i1 to i32
    %c0_i32_13 = arith.constant 0 : i32
    %22 = arith.cmpi ne, %21, %c0_i32_13 : i32
    scf.if %22 {
      %c0_14 = arith.constant 0 : index
      %c0_15 = arith.constant 0 : index
      %23 = vector.load %arg6[%c0_14, %c0_15] : memref<256x256xf32, #tpu.memory_space<vmem>>, vector<256x256xf32>
      %c0_16 = arith.constant 0 : index
      %c0_17 = arith.constant 0 : index
      %24 = vector.load %arg5[%c0_16, %c0_17] : memref<256x256xf32, #tpu.memory_space<vmem>>, vector<256x256xf32>
      tpu.vector_store %arg5[%c0_16, %c0_17], %23 {strides = array<i32>} : memref<256x256xf32, #tpu.memory_space<vmem>>, vector<256x256xf32>,
    } else {
    }
    return
  }
  func.func @transform_0(%arg0: i32, %arg1: i32) -> (i32, i32) {
    %c0_i32 = arith.constant 0 : i32
    %c0_i32_0 = arith.constant 0 : i32
    return %arg0, %c0_i32 : i32, i32
  }
  func.func @transform_1(%arg0: i32, %arg1: i32) -> (i32, i32) {
    %c0_i32 = arith.constant 0 : i32
    %c0_i32_0 = arith.constant 0 : i32
    return %c0_i32, %arg1 : i32, i32
  }
  func.func @transform_2(%arg0: i32, %arg1: i32) -> (i32, i32) {
    %c0_i32 = arith.constant 0 : i32
    %c0_i32_0 = arith.constant 0 : i32
    return %arg1, %c0_i32 : i32, i32
  }
  func.func @transform_3(%arg0: i32, %arg1: i32) -> (i32, i32) {
    %c0_i32 = arith.constant 0 : i32
    %c0_i32_0 = arith.constant 0 : i32
    return %arg0, %c0_i32 : i32, i32
  }
}

</mosaic_0001>

<bundles_post_ra>
// kernel: _feedforward_pallas.1
= control target key start
LH: loop header
LB: loop body
LE: loop exit
PB: predicated region body
PF: predicated region fallthrough
CT: control target
= control target key end

     0   :  { %8 = vsyncpa [#allocation4], 0  ;;  %s8390_s0 = inlined_call_operand.hbm [shape: f32[256,256], index: 0, kind: input, shape index: {}]   ;;  %s8391_s1 = inlined_call_operand.hbm [shape: f32[256,1536], index: 1, kind: input, shape index: {}]   ;;  %s8392_s2 = inlined_call_operand.hbm [shape: f32[768,256], index: 2, kind: input, shape index: {}]   ;;  %s8393_s3 = inlined_call_operand.hbm [shape: f32[256,256], index: 3, kind: output, shape index: {}]  }
   0x1   :  { %9 = vsyncpa [#allocation7], 0 }
   0x2   :  { %10 = vsyncpa [#allocation5], 0  ;;  %s6200_s12 = smov [#allocation6]  }
   0x3   :  { %s28_s13 = sshll.u32 %s6200_s12, 4  ;;  %s29_s13 = int_to_ptr.vmem [resolvable:$true] %s28_s13 }
   0x4   :  { %s6122_s14 = scalar_lea.vmem %s29_s13, 49152  ;;  %p6127_p1 = scmp.lt.s32.totalorder %s29_s13, %s29_s13 }
   0x5   :  { %p6123_p0 = scmp.ne.s32.totalorder %s29_s13, %s6122_s14  ;;  %p6128_p2 = scmp.lt.s32.totalorder %s6122_s14, %s6122_s14 }
   0x7   :  { %p6129_p3 = por %p6128_p2, %p6127_p1 }
   0x9   :  { %p6130_p4 = pnand %p6129_p3, %p6123_p0 }
   0xb   :  { %6133 = shalt.err (!%p6130_p4)
}
   0xc   :  { %s6201_s15 = smov 1536   ;;  %s6202_s16 = smov 96  }
   0xd   :  { %34 = dma.hbm_to_vmem [thread:$0]  %s8391_s1, 49152, %s29_s13, [#allocation7], %s6201_s15, %s6201_s15, %s6202_s16  }
   0xe   :  { %s6203_s19 = smov [#allocation3]  }
   0xf   :  { %s16_s20 = sshll.u32 %s6203_s19, 4  ;;  %s17_s20 = int_to_ptr.vmem [resolvable:$true] %s16_s20 }
  0x10   :  { %s6142_s21 = scalar_lea.vmem %s17_s20, 8192  ;;  %p6147_p6 = scmp.lt.s32.totalorder %s17_s20, %s17_s20 }
  0x11   :  { %p6143_p5 = scmp.ne.s32.totalorder %s17_s20, %s6142_s21  ;;  %p6148_p7 = scmp.lt.s32.totalorder %s6142_s21, %s6142_s21 }
  0x13   :  { %p6149_p8 = por %p6148_p7, %p6147_p6 }
  0x15   :  { %p6150_p9 = pnand %p6149_p8, %p6143_p5 }
  0x17   :  { %6153 = shalt.err (!%p6150_p9)
}
  0x18   :  { %s6204_s22 = smov 256   ;;  %s6205_s23 = smov 16  }
  0x19   :  { %22 = dma.hbm_to_vmem [thread:$0]  %s8390_s0, 8192, %s17_s20, [#allocation4], %s6204_s22, %s6204_s22, %s6205_s23  }
  0x1a   :  { %s6206_s1 = smov [#allocation8]  }
  0x1b   :  { %s40_s26 = sshll.u32 %s6206_s1, 4  ;;  %s41_s26 = int_to_ptr.vmem [resolvable:$true] %s40_s26 }
  0x1c   :  { %s6162_s27 = scalar_lea.vmem %s41_s26, 24576  ;;  %p6167_p11 = scmp.lt.s32.totalorder %s41_s26, %s41_s26 }
  0x1d   :  { %p6163_p10 = scmp.ne.s32.totalorder %s41_s26, %s6162_s27  ;;  %p6168_p12 = scmp.lt.s32.totalorder %s6162_s27, %s6162_s27 }
  0x1f   :  { %p6169_p13 = por %p6168_p12, %p6167_p11 }
  0x21   :  { %p6170_p0 = pnand %p6169_p13, %p6163_p10 }
  0x23   :  { %6173 = shalt.err (!%p6170_p0)
}
  0x24   :  { %46 = dma.hbm_to_vmem [thread:$0]  %s8392_s2, 24576, %s41_s26, [#allocation7], %s6204_s22, %s6204_s22, %s6205_s23  }
  0x25   :  { %6194 = dma.done.wait [#allocation4], 8192  }
  0x26   :  { %6195 = vsyncadd [#allocation4], 4294959104 }
  0x27   :  { %6196 = dma.done.wait [#allocation7], 73728  }
  0x28   :  { %6197 = vsyncadd [#allocation7], 4294893568  ;;  %v369_v0 = vld [vmem:[#allocation6 + $0x5a8] sm:$0xff]  ;;  %v368_v1 = vld [vmem:[#allocation6 + $0x5a0] sm:$0xff]  ;;  %s6207_s0 = smov [#allocation9]  }
  0x29   :  { %v357_v2 = vld [vmem:[#allocation6 + $0x548] sm:$0xff]  ;;  %572 = vmatprep.subr.mxu0 %v369_v0  ;;  %5146 = vmatprep.subr.mxu1 %v369_v0  ;;  %v356_v3 = vld [vmem:[#allocation6 + $0x540] sm:$0xff]  ;;  %s4941_s2 = sshll.u32 %s6207_s0, 4  ;;  %s4942_s2 = int_to_ptr.vmem [resolvable:$true] %s4941_s2 }
  0x2a   :  { %573 = vmatpush1.msra.mxu0 %v368_v1  ;;  %5178 = vmatpush1.msra.mxu1 %v368_v1  ;;  %v345_v4 = vld [vmem:[#allocation6 + $0x4e8] sm:$0xff]  ;;  %v344_v5 = vld [vmem:[#allocation6 + $0x4e0] sm:$0xff]  ;;  %s6174_s30 = scalar_lea.vmem %s4942_s2, 8192  ;;  %p6179_p2 = scmp.lt.s32.totalorder %s4942_s2, %s4942_s2 }
  0x2b   :  { %574 = vmatprep.subr.mxu0 %v357_v2  ;;  %5147 = vmatprep.subr.mxu1 %v357_v2  ;;  %v333_v6 = vld [vmem:[#allocation6 + $0x488] sm:$0xff]  ;;  %v332_v7 = vld [vmem:[#allocation6 + $0x480] sm:$0xff]  ;;  %p6175_p1 = scmp.ne.s32.totalorder %s4942_s2, %s6174_s30  ;;  %p6180_p3 = scmp.lt.s32.totalorder %s6174_s30, %s6174_s30 }
  0x2c   :  { %575 = vmatpush1.msra.mxu0 %v356_v3  ;;  %5179 = vmatpush1.msra.mxu1 %v356_v3  ;;  %v321_v8 = vld [vmem:[#allocation6 + $0x428] sm:$0xff]  ;;  %v320_v9 = vld [vmem:[#allocation6 + $0x420] sm:$0xff] }
  0x2d   :  { %576 = vmatprep.subr.mxu0 %v345_v4  ;;  %5148 = vmatprep.subr.mxu1 %v345_v4  ;;  %v309_v10 = vld [vmem:[#allocation6 + $0x3c8] sm:$0xff]  ;;  %v308_v11 = vld [vmem:[#allocation6 + $0x3c0] sm:$0xff]  ;;  %v371_v4 = vld [vmem:[#allocation6 + $0x5b8] sm:$0xff]  ;;  %p6181_p4 = por %p6180_p3, %p6179_p2 }
  0x2e   :  { %577 = vmatpush1.msra.mxu0 %v344_v5  ;;  %5180 = vmatpush1.msra.mxu1 %v344_v5  ;;  %v297_v12 = vld [vmem:[#allocation6 + $0x368] sm:$0xff]  ;;  %v296_v13 = vld [vmem:[#allocation6 + $0x360] sm:$0xff] }
  0x2f   :  { %578 = vmatprep.subr.mxu0 %v333_v6  ;;  %5149 = vmatprep.subr.mxu1 %v333_v6  ;;  %v285_v14 = vld [vmem:[#allocation6 + $0x308] sm:$0xff]  ;;  %v284_v15 = vld [vmem:[#allocation6 + $0x300] sm:$0xff]  ;;  %v370_v6 = vld [vmem:[#allocation6 + $0x5b0] sm:$0xff]  ;;  %p6182_p5 = pnand %p6181_p4, %p6175_p1 }
  0x30   :  { %579 = vmatpush1.msra.mxu0 %v332_v7  ;;  %5181 = vmatpush1.msra.mxu1 %v332_v7  ;;  %v273_v16 = vld [vmem:[#allocation6 + $0x2a8] sm:$0xff]  ;;  %v272_v17 = vld [vmem:[#allocation6 + $0x2a0] sm:$0xff] }
  0x31   :  { %580 = vmatprep.subr.mxu0 %v321_v8  ;;  %5150 = vmatprep.subr.mxu1 %v321_v8  ;;  %v261_v18 = vld [vmem:[#allocation6 + $0x248] sm:$0xff]  ;;  %v260_v19 = vld [vmem:[#allocation6 + $0x240] sm:$0xff]  ;;  %v359_v8 = vld [vmem:[#allocation6 + $0x558] sm:$0xff] }
  0x32   :  { %581 = vmatpush1.msra.mxu0 %v320_v9  ;;  %5182 = vmatpush1.msra.mxu1 %v320_v9  ;;  %v249_v20 = vld [vmem:[#allocation6 + $0x1e8] sm:$0xff]  ;;  %v248_v21 = vld [vmem:[#allocation6 + $0x1e0] sm:$0xff] }
  0x33   :  { %582 = vmatprep.subr.mxu0 %v309_v10  ;;  %5151 = vmatprep.subr.mxu1 %v309_v10  ;;  %v237_v22 = vld [vmem:[#allocation6 + $0x188] sm:$0xff]  ;;  %v236_v23 = vld [vmem:[#allocation6 + $0x180] sm:$0xff]  ;;  %v6249_v10 = vld [vmem:[#allocation3 + $0x18] sm:$0xff] }
  0x34   :  { %583 = vmatpush1.msra.mxu0 %v308_v11  ;;  %5183 = vmatpush1.msra.mxu1 %v308_v11  ;;  %v225_v24 = vld [vmem:[#allocation6 + $0x128] sm:$0xff]  ;;  %v224_v25 = vld [vmem:[#allocation6 + $0x120] sm:$0xff]  ;;  %v159_v11 = vld [vmem:[#allocation3 + $0x118] sm:$0xff] }
  0x35   :  { %584 = vmatprep.subr.mxu0 %v297_v12  ;;  %5152 = vmatprep.subr.mxu1 %v297_v12  ;;  %v213_v26 = vld [vmem:[#allocation6 + $0xc8] sm:$0xff]  ;;  %v212_v27 = vld [vmem:[#allocation6 + $0xc0] sm:$0xff]  ;;  %v358_v12 = vld [vmem:[#allocation6 + $0x550] sm:$0xff] }
  0x36   :  { %585 = vmatpush1.msra.mxu0 %v296_v13  ;;  %5184 = vmatpush1.msra.mxu1 %v296_v13  ;;  %v201_v28 = vld [vmem:[#allocation6 + $0x68] sm:$0xff]  ;;  %v200_v29 = vld [vmem:[#allocation6 + $0x60] sm:$0xff] }
  0x37   :  { %586 = vmatprep.subr.mxu0 %v285_v14  ;;  %5153 = vmatprep.subr.mxu1 %v285_v14  ;;  %v189_v30 = vld [vmem:[#allocation6 + $0x8] sm:$0xff]  ;;  %v188_v31 = vld [vmem:[#allocation6] sm:$0xff]  ;;  %v6251_v14 = vld [vmem:[#allocation3 + $0x10] sm:$0xff] }
  0x38   :  { %587 = vmatpush1.msra.mxu0 %v284_v15  ;;  %5185 = vmatpush1.msra.mxu1 %v284_v15  ;;  %v561_v32 = vld [vmem:[#allocation6 + $0xba8] sm:$0xff]  ;;  %v560_v33 = vld [vmem:[#allocation6 + $0xba0] sm:$0xff]  ;;  %v158_v15 = vld [vmem:[#allocation3 + $0x110] sm:$0xff] }
  0x39   :  { %588 = vmatprep.subr.mxu0 %v273_v16  ;;  %5154 = vmatprep.subr.mxu1 %v273_v16  ;;  %v549_v34 = vld [vmem:[#allocation6 + $0xb48] sm:$0xff]  ;;  %v548_v35 = vld [vmem:[#allocation6 + $0xb40] sm:$0xff]  ;;  %v347_v16 = vld [vmem:[#allocation6 + $0x4f8] sm:$0xff] }
  0x3a   :  { %589 = vmatpush1.msra.mxu0 %v272_v17  ;;  %5186 = vmatpush1.msra.mxu1 %v272_v17  ;;  %v537_v36 = vld [vmem:[#allocation6 + $0xae8] sm:$0xff]  ;;  %v536_v37 = vld [vmem:[#allocation6 + $0xae0] sm:$0xff] }
  0x3b   :  { %590 = vmatprep.subr.mxu0 %v261_v18  ;;  %5155 = vmatprep.subr.mxu1 %v261_v18  ;;  %v525_v38 = vld [vmem:[#allocation6 + $0xa88] sm:$0xff]  ;;  %v524_v39 = vld [vmem:[#allocation6 + $0xa80] sm:$0xff]  ;;  %v346_v18 = vld [vmem:[#allocation6 + $0x4f0] sm:$0xff] }
  0x3c   :  { %591 = vmatpush1.msra.mxu0 %v260_v19  ;;  %5187 = vmatpush1.msra.mxu1 %v260_v19  ;;  %v513_v40 = vld [vmem:[#allocation6 + $0xa28] sm:$0xff]  ;;  %v512_v41 = vld [vmem:[#allocation6 + $0xa20] sm:$0xff] }
  0x3d   :  { %592 = vmatprep.subr.mxu0 %v249_v20  ;;  %5156 = vmatprep.subr.mxu1 %v249_v20  ;;  %v501_v42 = vld [vmem:[#allocation6 + $0x9c8] sm:$0xff]  ;;  %v500_v43 = vld [vmem:[#allocation6 + $0x9c0] sm:$0xff]  ;;  %v335_v20 = vld [vmem:[#allocation6 + $0x498] sm:$0xff] }
  0x3e   :  { %593 = vmatpush1.msra.mxu0 %v248_v21  ;;  %5188 = vmatpush1.msra.mxu1 %v248_v21  ;;  %v489_v44 = vld [vmem:[#allocation6 + $0x968] sm:$0xff]  ;;  %v488_v45 = vld [vmem:[#allocation6 + $0x960] sm:$0xff] }
  0x3f   :  { %594 = vmatprep.subr.mxu0 %v237_v22  ;;  %5157 = vmatprep.subr.mxu1 %v237_v22  ;;  %v477_v46 = vld [vmem:[#allocation6 + $0x908] sm:$0xff]  ;;  %v476_v47 = vld [vmem:[#allocation6 + $0x900] sm:$0xff] }
  0x40   :  { %595 = vmatpush1.msra.mxu0 %v236_v23  ;;  %5189 = vmatpush1.msra.mxu1 %v236_v23  ;;  %v465_v48 = vld [vmem:[#allocation6 + $0x8a8] sm:$0xff]  ;;  %v464_v49 = vld [vmem:[#allocation6 + $0x8a0] sm:$0xff] }
  0x41   :  { %596 = vmatprep.subr.mxu0 %v225_v24  ;;  %5158 = vmatprep.subr.mxu1 %v225_v24  ;;  %v453_v50 = vld [vmem:[#allocation6 + $0x848] sm:$0xff]  ;;  %v452_v51 = vld [vmem:[#allocation6 + $0x840] sm:$0xff]  ;;  %v334_v24 = vld [vmem:[#allocation6 + $0x490] sm:$0xff] }
  0x42   :  { %597 = vmatpush1.msra.mxu0 %v224_v25  ;;  %5190 = vmatpush1.msra.mxu1 %v224_v25  ;;  %v441_v52 = vld [vmem:[#allocation6 + $0x7e8] sm:$0xff]  ;;  %v440_v53 = vld [vmem:[#allocation6 + $0x7e0] sm:$0xff] }
  0x43   :  { %598 = vmatprep.subr.mxu0 %v213_v26  ;;  %5159 = vmatprep.subr.mxu1 %v213_v26  ;;  %v429_v54 = vld [vmem:[#allocation6 + $0x788] sm:$0xff]  ;;  %v428_v55 = vld [vmem:[#allocation6 + $0x780] sm:$0xff] }
  0x44   :  { %599 = vmatpush1.msra.mxu0 %v212_v27  ;;  %5191 = vmatpush1.msra.mxu1 %v212_v27  ;;  %v417_v56 = vld [vmem:[#allocation6 + $0x728] sm:$0xff]  ;;  %v416_v57 = vld [vmem:[#allocation6 + $0x720] sm:$0xff] }
  0x45   :  { %600 = vmatprep.subr.mxu0 %v201_v28  ;;  %5160 = vmatprep.subr.mxu1 %v201_v28  ;;  %v405_v58 = vld [vmem:[#allocation6 + $0x6c8] sm:$0xff]  ;;  %v404_v59 = vld [vmem:[#allocation6 + $0x6c0] sm:$0xff]  ;;  %v323_v28 = vld [vmem:[#allocation6 + $0x438] sm:$0xff] }
  0x46   :  { %601 = vmatpush1.msra.mxu0 %v200_v29  ;;  %5192 = vmatpush1.msra.mxu1 %v200_v29  ;;  %v393_v60 = vld [vmem:[#allocation6 + $0x668] sm:$0xff]  ;;  %v392_v61 = vld [vmem:[#allocation6 + $0x660] sm:$0xff] }
  0x47   :  { %602 = vmatprep.subr.mxu0 %v189_v30  ;;  %5161 = vmatprep.subr.mxu1 %v189_v30  ;;  %v381_v62 = vld [vmem:[#allocation6 + $0x608] sm:$0xff]  ;;  %v380_v63 = vld [vmem:[#allocation6 + $0x600] sm:$0xff]  ;;  %v322_v30 = vld [vmem:[#allocation6 + $0x430] sm:$0xff] }
  0x48   :  { %603 = vmatpush1.msra.mxu0 %v188_v31  ;;  %5193 = vmatpush1.msra.mxu1 %v188_v31  ;;  %v6243_v0 = vld [vmem:[#allocation3 + $0x8] sm:$0xff]  ;;  %v6245_v2 = vld [vmem:[#allocation3] sm:$0xff] }
  0x49   :  { %604 = vmatprep.subr.mxu0 %v561_v32  ;;  %5162 = vmatprep.subr.mxu1 %v561_v32  ;;  %v157_v1 = vld [vmem:[#allocation3 + $0x108] sm:$0xff]  ;;  %v156_v3 = vld [vmem:[#allocation3 + $0x100] sm:$0xff]  ;;  %v311_v32 = vld [vmem:[#allocation6 + $0x3d8] sm:$0xff] }
  0x4a   :  { %605 = vmatpush2.msra.mxu0 %v560_v33  ;;  %5194 = vmatpush2.msra.mxu1 %v560_v33  ;;  %v373_v5 = vld [vmem:[#allocation6 + $0x5c8] sm:$0xff]  ;;  %v372_v7 = vld [vmem:[#allocation6 + $0x5c0] sm:$0xff] }
  0x4b   :  { %606 = vmatprep.subr.mxu0 %v549_v34  ;;  %5163 = vmatprep.subr.mxu1 %v549_v34  ;;  %v361_v9 = vld [vmem:[#allocation6 + $0x568] sm:$0xff]  ;;  %v360_v13 = vld [vmem:[#allocation6 + $0x560] sm:$0xff]  ;;  %v6261_v34 = vld [vmem:[#allocation3 + $0x38] sm:$0xff] }
  0x4c   :  { %607 = vmatpush2.msra.mxu0 %v548_v35  ;;  %5195 = vmatpush2.msra.mxu1 %v548_v35  ;;  %v349_v17 = vld [vmem:[#allocation6 + $0x508] sm:$0xff]  ;;  %v348_v19 = vld [vmem:[#allocation6 + $0x500] sm:$0xff]  ;;  %v163_v35 = vld [vmem:[#allocation3 + $0x138] sm:$0xff] }
  0x4d   :  { %608 = vmatprep.subr.mxu0 %v537_v36  ;;  %5164 = vmatprep.subr.mxu1 %v537_v36  ;;  %v337_v21 = vld [vmem:[#allocation6 + $0x4a8] sm:$0xff]  ;;  %v336_v25 = vld [vmem:[#allocation6 + $0x4a0] sm:$0xff]  ;;  %v310_v36 = vld [vmem:[#allocation6 + $0x3d0] sm:$0xff] }
  0x4e   :  { %609 = vmatpush2.msra.mxu0 %v536_v37  ;;  %5196 = vmatpush2.msra.mxu1 %v536_v37  ;;  %v6255_v22 = vld [vmem:[#allocation3 + $0x28] sm:$0xff]  ;;  %v6257_v26 = vld [vmem:[#allocation3 + $0x20] sm:$0xff] }
  0x4f   :  { %610 = vmatprep.subr.mxu0 %v525_v38  ;;  %5165 = vmatprep.subr.mxu1 %v525_v38  ;;  %v161_v23 = vld [vmem:[#allocation3 + $0x128] sm:$0xff]  ;;  %v160_v27 = vld [vmem:[#allocation3 + $0x120] sm:$0xff]  ;;  %v6263_v38 = vld [vmem:[#allocation3 + $0x30] sm:$0xff] }
  0x50   :  { %611 = vmatpush2.msra.mxu0 %v524_v39  ;;  %5197 = vmatpush2.msra.mxu1 %v524_v39  ;;  %v325_v29 = vld [vmem:[#allocation6 + $0x448] sm:$0xff]  ;;  %v324_v31 = vld [vmem:[#allocation6 + $0x440] sm:$0xff]  ;;  %v162_v39 = vld [vmem:[#allocation3 + $0x130] sm:$0xff] }
  0x51   :  { %612 = vmatprep.subr.mxu0 %v513_v40  ;;  %5166 = vmatprep.subr.mxu1 %v513_v40  ;;  %v313_v33 = vld [vmem:[#allocation6 + $0x3e8] sm:$0xff]  ;;  %v312_v37 = vld [vmem:[#allocation6 + $0x3e0] sm:$0xff]  ;;  %v299_v40 = vld [vmem:[#allocation6 + $0x378] sm:$0xff] }
  0x52   :  { %613 = vmatpush2.msra.mxu0 %v512_v41  ;;  %5198 = vmatpush2.msra.mxu1 %v512_v41  ;;  %v301_v41 = vld [vmem:[#allocation6 + $0x388] sm:$0xff] }
  0x53   :  { %614 = vmatprep.subr.mxu0 %v501_v42  ;;  %5167 = vmatprep.subr.mxu1 %v501_v42  ;;  %v298_v42 = vld [vmem:[#allocation6 + $0x370] sm:$0xff] }
  0x54   :  { %615 = vmatpush2.msra.mxu0 %v500_v43  ;;  %5199 = vmatpush2.msra.mxu1 %v500_v43  ;;  %v300_v43 = vld [vmem:[#allocation6 + $0x380] sm:$0xff] }
  0x55   :  { %616 = vmatprep.subr.mxu0 %v489_v44  ;;  %5168 = vmatprep.subr.mxu1 %v489_v44  ;;  %v287_v44 = vld [vmem:[#allocation6 + $0x318] sm:$0xff] }
  0x56   :  { %617 = vmatpush2.msra.mxu0 %v488_v45  ;;  %5200 = vmatpush2.msra.mxu1 %v488_v45  ;;  %v289_v45 = vld [vmem:[#allocation6 + $0x328] sm:$0xff] }
  0x57   :  { %618 = vmatprep.subr.mxu0 %v477_v46  ;;  %5169 = vmatprep.subr.mxu1 %v477_v46  ;;  %v6267_v46 = vld [vmem:[#allocation3 + $0x48] sm:$0xff] }
  0x58   :  { %619 = vmatpush2.msra.mxu0 %v476_v47  ;;  %5201 = vmatpush2.msra.mxu1 %v476_v47  ;;  %v165_v47 = vld [vmem:[#allocation3 + $0x148] sm:$0xff] }
  0x59   :  { %620 = vmatprep.subr.mxu0 %v465_v48  ;;  %5170 = vmatprep.subr.mxu1 %v465_v48  ;;  %v286_v48 = vld [vmem:[#allocation6 + $0x310] sm:$0xff] }
  0x5a   :  { %621 = vmatpush2.msra.mxu0 %v464_v49  ;;  %5202 = vmatpush2.msra.mxu1 %v464_v49  ;;  %v288_v49 = vld [vmem:[#allocation6 + $0x320] sm:$0xff] }
  0x5b   :  { %622 = vmatprep.subr.mxu0 %v453_v50  ;;  %5171 = vmatprep.subr.mxu1 %v453_v50  ;;  %v6269_v50 = vld [vmem:[#allocation3 + $0x40] sm:$0xff] }
  0x5c   :  { %623 = vmatpush2.msra.mxu0 %v452_v51  ;;  %5203 = vmatpush2.msra.mxu1 %v452_v51  ;;  %v164_v51 = vld [vmem:[#allocation3 + $0x140] sm:$0xff] }
  0x5d   :  { %624 = vmatprep.subr.mxu0 %v441_v52  ;;  %5172 = vmatprep.subr.mxu1 %v441_v52  ;;  %v275_v52 = vld [vmem:[#allocation6 + $0x2b8] sm:$0xff] }
  0x5e   :  { %625 = vmatpush2.msra.mxu0 %v440_v53  ;;  %5204 = vmatpush2.msra.mxu1 %v440_v53  ;;  %v277_v53 = vld [vmem:[#allocation6 + $0x2c8] sm:$0xff] }
  0x5f   :  { %626 = vmatprep.subr.mxu0 %v429_v54  ;;  %5173 = vmatprep.subr.mxu1 %v429_v54  ;;  %v274_v54 = vld [vmem:[#allocation6 + $0x2b0] sm:$0xff] }
  0x60   :  { %627 = vmatpush2.msra.mxu0 %v428_v55  ;;  %5205 = vmatpush2.msra.mxu1 %v428_v55  ;;  %v276_v55 = vld [vmem:[#allocation6 + $0x2c0] sm:$0xff] }
  0x61   :  { %628 = vmatprep.subr.mxu0 %v417_v56  ;;  %5174 = vmatprep.subr.mxu1 %v417_v56  ;;  %v263_v56 = vld [vmem:[#allocation6 + $0x258] sm:$0xff] }
  0x62   :  { %629 = vmatpush2.msra.mxu0 %v416_v57  ;;  %5206 = vmatpush2.msra.mxu1 %v416_v57  ;;  %v265_v57 = vld [vmem:[#allocation6 + $0x268] sm:$0xff] }
  0x63   :  { %630 = vmatprep.subr.mxu0 %v405_v58  ;;  %5175 = vmatprep.subr.mxu1 %v405_v58  ;;  %v6273_v58 = vld [vmem:[#allocation3 + $0x58] sm:$0xff] }
  0x64   :  { %631 = vmatpush2.msra.mxu0 %v404_v59  ;;  %5207 = vmatpush2.msra.mxu1 %v404_v59  ;;  %v167_v59 = vld [vmem:[#allocation3 + $0x158] sm:$0xff] }
  0x65   :  { %632 = vmatprep.subr.mxu0 %v393_v60  ;;  %5176 = vmatprep.subr.mxu1 %v393_v60  ;;  %v262_v60 = vld [vmem:[#allocation6 + $0x250] sm:$0xff] }
  0x66   :  { %633 = vmatpush2.msra.mxu0 %v392_v61  ;;  %5208 = vmatpush2.msra.mxu1 %v392_v61  ;;  %v264_v61 = vld [vmem:[#allocation6 + $0x260] sm:$0xff] }
  0x67   :  { %634 = vmatprep.subr.mxu0 %v381_v62  ;;  %5177 = vmatprep.subr.mxu1 %v381_v62  ;;  %v6275_v62 = vld [vmem:[#allocation3 + $0x50] sm:$0xff] }
  0x68   :  { %635 = vmatpush2.msra.mxu0 %v380_v63  ;;  %5209 = vmatpush2.msra.mxu1 %v380_v63  ;;  %v166_v63 = vld [vmem:[#allocation3 + $0x150] sm:$0xff] }
  0x69   :  { %636 = vmatprep.mubr.f32.mxu0 %v6243_v0  ;;  %732 = vmatprep.mubr.f32.mxu1 %v157_v1  ;;  %v251_v1 = vld [vmem:[#allocation6 + $0x1f8] sm:$0xff] }
  0x6a   :  { %637 = vmatmul.mubr.f32.vlgmr.msra.gmra.mxu0 %v6245_v2  ;;  %733 = vmatmul.mubr.f32.vlgmr.msra.gmra.mxu1 %v156_v3  ;;  %v253_v3 = vld [vmem:[#allocation6 + $0x208] sm:$0xff] }
  0x6b   :  { %829 = vmatprep.subr.mxu1 %v371_v4  ;;  %1086 = vmatprep.subr.mxu0 %v373_v5  ;;  %v250_v4 = vld [vmem:[#allocation6 + $0x1f0] sm:$0xff]  ;;  %v252_v5 = vld [vmem:[#allocation6 + $0x200] sm:$0xff] }
  0x6c   :  { %830 = vmatpush1.msra.mxu1 %v370_v6  ;;  %1087 = vmatpush1.msra.mxu0 %v372_v7  ;;  %v239_v6 = vld [vmem:[#allocation6 + $0x198] sm:$0xff]  ;;  %v241_v7 = vld [vmem:[#allocation6 + $0x1a8] sm:$0xff] }
  0x6d   :  { %831 = vmatprep.subr.mxu1 %v359_v8  ;;  %1088 = vmatprep.subr.mxu0 %v361_v9  ;;  %v6279_v8 = vld [vmem:[#allocation3 + $0x68] sm:$0xff] }
  0x6e   :  { %642 = vmatprep.mubr.f32.mxu0 %v6249_v10  ;;  %738 = vmatprep.mubr.f32.mxu1 %v159_v11  ;;  %v6281_v9 = vld [vmem:[#allocation3 + $0x168] sm:$0xff]  ;;  %v238_v11 = vld [vmem:[#allocation6 + $0x190] sm:$0xff] }
  0x6f   :  { %832 = vmatpush1.msra.mxu1 %v358_v12  ;;  %1089 = vmatpush1.msra.mxu0 %v360_v13  ;;  %v240_v12 = vld [vmem:[#allocation6 + $0x1a0] sm:$0xff] }
  0x70   :  { %643 = vmatmul.mubr.f32.gmra.mxu0 %v6251_v14  ;;  %739 = vmatmul.mubr.f32.gmra.mxu1 %v158_v15  ;;  %v6283_v13 = vld [vmem:[#allocation3 + $0x60] sm:$0xff] }
  0x71   :  { %833 = vmatprep.subr.mxu1 %v347_v16  ;;  %1090 = vmatprep.subr.mxu0 %v349_v17  ;;  %v6285_v15 = vld [vmem:[#allocation3 + $0x160] sm:$0xff]  ;;  %v227_v16 = vld [vmem:[#allocation6 + $0x138] sm:$0xff]  ;;  %v229_v17 = vld [vmem:[#allocation6 + $0x148] sm:$0xff] }
  0x72   :  { %834 = vmatpush1.msra.mxu1 %v346_v18  ;;  %1091 = vmatpush1.msra.mxu0 %v348_v19  ;;  %v226_v18 = vld [vmem:[#allocation6 + $0x130] sm:$0xff]  ;;  %v228_v19 = vld [vmem:[#allocation6 + $0x140] sm:$0xff] }
  0x73   :  { %835 = vmatprep.subr.mxu1 %v335_v20  ;;  %1092 = vmatprep.subr.mxu0 %v337_v21  ;;  %v215_v20 = vld [vmem:[#allocation6 + $0xd8] sm:$0xff]  ;;  %v217_v21 = vld [vmem:[#allocation6 + $0xe8] sm:$0xff] }
  0x74   :  { %648 = vmatprep.mubr.f32.mxu0 %v6255_v22  ;;  %744 = vmatprep.mubr.f32.mxu1 %v161_v23  ;;  %v6291_v23 = vld [vmem:[#allocation3 + $0x78] sm:$0xff] }
  0x75   :  { %836 = vmatpush1.msra.mxu1 %v334_v24  ;;  %1093 = vmatpush1.msra.mxu0 %v336_v25  ;;  %v6293_v24 = vld [vmem:[#allocation3 + $0x178] sm:$0xff]  ;;  %v214_v25 = vld [vmem:[#allocation6 + $0xd0] sm:$0xff] }
  0x76   :  { %649 = vmatmul.mubr.f32.gmra.mxu0 %v6257_v26  ;;  %745 = vmatmul.mubr.f32.gmra.mxu1 %v160_v27  ;;  %v216_v27 = vld [vmem:[#allocation6 + $0xe0] sm:$0xff] }
  0x77   :  { %837 = vmatprep.subr.mxu1 %v323_v28  ;;  %1094 = vmatprep.subr.mxu0 %v325_v29  ;;  %v6295_v28 = vld [vmem:[#allocation3 + $0x70] sm:$0xff] }
  0x78   :  { %838 = vmatpush1.msra.mxu1 %v322_v30  ;;  %1095 = vmatpush1.msra.mxu0 %v324_v31  ;;  %v6297_v29 = vld [vmem:[#allocation3 + $0x170] sm:$0xff]  ;;  %v203_v30 = vld [vmem:[#allocation6 + $0x78] sm:$0xff]  ;;  %v205_v31 = vld [vmem:[#allocation6 + $0x88] sm:$0xff] }
  0x79   :  { %839 = vmatprep.subr.mxu1 %v311_v32  ;;  %1096 = vmatprep.subr.mxu0 %v313_v33  ;;  %v202_v32 = vld [vmem:[#allocation6 + $0x70] sm:$0xff]  ;;  %v204_v33 = vld [vmem:[#allocation6 + $0x80] sm:$0xff] }
  0x7a   :  { %654 = vmatprep.mubr.f32.mxu0 %v6261_v34  ;;  %750 = vmatprep.mubr.f32.mxu1 %v163_v35  ;;  %v191_v35 = vld [vmem:[#allocation6 + $0x18] sm:$0xff] }
  0x7b   :  { %840 = vmatpush1.msra.mxu1 %v310_v36  ;;  %1097 = vmatpush1.msra.mxu0 %v312_v37  ;;  %v193_v36 = vld [vmem:[#allocation6 + $0x28] sm:$0xff] }
  0x7c   :  { %655 = vmatmul.mubr.f32.gmra.mxu0 %v6263_v38  ;;  %751 = vmatmul.mubr.f32.gmra.mxu1 %v162_v39  ;;  %v6303_v37 = vld [vmem:[#allocation3 + $0x88] sm:$0xff] }
  0x7d   :  { %841 = vmatprep.subr.mxu1 %v299_v40  ;;  %1098 = vmatprep.subr.mxu0 %v301_v41  ;;  %v6305_v39 = vld [vmem:[#allocation3 + $0x188] sm:$0xff]  ;;  %v190_v40 = vld [vmem:[#allocation6 + $0x10] sm:$0xff]  ;;  %v192_v41 = vld [vmem:[#allocation6 + $0x20] sm:$0xff] }
  0x7e   :  { %842 = vmatpush1.msra.mxu1 %v298_v42  ;;  %1099 = vmatpush1.msra.mxu0 %v300_v43  ;;  %v6307_v42 = vld [vmem:[#allocation3 + $0x80] sm:$0xff] }
  0x7f   :  { %843 = vmatprep.subr.mxu1 %v287_v44  ;;  %1100 = vmatprep.subr.mxu0 %v289_v45  ;;  %v6309_v43 = vld [vmem:[#allocation3 + $0x180] sm:$0xff]  ;;  %v563_v44 = vld [vmem:[#allocation6 + $0xbb8] sm:$0xff]  ;;  %v565_v45 = vld [vmem:[#allocation6 + $0xbc8] sm:$0xff] }
  0x80   :  { %660 = vmatprep.mubr.f32.mxu0 %v6267_v46  ;;  %756 = vmatprep.mubr.f32.mxu1 %v165_v47  ;;  %v562_v47 = vld [vmem:[#allocation6 + $0xbb0] sm:$0xff] }
  0x81   :  { %844 = vmatpush1.msra.mxu1 %v286_v48  ;;  %1101 = vmatpush1.msra.mxu0 %v288_v49  ;;  %v564_v48 = vld [vmem:[#allocation6 + $0xbc0] sm:$0xff]  ;;  %v551_v49 = vld [vmem:[#allocation6 + $0xb58] sm:$0xff] }
  0x82   :  { %661 = vmatmul.mubr.f32.gmra.mxu0 %v6269_v50  ;;  %757 = vmatmul.mubr.f32.gmra.mxu1 %v164_v51  ;;  %v553_v51 = vld [vmem:[#allocation6 + $0xb68] sm:$0xff] }
  0x83   :  { %845 = vmatprep.subr.mxu1 %v275_v52  ;;  %1102 = vmatprep.subr.mxu0 %v277_v53  ;;  %v6315_v52 = vld [vmem:[#allocation3 + $0x98] sm:$0xff] }
  0x84   :  { %846 = vmatpush1.msra.mxu1 %v274_v54  ;;  %1103 = vmatpush1.msra.mxu0 %v276_v55  ;;  %v6317_v53 = vld [vmem:[#allocation3 + $0x198] sm:$0xff]  ;;  %v550_v54 = vld [vmem:[#allocation6 + $0xb50] sm:$0xff]  ;;  %v552_v55 = vld [vmem:[#allocation6 + $0xb60] sm:$0xff] }
  0x85   :  { %847 = vmatprep.subr.mxu1 %v263_v56  ;;  %1104 = vmatprep.subr.mxu0 %v265_v57  ;;  %v6319_v56 = vld [vmem:[#allocation3 + $0x90] sm:$0xff] }
  0x86   :  { %666 = vmatprep.mubr.f32.mxu0 %v6273_v58  ;;  %762 = vmatprep.mubr.f32.mxu1 %v167_v59  ;;  %v6321_v57 = vld [vmem:[#allocation3 + $0x190] sm:$0xff]  ;;  %v539_v59 = vld [vmem:[#allocation6 + $0xaf8] sm:$0xff] }
  0x87   :  { %848 = vmatpush1.msra.mxu1 %v262_v60  ;;  %1105 = vmatpush1.msra.mxu0 %v264_v61  ;;  %v541_v60 = vld [vmem:[#allocation6 + $0xb08] sm:$0xff]  ;;  %v538_v61 = vld [vmem:[#allocation6 + $0xaf0] sm:$0xff] }
  0x88   :  { %667 = vmatmul.mubr.f32.gmra.mxu0 %v6275_v62  ;;  %763 = vmatmul.mubr.f32.gmra.mxu1 %v166_v63  ;;  %v540_v63 = vld [vmem:[#allocation6 + $0xb00] sm:$0xff] }
  0x89   :  { %849 = vmatprep.subr.mxu1 %v251_v1  ;;  %1106 = vmatprep.subr.mxu0 %v253_v3  ;;  %v527_v1 = vld [vmem:[#allocation6 + $0xa98] sm:$0xff]  ;;  %v529_v3 = vld [vmem:[#allocation6 + $0xaa8] sm:$0xff] }
  0x8a   :  { %850 = vmatpush1.msra.mxu1 %v250_v4  ;;  %1107 = vmatpush1.msra.mxu0 %v252_v5  ;;  %v6327_v4 = vld [vmem:[#allocation3 + $0xa8] sm:$0xff] }
  0x8b   :  { %851 = vmatprep.subr.mxu1 %v239_v6  ;;  %1108 = vmatprep.subr.mxu0 %v241_v7  ;;  %v6329_v5 = vld [vmem:[#allocation3 + $0x1a8] sm:$0xff]  ;;  %v526_v6 = vld [vmem:[#allocation6 + $0xa90] sm:$0xff]  ;;  %v528_v7 = vld [vmem:[#allocation6 + $0xaa0] sm:$0xff] }
  0x8c   :  { %672 = vmatprep.mubr.f32.mxu0 %v6279_v8  ;;  %768 = vmatprep.mubr.f32.mxu1 %v6281_v9 }
  0x8d   :  { %852 = vmatpush1.msra.mxu1 %v238_v11  ;;  %1109 = vmatpush1.msra.mxu0 %v240_v12  ;;  %v6331_v11 = vld [vmem:[#allocation3 + $0xa0] sm:$0xff] }
  0x8e   :  { %673 = vmatmul.mubr.f32.gmra.mxu0 %v6283_v13  ;;  %769 = vmatmul.mubr.f32.gmra.mxu1 %v6285_v15  ;;  %v6333_v12 = vld [vmem:[#allocation3 + $0x1a0] sm:$0xff] }
  0x8f   :  { %853 = vmatprep.subr.mxu1 %v227_v16  ;;  %1110 = vmatprep.subr.mxu0 %v229_v17  ;;  %v515_v16 = vld [vmem:[#allocation6 + $0xa38] sm:$0xff]  ;;  %v517_v17 = vld [vmem:[#allocation6 + $0xa48] sm:$0xff] }
  0x90   :  { %854 = vmatpush1.msra.mxu1 %v226_v18  ;;  %1111 = vmatpush1.msra.mxu0 %v228_v19  ;;  %v514_v18 = vld [vmem:[#allocation6 + $0xa30] sm:$0xff]  ;;  %v516_v19 = vld [vmem:[#allocation6 + $0xa40] sm:$0xff] }
  0x91   :  { %855 = vmatprep.subr.mxu1 %v215_v20  ;;  %1112 = vmatprep.subr.mxu0 %v217_v21  ;;  %v503_v20 = vld [vmem:[#allocation6 + $0x9d8] sm:$0xff]  ;;  %v505_v21 = vld [vmem:[#allocation6 + $0x9e8] sm:$0xff] }
  0x92   :  { %678 = vmatprep.mubr.f32.mxu0 %v6291_v23  ;;  %774 = vmatprep.mubr.f32.mxu1 %v6293_v24 }
  0x93   :  { %856 = vmatpush1.msra.mxu1 %v214_v25  ;;  %1113 = vmatpush1.msra.mxu0 %v216_v27  ;;  %v6339_v25 = vld [vmem:[#allocation3 + $0xb8] sm:$0xff] }
  0x94   :  { %679 = vmatmul.mubr.f32.gmra.mxu0 %v6295_v28  ;;  %775 = vmatmul.mubr.f32.gmra.mxu1 %v6297_v29  ;;  %v6341_v27 = vld [vmem:[#allocation3 + $0x1b8] sm:$0xff] }
  0x95   :  { %857 = vmatprep.subr.mxu1 %v203_v30  ;;  %1114 = vmatprep.subr.mxu0 %v205_v31  ;;  %v502_v30 = vld [vmem:[#allocation6 + $0x9d0] sm:$0xff]  ;;  %v504_v31 = vld [vmem:[#allocation6 + $0x9e0] sm:$0xff] }
  0x96   :  { %858 = vmatpush1.msra.mxu1 %v202_v32  ;;  %1115 = vmatpush1.msra.mxu0 %v204_v33  ;;  %v6343_v32 = vld [vmem:[#allocation3 + $0xb0] sm:$0xff] }
  0x97   :  { %859 = vmatprep.subr.mxu1 %v191_v35  ;;  %1116 = vmatprep.subr.mxu0 %v193_v36  ;;  %v6345_v33 = vld [vmem:[#allocation3 + $0x1b0] sm:$0xff]  ;;  %v491_v35 = vld [vmem:[#allocation6 + $0x978] sm:$0xff]  ;;  %v493_v36 = vld [vmem:[#allocation6 + $0x988] sm:$0xff] }
  0x98   :  { %684 = vmatprep.mubr.f32.mxu0 %v6303_v37  ;;  %780 = vmatprep.mubr.f32.mxu1 %v6305_v39 }
  0x99   :  { %860 = vmatpush1.msra.mxu1 %v190_v40  ;;  %1117 = vmatpush1.msra.mxu0 %v192_v41  ;;  %v490_v40 = vld [vmem:[#allocation6 + $0x970] sm:$0xff]  ;;  %v492_v41 = vld [vmem:[#allocation6 + $0x980] sm:$0xff] }
  0x9a   :  { %685 = vmatmul.mubr.f32.gmra.mxu0 %v6307_v42  ;;  %781 = vmatmul.mubr.f32.gmra.mxu1 %v6309_v43 }
  0x9b   :  { %861 = vmatprep.subr.mxu1 %v563_v44  ;;  %1118 = vmatprep.subr.mxu0 %v565_v45  ;;  %v479_v44 = vld [vmem:[#allocation6 + $0x918] sm:$0xff]  ;;  %v481_v45 = vld [vmem:[#allocation6 + $0x928] sm:$0xff] }
  0x9c   :  { %862 = vmatpush2.msra.mxu1 %v562_v47  ;;  %1119 = vmatpush2.msra.mxu0 %v564_v48  ;;  %v6351_v47 = vld [vmem:[#allocation3 + $0xc8] sm:$0xff] }
  0x9d   :  { %863 = vmatprep.subr.mxu1 %v551_v49  ;;  %1120 = vmatprep.subr.mxu0 %v553_v51  ;;  %v6353_v48 = vld [vmem:[#allocation3 + $0x1c8] sm:$0xff]  ;;  %v478_v49 = vld [vmem:[#allocation6 + $0x910] sm:$0xff]  ;;  %v480_v51 = vld [vmem:[#allocation6 + $0x920] sm:$0xff] }
  0x9e   :  { %690 = vmatprep.mubr.f32.mxu0 %v6315_v52  ;;  %786 = vmatprep.mubr.f32.mxu1 %v6317_v53 }
  0x9f   :  { %864 = vmatpush2.msra.mxu1 %v550_v54  ;;  %1121 = vmatpush2.msra.mxu0 %v552_v55  ;;  %v6355_v54 = vld [vmem:[#allocation3 + $0xc0] sm:$0xff] }
  0xa0   :  { %691 = vmatmul.mubr.f32.gmra.mxu0 %v6319_v56  ;;  %787 = vmatmul.mubr.f32.gmra.mxu1 %v6321_v57  ;;  %v6357_v55 = vld [vmem:[#allocation3 + $0x1c0] sm:$0xff] }
  0xa1   :  { %865 = vmatprep.subr.mxu1 %v539_v59  ;;  %1122 = vmatprep.subr.mxu0 %v541_v60  ;;  %v467_v59 = vld [vmem:[#allocation6 + $0x8b8] sm:$0xff]  ;;  %v469_v60 = vld [vmem:[#allocation6 + $0x8c8] sm:$0xff] }
  0xa2   :  { %866 = vmatpush2.msra.mxu1 %v538_v61  ;;  %1123 = vmatpush2.msra.mxu0 %v540_v63  ;;  %v466_v61 = vld [vmem:[#allocation6 + $0x8b0] sm:$0xff]  ;;  %v468_v63 = vld [vmem:[#allocation6 + $0x8c0] sm:$0xff] }
  0xa3   :  { %867 = vmatprep.subr.mxu1 %v527_v1  ;;  %1124 = vmatprep.subr.mxu0 %v529_v3  ;;  %v455_v1 = vld [vmem:[#allocation6 + $0x858] sm:$0xff]  ;;  %v457_v3 = vld [vmem:[#allocation6 + $0x868] sm:$0xff] }
  0xa4   :  { %696 = vmatprep.mubr.f32.mxu0 %v6327_v4  ;;  %792 = vmatprep.mubr.f32.mxu1 %v6329_v5 }
  0xa5   :  { %868 = vmatpush2.msra.mxu1 %v526_v6  ;;  %1125 = vmatpush2.msra.mxu0 %v528_v7  ;;  %v6363_v6 = vld [vmem:[#allocation3 + $0xd8] sm:$0xff] }
  0xa6   :  { %697 = vmatmul.mubr.f32.gmra.mxu0 %v6331_v11  ;;  %793 = vmatmul.mubr.f32.gmra.mxu1 %v6333_v12  ;;  %v6365_v7 = vld [vmem:[#allocation3 + $0x1d8] sm:$0xff] }
  0xa7   :  { %869 = vmatprep.subr.mxu1 %v515_v16  ;;  %1126 = vmatprep.subr.mxu0 %v517_v17  ;;  %v454_v16 = vld [vmem:[#allocation6 + $0x850] sm:$0xff]  ;;  %v456_v17 = vld [vmem:[#allocation6 + $0x860] sm:$0xff] }
  0xa8   :  { %870 = vmatpush2.msra.mxu1 %v514_v18  ;;  %1127 = vmatpush2.msra.mxu0 %v516_v19  ;;  %v6367_v18 = vld [vmem:[#allocation3 + $0xd0] sm:$0xff] }
  0xa9   :  { %871 = vmatprep.subr.mxu1 %v503_v20  ;;  %1128 = vmatprep.subr.mxu0 %v505_v21  ;;  %v6369_v19 = vld [vmem:[#allocation3 + $0x1d0] sm:$0xff]  ;;  %v443_v20 = vld [vmem:[#allocation6 + $0x7f8] sm:$0xff]  ;;  %v445_v21 = vld [vmem:[#allocation6 + $0x808] sm:$0xff] }
  0xaa   :  { %702 = vmatprep.mubr.f32.mxu0 %v6339_v25  ;;  %798 = vmatprep.mubr.f32.mxu1 %v6341_v27 }
  0xab   :  { %872 = vmatpush2.msra.mxu1 %v502_v30  ;;  %1129 = vmatpush2.msra.mxu0 %v504_v31  ;;  %v442_v30 = vld [vmem:[#allocation6 + $0x7f0] sm:$0xff]  ;;  %v444_v31 = vld [vmem:[#allocation6 + $0x800] sm:$0xff] }
  0xac   :  { %703 = vmatmul.mubr.f32.gmra.mxu0 %v6343_v32  ;;  %799 = vmatmul.mubr.f32.gmra.mxu1 %v6345_v33 }
  0xad   :  { %873 = vmatprep.subr.mxu1 %v491_v35  ;;  %1130 = vmatprep.subr.mxu0 %v493_v36  ;;  %v431_v35 = vld [vmem:[#allocation6 + $0x798] sm:$0xff]  ;;  %v433_v36 = vld [vmem:[#allocation6 + $0x7a8] sm:$0xff] }
  0xae   :  { %874 = vmatpush2.msra.mxu1 %v490_v40  ;;  %1131 = vmatpush2.msra.mxu0 %v492_v41  ;;  %v6375_v40 = vld [vmem:[#allocation3 + $0xe8] sm:$0xff] }
  0xaf   :  { %875 = vmatprep.subr.mxu1 %v479_v44  ;;  %1132 = vmatprep.subr.mxu0 %v481_v45  ;;  %v6377_v41 = vld [vmem:[#allocation3 + $0x1e8] sm:$0xff]  ;;  %v430_v44 = vld [vmem:[#allocation6 + $0x790] sm:$0xff]  ;;  %v432_v45 = vld [vmem:[#allocation6 + $0x7a0] sm:$0xff] }
  0xb0   :  { %708 = vmatprep.mubr.f32.mxu0 %v6351_v47  ;;  %804 = vmatprep.mubr.f32.mxu1 %v6353_v48 }
  0xb1   :  { %876 = vmatpush2.msra.mxu1 %v478_v49  ;;  %1133 = vmatpush2.msra.mxu0 %v480_v51  ;;  %v6379_v49 = vld [vmem:[#allocation3 + $0xe0] sm:$0xff] }
  0xb2   :  { %709 = vmatmul.mubr.f32.gmra.mxu0 %v6355_v54  ;;  %805 = vmatmul.mubr.f32.gmra.mxu1 %v6357_v55  ;;  %v6381_v51 = vld [vmem:[#allocation3 + $0x1e0] sm:$0xff] }
  0xb3   :  { %877 = vmatprep.subr.mxu1 %v467_v59  ;;  %1134 = vmatprep.subr.mxu0 %v469_v60  ;;  %v419_v59 = vld [vmem:[#allocation6 + $0x738] sm:$0xff]  ;;  %v421_v60 = vld [vmem:[#allocation6 + $0x748] sm:$0xff] }
  0xb4   :  { %878 = vmatpush2.msra.mxu1 %v466_v61  ;;  %1135 = vmatpush2.msra.mxu0 %v468_v63  ;;  %v418_v61 = vld [vmem:[#allocation6 + $0x730] sm:$0xff]  ;;  %v420_v63 = vld [vmem:[#allocation6 + $0x740] sm:$0xff] }
  0xb5   :  { %879 = vmatprep.subr.mxu1 %v455_v1  ;;  %1136 = vmatprep.subr.mxu0 %v457_v3  ;;  %v407_v1 = vld [vmem:[#allocation6 + $0x6d8] sm:$0xff]  ;;  %v409_v3 = vld [vmem:[#allocation6 + $0x6e8] sm:$0xff] }
  0xb6   :  { %714 = vmatprep.mubr.f32.mxu0 %v6363_v6  ;;  %810 = vmatprep.mubr.f32.mxu1 %v6365_v7 }
  0xb7   :  { %880 = vmatpush2.msra.mxu1 %v454_v16  ;;  %1137 = vmatpush2.msra.mxu0 %v456_v17  ;;  %v6387_v16 = vld [vmem:[#allocation3 + $0xf8] sm:$0xff] }
  0xb8   :  { %715 = vmatmul.mubr.f32.gmra.mxu0 %v6367_v18  ;;  %811 = vmatmul.mubr.f32.gmra.mxu1 %v6369_v19  ;;  %v6389_v17 = vld [vmem:[#allocation3 + $0x1f8] sm:$0xff] }
  0xb9   :  { %881 = vmatprep.subr.mxu1 %v443_v20  ;;  %1138 = vmatprep.subr.mxu0 %v445_v21  ;;  %v406_v20 = vld [vmem:[#allocation6 + $0x6d0] sm:$0xff]  ;;  %v408_v21 = vld [vmem:[#allocation6 + $0x6e0] sm:$0xff] }
  0xba   :  { %882 = vmatpush2.msra.mxu1 %v442_v30  ;;  %1139 = vmatpush2.msra.mxu0 %v444_v31  ;;  %v6391_v30 = vld [vmem:[#allocation3 + $0xf0] sm:$0xff] }
  0xbb   :  { %883 = vmatprep.subr.mxu1 %v431_v35  ;;  %1140 = vmatprep.subr.mxu0 %v433_v36  ;;  %v6393_v31 = vld [vmem:[#allocation3 + $0x1f0] sm:$0xff]  ;;  %v395_v35 = vld [vmem:[#allocation6 + $0x678] sm:$0xff]  ;;  %v397_v36 = vld [vmem:[#allocation6 + $0x688] sm:$0xff] }
  0xbc   :  { %720 = vmatprep.mubr.f32.mxu0 %v6375_v40  ;;  %816 = vmatprep.mubr.f32.mxu1 %v6377_v41 }
  0xbd   :  { %884 = vmatpush2.msra.mxu1 %v430_v44  ;;  %1141 = vmatpush2.msra.mxu0 %v432_v45  ;;  %v394_v44 = vld [vmem:[#allocation6 + $0x670] sm:$0xff]  ;;  %v396_v45 = vld [vmem:[#allocation6 + $0x680] sm:$0xff] }
  0xbe   :  { %721 = vmatmul.mubr.f32.gmra.mxu0 %v6379_v49  ;;  %817 = vmatmul.mubr.f32.gmra.mxu1 %v6381_v51 }
  0xbf   :  { %885 = vmatprep.subr.mxu1 %v419_v59  ;;  %1142 = vmatprep.subr.mxu0 %v421_v60  ;;  %v383_v59 = vld [vmem:[#allocation6 + $0x618] sm:$0xff]  ;;  %v385_v60 = vld [vmem:[#allocation6 + $0x628] sm:$0xff] }
  0xc0   :  { %886 = vmatpush2.msra.mxu1 %v418_v61  ;;  %1143 = vmatpush2.msra.mxu0 %v420_v63  ;;  %v382_v61 = vld [vmem:[#allocation6 + $0x610] sm:$0xff]  ;;  %v384_v63 = vld [vmem:[#allocation6 + $0x620] sm:$0xff] }
  0xc1   :  { %887 = vmatprep.subr.mxu1 %v407_v1  ;;  %1144 = vmatprep.subr.mxu0 %v409_v3  ;;  %v375_v1 = vld [vmem:[#allocation6 + $0x5d8] sm:$0xff]  ;;  %v374_v3 = vld [vmem:[#allocation6 + $0x5d0] sm:$0xff] }
  0xc2   :  { %726 = vmatprep.mubr.f32.mxu0 %v6387_v16  ;;  %822 = vmatprep.mubr.f32.mxu1 %v6389_v17 }
  0xc3   :  { %888 = vmatpush2.msra.mxu1 %v406_v20  ;;  %1145 = vmatpush2.msra.mxu0 %v408_v21  ;;  %v363_v20 = vld [vmem:[#allocation6 + $0x578] sm:$0xff]  ;;  %v377_v21 = vld [vmem:[#allocation6 + $0x5e8] sm:$0xff] }
  0xc4   :  { %727 = vmatmul.mubr.f32.gmra.mxu0 %v6391_v30  ;;  %823 = vmatmul.mubr.f32.gmra.mxu1 %v6393_v31 }
  0xc5   :  { %889 = vmatprep.subr.mxu1 %v395_v35  ;;  %1146 = vmatprep.subr.mxu0 %v397_v36  ;;  %v362_v35 = vld [vmem:[#allocation6 + $0x570] sm:$0xff]  ;;  %v351_v36 = vld [vmem:[#allocation6 + $0x518] sm:$0xff] }
  0xc6   :  { %890 = vmatpush2.msra.mxu1 %v394_v44  ;;  %1147 = vmatpush2.msra.mxu0 %v396_v45  ;;  %v376_v44 = vld [vmem:[#allocation6 + $0x5e0] sm:$0xff]  ;;  %v338_v45 = vld [vmem:[#allocation6 + $0x4b0] sm:$0xff] }
  0xc7   :  { %891 = vmatprep.subr.mxu1 %v383_v59  ;;  %1148 = vmatprep.subr.mxu0 %v385_v60  ;;  %v364_v59 = vld [vmem:[#allocation6 + $0x580] sm:$0xff]  ;;  %v326_v60 = vld [vmem:[#allocation6 + $0x450] sm:$0xff] }
  0xc8   :  { %892 = vmatpush2.msra.mxu1 %v382_v61  ;;  %893 = vmatprep.mubr.f32.mxu1 %v6243_v0  ;;  %v352_v61 = vld [vmem:[#allocation6 + $0x520] sm:$0xff] }
  0xc9   :  { %1149 = vmatpush2.msra.mxu0 %v384_v63  ;;  %1150 = vmatprep.mubr.f32.mxu0 %v6243_v0  ;;  %v350_v0 = vld [vmem:[#allocation6 + $0x510] sm:$0xff] }
  0xca   :  { %894 = vmatmul.mubr.f32.vlgmr.msra.gmra.mxu1 %v6245_v2  ;;  %1151 = vmatmul.mubr.f32.vlgmr.msra.gmra.mxu0 %v6245_v2  ;;  %v339_v2 = vld [vmem:[#allocation6 + $0x4b8] sm:$0xff]  ;;  %v314_v63 = vld [vmem:[#allocation6 + $0x3f0] sm:$0xff] }
  0xcb   :  { %1343 = vmatprep.subr.mxu1 %v375_v1  ;;  %899 = vmatprep.mubr.f32.mxu1 %v6249_v10  ;;  %v340_v1 = vld [vmem:[#allocation6 + $0x4c0] sm:$0xff] }
  0xcc   :  { %1344 = vmatpush1.msra.mxu1 %v374_v3  ;;  %1156 = vmatprep.mubr.f32.mxu0 %v6249_v10  ;;  %v365_v10 = vld [vmem:[#allocation6 + $0x588] sm:$0xff]  ;;  %v302_v3 = vld [vmem:[#allocation6 + $0x390] sm:$0xff] }
  0xcd   :  { %1345 = vmatprep.subr.mxu1 %v363_v20  ;;  %1600 = vmatprep.subr.mxu0 %v377_v21  ;;  %v328_v20 = vld [vmem:[#allocation6 + $0x460] sm:$0xff]  ;;  %v290_v21 = vld [vmem:[#allocation6 + $0x330] sm:$0xff] }
  0xce   :  { %900 = vmatmul.mubr.f32.gmra.mxu1 %v6251_v14  ;;  %1157 = vmatmul.mubr.f32.gmra.mxu0 %v6251_v14  ;;  %v327_v14 = vld [vmem:[#allocation6 + $0x458] sm:$0xff] }
  0xcf   :  { %1346 = vmatpush1.msra.mxu1 %v362_v35  ;;  %905 = vmatprep.mubr.f32.mxu1 %v6255_v22  ;;  %v316_v35 = vld [vmem:[#allocation6 + $0x400] sm:$0xff] }
  0xd0   :  { %1162 = vmatprep.mubr.f32.mxu0 %v6255_v22  ;;  %1347 = vmatprep.subr.mxu1 %v351_v36  ;;  %v353_v22 = vld [vmem:[#allocation6 + $0x528] sm:$0xff]  ;;  %v278_v36 = vld [vmem:[#allocation6 + $0x2d0] sm:$0xff] }
  0xd1   :  { %1348 = vmatpush1.msra.mxu1 %v350_v0  ;;  %1601 = vmatpush1.msra.mxu0 %v376_v44  ;;  %v304_v0 = vld [vmem:[#allocation6 + $0x3a0] sm:$0xff]  ;;  %v266_v44 = vld [vmem:[#allocation6 + $0x270] sm:$0xff] }
  0xd2   :  { %906 = vmatmul.mubr.f32.gmra.mxu1 %v6257_v26  ;;  %1163 = vmatmul.mubr.f32.gmra.mxu0 %v6257_v26  ;;  %v315_v26 = vld [vmem:[#allocation6 + $0x3f8] sm:$0xff] }
  0xd3   :  { %911 = vmatprep.mubr.f32.mxu1 %v6261_v34  ;;  %1168 = vmatprep.mubr.f32.mxu0 %v6261_v34  ;;  %v341_v34 = vld [vmem:[#allocation6 + $0x4c8] sm:$0xff] }
  0xd4   :  { %1349 = vmatprep.subr.mxu1 %v339_v2  ;;  %1602 = vmatprep.subr.mxu0 %v365_v10  ;;  %v292_v2 = vld [vmem:[#allocation6 + $0x340] sm:$0xff]  ;;  %v254_v10 = vld [vmem:[#allocation6 + $0x210] sm:$0xff] }
  0xd5   :  { %1350 = vmatpush1.msra.mxu1 %v338_v45  ;;  %1603 = vmatpush1.msra.mxu0 %v364_v59  ;;  %v280_v45 = vld [vmem:[#allocation6 + $0x2e0] sm:$0xff]  ;;  %v242_v59 = vld [vmem:[#allocation6 + $0x1b0] sm:$0xff] }
  0xd6   :  { %912 = vmatmul.mubr.f32.gmra.mxu1 %v6263_v38  ;;  %1169 = vmatmul.mubr.f32.gmra.mxu0 %v6263_v38  ;;  %v303_v38 = vld [vmem:[#allocation6 + $0x398] sm:$0xff] }
  0xd7   :  { %917 = vmatprep.mubr.f32.mxu1 %v6267_v46  ;;  %1174 = vmatprep.mubr.f32.mxu0 %v6267_v46  ;;  %v329_v46 = vld [vmem:[#allocation6 + $0x468] sm:$0xff] }
  0xd8   :  { %1351 = vmatprep.subr.mxu1 %v327_v14  ;;  %1604 = vmatprep.subr.mxu0 %v353_v22  ;;  %v268_v14 = vld [vmem:[#allocation6 + $0x280] sm:$0xff]  ;;  %v230_v22 = vld [vmem:[#allocation6 + $0x150] sm:$0xff] }
  0xd9   :  { %1352 = vmatpush1.msra.mxu1 %v326_v60  ;;  %1605 = vmatpush1.msra.mxu0 %v352_v61  ;;  %v256_v60 = vld [vmem:[#allocation6 + $0x220] sm:$0xff]  ;;  %v218_v61 = vld [vmem:[#allocation6 + $0xf0] sm:$0xff] }
  0xda   :  { %918 = vmatmul.mubr.f32.gmra.mxu1 %v6269_v50  ;;  %1175 = vmatmul.mubr.f32.gmra.mxu0 %v6269_v50  ;;  %v291_v50 = vld [vmem:[#allocation6 + $0x338] sm:$0xff] }
  0xdb   :  { %923 = vmatprep.mubr.f32.mxu1 %v6273_v58  ;;  %1180 = vmatprep.mubr.f32.mxu0 %v6273_v58  ;;  %v317_v58 = vld [vmem:[#allocation6 + $0x408] sm:$0xff] }
  0xdc   :  { %1353 = vmatprep.subr.mxu1 %v315_v26  ;;  %1606 = vmatprep.subr.mxu0 %v341_v34  ;;  %v244_v26 = vld [vmem:[#allocation6 + $0x1c0] sm:$0xff]  ;;  %v206_v34 = vld [vmem:[#allocation6 + $0x90] sm:$0xff] }
  0xdd   :  { %1354 = vmatpush1.msra.mxu1 %v314_v63  ;;  %1607 = vmatpush1.msra.mxu0 %v340_v1  ;;  %v232_v63 = vld [vmem:[#allocation6 + $0x160] sm:$0xff]  ;;  %v194_v1 = vld [vmem:[#allocation6 + $0x30] sm:$0xff] }
  0xde   :  { %924 = vmatmul.mubr.f32.gmra.mxu1 %v6275_v62  ;;  %1181 = vmatmul.mubr.f32.gmra.mxu0 %v6275_v62  ;;  %v279_v62 = vld [vmem:[#allocation6 + $0x2d8] sm:$0xff] }
  0xdf   :  { %929 = vmatprep.mubr.f32.mxu1 %v6279_v8  ;;  %1186 = vmatprep.mubr.f32.mxu0 %v6279_v8  ;;  %v305_v8 = vld [vmem:[#allocation6 + $0x3a8] sm:$0xff] }
  0xe0   :  { %1355 = vmatprep.subr.mxu1 %v303_v38  ;;  %1608 = vmatprep.subr.mxu0 %v329_v46  ;;  %v220_v38 = vld [vmem:[#allocation6 + $0x100] sm:$0xff]  ;;  %v566_v46 = vld [vmem:[#allocation6 + $0xbd0] sm:$0xff] }
  0xe1   :  { %1356 = vmatpush1.msra.mxu1 %v302_v3  ;;  %1609 = vmatpush1.msra.mxu0 %v328_v20  ;;  %v208_v3 = vld [vmem:[#allocation6 + $0xa0] sm:$0xff]  ;;  %v6463_v20 = vld [vmem:[#allocation3 + $0x108] sm:$0xff] }
  0xe2   :  { %930 = vmatmul.mubr.f32.gmra.mxu1 %v6283_v13  ;;  %1187 = vmatmul.mubr.f32.gmra.mxu0 %v6283_v13  ;;  %v267_v13 = vld [vmem:[#allocation6 + $0x278] sm:$0xff] }
  0xe3   :  { %935 = vmatprep.mubr.f32.mxu1 %v6291_v23  ;;  %1192 = vmatprep.mubr.f32.mxu0 %v6291_v23  ;;  %v293_v23 = vld [vmem:[#allocation6 + $0x348] sm:$0xff] }
  0xe4   :  { %1357 = vmatprep.subr.mxu1 %v291_v50  ;;  %1610 = vmatprep.subr.mxu0 %v317_v58  ;;  %v6467_v50 = vld [vmem:[#allocation3 + $0x100] sm:$0xff] }
  0xe5   :  { %1358 = vmatpush1.msra.mxu1 %v290_v21  ;;  %1611 = vmatpush1.msra.mxu0 %v316_v35  ;;  %v196_v58 = vld [vmem:[#allocation6 + $0x40] sm:$0xff]  ;;  %v6471_v21 = vld [vmem:[#allocation3 + $0x118] sm:$0xff] }
  0xe6   :  { %936 = vmatmul.mubr.f32.gmra.mxu1 %v6295_v28  ;;  %1193 = vmatmul.mubr.f32.gmra.mxu0 %v6295_v28  ;;  %v255_v28 = vld [vmem:[#allocation6 + $0x218] sm:$0xff] }
  0xe7   :  { %941 = vmatprep.mubr.f32.mxu1 %v6303_v37  ;;  %1198 = vmatprep.mubr.f32.mxu0 %v6303_v37  ;;  %v281_v37 = vld [vmem:[#allocation6 + $0x2e8] sm:$0xff]  ;;  %v543_v35 = vld [vmem:[#allocation6 + $0xb18] sm:$0xff] }
  0xe8   :  { %1359 = vmatprep.subr.mxu1 %v279_v62  ;;  %1612 = vmatprep.subr.mxu0 %v305_v8  ;;  %v569_v62 = vld [vmem:[#allocation6 + $0xbe8] sm:$0xff]  ;;  %v6475_v8 = vld [vmem:[#allocation3 + $0x110] sm:$0xff] }
  0xe9   :  { %1360 = vmatpush1.msra.mxu1 %v278_v36  ;;  %1613 = vmatpush1.msra.mxu0 %v304_v0  ;;  %v542_v36 = vld [vmem:[#allocation6 + $0xb10] sm:$0xff]  ;;  %v568_v0 = vld [vmem:[#allocation6 + $0xbe0] sm:$0xff] }
  0xea   :  { %942 = vmatmul.mubr.f32.gmra.mxu1 %v6307_v42  ;;  %1199 = vmatmul.mubr.f32.gmra.mxu0 %v6307_v42  ;;  %v243_v42 = vld [vmem:[#allocation6 + $0x1b8] sm:$0xff] }
  0xeb   :  { %947 = vmatprep.mubr.f32.mxu1 %v6315_v52  ;;  %1204 = vmatprep.mubr.f32.mxu0 %v6315_v52  ;;  %v269_v52 = vld [vmem:[#allocation6 + $0x288] sm:$0xff] }
  0xec   :  { %1361 = vmatprep.subr.mxu1 %v267_v13  ;;  %1614 = vmatprep.subr.mxu0 %v293_v23  ;;  %v6479_v13 = vld [vmem:[#allocation3 + $0x128] sm:$0xff]  ;;  %v531_v23 = vld [vmem:[#allocation6 + $0xab8] sm:$0xff] }
  0xed   :  { %1362 = vmatpush1.msra.mxu1 %v266_v44  ;;  %1615 = vmatpush1.msra.mxu0 %v292_v2  ;;  %v557_v44 = vld [vmem:[#allocation6 + $0xb88] sm:$0xff]  ;;  %v6483_v2 = vld [vmem:[#allocation3 + $0x120] sm:$0xff] }
  0xee   :  { %948 = vmatmul.mubr.f32.gmra.mxu1 %v6319_v56  ;;  %1205 = vmatmul.mubr.f32.gmra.mxu0 %v6319_v56  ;;  %v231_v56 = vld [vmem:[#allocation6 + $0x158] sm:$0xff] }
  0xef   :  { %953 = vmatprep.mubr.f32.mxu1 %v6327_v4  ;;  %1210 = vmatprep.mubr.f32.mxu0 %v6327_v4  ;;  %v257_v4 = vld [vmem:[#allocation6 + $0x228] sm:$0xff] }
  0xf0   :  { %1363 = vmatprep.subr.mxu1 %v255_v28  ;;  %1616 = vmatprep.subr.mxu0 %v281_v37  ;;  %v530_v28 = vld [vmem:[#allocation6 + $0xab0] sm:$0xff]  ;;  %v556_v37 = vld [vmem:[#allocation6 + $0xb80] sm:$0xff] }
  0xf1   :  { %1364 = vmatpush1.msra.mxu1 %v254_v10  ;;  %1617 = vmatpush1.msra.mxu0 %v280_v45  ;;  %v6487_v10 = vld [vmem:[#allocation3 + $0x138] sm:$0xff] }
  0xf2   :  { %954 = vmatmul.mubr.f32.gmra.mxu1 %v6331_v11  ;;  %1211 = vmatmul.mubr.f32.gmra.mxu0 %v6331_v11  ;;  %v219_v11 = vld [vmem:[#allocation6 + $0xf8] sm:$0xff] }
  0xf3   :  { %959 = vmatprep.mubr.f32.mxu1 %v6339_v25  ;;  %1216 = vmatprep.mubr.f32.mxu0 %v6339_v25  ;;  %v245_v25 = vld [vmem:[#allocation6 + $0x1c8] sm:$0xff]  ;;  %v519_v45 = vld [vmem:[#allocation6 + $0xa58] sm:$0xff] }
  0xf4   :  { %1365 = vmatprep.subr.mxu1 %v243_v42  ;;  %1618 = vmatprep.subr.mxu0 %v269_v52  ;;  %v545_v42 = vld [vmem:[#allocation6 + $0xb28] sm:$0xff]  ;;  %v6491_v52 = vld [vmem:[#allocation3 + $0x130] sm:$0xff] }
  0xf5   :  { %1366 = vmatpush1.msra.mxu1 %v242_v59  ;;  %1619 = vmatpush1.msra.mxu0 %v268_v14  ;;  %v518_v59 = vld [vmem:[#allocation6 + $0xa50] sm:$0xff]  ;;  %v544_v14 = vld [vmem:[#allocation6 + $0xb20] sm:$0xff] }
  0xf6   :  { %960 = vmatmul.mubr.f32.gmra.mxu1 %v6343_v32  ;;  %1217 = vmatmul.mubr.f32.gmra.mxu0 %v6343_v32  ;;  %v207_v32 = vld [vmem:[#allocation6 + $0x98] sm:$0xff] }
  0xf7   :  { %965 = vmatprep.mubr.f32.mxu1 %v6351_v47  ;;  %1222 = vmatprep.mubr.f32.mxu0 %v6351_v47  ;;  %v233_v47 = vld [vmem:[#allocation6 + $0x168] sm:$0xff] }
  0xf8   :  { %1367 = vmatprep.subr.mxu1 %v231_v56  ;;  %1620 = vmatprep.subr.mxu0 %v257_v4  ;;  %v6495_v56 = vld [vmem:[#allocation3 + $0x148] sm:$0xff]  ;;  %v507_v4 = vld [vmem:[#allocation6 + $0x9f8] sm:$0xff] }
  0xf9   :  { %1368 = vmatpush1.msra.mxu1 %v230_v22  ;;  %1621 = vmatpush1.msra.mxu0 %v256_v60  ;;  %v533_v22 = vld [vmem:[#allocation6 + $0xac8] sm:$0xff]  ;;  %v6499_v60 = vld [vmem:[#allocation3 + $0x140] sm:$0xff] }
  0xfa   :  { %966 = vmatmul.mubr.f32.gmra.mxu1 %v6355_v54  ;;  %1223 = vmatmul.mubr.f32.gmra.mxu0 %v6355_v54  ;;  %v195_v54 = vld [vmem:[#allocation6 + $0x38] sm:$0xff] }
  0xfb   :  { %971 = vmatprep.mubr.f32.mxu1 %v6363_v6  ;;  %1228 = vmatprep.mubr.f32.mxu0 %v6363_v6  ;;  %v221_v6 = vld [vmem:[#allocation6 + $0x108] sm:$0xff] }
  0xfc   :  { %1369 = vmatprep.subr.mxu1 %v219_v11  ;;  %1622 = vmatprep.subr.mxu0 %v245_v25  ;;  %v506_v11 = vld [vmem:[#allocation6 + $0x9f0] sm:$0xff]  ;;  %v532_v25 = vld [vmem:[#allocation6 + $0xac0] sm:$0xff] }
  0xfd   :  { %1370 = vmatpush1.msra.mxu1 %v218_v61  ;;  %1623 = vmatpush1.msra.mxu0 %v244_v26  ;;  %v6503_v61 = vld [vmem:[#allocation3 + $0x158] sm:$0xff] }
  0xfe   :  { %972 = vmatmul.mubr.f32.gmra.mxu1 %v6367_v18  ;;  %1229 = vmatmul.mubr.f32.gmra.mxu0 %v6367_v18  ;;  %v567_v18 = vld [vmem:[#allocation6 + $0xbd8] sm:$0xff] }
  0xff   :  { %977 = vmatprep.mubr.f32.mxu1 %v6375_v40  ;;  %1234 = vmatprep.mubr.f32.mxu0 %v6375_v40  ;;  %v209_v40 = vld [vmem:[#allocation6 + $0xa8] sm:$0xff]  ;;  %v495_v26 = vld [vmem:[#allocation6 + $0x998] sm:$0xff] }
 0x100   :  { %1371 = vmatprep.subr.mxu1 %v207_v32  ;;  %1624 = vmatprep.subr.mxu0 %v233_v47  ;;  %v521_v32 = vld [vmem:[#allocation6 + $0xa68] sm:$0xff]  ;;  %v6507_v47 = vld [vmem:[#allocation3 + $0x150] sm:$0xff] }
 0x101   :  { %1372 = vmatpush1.msra.mxu1 %v206_v34  ;;  %1625 = vmatpush1.msra.mxu0 %v232_v63  ;;  %v494_v34 = vld [vmem:[#allocation6 + $0x990] sm:$0xff]  ;;  %v520_v63 = vld [vmem:[#allocation6 + $0xa60] sm:$0xff] }
 0x102   :  { %978 = vmatmul.mubr.f32.gmra.mxu1 %v6379_v49  ;;  %1235 = vmatmul.mubr.f32.gmra.mxu0 %v6379_v49  ;;  %v555_v49 = vld [vmem:[#allocation6 + $0xb78] sm:$0xff] }
 0x103   :  { %983 = vmatprep.mubr.f32.mxu1 %v6387_v16  ;;  %1240 = vmatprep.mubr.f32.mxu0 %v6387_v16  ;;  %v197_v16 = vld [vmem:[#allocation6 + $0x48] sm:$0xff] }
 0x104   :  { %1373 = vmatprep.subr.mxu1 %v195_v54  ;;  %1626 = vmatprep.subr.mxu0 %v221_v6  ;;  %v483_v54 = vld [vmem:[#allocation6 + $0x938] sm:$0xff]  ;;  %v509_v6 = vld [vmem:[#allocation6 + $0xa08] sm:$0xff] }
 0x105   :  { %1374 = vmatpush1.msra.mxu1 %v194_v1  ;;  %1627 = vmatpush1.msra.mxu0 %v220_v38  ;;  %v482_v1 = vld [vmem:[#allocation6 + $0x930] sm:$0xff]  ;;  %v508_v38 = vld [vmem:[#allocation6 + $0xa00] sm:$0xff] }
 0x106   :  { %984 = vmatmul.mubr.f32.gmra.mxu1 %v6391_v30  ;;  %1241 = vmatmul.mubr.f32.gmra.mxu0 %v6391_v30  ;;  %v554_v30 = vld [vmem:[#allocation6 + $0xb70] sm:$0xff] }
 0x107   :  { %989 = vmatprep.mubr.f32.mxu1 %v6463_v20  ;;  %1246 = vmatprep.mubr.f32.mxu0 %v6463_v20 }
 0x108   :  { %1375 = vmatprep.subr.mxu1 %v567_v18  ;;  %1628 = vmatprep.subr.mxu0 %v209_v40  ;;  %v497_v18 = vld [vmem:[#allocation6 + $0x9a8] sm:$0xff]  ;;  %v470_v40 = vld [vmem:[#allocation6 + $0x8d0] sm:$0xff] }
 0x109   :  { %1376 = vmatpush2.msra.mxu1 %v566_v46  ;;  %1629 = vmatpush1.msra.mxu0 %v208_v3  ;;  %v496_v46 = vld [vmem:[#allocation6 + $0x9a0] sm:$0xff]  ;;  %v458_v3 = vld [vmem:[#allocation6 + $0x870] sm:$0xff] }
 0x10a   :  { %990 = vmatmul.mubr.f32.gmra.mxu1 %v6467_v50  ;;  %1247 = vmatmul.mubr.f32.gmra.mxu0 %v6467_v50 }
 0x10b   :  { %995 = vmatprep.mubr.f32.mxu1 %v6471_v21  ;;  %1252 = vmatprep.mubr.f32.mxu0 %v6471_v21 }
 0x10c   :  { %1377 = vmatprep.subr.mxu1 %v555_v49  ;;  %1630 = vmatprep.subr.mxu0 %v197_v16  ;;  %v484_v49 = vld [vmem:[#allocation6 + $0x940] sm:$0xff] }
 0x10d   :  { %1378 = vmatpush2.msra.mxu1 %v554_v30  ;;  %1631 = vmatpush1.msra.mxu0 %v196_v58  ;;  %v447_v58 = vld [vmem:[#allocation6 + $0x818] sm:$0xff] }
 0x10e   :  { %996 = vmatmul.mubr.f32.gmra.mxu1 %v6475_v8  ;;  %1253 = vmatmul.mubr.f32.gmra.mxu0 %v6475_v8 }
 0x10f   :  { %1001 = vmatprep.mubr.f32.mxu1 %v6479_v13  ;;  %1258 = vmatprep.mubr.f32.mxu0 %v6479_v13 }
 0x110   :  { %1379 = vmatprep.subr.mxu1 %v543_v35  ;;  %1632 = vmatprep.subr.mxu0 %v569_v62  ;;  %v446_v35 = vld [vmem:[#allocation6 + $0x810] sm:$0xff]  ;;  %v472_v62 = vld [vmem:[#allocation6 + $0x8e0] sm:$0xff] }
 0x111   :  { %1380 = vmatpush2.msra.mxu1 %v542_v36  ;;  %1633 = vmatpush2.msra.mxu0 %v568_v0  ;;  %v435_v0 = vld [vmem:[#allocation6 + $0x7b8] sm:$0xff] }
 0x112   :  { %1002 = vmatmul.mubr.f32.gmra.mxu1 %v6483_v2  ;;  %1259 = vmatmul.mubr.f32.gmra.mxu0 %v6483_v2 }
 0x113   :  { %1007 = vmatprep.mubr.f32.mxu1 %v6487_v10  ;;  %1264 = vmatprep.mubr.f32.mxu0 %v6487_v10 }
 0x114   :  { %1381 = vmatprep.subr.mxu1 %v531_v23  ;;  %1634 = vmatprep.subr.mxu0 %v557_v44  ;;  %v461_v23 = vld [vmem:[#allocation6 + $0x888] sm:$0xff]  ;;  %v460_v44 = vld [vmem:[#allocation6 + $0x880] sm:$0xff] }
 0x115   :  { %1382 = vmatpush2.msra.mxu1 %v530_v28  ;;  %1635 = vmatpush2.msra.mxu0 %v556_v37 }
 0x116   :  { %1008 = vmatmul.mubr.f32.gmra.mxu1 %v6491_v52  ;;  %1265 = vmatmul.mubr.f32.gmra.mxu0 %v6491_v52 }
 0x117   :  { %1013 = vmatprep.mubr.f32.mxu1 %v6495_v56  ;;  %1270 = vmatprep.mubr.f32.mxu0 %v6495_v56 }
 0x118   :  { %1383 = vmatprep.subr.mxu1 %v519_v45  ;;  %1636 = vmatprep.subr.mxu0 %v545_v42  ;;  %v449_v45 = vld [vmem:[#allocation6 + $0x828] sm:$0xff]  ;;  %v448_v42 = vld [vmem:[#allocation6 + $0x820] sm:$0xff] }
 0x119   :  { %1384 = vmatpush2.msra.mxu1 %v518_v59  ;;  %1637 = vmatpush2.msra.mxu0 %v544_v14 }
 0x11a   :  { %1014 = vmatmul.mubr.f32.gmra.mxu1 %v6499_v60  ;;  %1271 = vmatmul.mubr.f32.gmra.mxu0 %v6499_v60 }
 0x11b   :  { %1019 = vmatprep.mubr.f32.mxu1 %v6503_v61  ;;  %1276 = vmatprep.mubr.f32.mxu0 %v6503_v61 }
 0x11c   :  { %1385 = vmatprep.subr.mxu1 %v507_v4  ;;  %1638 = vmatprep.subr.mxu0 %v533_v22  ;;  %v411_v22 = vld [vmem:[#allocation6 + $0x6f8] sm:$0xff] }
 0x11d   :  { %1386 = vmatpush2.msra.mxu1 %v506_v11  ;;  %1639 = vmatpush2.msra.mxu0 %v532_v25  ;;  %v410_v11 = vld [vmem:[#allocation6 + $0x6f0] sm:$0xff]  ;;  %v436_v25 = vld [vmem:[#allocation6 + $0x7c0] sm:$0xff] }
 0x11e   :  { %1020 = vmatmul.mubr.f32.gmra.mxu1 %v6507_v47  ;;  %1277 = vmatmul.mubr.f32.gmra.mxu0 %v6507_v47 }
 0x11f   :  { %1025 = vmatprep.mubr.f32.mxu1 %v6281_v9  ;;  %1282 = vmatprep.mubr.f32.mxu0 %v6281_v9  ;;  %v471_v9 = vld [vmem:[#allocation6 + $0x8d8] sm:$0xff] }
 0x120   :  { %1387 = vmatprep.subr.mxu1 %v495_v26  ;;  %1640 = vmatprep.subr.mxu0 %v521_v32  ;;  %v399_v32 = vld [vmem:[#allocation6 + $0x698] sm:$0xff] }
 0x121   :  { %1388 = vmatpush2.msra.mxu1 %v494_v34  ;;  %1641 = vmatpush2.msra.mxu0 %v520_v63  ;;  %v425_v34 = vld [vmem:[#allocation6 + $0x768] sm:$0xff]  ;;  %v424_v63 = vld [vmem:[#allocation6 + $0x760] sm:$0xff] }
 0x122   :  { %1026 = vmatmul.mubr.f32.gmra.mxu1 %v6285_v15  ;;  %1283 = vmatmul.mubr.f32.gmra.mxu0 %v6285_v15  ;;  %v459_v15 = vld [vmem:[#allocation6 + $0x878] sm:$0xff] }
 0x123   :  { %1031 = vmatprep.mubr.f32.mxu1 %v6293_v24  ;;  %1288 = vmatprep.mubr.f32.mxu0 %v6293_v24  ;;  %v485_v24 = vld [vmem:[#allocation6 + $0x948] sm:$0xff] }
 0x124   :  { %1389 = vmatprep.subr.mxu1 %v483_v54  ;;  %1642 = vmatprep.subr.mxu0 %v509_v6 }
 0x125   :  { %1390 = vmatpush2.msra.mxu1 %v482_v1  ;;  %1643 = vmatpush2.msra.mxu0 %v508_v38  ;;  %v412_v1 = vld [vmem:[#allocation6 + $0x700] sm:$0xff]  ;;  %v401_v38 = vld [vmem:[#allocation6 + $0x6a8] sm:$0xff] }
 0x126   :  { %1032 = vmatmul.mubr.f32.gmra.mxu1 %v6297_v29  ;;  %1289 = vmatmul.mubr.f32.gmra.mxu0 %v6297_v29 }
 0x127   :  { %1037 = vmatprep.mubr.f32.mxu1 %v6305_v39  ;;  %1294 = vmatprep.mubr.f32.mxu0 %v6305_v39 }
 0x128   :  { %1391 = vmatprep.subr.mxu1 %v471_v9  ;;  %1644 = vmatprep.subr.mxu0 %v497_v18 }
 0x129   :  { %1392 = vmatpush2.msra.mxu1 %v470_v40  ;;  %1645 = vmatpush2.msra.mxu0 %v496_v46  ;;  %v400_v40 = vld [vmem:[#allocation6 + $0x6a0] sm:$0xff] }
 0x12a   :  { %1038 = vmatmul.mubr.f32.gmra.mxu1 %v6309_v43  ;;  %1295 = vmatmul.mubr.f32.gmra.mxu0 %v6309_v43  ;;  %v6523_v16 = vpop.f32.mrf.mxu0  ;;  %v6525_v29 = vpop.f32.mrf.mxu1  ;;  %v473_v43 = vld [vmem:[#allocation6 + $0x8e8] sm:$0xff] }
 0x12b   :  { %8579 = vst [vmem:[#allocation13_spill] sm:$0xff] %v6523_v16  ;;  %8580 = vst [vmem:[#allocation14_spill] sm:$0xff] %v6525_v29  ;;  %1043 = vmatprep.mubr.f32.mxu1 %v6317_v53  ;;  %1300 = vmatprep.mubr.f32.mxu0 %v6317_v53 }
 0x12c   :  { %1393 = vmatprep.subr.mxu1 %v459_v15  ;;  %1646 = vmatprep.subr.mxu0 %v485_v24  ;;  %v6529_v39 = vpop.f32.mrf.mxu0  ;;  %v6531_v30 = vpop.f32.mrf.mxu1  ;;  %v388_v24 = vld [vmem:[#allocation6 + $0x640] sm:$0xff] }
 0x12d   :  { %8581 = vst [vmem:[#allocation15_spill] sm:$0xff] %v6529_v39  ;;  %8582 = vst [vmem:[#allocation16_spill] sm:$0xff] %v6531_v30  ;;  %1394 = vmatpush2.msra.mxu1 %v458_v3  ;;  %1647 = vmatpush2.msra.mxu0 %v484_v49  ;;  %v5998_v3 = vld [vmem:[#allocation3 + $0x8] sm:$0xff] }
 0x12e   :  { %1044 = vmatmul.mubr.f32.gmra.mxu1 %v6321_v57  ;;  %1301 = vmatmul.mubr.f32.gmra.mxu0 %v6321_v57  ;;  %v434_v57 = vld [vmem:[#allocation6 + $0x7b0] sm:$0xff] }
 0x12f   :  { %1049 = vmatprep.mubr.f32.mxu1 %v6329_v5  ;;  %1306 = vmatprep.mubr.f32.mxu0 %v6329_v5  ;;  %v423_v5 = vld [vmem:[#allocation6 + $0x758] sm:$0xff] }
 0x130   :  { %1395 = vmatprep.subr.mxu1 %v447_v58  ;;  %1648 = vmatprep.subr.mxu0 %v473_v43  ;;  %v6537_v53 = vpop.f32.mrf.mxu0  ;;  %v6539_v36 = vpop.f32.mrf.mxu1  ;;  %v378_v43 = vld [vmem:[#allocation6 + $0x5f0] sm:$0xff] }
 0x131   :  { %8583 = vst [vmem:[#allocation17_spill] sm:$0xff] %v6537_v53  ;;  %8584 = vst [vmem:[#allocation18_spill] sm:$0xff] %v6539_v36  ;;  %1396 = vmatpush2.msra.mxu1 %v446_v35  ;;  %1649 = vmatpush2.msra.mxu0 %v472_v62  ;;  %v5999_v35 = vld [vmem:[#allocation3] sm:$0xff]  ;;  %v367_v62 = vld [vmem:[#allocation6 + $0x598] sm:$0xff] }
 0x132   :  { %1050 = vmatmul.mubr.f32.gmra.mxu1 %v6333_v12  ;;  %1307 = vmatmul.mubr.f32.gmra.mxu0 %v6333_v12  ;;  %v6543_v28 = vpop.f32.mrf.mxu0  ;;  %v6545_v37 = vpop.f32.mrf.mxu1  ;;  %v422_v12 = vld [vmem:[#allocation6 + $0x750] sm:$0xff] }
 0x133   :  { %8585 = vst [vmem:[#allocation19_spill] sm:$0xff] %v6543_v28  ;;  %8586 = vst [vmem:[#allocation20_spill] sm:$0xff] %v6545_v37  ;;  %1055 = vmatprep.mubr.f32.mxu1 %v6341_v27  ;;  %1312 = vmatprep.mubr.f32.mxu0 %v6341_v27 }
 0x134   :  { %1397 = vmatprep.subr.mxu1 %v435_v0  ;;  %1650 = vmatprep.subr.mxu0 %v461_v23  ;;  %v6000_v23 = vld [vmem:[#allocation3 + $0x18] sm:$0xff] }
 0x135   :  { %1398 = vmatpush2.msra.mxu1 %v434_v57  ;;  %1651 = vmatpush2.msra.mxu0 %v460_v44  ;;  %v366_v57 = vld [vmem:[#allocation6 + $0x590] sm:$0xff]  ;;  %v355_v44 = vld [vmem:[#allocation6 + $0x538] sm:$0xff] }
 0x136   :  { %1056 = vmatmul.mubr.f32.gmra.mxu1 %v6345_v33  ;;  %1313 = vmatmul.mubr.f32.gmra.mxu0 %v6345_v33  ;;  %v6551_v59 = vpop.f32.mrf.mxu0  ;;  %v6553_v14 = vpop.f32.mrf.mxu1  ;;  %v437_v33 = vld [vmem:[#allocation6 + $0x7c8] sm:$0xff] }
 0x137   :  { %8587 = vst [vmem:[#allocation21_spill] sm:$0xff] %v6551_v59  ;;  %8588 = vst [vmem:[#allocation22_spill] sm:$0xff] %v6553_v14  ;;  %1061 = vmatprep.mubr.f32.mxu1 %v6353_v48  ;;  %1318 = vmatprep.mubr.f32.mxu0 %v6353_v48 }
 0x138   :  { %1399 = vmatprep.subr.mxu1 %v423_v5  ;;  %1652 = vmatprep.subr.mxu0 %v449_v45  ;;  %v6557_v27 = vpop.f32.mrf.mxu0  ;;  %v6559_v4 = vpop.f32.mrf.mxu1  ;;  %v6001_v5 = vld [vmem:[#allocation3 + $0x10] sm:$0xff] }
 0x139   :  { %8589 = vst [vmem:[#allocation23_spill] sm:$0xff] %v6557_v27  ;;  %8590 = vst [vmem:[#allocation24_spill] sm:$0xff] %v6559_v4  ;;  %1400 = vmatpush2.msra.mxu1 %v422_v12  ;;  %1653 = vmatpush2.msra.mxu0 %v448_v42  ;;  %v354_v45 = vld [vmem:[#allocation6 + $0x530] sm:$0xff] }
 0x13a   :  { %1062 = vmatmul.mubr.f32.gmra.mxu1 %v6357_v55  ;;  %1319 = vmatmul.mubr.f32.gmra.mxu0 %v6357_v55  ;;  %v398_v55 = vld [vmem:[#allocation6 + $0x690] sm:$0xff] }
 0x13b   :  { %1067 = vmatprep.mubr.f32.mxu1 %v6365_v7  ;;  %1324 = vmatprep.mubr.f32.mxu0 %v6365_v7  ;;  %v413_v7 = vld [vmem:[#allocation6 + $0x708] sm:$0xff] }
 0x13c   :  { %1401 = vmatprep.subr.mxu1 %v411_v22  ;;  %1654 = vmatprep.subr.mxu0 %v437_v33  ;;  %v6565_v48 = vpop.f32.mrf.mxu0  ;;  %v6567_v26 = vpop.f32.mrf.mxu1  ;;  %v6002_v22 = vld [vmem:[#allocation3 + $0x28] sm:$0xff] }
 0x13d   :  { %8591 = vst [vmem:[#allocation25_spill] sm:$0xff] %v6565_v48  ;;  %8592 = vst [vmem:[#allocation26_spill] sm:$0xff] %v6567_v26  ;;  %1402 = vmatpush2.msra.mxu1 %v410_v11  ;;  %1655 = vmatpush2.msra.mxu0 %v436_v25  ;;  %v343_v25 = vld [vmem:[#allocation6 + $0x4d8] sm:$0xff] }
 0x13e   :  { %1068 = vmatmul.mubr.f32.gmra.mxu1 %v6369_v19  ;;  %1325 = vmatmul.mubr.f32.gmra.mxu0 %v6369_v19  ;;  %v6571_v54 = vpop.f32.mrf.mxu0  ;;  %v6573_v6 = vpop.f32.mrf.mxu1  ;;  %v387_v19 = vld [vmem:[#allocation6 + $0x638] sm:$0xff] }
 0x13f   :  { %8593 = vst [vmem:[#allocation27_spill] sm:$0xff] %v6571_v54  ;;  %8594 = vst [vmem:[#allocation28_spill] sm:$0xff] %v6573_v6  ;;  %1073 = vmatprep.mubr.f32.mxu1 %v6377_v41  ;;  %1330 = vmatprep.mubr.f32.mxu0 %v6377_v41  ;;  %v386_v41 = vld [vmem:[#allocation6 + $0x630] sm:$0xff] }
 0x140   :  { %1403 = vmatprep.subr.mxu1 %v399_v32  ;;  %1656 = vmatprep.subr.mxu0 %v425_v34  ;;  %v6003_v32 = vld [vmem:[#allocation3 + $0x20] sm:$0xff]  ;;  %v342_v34 = vld [vmem:[#allocation6 + $0x4d0] sm:$0xff] }
 0x141   :  { %1404 = vmatpush2.msra.mxu1 %v398_v55  ;;  %1657 = vmatpush2.msra.mxu0 %v424_v63  ;;  %v6004_v55 = vld [vmem:[#allocation3 + $0x38] sm:$0xff] }
 0x142   :  { %1074 = vmatmul.mubr.f32.gmra.mxu1 %v6381_v51  ;;  %1331 = vmatmul.mubr.f32.gmra.mxu0 %v6381_v51  ;;  %v6579_v9 = vpop.f32.mrf.mxu0  ;;  %v6581_v18 = vpop.f32.mrf.mxu1  ;;  %v389_v51 = vld [vmem:[#allocation6 + $0x648] sm:$0xff] }
 0x143   :  { %8595 = vst [vmem:[#allocation29_spill] sm:$0xff] %v6579_v9  ;;  %8596 = vst [vmem:[#allocation30_spill] sm:$0xff] %v6581_v18  ;;  %1658 = vmatprep.subr.mxu0 %v413_v7  ;;  %1079 = vmatprep.mubr.f32.mxu1 %v6389_v17 }
 0x144   :  { %1336 = vmatprep.mubr.f32.mxu0 %v6389_v17  ;;  %1659 = vmatpush2.msra.mxu0 %v412_v1  ;;  %v6585_v46 = vpop.f32.mrf.mxu0  ;;  %v6587_v15 = vpop.f32.mrf.mxu1  ;;  %v379_v17 = vld [vmem:[#allocation6 + $0x5f8] sm:$0xff] }
 0x145   :  { %8597 = vst [vmem:[#allocation31_spill] sm:$0xff] %v6585_v46  ;;  %8598 = vst [vmem:[#allocation32_spill] sm:$0xff] %v6587_v15  ;;  %1405 = vmatprep.subr.mxu1 %v387_v19  ;;  %1660 = vmatprep.subr.mxu0 %v401_v38  ;;  %v3681_v1 = vld [vmem:[#allocation8 + $0xf8] sm:$0xff]  ;;  %v3680_v38 = vld [vmem:[#allocation8 + $0xf0] sm:$0xff] }
 0x146   :  { %1080 = vmatmul.mubr.f32.gmra.mxu1 %v6393_v31  ;;  %1337 = vmatmul.mubr.f32.gmra.mxu0 %v6393_v31  ;;  %v331_v19 = vld [vmem:[#allocation6 + $0x478] sm:$0xff] }
 0x147   :  { %1406 = vmatpush2.msra.mxu1 %v386_v41  ;;  %1661 = vmatpush2.msra.mxu0 %v400_v40  ;;  %v6005_v41 = vld [vmem:[#allocation3 + $0x30] sm:$0xff] }
 0x148   :  { %1662 = vmatprep.subr.mxu0 %v389_v51  ;;  %1407 = vmatprep.mubr.f32.mxu1 %v5998_v3  ;;  %v6591_v49 = vpop.f32.mrf.mxu0  ;;  %v6593_v58 = vpop.f32.mrf.mxu1  ;;  %v330_v40 = vld [vmem:[#allocation6 + $0x470] sm:$0xff] }
 0x149   :  { %8599 = vst [vmem:[#allocation33_spill] sm:$0xff] %v6593_v58  ;;  %1663 = vmatpush2.msra.mxu0 %v388_v24  ;;  %1664 = vmatprep.mubr.f32.mxu0 %v5998_v3  ;;  %v6006_v3 = vld [vmem:[#allocation3 + $0x48] sm:$0xff] }
 0x14a   :  { %1408 = vmatmul.mubr.f32.vlgmr.msra.gmra.mxu1 %v5999_v35  ;;  %1665 = vmatmul.mubr.f32.vlgmr.msra.gmra.mxu0 %v5999_v35  ;;  %v6595_v0 = vpop.f32.mrf.mxu0  ;;  %v6597_v31 = vpop.f32.mrf.mxu1  ;;  %v318_v35 = vld [vmem:[#allocation6 + $0x410] sm:$0xff] }
 0x14b   :  { %8600 = vst [vmem:[#allocation34_spill] sm:$0xff] %v6597_v31  ;;  %1857 = vmatprep.subr.mxu1 %v379_v17  ;;  %1413 = vmatprep.mubr.f32.mxu1 %v6000_v23  ;;  %v319_v17 = vld [vmem:[#allocation6 + $0x418] sm:$0xff] }
 0x14c   :  { %1858 = vmatpush1.msra.mxu1 %v378_v43  ;;  %1670 = vmatprep.mubr.f32.mxu0 %v6000_v23  ;;  %v6007_v43 = vld [vmem:[#allocation3 + $0x40] sm:$0xff] }
 0x14d   :  { %1859 = vmatprep.subr.mxu1 %v367_v62  ;;  %3906 = vmatprep.subr.mxu0 %v3681_v1 }
 0x14e   :  { %1414 = vmatmul.mubr.f32.gmra.mxu1 %v6001_v5  ;;  %1671 = vmatmul.mubr.f32.gmra.mxu0 %v6001_v5  ;;  %v6599_v12 = vpop.f32.mrf.mxu0  ;;  %v6601_v42 = vpop.f32.mrf.mxu1  ;;  %v6008_v5 = vld [vmem:[#allocation3 + $0x58] sm:$0xff] }
 0x14f   :  { %8601 = vst [vmem:[#allocation35_spill] sm:$0xff] %v6601_v42  ;;  %1860 = vmatpush1.msra.mxu1 %v366_v57  ;;  %1419 = vmatprep.mubr.f32.mxu1 %v6002_v22  ;;  %v3679_v57 = vld [vmem:[#allocation8 + $0xe8] sm:$0xff] }
 0x150   :  { %1676 = vmatprep.mubr.f32.mxu0 %v6002_v22  ;;  %1861 = vmatprep.subr.mxu1 %v355_v44  ;;  %v6603_v33 = vpop.f32.mrf.mxu0  ;;  %v6605_v11 = vpop.f32.mrf.mxu1  ;;  %v3678_v44 = vld [vmem:[#allocation8 + $0xe0] sm:$0xff] }
 0x151   :  { %8602 = vst [vmem:[#allocation36_spill] sm:$0xff] %v6605_v11  ;;  %1862 = vmatpush1.msra.mxu1 %v354_v45  ;;  %3907 = vmatpush1.msra.mxu0 %v3680_v38  ;;  %v295_v38 = vld [vmem:[#allocation6 + $0x358] sm:$0xff] }
 0x152   :  { %1420 = vmatmul.mubr.f32.gmra.mxu1 %v6003_v32  ;;  %1677 = vmatmul.mubr.f32.gmra.mxu0 %v6003_v32  ;;  %v6009_v32 = vld [vmem:[#allocation3 + $0x50] sm:$0xff] }
 0x153   :  { %1425 = vmatprep.mubr.f32.mxu1 %v6004_v55  ;;  %1682 = vmatprep.mubr.f32.mxu0 %v6004_v55  ;;  %v6010_v55 = vld [vmem:[#allocation3 + $0x68] sm:$0xff] }
 0x154   :  { %1863 = vmatprep.subr.mxu1 %v343_v25  ;;  %v6607_v63 = vpop.f32.mrf.mxu0  ;;  %v6609_v7 = vpop.f32.mrf.mxu1  ;;  %3908 = vmatprep.subr.mxu0 %v3679_v57  ;;  %v307_v25 = vld [vmem:[#allocation6 + $0x3b8] sm:$0xff]  ;;  %v6013_v57 = vld [vmem:[#allocation3 + $0x70] sm:$0xff] }
 0x155   :  { %8603 = vst [vmem:[#allocation37_spill] sm:$0xff] %v6607_v63  ;;  %8604 = vst [vmem:[#allocation38_spill] sm:$0xff] %v6609_v7  ;;  %1864 = vmatpush1.msra.mxu1 %v342_v34  ;;  %3909 = vmatpush1.msra.mxu0 %v3678_v44  ;;  %v306_v34 = vld [vmem:[#allocation6 + $0x3b0] sm:$0xff] }
 0x156   :  { %1426 = vmatmul.mubr.f32.gmra.mxu1 %v6005_v41  ;;  %1683 = vmatmul.mubr.f32.gmra.mxu0 %v6005_v41  ;;  %v6611_v51 = vpop.f32.mrf.mxu0  ;;  %v6613_v24 = vpop.f32.mrf.mxu1  ;;  %v6011_v41 = vld [vmem:[#allocation3 + $0x60] sm:$0xff]  ;;  %v282_v44 = vld [vmem:[#allocation6 + $0x2f0] sm:$0xff] }
 0x157   :  { %8605 = vst [vmem:[#allocation39_spill] sm:$0xff] %v6613_v24  ;;  %1431 = vmatprep.mubr.f32.mxu1 %v6006_v3  ;;  %1688 = vmatprep.mubr.f32.mxu0 %v6006_v3 }
 0x158   :  { %1865 = vmatprep.subr.mxu1 %v331_v19 }
 0x159   :  { %1866 = vmatpush1.msra.mxu1 %v330_v40  ;;  %v294_v40 = vld [vmem:[#allocation6 + $0x350] sm:$0xff] }
 0x15a   :  { %1432 = vmatmul.mubr.f32.gmra.mxu1 %v6007_v43  ;;  %1689 = vmatmul.mubr.f32.gmra.mxu0 %v6007_v43  ;;  %v6615_v62 = vpop.f32.mrf.mxu0  ;;  %v6617_v23 = vpop.f32.mrf.mxu1  ;;  %v6012_v43 = vld [vmem:[#allocation3 + $0x78] sm:$0xff] }
 0x15b   :  { %8606 = vst [vmem:[#allocation40_spill] sm:$0xff] %v6615_v62  ;;  %8607 = vst [vmem:[#allocation41_spill] sm:$0xff] %v6617_v23  ;;  %1437 = vmatprep.mubr.f32.mxu1 %v6008_v5  ;;  %1694 = vmatprep.mubr.f32.mxu0 %v6008_v5 }
 0x15c   :  { %1867 = vmatprep.subr.mxu1 %v319_v17  ;;  %v6619_v45 = vpop.f32.mrf.mxu0  ;;  %v6621_v22 = vpop.f32.mrf.mxu1 }
 0x15d   :  { %8608 = vst [vmem:[#allocation42_spill] sm:$0xff] %v6619_v45  ;;  %8609 = vst [vmem:[#allocation43_spill] sm:$0xff] %v6621_v22  ;;  %1868 = vmatpush1.msra.mxu1 %v318_v35  ;;  %v283_v35 = vld [vmem:[#allocation6 + $0x2f8] sm:$0xff] }
 0x15e   :  { %1438 = vmatmul.mubr.f32.gmra.mxu1 %v6009_v32  ;;  %1695 = vmatmul.mubr.f32.gmra.mxu0 %v6009_v32  ;;  %v3677_v32 = vld [vmem:[#allocation8 + $0xd8] sm:$0xff] }
 0x15f   :  { %1443 = vmatprep.mubr.f32.mxu1 %v6010_v55  ;;  %1700 = vmatprep.mubr.f32.mxu0 %v6010_v55  ;;  %v6014_v55 = vld [vmem:[#allocation3 + $0x88] sm:$0xff] }
 0x160   :  { %1869 = vmatprep.subr.mxu1 %v307_v25  ;;  %v6623_v1 = vpop.f32.mrf.mxu0  ;;  %v6625_v19 = vpop.f32.mrf.mxu1  ;;  %3910 = vmatprep.subr.mxu0 %v3677_v32 }
 0x161   :  { %8610 = vst [vmem:[#allocation44_spill] sm:$0xff] %v6623_v1  ;;  %8611 = vst [vmem:[#allocation45_spill] sm:$0xff] %v6625_v19  ;;  %1870 = vmatpush1.msra.mxu1 %v306_v34  ;;  %v3676_v34 = vld [vmem:[#allocation8 + $0xd0] sm:$0xff] }
 0x162   :  { %1444 = vmatmul.mubr.f32.gmra.mxu1 %v6011_v41  ;;  %1701 = vmatmul.mubr.f32.gmra.mxu0 %v6011_v41  ;;  %v6627_v3 = vpop.f32.mrf.mxu0  ;;  %v6629_v17 = vpop.f32.mrf.mxu1 }
 0x163   :  { %8612 = vst [vmem:[#allocation46_spill] sm:$0xff] %v6627_v3  ;;  %8613 = vst [vmem:[#allocation47_spill] sm:$0xff] %v6629_v17  ;;  %1449 = vmatprep.mubr.f32.mxu1 %v6012_v43  ;;  %1706 = vmatprep.mubr.f32.mxu0 %v6012_v43  ;;  %v6018_v17 = vld [vmem:[#allocation3 + $0xa8] sm:$0xff]  ;;  %v6024_v3 = vld [vmem:[#allocation3 + $0xd8] sm:$0xff] }
 0x164   :  { %1871 = vmatprep.subr.mxu1 %v295_v38  ;;  %v271_v38 = vld [vmem:[#allocation6 + $0x298] sm:$0xff]  ;;  %3911 = vmatpush1.msra.mxu0 %v3676_v34 }
 0x165   :  { %1872 = vmatpush1.msra.mxu1 %v294_v40  ;;  %v6015_v40 = vld [vmem:[#allocation3 + $0x80] sm:$0xff] }
 0x166   :  { %1450 = vmatmul.mubr.f32.gmra.mxu1 %v6013_v57  ;;  %1707 = vmatmul.mubr.f32.gmra.mxu0 %v6013_v57  ;;  %v6631_v5 = vpop.f32.mrf.mxu0  ;;  %v6633_v25 = vpop.f32.mrf.mxu1  ;;  %v270_v57 = vld [vmem:[#allocation6 + $0x290] sm:$0xff] }
 0x167   :  { %8614 = vst [vmem:[#allocation48_spill] sm:$0xff] %v6631_v5  ;;  %8615 = vst [vmem:[#allocation49_spill] sm:$0xff] %v6633_v25  ;;  %1455 = vmatprep.mubr.f32.mxu1 %v6014_v55  ;;  %1712 = vmatprep.mubr.f32.mxu0 %v6014_v55  ;;  %v6016_v5 = vld [vmem:[#allocation3 + $0x98] sm:$0xff] }
 0x168   :  { %1873 = vmatprep.subr.mxu1 %v283_v35  ;;  %v6635_v41 = vpop.f32.mrf.mxu0  ;;  %v6637_v43 = vpop.f32.mrf.mxu1  ;;  %v259_v35 = vld [vmem:[#allocation6 + $0x238] sm:$0xff] }
 0x169   :  { %8616 = vst [vmem:[#allocation50_spill] sm:$0xff] %v6635_v41  ;;  %8617 = vst [vmem:[#allocation51_spill] sm:$0xff] %v6637_v43  ;;  %1874 = vmatpush1.msra.mxu1 %v282_v44  ;;  %v6017_v41 = vld [vmem:[#allocation3 + $0x90] sm:$0xff]  ;;  %v3674_v43 = vld [vmem:[#allocation8 + $0xc0] sm:$0xff] }
 0x16a   :  { %1456 = vmatmul.mubr.f32.gmra.mxu1 %v6015_v40  ;;  %1713 = vmatmul.mubr.f32.gmra.mxu0 %v6015_v40  ;;  %v258_v44 = vld [vmem:[#allocation6 + $0x230] sm:$0xff]  ;;  %v3675_v40 = vld [vmem:[#allocation8 + $0xc8] sm:$0xff] }
 0x16b   :  { %1461 = vmatprep.mubr.f32.mxu1 %v6016_v5  ;;  %1718 = vmatprep.mubr.f32.mxu0 %v6016_v5  ;;  %v247_v5 = vld [vmem:[#allocation6 + $0x1d8] sm:$0xff] }
 0x16c   :  { %1875 = vmatprep.subr.mxu1 %v271_v38  ;;  %v6639_v25 = vpop.f32.mrf.mxu0  ;;  %v6641_v55 = vpop.f32.mrf.mxu1  ;;  %3912 = vmatprep.subr.mxu0 %v3675_v40  ;;  %v6019_v38 = vld [vmem:[#allocation3 + $0xa0] sm:$0xff]  ;;  %v6021_v40 = vld [vmem:[#allocation3 + $0xb0] sm:$0xff] }
 0x16d   :  { %8618 = vst [vmem:[#allocation52_spill] sm:$0xff] %v6639_v25  ;;  %8619 = vst [vmem:[#allocation53_spill] sm:$0xff] %v6641_v55  ;;  %1876 = vmatpush1.msra.mxu1 %v270_v57  ;;  %3913 = vmatpush1.msra.mxu0 %v3674_v43  ;;  %v246_v57 = vld [vmem:[#allocation6 + $0x1d0] sm:$0xff]  ;;  %v3670_v25 = vld [vmem:[#allocation8 + $0xa0] sm:$0xff] }
 0x16e   :  { %1462 = vmatmul.mubr.f32.gmra.mxu1 %v6017_v41  ;;  %1719 = vmatmul.mubr.f32.gmra.mxu0 %v6017_v41  ;;  %v6643_v32 = vpop.f32.mrf.mxu0  ;;  %v6645_v34 = vpop.f32.mrf.mxu1  ;;  %v3672_v43 = vld [vmem:[#allocation8 + $0xb0] sm:$0xff] }
 0x16f   :  { %8620 = vst [vmem:[#allocation54_spill] sm:$0xff] %v6643_v32  ;;  %8621 = vst [vmem:[#allocation55_spill] sm:$0xff] %v6645_v34  ;;  %1467 = vmatprep.mubr.f32.mxu1 %v6018_v17  ;;  %1724 = vmatprep.mubr.f32.mxu0 %v6018_v17  ;;  %v6020_v32 = vld [vmem:[#allocation3 + $0xb8] sm:$0xff] }
 0x170   :  { %1877 = vmatprep.subr.mxu1 %v259_v35  ;;  %v3673_v35 = vld [vmem:[#allocation8 + $0xb8] sm:$0xff] }
 0x171   :  { %1878 = vmatpush1.msra.mxu1 %v258_v44  ;;  %v235_v44 = vld [vmem:[#allocation6 + $0x178] sm:$0xff]  ;;  %3914 = vmatprep.subr.mxu0 %v3673_v35 }
 0x172   :  { %1468 = vmatmul.mubr.f32.gmra.mxu1 %v6019_v38  ;;  %1725 = vmatmul.mubr.f32.gmra.mxu0 %v6019_v38  ;;  %v6647_v41 = vpop.f32.mrf.mxu0  ;;  %v6649_v55 = vpop.f32.mrf.mxu1  ;;  %v234_v38 = vld [vmem:[#allocation6 + $0x170] sm:$0xff] }
 0x173   :  { %8622 = vst [vmem:[#allocation56_spill] sm:$0xff] %v6647_v41  ;;  %8623 = vst [vmem:[#allocation57_spill] sm:$0xff] %v6649_v55  ;;  %1473 = vmatprep.mubr.f32.mxu1 %v6020_v32  ;;  %1730 = vmatprep.mubr.f32.mxu0 %v6020_v32  ;;  %v6022_v41 = vld [vmem:[#allocation3 + $0xc8] sm:$0xff] }
 0x174   :  { %1879 = vmatprep.subr.mxu1 %v247_v5  ;;  %v6651_v34 = vpop.f32.mrf.mxu0  ;;  %v6653_v17 = vpop.f32.mrf.mxu1  ;;  %3915 = vmatpush1.msra.mxu0 %v3672_v43  ;;  %v223_v5 = vld [vmem:[#allocation6 + $0x118] sm:$0xff] }
 0x175   :  { %8624 = vst [vmem:[#allocation58_spill] sm:$0xff] %v6651_v34  ;;  %8625 = vst [vmem:[#allocation59_spill] sm:$0xff] %v6653_v17  ;;  %1880 = vmatpush1.msra.mxu1 %v246_v57  ;;  %v6023_v17 = vld [vmem:[#allocation3 + $0xc0] sm:$0xff]  ;;  %v222_v57 = vld [vmem:[#allocation6 + $0x110] sm:$0xff] }
 0x176   :  { %1474 = vmatmul.mubr.f32.gmra.mxu1 %v6021_v40  ;;  %1731 = vmatmul.mubr.f32.gmra.mxu0 %v6021_v40  ;;  %v3671_v40 = vld [vmem:[#allocation8 + $0xa8] sm:$0xff] }
 0x177   :  { %1479 = vmatprep.mubr.f32.mxu1 %v6022_v41  ;;  %1736 = vmatprep.mubr.f32.mxu0 %v6022_v41  ;;  %v211_v41 = vld [vmem:[#allocation6 + $0xb8] sm:$0xff] }
 0x178   :  { %1881 = vmatprep.subr.mxu1 %v235_v44  ;;  %v6655_v55 = vpop.f32.mrf.mxu0  ;;  %v6657_v32 = vpop.f32.mrf.mxu1  ;;  %3916 = vmatprep.subr.mxu0 %v3671_v40  ;;  %v6025_v44 = vld [vmem:[#allocation3 + $0xd0] sm:$0xff]  ;;  %v6028_v40 = vld [vmem:[#allocation3 + $0xf8] sm:$0xff] }
 0x179   :  { %8626 = vst [vmem:[#allocation60_spill] sm:$0xff] %v6655_v55  ;;  %8627 = vst [vmem:[#allocation61_spill] sm:$0xff] %v6657_v32  ;;  %1882 = vmatpush1.msra.mxu1 %v234_v38  ;;  %3917 = vmatpush1.msra.mxu0 %v3670_v25  ;;  %v210_v38 = vld [vmem:[#allocation6 + $0xb0] sm:$0xff] }
 0x17a   :  { %1480 = vmatmul.mubr.f32.gmra.mxu1 %v6023_v17  ;;  %1737 = vmatmul.mubr.f32.gmra.mxu0 %v6023_v17  ;;  %v6659_v35 = vpop.f32.mrf.mxu0  ;;  %v6661_v34 = vpop.f32.mrf.mxu1  ;;  %v198_v25 = vld [vmem:[#allocation6 + $0x50] sm:$0xff] }
 0x17b   :  { %8628 = vst [vmem:[#allocation62_spill] sm:$0xff] %v6659_v35  ;;  %8629 = vst [vmem:[#allocation63_spill] sm:$0xff] %v6661_v34  ;;  %1485 = vmatprep.mubr.f32.mxu1 %v6024_v3  ;;  %1742 = vmatprep.mubr.f32.mxu0 %v6024_v3  ;;  %v6026_v35 = vld [vmem:[#allocation3 + $0xe8] sm:$0xff]  ;;  %v3668_v32 = vld [vmem:[#allocation8 + $0x90] sm:$0xff] }
 0x17c   :  { %1883 = vmatprep.subr.mxu1 %v223_v5  ;;  %v199_v5 = vld [vmem:[#allocation6 + $0x58] sm:$0xff] }
 0x17d   :  { %1884 = vmatpush1.msra.mxu1 %v222_v57  ;;  %v6027_v57 = vld [vmem:[#allocation3 + $0xe0] sm:$0xff] }
 0x17e   :  { %1486 = vmatmul.mubr.f32.gmra.mxu1 %v6025_v44  ;;  %1743 = vmatmul.mubr.f32.gmra.mxu0 %v6025_v44  ;;  %v6663_v43 = vpop.f32.mrf.mxu0  ;;  %v6665_v17 = vpop.f32.mrf.mxu1 }
 0x17f   :  { %8630 = vst [vmem:[#allocation64_spill] sm:$0xff] %v6663_v43  ;;  %8631 = vst [vmem:[#allocation65_spill] sm:$0xff] %v6665_v17  ;;  %1491 = vmatprep.mubr.f32.mxu1 %v6026_v35  ;;  %1748 = vmatprep.mubr.f32.mxu0 %v6026_v35  ;;  %v4954_v35 = vmul.f32 -1.442695, %v6523_v16  ;;  %v570_v43 = vld [vmem:[#allocation6 + $0xbf0] sm:$0xff] }
 0x180   :  { %1885 = vmatprep.subr.mxu1 %v211_v41  ;;  %v6667_v34 = vpop.f32.mrf.mxu0  ;;  %v6669_v3 = vpop.f32.mrf.mxu1  ;;  %v571_v41 = vld [vmem:[#allocation6 + $0xbf8] sm:$0xff]  ;;  %v558_v16 = vld [vmem:[#allocation6 + $0xb90] sm:$0xff] }
 0x181   :  { %8632 = vst [vmem:[#allocation66_spill] sm:$0xff] %v6667_v34  ;;  %8633 = vst [vmem:[#allocation67_spill] sm:$0xff] %v6669_v3  ;;  %1886 = vmatpush1.msra.mxu1 %v210_v38  ;;  %v5050_v3 = vmul.f32 -1.442695, %v6525_v29  ;;  %v6029_v38 = vld [vmem:[#allocation3 + $0xf0] sm:$0xff]  ;;  %5218 = vpow2.f32 %v4954_v35  ;;  %v3667_v35 = vld [vmem:[#allocation8 + $0x88] sm:$0xff] }
 0x182   :  { %1492 = vmatmul.mubr.f32.gmra.mxu1 %v6027_v57  ;;  %1749 = vmatmul.mubr.f32.gmra.mxu0 %v6027_v57 }
 0x183   :  { %1497 = vmatprep.mubr.f32.mxu1 %v6028_v40  ;;  %1754 = vmatprep.mubr.f32.mxu0 %v6028_v40  ;;  %v3669_v40 = vld [vmem:[#allocation8 + $0x98] sm:$0xff]  ;;  %5220 = vpow2.f32 %v5050_v3 }
 0x184   :  { %v6671_v44 = vpop.f32.mrf.mxu0  ;;  %v6673_v17 = vpop.f32.mrf.mxu1  ;;  %1887 = vmatprep.subr.mxu1 %v199_v5  ;;  %v5051_v5 = vmul.f32 -1.442695, %v6531_v30  ;;  %3918 = vmatprep.subr.mxu0 %v3669_v40  ;;  %v547_v3 = vld [vmem:[#allocation6 + $0xb38] sm:$0xff]  ;;  %v3666_v40 = vld [vmem:[#allocation8 + $0x80] sm:$0xff] }
 0x185   :  { %8634 = vst [vmem:[#allocation68_spill] sm:$0xff] %v6671_v44  ;;  %8635 = vst [vmem:[#allocation69_spill] sm:$0xff] %v6673_v17  ;;  %1888 = vmatpush1.msra.mxu1 %v198_v25  ;;  %v4955_v44 = vmul.f32 -1.442695, %v6529_v39  ;;  %v559_v25 = vld [vmem:[#allocation6 + $0xb98] sm:$0xff]  ;;  %3919 = vmatpush1.msra.mxu0 %v3668_v32 }
 0x186   :  { %1498 = vmatmul.mubr.f32.gmra.mxu1 %v6029_v38  ;;  %1755 = vmatmul.mubr.f32.gmra.mxu0 %v6029_v38  ;;  %v6677_v34 = vpop.f32.mrf.mxu0  ;;  %v6679_v57 = vpop.f32.mrf.mxu1  ;;  %v4960_v32 = vmul.f32 -1.442695, %v6537_v53  ;;  %v535_v30 = vld [vmem:[#allocation6 + $0xad8] sm:$0xff] }
 0x187   :  { %8636 = vst [vmem:[#allocation70_spill] sm:$0xff] %v6679_v57  ;;  %1503 = vmatprep.mubr.f32.mxu1 %v6463_v20  ;;  %1760 = vmatprep.mubr.f32.mxu0 %v6463_v20  ;;  %5222 = vpow2.f32 %v4955_v44 }
 0x188   :  { %1889 = vmatprep.subr.mxu1 %v571_v41  ;;  %5224 = vpow2.f32 %v5051_v5  ;;  %v5056_v41 = vmul.f32 -1.442695, %v6539_v36  ;;  %v4961_v5 = vmul.f32 -1.442695, %v6543_v28  ;;  %3920 = vmatprep.subr.mxu0 %v3667_v35 }
 0x189   :  { %1890 = vmatpush2.msra.mxu1 %v570_v43  ;;  %5226 = vpow2.f32 %v4960_v32  ;;  %3921 = vmatpush1.msra.mxu0 %v3666_v40  ;;  %v3664_v32 = vld [vmem:[#allocation8 + $0x70] sm:$0xff]  ;;  %v523_v40 = vld [vmem:[#allocation6 + $0xa78] sm:$0xff] }
 0x18a   :  { %v6685_v38 = vpop.f32.mrf.mxu1  ;;  %v6687_v29 = vpop.f32.mrf.mxu0  ;;  %1504 = vmatmul.mubr.f32.gmra.mxu1 %v6467_v50  ;;  %1761 = vmatmul.mubr.f32.gmra.mxu0 %v6467_v50  ;;  %5228 = vpow2.f32 %v5056_v41 }
 0x18b   :  { %8637 = vst [vmem:[#allocation71_spill] sm:$0xff] %v6685_v38  ;;  %8638 = vst [vmem:[#allocation72_spill] sm:$0xff] %v6687_v29  ;;  %1509 = vmatprep.mubr.f32.mxu1 %v6471_v21  ;;  %1766 = vmatprep.mubr.f32.mxu0 %v6471_v21  ;;  %v546_v21 = vld [vmem:[#allocation6 + $0xb30] sm:$0xff]  ;;  %5230 = vpow2.f32 %v4961_v5  ;;  %v5062_v5 = vmul.f32 -1.442695, %v6553_v14 }
 0x18c   :  { %v6693_v20 = vpop.f32.mrf.mxu1  ;;  %v6695_v43 = vpop.f32.mrf.mxu0  ;;  %1891 = vmatprep.subr.mxu1 %v559_v25 }
 0x18d   :  { %8639 = vst [vmem:[#allocation73_spill] sm:$0xff] %v6695_v43  ;;  %1892 = vmatpush2.msra.mxu1 %v558_v16  ;;  %v5057_v16 = vmul.f32 -1.442695, %v6545_v37 }
 0x18e   :  { %v6699_v50 = vpop.f32.mrf.mxu1  ;;  %v6701_v44 = vpop.f32.mrf.mxu0  ;;  %1510 = vmatmul.mubr.f32.gmra.mxu1 %v6475_v8  ;;  %1767 = vmatmul.mubr.f32.gmra.mxu0 %v6475_v8 }
 0x18f   :  { %8640 = vst [vmem:[#allocation74_spill] sm:$0xff] %v6699_v50  ;;  %8641 = vst [vmem:[#allocation75_spill] sm:$0xff] %v6701_v44  ;;  %1515 = vmatprep.mubr.f32.mxu1 %v6479_v13  ;;  %1772 = vmatprep.mubr.f32.mxu0 %v6479_v13  ;;  %v534_v13 = vld [vmem:[#allocation6 + $0xad0] sm:$0xff]  ;;  %5232 = vpow2.f32 %v5057_v16 }
 0x190   :  { %v6709_v25 = vpop.f32.mrf.mxu1  ;;  %v6711_v36 = vpop.f32.mrf.mxu0  ;;  %1893 = vmatprep.subr.mxu1 %v547_v3  ;;  %v3665_v3 = vld [vmem:[#allocation8 + $0x78] sm:$0xff]  ;;  %v522_v16 = vld [vmem:[#allocation6 + $0xa70] sm:$0xff] }
 0x191   :  { %8642 = vst [vmem:[#allocation76_spill] sm:$0xff] %v6709_v25  ;;  %8643 = vst [vmem:[#allocation77_spill] sm:$0xff] %v6711_v36  ;;  %1894 = vmatpush2.msra.mxu1 %v546_v21  ;;  %3922 = vmatprep.subr.mxu0 %v3665_v3  ;;  %v4966_v21 = vmul.f32 -1.442695, %v6551_v59  ;;  %v5063_v3 = vmul.f32 -1.442695, %v6559_v4 }
 0x192   :  { %v6713_v8 = vpop.f32.mrf.mxu1  ;;  %v6715_v53 = vpop.f32.mrf.mxu0  ;;  %1516 = vmatmul.mubr.f32.gmra.mxu1 %v6483_v2  ;;  %1773 = vmatmul.mubr.f32.gmra.mxu0 %v6483_v2  ;;  %v3662_v4 = vld [vmem:[#allocation8 + $0x60] sm:$0xff] }
 0x193   :  { %8644 = vst [vmem:[#allocation78_spill] sm:$0xff] %v6713_v8  ;;  %8645 = vst [vmem:[#allocation79_spill] sm:$0xff] %v6715_v53  ;;  %1521 = vmatprep.mubr.f32.mxu1 %v6487_v10  ;;  %1778 = vmatprep.mubr.f32.mxu0 %v6487_v10  ;;  %v5219_v2 = vpop.eup %5218  ;;  %5234 = vpow2.f32 %v4966_v21 }
 0x194   :  { %v6721_v35 = vpop.f32.mrf.mxu1  ;;  %v6723_v41 = vpop.f32.mrf.mxu0  ;;  %1895 = vmatprep.subr.mxu1 %v535_v30  ;;  %3923 = vmatpush1.msra.mxu0 %v3664_v32  ;;  %v4967_v30 = vmul.f32 -1.442695, %v6557_v27  ;;  %v2690_v39 = vadd.f32 1.0, %v5219_v2  ;;  %5236 = vpow2.f32 %v5062_v5  ;;  %v4972_v2 = vmul.f32 -1.442695, %v6565_v48 }
 0x195   :  { %8646 = vst [vmem:[#allocation80_spill] sm:$0xff] %v6721_v35  ;;  %8647 = vst [vmem:[#allocation81_spill] sm:$0xff] %v6723_v41  ;;  %1896 = vmatpush2.msra.mxu1 %v534_v13  ;;  %v5221_v28 = vpop.eup %5220 }
 0x196   :  { %v6727_v37 = vpop.f32.mrf.mxu1  ;;  %v6729_v10 = vpop.f32.mrf.mxu0  ;;  %1522 = vmatmul.mubr.f32.gmra.mxu1 %v6491_v52  ;;  %1779 = vmatmul.mubr.f32.gmra.mxu0 %v6491_v52  ;;  %v511_v52 = vld [vmem:[#allocation6 + $0xa18] sm:$0xff]  ;;  %5238 = vpow2.f32 %v4967_v30 }
 0x197   :  { %8648 = vst [vmem:[#allocation82_spill] sm:$0xff] %v6727_v37  ;;  %8649 = vst [vmem:[#allocation83_spill] sm:$0xff] %v6729_v10  ;;  %1527 = vmatprep.mubr.f32.mxu1 %v6495_v56  ;;  %1784 = vmatprep.mubr.f32.mxu0 %v6495_v56  ;;  %v5223_v13 = vpop.eup %5222  ;;  %v3663_v10 = vld [vmem:[#allocation8 + $0x68] sm:$0xff]  ;;  %v2786_v37 = vadd.f32 1.0, %v5221_v28  ;;  %v510_v56 = vld [vmem:[#allocation6 + $0xa10] sm:$0xff]  ;;  %5240 = vpow2.f32 %v5063_v3 }
 0x198   :  { %v6737_v32 = vpop.f32.mrf.mxu1  ;;  %v6739_v14 = vpop.f32.mrf.mxu0  ;;  %1897 = vmatprep.subr.mxu1 %v523_v40  ;;  %3924 = vmatprep.subr.mxu0 %v3663_v10  ;;  %5242 = vrcp.f32 %v2690_v39  ;;  %v4973_v39 = vmul.f32 -1.442695, %v6571_v54 }
 0x199   :  { %8650 = vst [vmem:[#allocation84_spill] sm:$0xff] %v6737_v32  ;;  %8651 = vst [vmem:[#allocation85_spill] sm:$0xff] %v6739_v14  ;;  %v5225_v59 = vpop.eup %5224  ;;  %1898 = vmatpush2.msra.mxu1 %v522_v16  ;;  %v2691_v14 = vadd.f32 1.0, %v5223_v13  ;;  %3925 = vmatpush1.msra.mxu0 %v3662_v4  ;;  %5244 = vrcp.f32 %v2786_v37  ;;  %v5068_v16 = vmul.f32 -1.442695, %v6567_v26  ;;  %v6030_v13 = vld [vmem:[#allocation3 + $0x168] sm:$0xff] }
 0x19a   :  { %v6741_v27 = vpop.f32.mrf.mxu1  ;;  %v6743_v41 = vpop.f32.mrf.mxu0  ;;  %1528 = vmatmul.mubr.f32.gmra.mxu1 %v6499_v60  ;;  %1785 = vmatmul.mubr.f32.gmra.mxu0 %v6499_v60  ;;  %v2787_v21 = vadd.f32 1.0, %v5225_v59  ;;  %v499_v60 = vld [vmem:[#allocation6 + $0x9b8] sm:$0xff]  ;;  %v498_v59 = vld [vmem:[#allocation6 + $0x9b0] sm:$0xff]  ;;  %v5069_v37 = vmul.f32 -1.442695, %v6573_v6 }
 0x19b   :  { %8652 = vst [vmem:[#allocation86_spill] sm:$0xff] %v6741_v27  ;;  %8653 = vst [vmem:[#allocation87_spill] sm:$0xff] %v6743_v41  ;;  %1533 = vmatprep.mubr.f32.mxu1 %v6503_v61  ;;  %1790 = vmatprep.mubr.f32.mxu0 %v6503_v61  ;;  %v5227_v5 = vpop.eup %5226  ;;  %5246 = vrcp.f32 %v2691_v14 }
 0x19c   :  { %v6749_v28 = vpop.f32.mrf.mxu1  ;;  %v6751_v40 = vpop.f32.mrf.mxu0  ;;  %1899 = vmatprep.subr.mxu1 %v511_v52  ;;  %5248 = vrcp.f32 %v2787_v21  ;;  %v2696_v26 = vadd.f32 1.0, %v5227_v5  ;;  %v486_v21 = vld [vmem:[#allocation6 + $0x950] sm:$0xff] }
 0x19d   :  { %8654 = vst [vmem:[#allocation88_spill] sm:$0xff] %v6749_v28  ;;  %8655 = vst [vmem:[#allocation89_spill] sm:$0xff] %v6751_v40  ;;  %1900 = vmatpush2.msra.mxu1 %v510_v56  ;;  %v5229_v10 = vpop.eup %5228  ;;  %5250 = vpow2.f32 %v4972_v2 }
 0x19e   :  { %v6755_v30 = vpop.f32.mrf.mxu1  ;;  %v6757_v61 = vpop.f32.mrf.mxu0  ;;  %1534 = vmatmul.mubr.f32.gmra.mxu1 %v6507_v47  ;;  %1791 = vmatmul.mubr.f32.gmra.mxu0 %v6507_v47  ;;  %v487_v47 = vld [vmem:[#allocation6 + $0x958] sm:$0xff]  ;;  %v2792_v14 = vadd.f32 1.0, %v5229_v10  ;;  %5252 = vpow2.f32 %v5068_v16  ;;  %v4978_v16 = vmul.f32 -1.442695, %v6579_v9 }
 0x19f   :  { %8656 = vst [vmem:[#allocation90_spill] sm:$0xff] %v6755_v30  ;;  %8657 = vst [vmem:[#allocation91_spill] sm:$0xff] %v6757_v61  ;;  %1539 = vmatprep.mubr.f32.mxu1 %v6030_v13  ;;  %1796 = vmatprep.mubr.f32.mxu0 %v6030_v13  ;;  %v5231_v4 = vpop.eup %5230  ;;  %v6031_v13 = vld [vmem:[#allocation3 + $0x160] sm:$0xff]  ;;  %5254 = vpow2.f32 %v4973_v39  ;;  %v3661_v10 = vld [vmem:[#allocation8 + $0x58] sm:$0xff]  ;;  %v5074_v39 = vmul.f32 -1.442695, %v6581_v18 }
 0x1a0   :  { %v6763_v3 = vpop.f32.mrf.mxu1  ;;  %v6765_v52 = vpop.f32.mrf.mxu0  ;;  %1901 = vmatprep.subr.mxu1 %v499_v60  ;;  %v2697_v6 = vadd.f32 1.0, %v5231_v4  ;;  %5256 = vpow2.f32 %v5069_v37  ;;  %v6033_v37 = vld [vmem:[#allocation3 + $0x170] sm:$0xff]  ;;  %3926 = vmatprep.subr.mxu0 %v3661_v10 }
 0x1a1   :  { %8658 = vst [vmem:[#allocation92_spill] sm:$0xff] %v6763_v3  ;;  %8659 = vst [vmem:[#allocation93_spill] sm:$0xff] %v6765_v52  ;;  %v5233_v56 = vpop.eup %5232  ;;  %1902 = vmatpush2.msra.mxu1 %v498_v59  ;;  %v6032_v3 = vld [vmem:[#allocation3 + $0x178] sm:$0xff]  ;;  %5258 = vrcp.f32 %v2696_v26  ;;  %v4979_v26 = vmul.f32 -1.442695, %v6585_v46 }
 0x1a2   :  { %v6767_v48 = vpop.f32.mrf.mxu1  ;;  %v6769_v54 = vpop.f32.mrf.mxu0  ;;  %1540 = vmatmul.mubr.f32.gmra.mxu1 %v6031_v13  ;;  %1797 = vmatmul.mubr.f32.gmra.mxu0 %v6031_v13  ;;  %v2793_v60 = vadd.f32 1.0, %v5233_v56  ;;  %v475_v59 = vld [vmem:[#allocation6 + $0x8f8] sm:$0xff]  ;;  %5260 = vrcp.f32 %v2792_v14  ;;  %v474_v56 = vld [vmem:[#allocation6 + $0x8f0] sm:$0xff]  ;;  %v5075_v14 = vmul.f32 -1.442695, %v6587_v15  ;;  %v6035_v15 = vld [vmem:[#allocation3 + $0x180] sm:$0xff] }
 0x1a3   :  { %8660 = vst [vmem:[#allocation94_spill] sm:$0xff] %v6767_v48  ;;  %8661 = vst [vmem:[#allocation95_spill] sm:$0xff] %v6769_v54  ;;  %1545 = vmatprep.mubr.f32.mxu1 %v6032_v3  ;;  %1802 = vmatprep.mubr.f32.mxu0 %v6032_v3  ;;  %v5235_v13 = vpop.eup %5234  ;;  %5262 = vrcp.f32 %v2697_v6  ;;  %v463_v6 = vld [vmem:[#allocation6 + $0x898] sm:$0xff] }
 0x1a4   :  { %v6771_v2 = vpop.f32.mrf.mxu1  ;;  %v6773_v5 = vpop.f32.mrf.mxu0  ;;  %1903 = vmatprep.subr.mxu1 %v487_v47  ;;  %5264 = vrcp.f32 %v2793_v60 }
 0x1a5   :  { %8662 = vst [vmem:[#allocation96_spill] sm:$0xff] %v6771_v2  ;;  %8663 = vst [vmem:[#allocation97_spill] sm:$0xff] %v6773_v5  ;;  %1904 = vmatpush2.msra.mxu1 %v486_v21  ;;  %v3660_v5 = vld [vmem:[#allocation8 + $0x50] sm:$0xff]  ;;  %v5237_v47 = vpop.eup %5236  ;;  %v6034_v21 = vld [vmem:[#allocation3 + $0x188] sm:$0xff]  ;;  %5266 = vpow2.f32 %v4978_v16 }
 0x1a6   :  { %v6777_v4 = vpop.f32.mrf.mxu1  ;;  %v6779_v3 = vpop.f32.mrf.mxu0  ;;  %1546 = vmatmul.mubr.f32.gmra.mxu1 %v6033_v37  ;;  %1803 = vmatmul.mubr.f32.gmra.mxu0 %v6033_v37  ;;  %v2798_v46 = vadd.f32 1.0, %v5237_v47  ;;  %5268 = vpow2.f32 %v5074_v39  ;;  %v6036_v16 = vld [vmem:[#allocation3 + $0x198] sm:$0xff] }
 0x1a7   :  { %8664 = vst [vmem:[#allocation98_spill] sm:$0xff] %v6777_v4  ;;  %8665 = vst [vmem:[#allocation99_spill] sm:$0xff] %v6779_v3  ;;  %1551 = vmatprep.mubr.f32.mxu1 %v6034_v21  ;;  %1808 = vmatprep.mubr.f32.mxu0 %v6034_v21  ;;  %v5239_v9 = vpop.eup %5238  ;;  %v2702_v3 = vadd.f32 1.0, %v5235_v13  ;;  %5270 = vpow2.f32 %v4979_v26  ;;  %v3659_v26 = vld [vmem:[#allocation8 + $0x48] sm:$0xff] }
 0x1a8   :  { %v6783_v18 = vpop.f32.mrf.mxu1  ;;  %v6785_v4 = vpop.f32.mrf.mxu0  ;;  %1905 = vmatprep.subr.mxu1 %v475_v59  ;;  %3927 = vmatpush1.msra.mxu0 %v3660_v5  ;;  %v2703_v10 = vadd.f32 1.0, %v5239_v9  ;;  %v451_v9 = vld [vmem:[#allocation6 + $0x838] sm:$0xff] }
 0x1a9   :  { %8666 = vst [vmem:[#allocation100_spill] sm:$0xff] %v6783_v18  ;;  %8667 = vst [vmem:[#allocation101_spill] sm:$0xff] %v6785_v4  ;;  %v5241_v37 = vpop.eup %5240  ;;  %1906 = vmatpush2.msra.mxu1 %v474_v56  ;;  %v462_v4 = vld [vmem:[#allocation6 + $0x890] sm:$0xff]  ;;  %5272 = vpow2.f32 %v5075_v14  ;;  %3928 = vmatprep.subr.mxu0 %v3659_v26 }
 0x1aa   :  { %v6787_v2 = vpop.eup %5242  ;;  %v6789_v21 = vpop.f32.mrf.mxu1  ;;  %1552 = vmatmul.mubr.f32.gmra.mxu1 %v6035_v15  ;;  %1809 = vmatmul.mubr.f32.gmra.mxu0 %v6035_v15  ;;  %v2799_v13 = vadd.f32 1.0, %v5241_v37  ;;  %5274 = vrcp.f32 %v2702_v3  ;;  %v4984_v15 = vmul.f32 -1.442695, %v6591_v49  ;;  %v6037_v37 = vld [vmem:[#allocation3 + $0x190] sm:$0xff]  ;;  %v4985_v3 = vmul.f32 -1.442695, %v6595_v0 }
 0x1ab   :  { %8668 = vst [vmem:[#allocation102_spill] sm:$0xff] %v6789_v21  ;;  %v6791_v60 = vpop.f32.mrf.mxu0  ;;  %v6793_v59 = vpop.eup %5244  ;;  %1557 = vmatprep.mubr.f32.mxu1 %v6036_v16  ;;  %1814 = vmatprep.mubr.f32.mxu0 %v6036_v16  ;;  %5276 = vrcp.f32 %v2798_v46  ;;  %v5080_v16 = vmul.f32 -1.442695, %v6593_v58  ;;  %v5081_v46 = vmul.f32 -1.442695, %v6597_v31  ;;  %v6039_v31 = vld [vmem:[#allocation3 + $0x1a0] sm:$0xff] }
 0x1ac   :  { %8669 = vst [vmem:[#allocation103_spill] sm:$0xff] %v6791_v60  ;;  %8670 = vst [vmem:[#allocation104_spill] sm:$0xff] %v6793_v59  ;;  %v6795_v5 = vpop.eup %5246  ;;  %v6797_v39 = vpop.f32.mrf.mxu1  ;;  %1907 = vmatprep.subr.mxu1 %v463_v6  ;;  %v450_v6 = vld [vmem:[#allocation6 + $0x830] sm:$0xff]  ;;  %5278 = vrcp.f32 %v2703_v10  ;;  %v439_v10 = vld [vmem:[#allocation6 + $0x7d8] sm:$0xff] }
 0x1ad   :  { %8671 = vst [vmem:[#allocation105_spill] sm:$0xff] %v6797_v39  ;;  %v6799_v56 = vpop.f32.mrf.mxu0  ;;  %v6801_v47 = vpop.eup %5248  ;;  %1908 = vmatpush2.msra.mxu1 %v462_v4  ;;  %v6038_v4 = vld [vmem:[#allocation3 + $0x1a8] sm:$0xff]  ;;  %5280 = vrcp.f32 %v2799_v13 }
 0x1ae   :  { %8672 = vst [vmem:[#allocation106_spill] sm:$0xff] %v6799_v56  ;;  %8673 = vst [vmem:[#allocation107_spill] sm:$0xff] %v6801_v47  ;;  %v5251_v59 = vpop.eup %5250  ;;  %v6805_v60 = vpop.f32.mrf.mxu1  ;;  %1558 = vmatmul.mubr.f32.gmra.mxu1 %v6037_v37  ;;  %1815 = vmatmul.mubr.f32.gmra.mxu0 %v6037_v37  ;;  %v3658_v56 = vld [vmem:[#allocation8 + $0x40] sm:$0xff]  ;;  %5282 = vpow2.f32 %v4984_v15  ;;  %v3656_v15 = vld [vmem:[#allocation8 + $0x30] sm:$0xff] }
 0x1af   :  { %8674 = vst [vmem:[#allocation108_spill] sm:$0xff] %v6805_v60  ;;  %v6807_v14 = vpop.f32.mrf.mxu0  ;;  %v5253_v47 = vpop.eup %5252  ;;  %1563 = vmatprep.mubr.f32.mxu1 %v6038_v4  ;;  %1820 = vmatprep.mubr.f32.mxu0 %v6038_v4  ;;  %5284 = vpow2.f32 %v5080_v16 }
 0x1b0   :  { %8675 = vst [vmem:[#allocation109_spill] sm:$0xff] %v6807_v14  ;;  %v5255_v39 = vpop.eup %5254  ;;  %v6811_v58 = vpop.f32.mrf.mxu1  ;;  %1909 = vmatprep.subr.mxu1 %v451_v9  ;;  %v2708_v14 = vadd.f32 1.0, %v5251_v59  ;;  %3929 = vmatpush1.msra.mxu0 %v3658_v56  ;;  %v2804_v18 = vadd.f32 1.0, %v5253_v47  ;;  %5286 = vpow2.f32 %v4985_v3  ;;  %v6040_v59 = vld [vmem:[#allocation3 + $0x1b8] sm:$0xff] }
 0x1b1   :  { %8676 = vst [vmem:[#allocation110_spill] sm:$0xff] %v6811_v58  ;;  %v6813_v60 = vpop.f32.mrf.mxu0  ;;  %v5257_v37 = vpop.eup %5256  ;;  %1910 = vmatpush2.msra.mxu1 %v450_v6  ;;  %v2709_v26 = vadd.f32 1.0, %v5255_v39  ;;  %v3657_v56 = vld [vmem:[#allocation8 + $0x38] sm:$0xff]  ;;  %5288 = vpow2.f32 %v5081_v46  ;;  %v4990_v39 = vmul.f32 -1.442695, %v6599_v12 }
 0x1b2   :  { %8677 = vst [vmem:[#allocation111_spill] sm:$0xff] %v6813_v60  ;;  %v6815_v21 = vpop.eup %5258  ;;  %v6817_v4 = vpop.f32.mrf.mxu1  ;;  %1564 = vmatmul.mubr.f32.gmra.mxu1 %v6039_v31  ;;  %1821 = vmatmul.mubr.f32.gmra.mxu0 %v6039_v31  ;;  %v438_v60 = vld [vmem:[#allocation6 + $0x7d0] sm:$0xff]  ;;  %v2805_v47 = vadd.f32 1.0, %v5257_v37  ;;  %5290 = vrcp.f32 %v2708_v14  ;;  %v427_v3 = vld [vmem:[#allocation6 + $0x778] sm:$0xff]  ;;  %v4991_v14 = vmul.f32 -1.442695, %v6603_v33 }
 0x1b3   :  { %8678 = vst [vmem:[#allocation112_spill] sm:$0xff] %v6817_v4  ;;  %v6819_v13 = vpop.f32.mrf.mxu0  ;;  %v6821_v9 = vpop.eup %5260  ;;  %1569 = vmatprep.mubr.f32.mxu1 %v6040_v59  ;;  %1826 = vmatprep.mubr.f32.mxu0 %v6040_v59  ;;  %5292 = vrcp.f32 %v2804_v18  ;;  %v5087_v18 = vmul.f32 -1.442695, %v6605_v11  ;;  %v6043_v11 = vld [vmem:[#allocation3 + $0x1c0] sm:$0xff] }
 0x1b4   :  { %8679 = vst [vmem:[#allocation113_spill] sm:$0xff] %v6819_v13  ;;  %8680 = vst [vmem:[#allocation114_spill] sm:$0xff] %v6821_v9  ;;  %v6823_v6 = vpop.eup %5262  ;;  %v6825_v16 = vpop.f32.mrf.mxu1  ;;  %1911 = vmatprep.subr.mxu1 %v439_v10  ;;  %3930 = vmatprep.subr.mxu0 %v3657_v56  ;;  %v5086_v9 = vmul.f32 -1.442695, %v6601_v42  ;;  %v426_v10 = vld [vmem:[#allocation6 + $0x770] sm:$0xff]  ;;  %5294 = vrcp.f32 %v2709_v26  ;;  %v3655_v26 = vld [vmem:[#allocation8 + $0x28] sm:$0xff] }
 0x1b5   :  { %8681 = vst [vmem:[#allocation115_spill] sm:$0xff] %v6825_v16  ;;  %v6827_v13 = vpop.f32.mrf.mxu0  ;;  %v6829_v31 = vpop.eup %5264  ;;  %1912 = vmatpush2.msra.mxu1 %v438_v60  ;;  %3931 = vmatpush1.msra.mxu0 %v3656_v15  ;;  %v6041_v16 = vld [vmem:[#allocation3 + $0x1b0] sm:$0xff]  ;;  %5296 = vrcp.f32 %v2805_v47 }
 0x1b6   :  { %8682 = vst [vmem:[#allocation116_spill] sm:$0xff] %v6827_v13  ;;  %8683 = vst [vmem:[#allocation117_spill] sm:$0xff] %v6829_v31  ;;  %v5267_v59 = vpop.eup %5266  ;;  %v6833_v37 = vpop.f32.mrf.mxu1  ;;  %1570 = vmatmul.mubr.f32.gmra.mxu1 %v6041_v16  ;;  %1827 = vmatmul.mubr.f32.gmra.mxu0 %v6041_v16  ;;  %v6042_v31 = vld [vmem:[#allocation3 + $0x1c8] sm:$0xff]  ;;  %5298 = vpow2.f32 %v4990_v39  ;;  %v415_v16 = vld [vmem:[#allocation6 + $0x718] sm:$0xff] }
 0x1b7   :  { %8684 = vst [vmem:[#allocation118_spill] sm:$0xff] %v6833_v37  ;;  %v6835_v46 = vpop.f32.mrf.mxu0  ;;  %v5269_v56 = vpop.eup %5268  ;;  %1575 = vmatprep.mubr.f32.mxu1 %v6042_v31  ;;  %1832 = vmatprep.mubr.f32.mxu0 %v6042_v31  ;;  %v2714_v37 = vadd.f32 1.0, %v5267_v59  ;;  %5300 = vpow2.f32 %v5086_v9  ;;  %v6044_v39 = vld [vmem:[#allocation3 + $0x1d8] sm:$0xff] }
 0x1b8   :  { %8685 = vst [vmem:[#allocation119_spill] sm:$0xff] %v6835_v46  ;;  %v5271_v60 = vpop.eup %5270  ;;  %v6839_v15 = vpop.f32.mrf.mxu1  ;;  %1913 = vmatprep.subr.mxu1 %v427_v3  ;;  %v2810_v4 = vadd.f32 1.0, %v5269_v56  ;;  %5302 = vpow2.f32 %v4991_v14  ;;  %3932 = vmatprep.subr.mxu0 %v3655_v26  ;;  %v403_v14 = vld [vmem:[#allocation6 + $0x6b8] sm:$0xff] }
 0x1b9   :  { %8686 = vst [vmem:[#allocation120_spill] sm:$0xff] %v6839_v15  ;;  %v6841_v42 = vpop.f32.mrf.mxu0  ;;  %v5273_v46 = vpop.eup %5272  ;;  %1914 = vmatpush2.msra.mxu1 %v426_v10  ;;  %v414_v15 = vld [vmem:[#allocation6 + $0x710] sm:$0xff]  ;;  %v2715_v59 = vadd.f32 1.0, %v5271_v60  ;;  %5304 = vpow2.f32 %v5087_v18 }
 0x1ba   :  { %8687 = vst [vmem:[#allocation121_spill] sm:$0xff] %v6841_v42  ;;  %v6843_v13 = vpop.eup %5274  ;;  %v6845_v31 = vpop.f32.mrf.mxu1  ;;  %1576 = vmatmul.mubr.f32.gmra.mxu1 %v6043_v11  ;;  %1833 = vmatmul.mubr.f32.gmra.mxu0 %v6043_v11  ;;  %v3654_v42 = vld [vmem:[#allocation8 + $0x20] sm:$0xff]  ;;  %v2811_v56 = vadd.f32 1.0, %v5273_v46  ;;  %5306 = vrcp.f32 %v2714_v37  ;;  %v4997_v37 = vmul.f32 -1.442695, %v6611_v51 }
 0x1bb   :  { %8688 = vst [vmem:[#allocation122_spill] sm:$0xff] %v6845_v31  ;;  %v6847_v47 = vpop.f32.mrf.mxu0  ;;  %v6849_v3 = vpop.eup %5276  ;;  %1581 = vmatprep.mubr.f32.mxu1 %v6044_v39  ;;  %1838 = vmatprep.mubr.f32.mxu0 %v6044_v39  ;;  %5308 = vrcp.f32 %v2810_v4  ;;  %v5092_v39 = vmul.f32 -1.442695, %v6609_v7  ;;  %v5093_v4 = vmul.f32 -1.442695, %v6613_v24  ;;  %v390_v24 = vld [vmem:[#allocation6 + $0x650] sm:$0xff] }
 0x1bc   :  { %8689 = vst [vmem:[#allocation123_spill] sm:$0xff] %v6847_v47  ;;  %8690 = vst [vmem:[#allocation124_spill] sm:$0xff] %v6849_v3  ;;  %v6851_v10 = vpop.eup %5278  ;;  %v6853_v9 = vpop.f32.mrf.mxu1  ;;  %1915 = vmatprep.subr.mxu1 %v415_v16  ;;  %v4996_v3 = vmul.f32 -1.442695, %v6607_v63  ;;  %3933 = vmatpush1.msra.mxu0 %v3654_v42  ;;  %v402_v16 = vld [vmem:[#allocation6 + $0x6b0] sm:$0xff]  ;;  %5310 = vrcp.f32 %v2715_v59 }
 0x1bd   :  { %8691 = vst [vmem:[#allocation125_spill] sm:$0xff] %v6853_v9  ;;  %v6855_v31 = vpop.f32.mrf.mxu0  ;;  %v6857_v11 = vpop.eup %5280  ;;  %1916 = vmatpush2.msra.mxu1 %v414_v15  ;;  %v6045_v9 = vld [vmem:[#allocation3 + $0x1d0] sm:$0xff]  ;;  %5312 = vrcp.f32 %v2811_v56  ;;  %v6047_v56 = vld [vmem:[#allocation3 + $0x1e0] sm:$0xff] }
 0x1be   :  { %8692 = vst [vmem:[#allocation126_spill] sm:$0xff] %v6855_v31  ;;  %8693 = vst [vmem:[#allocation127_spill] sm:$0xff] %v6857_v11  ;;  %v5283_v60 = vpop.eup %5282  ;;  %v6861_v46 = vpop.f32.mrf.mxu1  ;;  %1582 = vmatmul.mubr.f32.gmra.mxu1 %v6045_v9  ;;  %1839 = vmatmul.mubr.f32.gmra.mxu0 %v6045_v9  ;;  %v6046_v11 = vld [vmem:[#allocation3 + $0x1e8] sm:$0xff]  ;;  %5314 = vpow2.f32 %v4996_v3  ;;  %v391_v9 = vld [vmem:[#allocation6 + $0x658] sm:$0xff] }
 0x1bf   :  { %8694 = vst [vmem:[#allocation128_spill] sm:$0xff] %v6861_v46  ;;  %v6863_v18 = vpop.f32.mrf.mxu0  ;;  %v5285_v26 = vpop.eup %5284  ;;  %1587 = vmatprep.mubr.f32.mxu1 %v6046_v11  ;;  %1844 = vmatprep.mubr.f32.mxu0 %v6046_v11  ;;  %v2720_v46 = vadd.f32 1.0, %v5283_v60  ;;  %5316 = vpow2.f32 %v5092_v39  ;;  %v6048_v60 = vld [vmem:[#allocation3 + $0x1f8] sm:$0xff] }
 0x1c0   :  { %8695 = vst [vmem:[#allocation129_spill] sm:$0xff] %v6863_v18  ;;  %v5287_v42 = vpop.eup %5286  ;;  %v6867_v15 = vpop.f32.mrf.mxu1  ;;  %1917 = vmatprep.subr.mxu1 %v403_v14  ;;  %v2816_v31 = vadd.f32 1.0, %v5285_v26  ;;  %5318 = vpow2.f32 %v4997_v37  ;;  %v3652_v37 = vld [vmem:[#allocation8 + $0x10] sm:$0xff] }
 0x1c1   :  { %8696 = vst [vmem:[#allocation130_spill] sm:$0xff] %v6867_v15  ;;  %v6869_v7 = vpop.f32.mrf.mxu0  ;;  %v5289_v18 = vpop.eup %5288  ;;  %1918 = vmatpush2.msra.mxu1 %v402_v16  ;;  %v2721_v14 = vadd.f32 1.0, %v5287_v42  ;;  %5320 = vpow2.f32 %v5093_v4  ;;  %v3653_v42 = vld [vmem:[#allocation8 + $0x18] sm:$0xff]  ;;  %v6049_v4 = vld [vmem:[#allocation3 + $0x1f0] sm:$0xff] }
 0x1c2   :  { %8697 = vst [vmem:[#allocation131_spill] sm:$0xff] %v6869_v7  ;;  %v6871_v59 = vpop.eup %5290  ;;  %v6873_v47 = vpop.f32.mrf.mxu1  ;;  %1588 = vmatmul.mubr.f32.gmra.mxu1 %v6047_v56  ;;  %1845 = vmatmul.mubr.f32.gmra.mxu0 %v6047_v56  ;;  %v2817_v16 = vadd.f32 1.0, %v5289_v18  ;;  %5322 = vrcp.f32 %v2720_v46  ;;  %v5002_v56 = vmul.f32 -1.442695, %v6615_v62  ;;  %v5003_v46 = vmul.f32 -1.442695, %v6619_v45 }
 0x1c3   :  { %8698 = vst [vmem:[#allocation132_spill] sm:$0xff] %v6873_v47  ;;  %v6875_v11 = vpop.f32.mrf.mxu0  ;;  %v6877_v15 = vpop.eup %5292  ;;  %1593 = vmatprep.mubr.f32.mxu1 %v6048_v60  ;;  %1850 = vmatprep.mubr.f32.mxu0 %v6048_v60  ;;  %5324 = vrcp.f32 %v2816_v31  ;;  %v5098_v60 = vmul.f32 -1.442695, %v6617_v23  ;;  %v5099_v31 = vmul.f32 -1.442695, %v6621_v22  ;;  %v6062_v62 = vld [vmem:[#allocation3 + $0x68] sm:$0xff] }
 0x1c4   :  { %8699 = vst [vmem:[#allocation133_spill] sm:$0xff] %v6875_v11  ;;  %8700 = vst [vmem:[#allocation134_spill] sm:$0xff] %v6877_v15  ;;  %v6879_v3 = vpop.eup %5294  ;;  %v6881_v39 = vpop.f32.mrf.mxu1  ;;  %1919 = vmatprep.subr.mxu1 %v391_v9  ;;  %5326 = vrcp.f32 %v2721_v14  ;;  %3934 = vmatprep.subr.mxu0 %v3653_v42 }
 0x1c5   :  { %8701 = vst [vmem:[#allocation135_spill] sm:$0xff] %v6881_v39  ;;  %v6883_v26 = vpop.f32.mrf.mxu0  ;;  %v6885_v11 = vpop.eup %5296  ;;  %1920 = vmatpush2.msra.mxu1 %v390_v24  ;;  %5328 = vrcp.f32 %v2817_v16  ;;  %3935 = vmatpush1.msra.mxu0 %v3652_v37 }
 0x1c6   :  { %8702 = vst [vmem:[#allocation136_spill] sm:$0xff] %v6883_v26  ;;  %8703 = vst [vmem:[#allocation137_spill] sm:$0xff] %v6885_v11  ;;  %v5299_v15 = vpop.eup %5298  ;;  %v6889_v47 = vpop.f32.mrf.mxu1  ;;  %1594 = vmatmul.mubr.f32.gmra.mxu1 %v6049_v4  ;;  %1851 = vmatmul.mubr.f32.gmra.mxu0 %v6049_v4  ;;  %v6050_v26 = vld [vmem:[#allocation3 + $0x8] sm:$0xff]  ;;  %5330 = vpow2.f32 %v5002_v56 }
 0x1c7   :  { %8704 = vst [vmem:[#allocation138_spill] sm:$0xff] %v6889_v47  ;;  %v6891_v18 = vpop.f32.mrf.mxu0  ;;  %v5301_v9 = vpop.eup %5300  ;;  %1921 = vmatprep.mubr.f32.mxu1 %v6050_v26  ;;  %v2726_v47 = vadd.f32 1.0, %v5299_v15  ;;  %5332 = vpow2.f32 %v5098_v60  ;;  %v6051_v26 = vld [vmem:[#allocation3] sm:$0xff] }
 0x1c8   :  { %8705 = vst [vmem:[#allocation139_spill] sm:$0xff] %v6891_v18  ;;  %v5303_v24 = vpop.eup %5302  ;;  %v6895_v11 = vpop.f32.mrf.mxu1  ;;  %v2822_v14 = vadd.f32 1.0, %v5301_v9  ;;  %5334 = vpow2.f32 %v5003_v46  ;;  %v5104_v46 = vmul.f32 -1.442695, %v6625_v19 }
 0x1c9   :  { %8706 = vst [vmem:[#allocation140_spill] sm:$0xff] %v6895_v11  ;;  %v6897_v23 = vpop.f32.mrf.mxu0  ;;  %v5305_v18 = vpop.eup %5304  ;;  %v2727_v22 = vadd.f32 1.0, %v5303_v24  ;;  %v6052_v11 = vld [vmem:[#allocation3 + $0x18] sm:$0xff]  ;;  %5336 = vpow2.f32 %v5099_v31  ;;  %v6053_v24 = vld [vmem:[#allocation3 + $0x10] sm:$0xff] }
 0x1ca   :  { %8707 = vst [vmem:[#allocation141_spill] sm:$0xff] %v6897_v23  ;;  %v6899_v4 = vpop.eup %5306  ;;  %v6901_v39 = vpop.f32.mrf.mxu1  ;;  %1922 = vmatmul.mubr.f32.vlgmr.msra.gmra.mxu1 %v6051_v26  ;;  %v2823_v15 = vadd.f32 1.0, %v5305_v18  ;;  %5338 = vrcp.f32 %v2726_v47  ;;  %v3651_v26 = vld [vmem:[#allocation8 + $0x8] sm:$0xff]  ;;  %v3650_v23 = vld [vmem:[#allocation8] sm:$0xff] }
 0x1cb   :  { %8708 = vst [vmem:[#allocation142_spill] sm:$0xff] %v6901_v39  ;;  %v6903_v42 = vpop.f32.mrf.mxu0  ;;  %v6905_v16 = vpop.eup %5308  ;;  %1927 = vmatprep.mubr.f32.mxu1 %v6052_v11  ;;  %5340 = vrcp.f32 %v2822_v14  ;;  %3936 = vmatprep.subr.mxu0 %v3651_v26  ;;  %v6054_v47 = vld [vmem:[#allocation3 + $0x28] sm:$0xff] }
 0x1cc   :  { %8709 = vst [vmem:[#allocation143_spill] sm:$0xff] %v6903_v42  ;;  %8710 = vst [vmem:[#allocation144_spill] sm:$0xff] %v6905_v16  ;;  %v6907_v37 = vpop.eup %5310  ;;  %v6909_v56 = vpop.f32.mrf.mxu1  ;;  %v5008_v42 = vmul.f32 -1.442695, %v6623_v1  ;;  %5342 = vrcp.f32 %v2727_v22  ;;  %3937 = vmatpush1.msra.mxu0 %v3650_v23  ;;  %v3712_v23 = vld [vmem:[#allocation8 + $0x1f0] sm:$0xff] }
 0x1cd   :  { %8711 = vst [vmem:[#allocation145_spill] sm:$0xff] %v6909_v56  ;;  %v6911_v9 = vpop.f32.mrf.mxu0  ;;  %v6913_v60 = vpop.eup %5312  ;;  %5344 = vrcp.f32 %v2823_v15  ;;  %v6055_v15 = vld [vmem:[#allocation3 + $0x20] sm:$0xff] }
 0x1ce   :  { %8712 = vst [vmem:[#allocation146_spill] sm:$0xff] %v6911_v9  ;;  %8713 = vst [vmem:[#allocation147_spill] sm:$0xff] %v6913_v60  ;;  %v5315_v39 = vpop.eup %5314  ;;  %v6917_v11 = vpop.f32.mrf.mxu1  ;;  %1928 = vmatmul.mubr.f32.gmra.mxu1 %v6053_v24  ;;  %v8716_v9 = vld [vmem:[#allocation46_spill] sm:$0xff]  ;;  %v8717_v60 = vld [vmem:[#allocation47_spill] sm:$0xff]  ;;  %5346 = vpow2.f32 %v5008_v42 }
 0x1cf   :  { %8714 = vst [vmem:[#allocation148_spill] sm:$0xff] %v6917_v11  ;;  %v6919_v18 = vpop.f32.mrf.mxu0  ;;  %v5317_v31 = vpop.eup %5316  ;;  %v5009_v16 = vmul.f32 -1.442695, %v8716_v9  ;;  %1933 = vmatprep.mubr.f32.mxu1 %v6054_v47  ;;  %v5105_v14 = vmul.f32 -1.442695, %v8717_v60  ;;  %v2732_v11 = vadd.f32 1.0, %v5315_v39  ;;  %5348 = vpow2.f32 %v5104_v46 }
 0x1d0   :  { %8715 = vst [vmem:[#allocation149_spill] sm:$0xff] %v6919_v18  ;;  %v5319_v56 = vpop.eup %5318  ;;  %v6923_v7 = vpop.f32.mrf.mxu1  ;;  %v3713_v18 = vld [vmem:[#allocation8 + $0x1f8] sm:$0xff]  ;;  %v2828_v22 = vadd.f32 1.0, %v5317_v31 }
 0x1d1   :  { %8718 = vst [vmem:[#allocation150_spill] sm:$0xff] %v6923_v7  ;;  %v6925_v26 = vpop.f32.mrf.mxu0  ;;  %v5321_v19 = vpop.eup %5320  ;;  %3938 = vmatprep.subr.mxu0 %v3713_v18  ;;  %v2733_v7 = vadd.f32 1.0, %v5319_v56  ;;  %5350 = vpow2.f32 %v5009_v16  ;;  %v6056_v39 = vld [vmem:[#allocation3 + $0x38] sm:$0xff]  ;;  %v8727_v16 = vld [vmem:[#allocation49_spill] sm:$0xff] }
 0x1d2   :  { %8719 = vst [vmem:[#allocation151_spill] sm:$0xff] %v6925_v26  ;;  %v6927_v24 = vpop.eup %5322  ;;  %v6929_v1 = vpop.f32.mrf.mxu1  ;;  %1934 = vmatmul.mubr.f32.gmra.mxu1 %v6055_v15  ;;  %3939 = vmatpush2.msra.mxu0 %v3712_v23  ;;  %v2829_v26 = vadd.f32 1.0, %v5321_v19  ;;  %5352 = vpow2.f32 %v5105_v14  ;;  %v5110_v56 = vmul.f32 -1.442695, %v8727_v16  ;;  %v3710_v23 = vld [vmem:[#allocation8 + $0x1e0] sm:$0xff]  ;;  %v6057_v14 = vld [vmem:[#allocation3 + $0x30] sm:$0xff] }
 0x1d3   :  { %8720 = vst [vmem:[#allocation152_spill] sm:$0xff] %v6929_v1  ;;  %v6931_v47 = vpop.f32.mrf.mxu0  ;;  %v6933_v60 = vpop.eup %5324  ;;  %1939 = vmatprep.mubr.f32.mxu1 %v6056_v39  ;;  %5354 = vrcp.f32 %v2732_v11  ;;  %v3711_v1 = vld [vmem:[#allocation8 + $0x1e8] sm:$0xff] }
 0x1d4   :  { %8721 = vst [vmem:[#allocation153_spill] sm:$0xff] %v6931_v47  ;;  %8722 = vst [vmem:[#allocation154_spill] sm:$0xff] %v6933_v60  ;;  %v6935_v42 = vpop.eup %5326  ;;  %v6937_v46 = vpop.f32.mrf.mxu1  ;;  %v8726_v47 = vld [vmem:[#allocation48_spill] sm:$0xff]  ;;  %5356 = vrcp.f32 %v2828_v22  ;;  %3940 = vmatprep.subr.mxu0 %v3711_v1  ;;  %v6058_v11 = vld [vmem:[#allocation3 + $0x48] sm:$0xff] }
 0x1d5   :  { %8723 = vst [vmem:[#allocation155_spill] sm:$0xff] %v6937_v46  ;;  %v6939_v18 = vpop.f32.mrf.mxu0  ;;  %v6941_v31 = vpop.eup %5328  ;;  %v5014_v15 = vmul.f32 -1.442695, %v8726_v47  ;;  %5358 = vrcp.f32 %v2733_v7  ;;  %3941 = vmatpush2.msra.mxu0 %v3710_v23  ;;  %v8731_v22 = vld [vmem:[#allocation51_spill] sm:$0xff] }
 0x1d6   :  { %8724 = vst [vmem:[#allocation156_spill] sm:$0xff] %v6939_v18  ;;  %8725 = vst [vmem:[#allocation157_spill] sm:$0xff] %v6941_v31  ;;  %v5331_v60 = vpop.eup %5330  ;;  %v6945_v39 = vpop.f32.mrf.mxu1  ;;  %1940 = vmatmul.mubr.f32.gmra.mxu1 %v6057_v14  ;;  %v8730_v18 = vld [vmem:[#allocation50_spill] sm:$0xff]  ;;  %5360 = vrcp.f32 %v2829_v26  ;;  %v5111_v58 = vmul.f32 -1.442695, %v8731_v22 }
 0x1d7   :  { %8728 = vst [vmem:[#allocation158_spill] sm:$0xff] %v6945_v39  ;;  %v6947_v19 = vpop.f32.mrf.mxu0  ;;  %v5333_v46 = vpop.eup %5332  ;;  %v5015_v31 = vmul.f32 -1.442695, %v8730_v18  ;;  %1945 = vmatprep.mubr.f32.mxu1 %v6058_v11  ;;  %v2738_v9 = vadd.f32 1.0, %v5331_v60  ;;  %5362 = vpow2.f32 %v5014_v15  ;;  %v6059_v11 = vld [vmem:[#allocation3 + $0x40] sm:$0xff]  ;;  %v6061_v18 = vld [vmem:[#allocation3 + $0x50] sm:$0xff] }
 0x1d8   :  { %8729 = vst [vmem:[#allocation159_spill] sm:$0xff] %v6947_v19  ;;  %v5335_v47 = vpop.eup %5334  ;;  %v6951_v16 = vpop.f32.mrf.mxu1  ;;  %v2834_v14 = vadd.f32 1.0, %v5333_v46  ;;  %5364 = vpow2.f32 %v5110_v56 }
 0x1d9   :  { %8732 = vst [vmem:[#allocation160_spill] sm:$0xff] %v6951_v16  ;;  %v6953_v1 = vpop.f32.mrf.mxu0  ;;  %v5337_v39 = vpop.eup %5336  ;;  %v2739_v22 = vadd.f32 1.0, %v5335_v47  ;;  %5366 = vpow2.f32 %v5015_v31  ;;  %v6060_v16 = vld [vmem:[#allocation3 + $0x58] sm:$0xff] }
 0x1da   :  { %8733 = vst [vmem:[#allocation161_spill] sm:$0xff] %v6953_v1  ;;  %v6955_v19 = vpop.eup %5338  ;;  %v6957_v7 = vpop.f32.mrf.mxu1  ;;  %1946 = vmatmul.mubr.f32.gmra.mxu1 %v6059_v11  ;;  %v2835_v60 = vadd.f32 1.0, %v5337_v39  ;;  %5368 = vpow2.f32 %v5111_v58  ;;  %v8744_v39 = vld [vmem:[#allocation54_spill] sm:$0xff] }
 0x1db   :  { %8734 = vst [vmem:[#allocation162_spill] sm:$0xff] %v6957_v7  ;;  %v6959_v23 = vpop.f32.mrf.mxu0  ;;  %v6961_v26 = vpop.eup %5340  ;;  %1951 = vmatprep.mubr.f32.mxu1 %v6060_v16  ;;  %5370 = vrcp.f32 %v2738_v9 }
 0x1dc   :  { %8735 = vst [vmem:[#allocation163_spill] sm:$0xff] %v6959_v23  ;;  %8736 = vst [vmem:[#allocation164_spill] sm:$0xff] %v6961_v26  ;;  %v6963_v1 = vpop.eup %5342  ;;  %v6965_v15 = vpop.f32.mrf.mxu1  ;;  %v8740_v23 = vld [vmem:[#allocation52_spill] sm:$0xff]  ;;  %5372 = vrcp.f32 %v2834_v14  ;;  %v8741_v26 = vld [vmem:[#allocation53_spill] sm:$0xff] }
 0x1dd   :  { %8737 = vst [vmem:[#allocation165_spill] sm:$0xff] %v6965_v15  ;;  %v6967_v46 = vpop.f32.mrf.mxu0  ;;  %v6969_v56 = vpop.eup %5344  ;;  %v5020_v7 = vmul.f32 -1.442695, %v8740_v23  ;;  %v5116_v47 = vmul.f32 -1.442695, %v8741_v26  ;;  %5374 = vrcp.f32 %v2739_v22  ;;  %v3708_v14 = vld [vmem:[#allocation8 + $0x1d0] sm:$0xff] }
 0x1de   :  { %8738 = vst [vmem:[#allocation166_spill] sm:$0xff] %v6967_v46  ;;  %8739 = vst [vmem:[#allocation167_spill] sm:$0xff] %v6969_v56  ;;  %v5347_v11 = vpop.eup %5346  ;;  %v6973_v31 = vpop.f32.mrf.mxu1  ;;  %1952 = vmatmul.mubr.f32.gmra.mxu1 %v6061_v18  ;;  %v5021_v15 = vmul.f32 -1.442695, %v8744_v39  ;;  %v3709_v46 = vld [vmem:[#allocation8 + $0x1d8] sm:$0xff]  ;;  %5376 = vrcp.f32 %v2835_v60  ;;  %v8745_v56 = vld [vmem:[#allocation55_spill] sm:$0xff] }
 0x1df   :  { %8742 = vst [vmem:[#allocation168_spill] sm:$0xff] %v6973_v31  ;;  %v6975_v16 = vpop.f32.mrf.mxu0  ;;  %v5349_v58 = vpop.eup %5348  ;;  %1957 = vmatprep.mubr.f32.mxu1 %v6062_v62  ;;  %v5117_v23 = vmul.f32 -1.442695, %v8745_v56  ;;  %3942 = vmatprep.subr.mxu0 %v3709_v46  ;;  %v2744_v45 = vadd.f32 1.0, %v5347_v11  ;;  %5378 = vpow2.f32 %v5020_v7  ;;  %v6063_v60 = vld [vmem:[#allocation3 + $0x60] sm:$0xff] }
 0x1e0   :  { %8743 = vst [vmem:[#allocation169_spill] sm:$0xff] %v6975_v16  ;;  %v5351_v9 = vpop.eup %5350  ;;  %v6979_v26 = vpop.f32.mrf.mxu1  ;;  %3943 = vmatpush2.msra.mxu0 %v3708_v14  ;;  %v2840_v22 = vadd.f32 1.0, %v5349_v58  ;;  %5380 = vpow2.f32 %v5116_v47  ;;  %v8755_v14 = vld [vmem:[#allocation56_spill] sm:$0xff] }
 0x1e1   :  { %8746 = vst [vmem:[#allocation170_spill] sm:$0xff] %v6979_v26  ;;  %v6981_v31 = vpop.f32.mrf.mxu0  ;;  %v5353_v16 = vpop.eup %5352  ;;  %v2745_v56 = vadd.f32 1.0, %v5351_v9  ;;  %5382 = vpow2.f32 %v5021_v15  ;;  %v6064_v26 = vld [vmem:[#allocation3 + $0x78] sm:$0xff]  ;;  %v8756_v9 = vld [vmem:[#allocation57_spill] sm:$0xff] }
 0x1e2   :  { %8747 = vst [vmem:[#allocation171_spill] sm:$0xff] %v6981_v31  ;;  %v6983_v18 = vpop.eup %5354  ;;  %v6985_v39 = vpop.f32.mrf.mxu1  ;;  %1958 = vmatmul.mubr.f32.gmra.mxu1 %v6063_v60  ;;  %v2841_v7 = vadd.f32 1.0, %v5353_v16  ;;  %5384 = vpow2.f32 %v5117_v23  ;;  %v3707_v60 = vld [vmem:[#allocation8 + $0x1c8] sm:$0xff]  ;;  %v5122_v15 = vmul.f32 -1.442695, %v8756_v9  ;;  %v6065_v23 = vld [vmem:[#allocation3 + $0x70] sm:$0xff] }
 0x1e3   :  { %8748 = vst [vmem:[#allocation172_spill] sm:$0xff] %v6983_v18  ;;  %8749 = vst [vmem:[#allocation173_spill] sm:$0xff] %v6985_v39  ;;  %v6987_v62 = vpop.f32.mrf.mxu0  ;;  %v6989_v46 = vpop.eup %5356  ;;  %1963 = vmatprep.mubr.f32.mxu1 %v6064_v26  ;;  %5386 = vrcp.f32 %v2744_v45  ;;  %3944 = vmatprep.subr.mxu0 %v3707_v60  ;;  %v3706_v26 = vld [vmem:[#allocation8 + $0x1c0] sm:$0xff]  ;;  %v6066_v45 = vld [vmem:[#allocation3 + $0x88] sm:$0xff] }
 0x1e4   :  { %8750 = vst [vmem:[#allocation174_spill] sm:$0xff] %v6987_v62  ;;  %8751 = vst [vmem:[#allocation175_spill] sm:$0xff] %v6989_v46  ;;  %v6991_v31 = vpop.eup %5358  ;;  %v6993_v11 = vpop.f32.mrf.mxu1  ;;  %v5026_v62 = vmul.f32 -1.442695, %v8755_v14  ;;  %5388 = vrcp.f32 %v2840_v22  ;;  %3945 = vmatpush2.msra.mxu0 %v3706_v26  ;;  %v8760_v22 = vld [vmem:[#allocation59_spill] sm:$0xff] }
 0x1e5   :  { %8752 = vst [vmem:[#allocation176_spill] sm:$0xff] %v6993_v11  ;;  %v6995_v58 = vpop.f32.mrf.mxu0  ;;  %v6997_v47 = vpop.eup %5360  ;;  %5390 = vrcp.f32 %v2745_v56  ;;  %v5123_v18 = vmul.f32 -1.442695, %v8760_v22  ;;  %v3704_v26 = vld [vmem:[#allocation8 + $0x1b0] sm:$0xff] }
 0x1e6   :  { %8753 = vst [vmem:[#allocation177_spill] sm:$0xff] %v6995_v58  ;;  %8754 = vst [vmem:[#allocation178_spill] sm:$0xff] %v6997_v47  ;;  %v5363_v39 = vpop.eup %5362  ;;  %v7001_v46 = vpop.f32.mrf.mxu1  ;;  %1964 = vmatmul.mubr.f32.gmra.mxu1 %v6065_v23  ;;  %v8759_v58 = vld [vmem:[#allocation58_spill] sm:$0xff]  ;;  %5392 = vrcp.f32 %v2841_v7  ;;  %v6067_v7 = vld [vmem:[#allocation3 + $0x80] sm:$0xff] }
 0x1e7   :  { %8757 = vst [vmem:[#allocation179_spill] sm:$0xff] %v7001_v46  ;;  %v7003_v16 = vpop.f32.mrf.mxu0  ;;  %v5365_v11 = vpop.eup %5364  ;;  %v5027_v47 = vmul.f32 -1.442695, %v8759_v58  ;;  %1969 = vmatprep.mubr.f32.mxu1 %v6066_v45  ;;  %v2750_v63 = vadd.f32 1.0, %v5363_v39  ;;  %5394 = vpow2.f32 %v5026_v62  ;;  %v6068_v39 = vld [vmem:[#allocation3 + $0x98] sm:$0xff] }
 0x1e8   :  { %8758 = vst [vmem:[#allocation180_spill] sm:$0xff] %v7003_v16  ;;  %v5367_v14 = vpop.eup %5366  ;;  %v7007_v9 = vpop.f32.mrf.mxu1  ;;  %v3705_v16 = vld [vmem:[#allocation8 + $0x1b8] sm:$0xff]  ;;  %v2846_v56 = vadd.f32 1.0, %v5365_v11  ;;  %5396 = vpow2.f32 %v5122_v15 }
 0x1e9   :  { %8761 = vst [vmem:[#allocation181_spill] sm:$0xff] %v7007_v9  ;;  %v7009_v60 = vpop.f32.mrf.mxu0  ;;  %v5369_v46 = vpop.eup %5368  ;;  %3946 = vmatprep.subr.mxu0 %v3705_v16  ;;  %v2751_v9 = vadd.f32 1.0, %v5367_v14  ;;  %5398 = vpow2.f32 %v5027_v47  ;;  %v5032_v16 = vmul.f32 -1.442695, %v6655_v55  ;;  %v3702_v47 = vld [vmem:[#allocation8 + $0x1a0] sm:$0xff] }
 0x1ea   :  { %8762 = vst [vmem:[#allocation182_spill] sm:$0xff] %v7009_v60  ;;  %v7011_v23 = vpop.eup %5370  ;;  %v7013_v58 = vpop.f32.mrf.mxu1  ;;  %1970 = vmatmul.mubr.f32.gmra.mxu1 %v6067_v7  ;;  %3947 = vmatpush2.msra.mxu0 %v3704_v26  ;;  %v2847_v60 = vadd.f32 1.0, %v5369_v46  ;;  %5400 = vpow2.f32 %v5123_v18  ;;  %v8771_v18 = vld [vmem:[#allocation62_spill] sm:$0xff] }
 0x1eb   :  { %8763 = vst [vmem:[#allocation183_spill] sm:$0xff] %v7011_v23  ;;  %8764 = vst [vmem:[#allocation184_spill] sm:$0xff] %v7013_v58  ;;  %v7015_v45 = vpop.f32.mrf.mxu0  ;;  %v7017_v22 = vpop.eup %5372  ;;  %1975 = vmatprep.mubr.f32.mxu1 %v6068_v39  ;;  %5402 = vrcp.f32 %v2750_v63  ;;  %v8769_v58 = vld [vmem:[#allocation61_spill] sm:$0xff]  ;;  %v6069_v39 = vld [vmem:[#allocation3 + $0x90] sm:$0xff] }
 0x1ec   :  { %8765 = vst [vmem:[#allocation185_spill] sm:$0xff] %v7015_v45  ;;  %8766 = vst [vmem:[#allocation186_spill] sm:$0xff] %v7017_v22  ;;  %v7019_v62 = vpop.eup %5374  ;;  %v7021_v11 = vpop.f32.mrf.mxu1  ;;  %v3703_v45 = vld [vmem:[#allocation8 + $0x1a8] sm:$0xff]  ;;  %5404 = vrcp.f32 %v2846_v56  ;;  %v5128_v14 = vmul.f32 -1.442695, %v8769_v58 }
 0x1ed   :  { %8767 = vst [vmem:[#allocation187_spill] sm:$0xff] %v7021_v11  ;;  %v7023_v15 = vpop.eup %5376  ;;  %3948 = vmatprep.subr.mxu0 %v3703_v45  ;;  %v7027_v26 = vpop.f32.mrf.mxu0  ;;  %5406 = vrcp.f32 %v2751_v9  ;;  %v5033_v11 = vmul.f32 -1.442695, %v8771_v18  ;;  %v6070_v22 = vld [vmem:[#allocation3 + $0xa8] sm:$0xff]  ;;  %v6071_v9 = vld [vmem:[#allocation3 + $0xa0] sm:$0xff] }
 0x1ee   :  { %8768 = vst [vmem:[#allocation188_spill] sm:$0xff] %v7023_v15  ;;  %v5379_v7 = vpop.eup %5378  ;;  %8770 = vst [vmem:[#allocation189_spill] sm:$0xff] %v7027_v26  ;;  %1976 = vmatmul.mubr.f32.gmra.mxu1 %v6069_v39  ;;  %3949 = vmatpush2.msra.mxu0 %v3702_v47  ;;  %5408 = vrcp.f32 %v2847_v60  ;;  %v8772_v15 = vld [vmem:[#allocation63_spill] sm:$0xff]  ;;  %v7031_v56 = vpop.f32.mrf.mxu1  ;;  %v6072_v60 = vld [vmem:[#allocation3 + $0xb8] sm:$0xff] }
 0x1ef   :  { %v5381_v46 = vpop.eup %5380  ;;  %1981 = vmatprep.mubr.f32.mxu1 %v6070_v22  ;;  %v5129_v55 = vmul.f32 -1.442695, %v8772_v15  ;;  %8773 = vst [vmem:[#allocation190_spill] sm:$0xff] %v7031_v56  ;;  %v2756_v45 = vadd.f32 1.0, %v5379_v7  ;;  %5410 = vpow2.f32 %v5032_v16  ;;  %v7035_v39 = vpop.f32.mrf.mxu0 }
 0x1f0   :  { %v5383_v63 = vpop.eup %5382  ;;  %v2852_v26 = vadd.f32 1.0, %v5381_v46  ;;  %5412 = vpow2.f32 %v5128_v14  ;;  %8775 = vst [vmem:[#allocation192_spill] sm:$0xff] %v7035_v39  ;;  %v7041_v7 = vpop.f32.mrf.mxu1  ;;  %v8780_v14 = vld [vmem:[#allocation64_spill] sm:$0xff] }
 0x1f1   :  { %v5385_v58 = vpop.eup %5384  ;;  %v2757_v22 = vadd.f32 1.0, %v5383_v63  ;;  %5414 = vpow2.f32 %v5033_v11  ;;  %8778 = vst [vmem:[#allocation195_spill] sm:$0xff] %v7041_v7  ;;  %v5038_v46 = vmul.f32 -1.442695, %v8780_v14  ;;  %v6073_v11 = vld [vmem:[#allocation3 + $0xb0] sm:$0xff] }
 0x1f2   :  { %v7033_v23 = vpop.eup %5386  ;;  %1982 = vmatmul.mubr.f32.gmra.mxu1 %v6071_v9  ;;  %v2853_v56 = vadd.f32 1.0, %v5385_v58  ;;  %5416 = vpow2.f32 %v5129_v55  ;;  %v8781_v9 = vld [vmem:[#allocation65_spill] sm:$0xff]  ;;  %v3701_v55 = vld [vmem:[#allocation8 + $0x198] sm:$0xff]  ;;  %v3700_v14 = vld [vmem:[#allocation8 + $0x190] sm:$0xff] }
 0x1f3   :  { %8774 = vst [vmem:[#allocation191_spill] sm:$0xff] %v7033_v23  ;;  %v7037_v47 = vpop.eup %5388  ;;  %1987 = vmatprep.mubr.f32.mxu1 %v6072_v60  ;;  %5418 = vrcp.f32 %v2756_v45  ;;  %v5134_v18 = vmul.f32 -1.442695, %v8781_v9  ;;  %v8783_v60 = vld [vmem:[#allocation66_spill] sm:$0xff]  ;;  %v8784_v45 = vld [vmem:[#allocation67_spill] sm:$0xff]  ;;  %3950 = vmatprep.subr.mxu0 %v3701_v55  ;;  %v6076_v55 = vld [vmem:[#allocation3 + $0xd8] sm:$0xff] }
 0x1f4   :  { %8776 = vst [vmem:[#allocation193_spill] sm:$0xff] %v7037_v47  ;;  %v7039_v15 = vpop.eup %5390  ;;  %5420 = vrcp.f32 %v2852_v26  ;;  %v7047_v47 = vpop.f32.mrf.mxu0  ;;  %v5039_v58 = vmul.f32 -1.442695, %v8783_v60  ;;  %v6074_v23 = vld [vmem:[#allocation3 + $0xc8] sm:$0xff]  ;;  %3951 = vmatpush2.msra.mxu0 %v3700_v14  ;;  %v6075_v60 = vld [vmem:[#allocation3 + $0xc0] sm:$0xff] }
 0x1f5   :  { %8777 = vst [vmem:[#allocation194_spill] sm:$0xff] %v7039_v15  ;;  %v7043_v16 = vpop.eup %5392  ;;  %8782 = vst [vmem:[#allocation197_spill] sm:$0xff] %v7047_v47  ;;  %5422 = vrcp.f32 %v2757_v22  ;;  %v7051_v26 = vpop.f32.mrf.mxu1 }
 0x1f6   :  { %8779 = vst [vmem:[#allocation196_spill] sm:$0xff] %v7043_v16  ;;  %v5395_v39 = vpop.eup %5394  ;;  %1988 = vmatmul.mubr.f32.gmra.mxu1 %v6073_v11  ;;  %5424 = vrcp.f32 %v2853_v56  ;;  %v5135_v16 = vmul.f32 -1.442695, %v8784_v45  ;;  %8785 = vst [vmem:[#allocation198_spill] sm:$0xff] %v7051_v26  ;;  %v7055_v47 = vpop.f32.mrf.mxu0 }
 0x1f7   :  { %v5397_v63 = vpop.eup %5396  ;;  %1993 = vmatprep.mubr.f32.mxu1 %v6074_v23  ;;  %v2762_v15 = vadd.f32 1.0, %v5395_v39  ;;  %5426 = vpow2.f32 %v5038_v46  ;;  %8786 = vst [vmem:[#allocation199_spill] sm:$0xff] %v7055_v47  ;;  %v7061_v39 = vpop.f32.mrf.mxu1 }
 0x1f8   :  { %v5399_v7 = vpop.eup %5398  ;;  %v2858_v22 = vadd.f32 1.0, %v5397_v63  ;;  %5428 = vpow2.f32 %v5134_v18  ;;  %8788 = vst [vmem:[#allocation201_spill] sm:$0xff] %v7061_v39  ;;  %v8790_v18 = vld [vmem:[#allocation68_spill] sm:$0xff]  ;;  %v3699_v63 = vld [vmem:[#allocation8 + $0x188] sm:$0xff] }
 0x1f9   :  { %v5401_v9 = vpop.eup %5400  ;;  %v2763_v56 = vadd.f32 1.0, %v5399_v7  ;;  %5430 = vpow2.f32 %v5039_v58  ;;  %v5044_v46 = vmul.f32 -1.442695, %v8790_v18  ;;  %3952 = vmatprep.subr.mxu0 %v3699_v63  ;;  %v3698_v7 = vld [vmem:[#allocation8 + $0x180] sm:$0xff]  ;;  %v7067_v58 = vpop.f32.mrf.mxu0  ;;  %v6078_v39 = vld [vmem:[#allocation3 + $0xe8] sm:$0xff] }
 0x1fa   :  { %v7053_v11 = vpop.eup %5402  ;;  %1994 = vmatmul.mubr.f32.gmra.mxu1 %v6075_v60  ;;  %v2859_v26 = vadd.f32 1.0, %v5401_v9  ;;  %5432 = vpow2.f32 %v5135_v16  ;;  %v5140_v60 = vmul.f32 -1.442695, %v6673_v17  ;;  %8791 = vst [vmem:[#allocation203_spill] sm:$0xff] %v7067_v58  ;;  %v5045_v16 = vmul.f32 -1.442695, %v6677_v34  ;;  %3953 = vmatpush2.msra.mxu0 %v3698_v7 }
 0x1fb   :  { %v7057_v23 = vpop.eup %5404  ;;  %1999 = vmatprep.mubr.f32.mxu1 %v6076_v55  ;;  %5434 = vrcp.f32 %v2762_v15  ;;  %v6077_v55 = vld [vmem:[#allocation3 + $0xd0] sm:$0xff]  ;;  %v7075_v18 = vpop.f32.mrf.mxu0  ;;  %v6079_v7 = vld [vmem:[#allocation3 + $0xe0] sm:$0xff] }
 0x1fc   :  { %8787 = vst [vmem:[#allocation200_spill] sm:$0xff] %v7057_v23  ;;  %v7059_v45 = vpop.eup %5406  ;;  %5436 = vrcp.f32 %v2858_v22  ;;  %v5141_v23 = vmul.f32 -1.442695, %v6679_v57  ;;  %v7071_v22 = vpop.f32.mrf.mxu1  ;;  %8793 = vst [vmem:[#allocation205_spill] sm:$0xff] %v7075_v18  ;;  %v6082_v18 = vld [vmem:[#allocation3 + $0x108] sm:$0xff] }
 0x1fd   :  { %v7063_v14 = vpop.eup %5408  ;;  %5438 = vrcp.f32 %v2763_v56  ;;  %8792 = vst [vmem:[#allocation204_spill] sm:$0xff] %v7071_v22  ;;  %v3696_v56 = vld [vmem:[#allocation8 + $0x170] sm:$0xff]  ;;  %v6080_v22 = vld [vmem:[#allocation3 + $0xf8] sm:$0xff] }
 0x1fe   :  { %8789 = vst [vmem:[#allocation202_spill] sm:$0xff] %v7063_v14  ;;  %v5411_v47 = vpop.eup %5410  ;;  %2000 = vmatmul.mubr.f32.gmra.mxu1 %v6077_v55  ;;  %5440 = vrcp.f32 %v2859_v26  ;;  %v3697_v14 = vld [vmem:[#allocation8 + $0x178] sm:$0xff]  ;;  %v7081_v57 = vpop.f32.mrf.mxu1 }
 0x1ff   :  { %v5413_v9 = vpop.eup %5412  ;;  %2005 = vmatprep.mubr.f32.mxu1 %v6078_v39  ;;  %v2768_v63 = vadd.f32 1.0, %v5411_v47  ;;  %5442 = vpow2.f32 %v5044_v46  ;;  %3954 = vmatprep.subr.mxu0 %v3697_v14  ;;  %8795 = vst [vmem:[#allocation207_spill] sm:$0xff] %v7081_v57  ;;  %v4956_v14 = vmul.f32 -1.442695, %v6685_v38  ;;  %v4959_v57 = vmul.f32 -1.442695, %v6695_v43 }
 0x200   :  { %v5415_v15 = vpop.eup %5414  ;;  %v2864_v55 = vadd.f32 1.0, %v5413_v9  ;;  %5444 = vpow2.f32 %v5140_v60  ;;  %3955 = vmatpush2.msra.mxu0 %v3696_v56  ;;  %v3695_v9 = vld [vmem:[#allocation8 + $0x168] sm:$0xff]  ;;  %v7087_v56 = vpop.f32.mrf.mxu0 }
 0x201   :  { %v5417_v17 = vpop.eup %5416  ;;  %v2769_v26 = vadd.f32 1.0, %v5415_v15  ;;  %5446 = vpow2.f32 %v5045_v16  ;;  %v4958_v15 = vmul.f32 -1.442695, %v6687_v29  ;;  %3956 = vmatprep.subr.mxu0 %v3695_v9  ;;  %v3694_v16 = vld [vmem:[#allocation8 + $0x160] sm:$0xff]  ;;  %8797 = vst [vmem:[#allocation209_spill] sm:$0xff] %v7087_v56 }
 0x202   :  { %v7073_v58 = vpop.eup %5418  ;;  %2006 = vmatmul.mubr.f32.gmra.mxu1 %v6079_v7  ;;  %v2865_v46 = vadd.f32 1.0, %v5417_v17  ;;  %5448 = vpow2.f32 %v5141_v23  ;;  %v4957_v23 = vmul.f32 -1.442695, %v6693_v20  ;;  %3957 = vmatpush2.msra.mxu0 %v3694_v16 }
 0x203   :  { %v7077_v39 = vpop.eup %5420  ;;  %2011 = vmatprep.mubr.f32.mxu1 %v6080_v22  ;;  %5450 = vrcp.f32 %v2768_v63  ;;  %v6081_v22 = vld [vmem:[#allocation3 + $0xf0] sm:$0xff] }
 0x204   :  { %8794 = vst [vmem:[#allocation206_spill] sm:$0xff] %v7077_v39  ;;  %v7079_v47 = vpop.eup %5422  ;;  %5452 = vrcp.f32 %v2864_v55  ;;  %v7091_v55 = vpop.f32.mrf.mxu1 }
 0x205   :  { %v7083_v60 = vpop.eup %5424  ;;  %5454 = vrcp.f32 %v2769_v26  ;;  %8798 = vst [vmem:[#allocation210_spill] sm:$0xff] %v7091_v55  ;;  %v6083_v26 = vld [vmem:[#allocation3 + $0x100] sm:$0xff] }
 0x206   :  { %8796 = vst [vmem:[#allocation208_spill] sm:$0xff] %v7083_v60  ;;  %v5427_v7 = vpop.eup %5426  ;;  %2012 = vmatmul.mubr.f32.gmra.mxu1 %v6081_v22  ;;  %5456 = vrcp.f32 %v2865_v46  ;;  %v7095_v22 = vpop.f32.mrf.mxu0  ;;  %v6084_v46 = vld [vmem:[#allocation3 + $0x118] sm:$0xff]  ;;  %v6086_v60 = vld [vmem:[#allocation3 + $0x128] sm:$0xff] }
 0x207   :  { %v5429_v17 = vpop.eup %5428  ;;  %2017 = vmatprep.mubr.f32.mxu1 %v6082_v18  ;;  %v2774_v9 = vadd.f32 1.0, %v5427_v7  ;;  %5458 = vpow2.f32 %v4956_v14  ;;  %8799 = vst [vmem:[#allocation211_spill] sm:$0xff] %v7095_v22  ;;  %v4962_v18 = vmul.f32 -1.442695, %v6699_v50  ;;  %v4964_v14 = vmul.f32 -1.442695, %v6701_v44  ;;  %v7103_v7 = vpop.f32.mrf.mxu1 }
 0x208   :  { %v5431_v63 = vpop.eup %5430  ;;  %v2870_v56 = vadd.f32 1.0, %v5429_v17  ;;  %5460 = vpow2.f32 %v4958_v15  ;;  %8801 = vst [vmem:[#allocation213_spill] sm:$0xff] %v7103_v7  ;;  %v7105_v17 = vpop.f32.mrf.mxu0  ;;  %v3693_v44 = vld [vmem:[#allocation8 + $0x158] sm:$0xff] }
 0x209   :  { %v5433_v29 = vpop.eup %5432  ;;  %5462 = vpow2.f32 %v4957_v23  ;;  %8802 = vst [vmem:[#allocation214_spill] sm:$0xff] %v7105_v17  ;;  %v7109_v55 = vpop.f32.mrf.mxu1  ;;  %v4965_v17 = vmul.f32 -1.442695, %v6711_v36  ;;  %3958 = vmatprep.subr.mxu0 %v3693_v44  ;;  %v6088_v44 = vld [vmem:[#allocation3 + $0x138] sm:$0xff] }
 0x20a   :  { %v7093_v39 = vpop.eup %5434  ;;  %2018 = vmatmul.mubr.f32.gmra.mxu1 %v6083_v26  ;;  %5464 = vpow2.f32 %v4959_v57  ;;  %v2775_v26 = vadd.f32 1.0, %v5431_v63  ;;  %v2871_v23 = vadd.f32 1.0, %v5433_v29  ;;  %8804 = vst [vmem:[#allocation216_spill] sm:$0xff] %v7109_v55  ;;  %v4963_v57 = vmul.f32 -1.442695, %v6709_v25  ;;  %v3692_v63 = vld [vmem:[#allocation8 + $0x150] sm:$0xff] }
 0x20b   :  { %v7097_v16 = vpop.eup %5436  ;;  %2023 = vmatprep.mubr.f32.mxu1 %v6084_v46  ;;  %5466 = vrcp.f32 %v2774_v9  ;;  %v7113_v9 = vpop.f32.mrf.mxu0  ;;  %3959 = vmatpush2.msra.mxu0 %v3692_v63 }
 0x20c   :  { %8800 = vst [vmem:[#allocation212_spill] sm:$0xff] %v7097_v16  ;;  %v7100_v43 = vpop.eup %5438  ;;  %5468 = vrcp.f32 %v2870_v56  ;;  %v6085_v16 = vld [vmem:[#allocation3 + $0x110] sm:$0xff]  ;;  %8805 = vst [vmem:[#allocation217_spill] sm:$0xff] %v7113_v9  ;;  %v7117_v55 = vpop.f32.mrf.mxu1 }
 0x20d   :  { %v7107_v15 = vpop.eup %5440  ;;  %5470 = vpow2.f32 %v4962_v18  ;;  %8806 = vst [vmem:[#allocation218_spill] sm:$0xff] %v7117_v55  ;;  %v8811_v55 = vld [vmem:[#allocation81_spill] sm:$0xff] }
 0x20e   :  { %8803 = vst [vmem:[#allocation215_spill] sm:$0xff] %v7107_v15  ;;  %v5443_v22 = vpop.eup %5442  ;;  %2024 = vmatmul.mubr.f32.gmra.mxu1 %v6085_v16  ;;  %5472 = vpow2.f32 %v4964_v14  ;;  %v6087_v15 = vld [vmem:[#allocation3 + $0x120] sm:$0xff] }
 0x20f   :  { %v5445_v46 = vpop.eup %5444  ;;  %2029 = vmatprep.mubr.f32.mxu1 %v6086_v60  ;;  %5474 = vrcp.f32 %v2775_v26  ;;  %v2780_v56 = vadd.f32 1.0, %v5443_v22  ;;  %v7123_v22 = vpop.f32.mrf.mxu0 }
 0x210   :  { %v5447_v7 = vpop.eup %5446  ;;  %5476 = vrcp.f32 %v2871_v23  ;;  %v2876_v18 = vadd.f32 1.0, %v5445_v46  ;;  %8808 = vst [vmem:[#allocation220_spill] sm:$0xff] %v7123_v22  ;;  %v4968_v23 = vmul.f32 -1.442695, %v6713_v8  ;;  %v3691_v46 = vld [vmem:[#allocation8 + $0x148] sm:$0xff] }
 0x211   :  { %v5449_v29 = vpop.eup %5448  ;;  %v2781_v14 = vadd.f32 1.0, %v5447_v7  ;;  %5478 = vpow2.f32 %v4963_v57  ;;  %3960 = vmatprep.subr.mxu0 %v3691_v46  ;;  %v3690_v7 = vld [vmem:[#allocation8 + $0x140] sm:$0xff]  ;;  %v7129_v57 = vpop.f32.mrf.mxu1  ;;  %v6090_v22 = vld [vmem:[#allocation3 + $0x148] sm:$0xff] }
 0x212   :  { %v7115_v16 = vpop.eup %5450  ;;  %2030 = vmatmul.mubr.f32.gmra.mxu1 %v6087_v15  ;;  %v2877_v9 = vadd.f32 1.0, %v5449_v29  ;;  %5480 = vpow2.f32 %v4965_v17  ;;  %v4970_v15 = vmul.f32 -1.442695, %v6715_v53  ;;  %8810 = vst [vmem:[#allocation222_spill] sm:$0xff] %v7129_v57  ;;  %v4969_v17 = vmul.f32 -1.442695, %v6721_v35  ;;  %3961 = vmatpush2.msra.mxu0 %v3690_v7 }
 0x213   :  { %v7119_v60 = vpop.eup %5452  ;;  %2035 = vmatprep.mubr.f32.mxu1 %v6088_v44  ;;  %5482 = vrcp.f32 %v2780_v56  ;;  %v6089_v44 = vld [vmem:[#allocation3 + $0x130] sm:$0xff]  ;;  %v7137_v8 = vpop.f32.mrf.mxu1  ;;  %v6091_v7 = vld [vmem:[#allocation3 + $0x140] sm:$0xff]  ;;  %v3687_v35 = vld [vmem:[#allocation8 + $0x128] sm:$0xff] }
 0x214   :  { %8807 = vst [vmem:[#allocation219_spill] sm:$0xff] %v7119_v60  ;;  %v7121_v36 = vpop.eup %5454  ;;  %5484 = vrcp.f32 %v2876_v18  ;;  %v4971_v60 = vmul.f32 -1.442695, %v8811_v55  ;;  %v7133_v18 = vpop.f32.mrf.mxu0  ;;  %8813 = vst [vmem:[#allocation224_spill] sm:$0xff] %v7137_v8 }
 0x215   :  { %v7125_v26 = vpop.eup %5456  ;;  %5486 = vrcp.f32 %v2781_v14  ;;  %8812 = vst [vmem:[#allocation223_spill] sm:$0xff] %v7133_v18  ;;  %v3688_v14 = vld [vmem:[#allocation8 + $0x130] sm:$0xff]  ;;  %v6092_v18 = vld [vmem:[#allocation3 + $0x158] sm:$0xff] }
 0x216   :  { %8809 = vst [vmem:[#allocation221_spill] sm:$0xff] %v7125_v26  ;;  %v5459_v63 = vpop.eup %5458  ;;  %2036 = vmatmul.mubr.f32.gmra.mxu1 %v6089_v44  ;;  %5488 = vrcp.f32 %v2877_v9  ;;  %v3689_v26 = vld [vmem:[#allocation8 + $0x138] sm:$0xff]  ;;  %v7141_v55 = vpop.f32.mrf.mxu0 }
 0x217   :  { %v5461_v29 = vpop.eup %5460  ;;  %2041 = vmatprep.mubr.f32.mxu1 %v6090_v22  ;;  %v2692_v46 = vadd.f32 1.0, %v5459_v63  ;;  %5490 = vpow2.f32 %v4968_v23  ;;  %3962 = vmatprep.subr.mxu0 %v3689_v26  ;;  %8815 = vst [vmem:[#allocation226_spill] sm:$0xff] %v7141_v55  ;;  %v8816_v26 = vld [vmem:[#allocation82_spill] sm:$0xff] }
 0x218   :  { %v5463_v56 = vpop.eup %5462  ;;  %v2694_v44 = vadd.f32 1.0, %v5461_v29  ;;  %5492 = vpow2.f32 %v4970_v15  ;;  %3963 = vmatpush2.msra.mxu0 %v3688_v14  ;;  %v4974_v15 = vmul.f32 -1.442695, %v8816_v26  ;;  %v7151_v26 = vpop.f32.mrf.mxu0 }
 0x219   :  { %v5465_v53 = vpop.eup %5464  ;;  %v2693_v9 = vadd.f32 1.0, %v5463_v56  ;;  %5494 = vpow2.f32 %v4969_v17  ;;  %3964 = vmatprep.subr.mxu0 %v3687_v35  ;;  %v3686_v17 = vld [vmem:[#allocation8 + $0x120] sm:$0xff]  ;;  %v7147_v56 = vpop.f32.mrf.mxu1  ;;  %8820 = vst [vmem:[#allocation229_spill] sm:$0xff] %v7151_v26  ;;  %v4975_v35 = vmul.f32 -1.442695, %v6737_v32 }
 0x21a   :  { %v7135_v57 = vpop.eup %5466  ;;  %2042 = vmatmul.mubr.f32.gmra.mxu1 %v6091_v7  ;;  %v2695_v23 = vadd.f32 1.0, %v5465_v53  ;;  %5496 = vpow2.f32 %v4971_v60  ;;  %v8817_v7 = vld [vmem:[#allocation83_spill] sm:$0xff]  ;;  %8818 = vst [vmem:[#allocation227_spill] sm:$0xff] %v7147_v56  ;;  %3965 = vmatpush2.msra.mxu0 %v3686_v17  ;;  %v8829_v32 = vld [vmem:[#allocation13_spill] sm:$0xff] }
 0x21b   :  { %v7139_v22 = vpop.eup %5468  ;;  %2047 = vmatprep.mubr.f32.mxu1 %v6092_v18  ;;  %5498 = vrcp.f32 %v2692_v46  ;;  %v6093_v18 = vld [vmem:[#allocation3 + $0x150] sm:$0xff]  ;;  %v6094_v46 = vld [vmem:[#allocation3 + $0x168] sm:$0xff]  ;;  %v3266_v50 = vmul.f32 %v6787_v2, %v8829_v32 }
 0x21c   :  { %8814 = vst [vmem:[#allocation225_spill] sm:$0xff] %v7139_v22  ;;  %v5471_v63 = vpop.eup %5470  ;;  %5500 = vrcp.f32 %v2694_v44  ;;  %v4976_v22 = vmul.f32 -1.442695, %v8817_v7 }
 0x21d   :  { %v5473_v29 = vpop.eup %5472  ;;  %5502 = vrcp.f32 %v2693_v9  ;;  %v2698_v60 = vadd.f32 1.0, %v5471_v63  ;;  %v6095_v9 = vld [vmem:[#allocation3 + $0x160] sm:$0xff] }
 0x21e   :  { %v7144_v8 = vpop.eup %5474  ;;  %2048 = vmatmul.mubr.f32.gmra.mxu1 %v6093_v18  ;;  %5504 = vrcp.f32 %v2695_v23  ;;  %v2700_v55 = vadd.f32 1.0, %v5473_v29  ;;  %v8822_v18 = vld [vmem:[#allocation85_spill] sm:$0xff]  ;;  %v6096_v29 = vld [vmem:[#allocation3 + $0x178] sm:$0xff] }
 0x21f   :  { %v7149_v53 = vpop.eup %5476  ;;  %2053 = vmatprep.mubr.f32.mxu1 %v6094_v46  ;;  %5506 = vpow2.f32 %v4974_v15  ;;  %v4977_v56 = vmul.f32 -1.442695, %v8822_v18  ;;  %v7163_v46 = vpop.f32.mrf.mxu0 }
 0x220   :  { %8819 = vst [vmem:[#allocation228_spill] sm:$0xff] %v7149_v53  ;;  %v5479_v14 = vpop.eup %5478  ;;  %5508 = vpow2.f32 %v4976_v22  ;;  %v7157_v53 = vpop.f32.mrf.mxu1  ;;  %8825 = vst [vmem:[#allocation233_spill] sm:$0xff] %v7163_v46  ;;  %v4980_v22 = vmul.f32 -1.442695, %v6741_v27  ;;  %v3743_v27 = vld [vmem:[#allocation8 + $0x2e8] sm:$0xff] }
 0x221   :  { %v5481_v44 = vpop.eup %5480  ;;  %8823 = vst [vmem:[#allocation231_spill] sm:$0xff] %v7157_v53  ;;  %5510 = vrcp.f32 %v2698_v60  ;;  %v2699_v23 = vadd.f32 1.0, %v5479_v14  ;;  %v3745_v53 = vld [vmem:[#allocation8 + $0x2f8] sm:$0xff]  ;;  %v7169_v14 = vpop.f32.mrf.mxu0 }
 0x222   :  { %v7154_v7 = vpop.eup %5482  ;;  %2054 = vmatmul.mubr.f32.gmra.mxu1 %v6095_v9  ;;  %5512 = vrcp.f32 %v2700_v55  ;;  %v2701_v15 = vadd.f32 1.0, %v5481_v44  ;;  %v4982_v9 = vmul.f32 -1.442695, %v6743_v41  ;;  %v1409_v60 = vpop.f32.mrf.mxu1  ;;  %8827 = vst [vmem:[#allocation235_spill] sm:$0xff] %v7169_v14  ;;  %4163 = vmatprep.subr.mxu1 %v3745_v53  ;;  %v8828_v44 = vld [vmem:[#allocation15_spill] sm:$0xff] }
 0x223   :  { %8821 = vst [vmem:[#allocation230_spill] sm:$0xff] %v7154_v7  ;;  %v7159_v63 = vpop.eup %5484  ;;  %2059 = vmatprep.mubr.f32.mxu1 %v6096_v29  ;;  %5514 = vpow2.f32 %v4975_v35  ;;  %v3744_v29 = vld [vmem:[#allocation8 + $0x2f0] sm:$0xff]  ;;  %v3267_v46 = vmul.f32 %v6795_v5, %v8828_v44  ;;  %v4981_v35 = vmul.f32 -1.442695, %v6749_v28  ;;  %v4983_v53 = vmul.f32 -1.442695, %v6751_v40  ;;  %v7177_v25 = vpop.f32.mrf.mxu0 }
 0x224   :  { %8824 = vst [vmem:[#allocation232_spill] sm:$0xff] %v7159_v63  ;;  %v7161_v17 = vpop.eup %5486  ;;  %5516 = vpow2.f32 %v4977_v56  ;;  %v6097_v63 = vld [vmem:[#allocation3 + $0x170] sm:$0xff]  ;;  %4164 = vmatpush1.msra.mxu1 %v3744_v29  ;;  %v6098_v56 = vld [vmem:[#allocation3 + $0x188] sm:$0xff]  ;;  %v1411_v14 = vpop.f32.mrf.mxu1  ;;  %v3742_v5 = vld [vmem:[#allocation8 + $0x2e0] sm:$0xff]  ;;  %v3458_v2 = vmul.f32 %v3266_v50, %v1409_v60 }
 0x225   :  { %v7165_v26 = vpop.eup %5488  ;;  %5518 = vrcp.f32 %v2699_v23  ;;  %4165 = vmatprep.subr.mxu1 %v3743_v27  ;;  %v3459_v29 = vmul.f32 %v3267_v46, %v1411_v14  ;;  %v3741_v28 = vld [vmem:[#allocation8 + $0x2d8] sm:$0xff]  ;;  %v7181_v40 = vpop.f32.mrf.mxu0  ;;  %v3740_v27 = vld [vmem:[#allocation8 + $0x2d0] sm:$0xff]  ;;  %v3739_v14 = vld [vmem:[#allocation8 + $0x2c8] sm:$0xff] }
 0x226   :  { %8826 = vst [vmem:[#allocation234_spill] sm:$0xff] %v7165_v26  ;;  %v5491_v18 = vpop.eup %5490  ;;  %2060 = vmatmul.mubr.f32.gmra.mxu1 %v6097_v63  ;;  %v3685_v26 = vld [vmem:[#allocation8 + $0x118] sm:$0xff]  ;;  %5520 = vrcp.f32 %v2701_v15  ;;  %v3684_v63 = vld [vmem:[#allocation8 + $0x110] sm:$0xff]  ;;  %v1415_v15 = vpop.f32.mrf.mxu1  ;;  %v8832_v50 = vld [vmem:[#allocation17_spill] sm:$0xff] }
 0x227   :  { %v5493_v55 = vpop.eup %5492  ;;  %2065 = vmatprep.mubr.f32.mxu1 %v6098_v56  ;;  %3966 = vmatprep.subr.mxu0 %v3685_v26  ;;  %v2704_v44 = vadd.f32 1.0, %v5491_v18  ;;  %5522 = vpow2.f32 %v4980_v22  ;;  %v3683_v56 = vld [vmem:[#allocation8 + $0x108] sm:$0xff]  ;;  %v3682_v26 = vld [vmem:[#allocation8 + $0x100] sm:$0xff]  ;;  %v8831_v18 = vld [vmem:[#allocation19_spill] sm:$0xff]  ;;  %v4986_v22 = vmul.f32 -1.442695, %v6755_v30  ;;  %v3272_v60 = vmul.f32 %v6815_v21, %v8832_v50 }
 0x228   :  { %v5495_v41 = vpop.eup %5494  ;;  %3967 = vmatpush2.msra.mxu0 %v3684_v63  ;;  %4166 = vmatpush1.msra.mxu1 %v3742_v5  ;;  %v2706_v32 = vadd.f32 1.0, %v5493_v55  ;;  %5524 = vpow2.f32 %v4982_v9  ;;  %v3273_v46 = vmul.f32 %v6823_v6, %v8831_v18  ;;  %v7192_v63 = vpop.f32.mrf.mxu0  ;;  %v3738_v5 = vld [vmem:[#allocation8 + $0x2c0] sm:$0xff] }
 0x229   :  { %v5497_v23 = vpop.eup %5496  ;;  %3968 = vmatprep.subr.mxu0 %v3683_v56  ;;  %4167 = vmatprep.subr.mxu1 %v3741_v28  ;;  %5526 = vpow2.f32 %v4981_v35  ;;  %v2705_v55 = vadd.f32 1.0, %v5495_v41  ;;  %v1417_v28 = vpop.f32.mrf.mxu1  ;;  %v4988_v35 = vmul.f32 -1.442695, %v6757_v61  ;;  %v3737_v56 = vld [vmem:[#allocation8 + $0x2b8] sm:$0xff]  ;;  %v3734_v61 = vld [vmem:[#allocation8 + $0x2a0] sm:$0xff] }
 0x22a   :  { %v7179_v7 = vpop.eup %5498  ;;  %3969 = vmatpush2.msra.mxu0 %v3682_v26  ;;  %3970 = vmatprep.mubr.f32.mxu0 %v3459_v29  ;;  %5528 = vpow2.f32 %v4983_v53  ;;  %v3465_v29 = vmul.f32 %v3273_v46, %v1417_v28  ;;  %v6099_v26 = vld [vmem:[#allocation3 + $0x180] sm:$0xff]  ;;  %v8834_v41 = vld [vmem:[#allocation92_spill] sm:$0xff]  ;;  %v3464_v53 = vmul.f32 %v3272_v60, %v1415_v15  ;;  %v7198_v50 = vpop.f32.mrf.mxu0  ;;  %v3735_v28 = vld [vmem:[#allocation8 + $0x2a8] sm:$0xff]  ;;  %v4989_v60 = vmul.f32 -1.442695, %v6765_v52 }
 0x22b   :  { %v7183_v38 = vpop.eup %5500  ;;  %4168 = vmatpush1.msra.mxu1 %v3740_v27  ;;  %3971 = vmatmul.mubr.f32.vlgmr.msra.gmra.mxu0 %v3458_v2  ;;  %5530 = vrcp.f32 %v2704_v44  ;;  %v4987_v21 = vmul.f32 -1.442695, %v8834_v41  ;;  %v1421_v27 = vpop.f32.mrf.mxu1  ;;  %v3736_v2 = vld [vmem:[#allocation8 + $0x2b0] sm:$0xff]  ;;  %v6102_v52 = vld [vmem:[#allocation3 + $0x1a8] sm:$0xff] }
 0x22c   :  { %8830 = vst [vmem:[#allocation15_spill] sm:$0xff] %v7183_v38  ;;  %v7188_v9 = vpop.eup %5502  ;;  %4169 = vmatprep.subr.mxu1 %v3739_v14  ;;  %2066 = vmatmul.mubr.f32.gmra.mxu1 %v6099_v26  ;;  %5532 = vrcp.f32 %v2706_v32  ;;  %v6100_v38 = vld [vmem:[#allocation3 + $0x198] sm:$0xff]  ;;  %v2707_v14 = vadd.f32 1.0, %v5497_v23  ;;  %v8836_v26 = vld [vmem:[#allocation21_spill] sm:$0xff] }
 0x22d   :  { %v7194_v6 = vpop.eup %5504  ;;  %4170 = vmatpush1.msra.mxu1 %v3738_v5  ;;  %2071 = vmatprep.mubr.f32.mxu1 %v6100_v38  ;;  %5534 = vpow2.f32 %v4986_v22  ;;  %v3278_v15 = vmul.f32 %v6843_v13, %v8836_v26  ;;  %v1423_v5 = vpop.f32.mrf.mxu1  ;;  %v4992_v13 = vmul.f32 -1.442695, %v6767_v48 }
 0x22e   :  { %8833 = vst [vmem:[#allocation13_spill] sm:$0xff] %v7194_v6  ;;  %v5507_v18 = vpop.eup %5506  ;;  %v8835_v6 = vld [vmem:[#allocation23_spill] sm:$0xff]  ;;  %4171 = vmatprep.subr.mxu1 %v3737_v56  ;;  %3976 = vmatprep.mubr.f32.mxu0 %v3465_v29  ;;  %5536 = vrcp.f32 %v2705_v55  ;;  %v7207_v38 = vpop.f32.mrf.mxu0 }
 0x22f   :  { %v5509_v44 = vpop.eup %5508  ;;  %v3279_v46 = vmul.f32 %v6851_v10, %v8835_v6  ;;  %4172 = vmatpush1.msra.mxu1 %v3736_v2  ;;  %3977 = vmatmul.mubr.f32.gmra.mxu0 %v3464_v53  ;;  %v2710_v23 = vadd.f32 1.0, %v5507_v18  ;;  %5538 = vpow2.f32 %v4988_v35  ;;  %v3733_v6 = vld [vmem:[#allocation8 + $0x298] sm:$0xff]  ;;  %v6101_v29 = vld [vmem:[#allocation3 + $0x190] sm:$0xff]  ;;  %v3470_v55 = vmul.f32 %v3278_v15, %v1421_v27  ;;  %v1427_v2 = vpop.f32.mrf.mxu1 }
 0x230   :  { %v7202_v32 = vpop.eup %5510  ;;  %4173 = vmatprep.subr.mxu1 %v3735_v28  ;;  %2072 = vmatmul.mubr.f32.gmra.mxu1 %v6101_v29  ;;  %5540 = vpow2.f32 %v4987_v21  ;;  %v7212_v26 = vpop.f32.mrf.mxu0  ;;  %v3732_v53 = vld [vmem:[#allocation8 + $0x290] sm:$0xff]  ;;  %v3731_v28 = vld [vmem:[#allocation8 + $0x288] sm:$0xff]  ;;  %v4994_v27 = vmul.f32 -1.442695, %v6769_v54  ;;  %v3730_v29 = vld [vmem:[#allocation8 + $0x280] sm:$0xff] }
 0x231   :  { %v7209_v10 = vpop.eup %5512  ;;  %v3471_v22 = vmul.f32 %v3279_v46, %v1423_v5  ;;  %4174 = vmatpush1.msra.mxu1 %v3734_v61  ;;  %2077 = vmatprep.mubr.f32.mxu1 %v6102_v52  ;;  %v8838_v18 = vld [vmem:[#allocation27_spill] sm:$0xff]  ;;  %5542 = vrcp.f32 %v2707_v14  ;;  %v2712_v46 = vadd.f32 1.0, %v5509_v44  ;;  %v8839_v5 = vld [vmem:[#allocation25_spill] sm:$0xff]  ;;  %v1429_v15 = vpop.f32.mrf.mxu1 }
 0x232   :  { %8837 = vst [vmem:[#allocation19_spill] sm:$0xff] %v7209_v10  ;;  %v5515_v56 = vpop.eup %5514  ;;  %v3285_v35 = vmul.f32 %v6879_v3, %v8838_v18  ;;  %4175 = vmatprep.subr.mxu1 %v3733_v6  ;;  %v3284_v61 = vmul.f32 %v6871_v59, %v8839_v5  ;;  %5544 = vpow2.f32 %v4989_v60  ;;  %v7221_v52 = vpop.f32.mrf.mxu0  ;;  %v6103_v6 = vld [vmem:[#allocation3 + $0x1a0] sm:$0xff]  ;;  %v3728_v54 = vld [vmem:[#allocation8 + $0x270] sm:$0xff] }
 0x233   :  { %v5517_v10 = vpop.eup %5516  ;;  %3982 = vmatprep.mubr.f32.mxu0 %v3471_v22  ;;  %4176 = vmatpush1.msra.mxu1 %v3732_v53  ;;  %5546 = vrcp.f32 %v2710_v23  ;;  %v2711_v44 = vadd.f32 1.0, %v5515_v56  ;;  %v3729_v22 = vld [vmem:[#allocation8 + $0x278] sm:$0xff]  ;;  %v1433_v53 = vpop.f32.mrf.mxu1 }
 0x234   :  { %v7216_v21 = vpop.eup %5518  ;;  %3983 = vmatmul.mubr.f32.gmra.mxu0 %v3470_v55  ;;  %v3477_v14 = vmul.f32 %v3285_v35, %v1429_v15  ;;  %4177 = vmatprep.subr.mxu1 %v3731_v28  ;;  %v2713_v59 = vadd.f32 1.0, %v5517_v10  ;;  %5548 = vpow2.f32 %v4992_v13  ;;  %v3476_v60 = vmul.f32 %v3284_v61, %v1427_v2  ;;  %v7225_v5 = vpop.f32.mrf.mxu0  ;;  %v6104_v55 = vld [vmem:[#allocation3 + $0x1b8] sm:$0xff]  ;;  %v3727_v28 = vld [vmem:[#allocation8 + $0x268] sm:$0xff]  ;;  %v8843_v13 = vld [vmem:[#allocation29_spill] sm:$0xff] }
 0x235   :  { %v7223_v3 = vpop.eup %5520  ;;  %2078 = vmatmul.mubr.f32.gmra.mxu1 %v6103_v6  ;;  %5550 = vrcp.f32 %v2712_v46  ;;  %v8842_v56 = vld [vmem:[#allocation96_spill] sm:$0xff]  ;;  %v3290_v2 = vmul.f32 %v6899_v4, %v8843_v13  ;;  %v8844_v61 = vld [vmem:[#allocation97_spill] sm:$0xff] }
 0x236   :  { %8840 = vst [vmem:[#allocation17_spill] sm:$0xff] %v7223_v3  ;;  %v5523_v18 = vpop.eup %5522  ;;  %4178 = vmatpush1.msra.mxu1 %v3730_v29  ;;  %2083 = vmatprep.mubr.f32.mxu1 %v6104_v55  ;;  %v8841_v3 = vld [vmem:[#allocation31_spill] sm:$0xff]  ;;  %v4993_v35 = vmul.f32 -1.442695, %v8842_v56  ;;  %5552 = vpow2.f32 %v4994_v27  ;;  %v4995_v15 = vmul.f32 -1.442695, %v8844_v61  ;;  %v1435_v29 = vpop.f32.mrf.mxu1 }
 0x237   :  { %v5525_v48 = vpop.eup %5524  ;;  %v3291_v23 = vmul.f32 %v6907_v37, %v8841_v3  ;;  %4179 = vmatprep.subr.mxu1 %v3729_v22  ;;  %3988 = vmatprep.mubr.f32.mxu0 %v3477_v14  ;;  %v7233_v6 = vpop.f32.mrf.mxu0  ;;  %v3726_v55 = vld [vmem:[#allocation8 + $0x260] sm:$0xff]  ;;  %5554 = vrcp.f32 %v2711_v44  ;;  %v2716_v46 = vadd.f32 1.0, %v5523_v18  ;;  %v3725_v14 = vld [vmem:[#allocation8 + $0x258] sm:$0xff]  ;;  %v6105_v22 = vld [vmem:[#allocation3 + $0x1b0] sm:$0xff]  ;;  %v3482_v27 = vmul.f32 %v3290_v2, %v1433_v53 }
 0x238   :  { %v5527_v10 = vpop.eup %5526  ;;  %4180 = vmatpush1.msra.mxu1 %v3728_v54  ;;  %3989 = vmatmul.mubr.f32.gmra.mxu0 %v3476_v60  ;;  %5556 = vrcp.f32 %v2713_v59  ;;  %v2718_v4 = vadd.f32 1.0, %v5525_v48  ;;  %v1439_v54 = vpop.f32.mrf.mxu1  ;;  %v3724_v61 = vld [vmem:[#allocation8 + $0x250] sm:$0xff]  ;;  %v6106_v60 = vld [vmem:[#allocation3 + $0x1c8] sm:$0xff]  ;;  %v3297_v44 = vmul.f32 %v6935_v42, %v6595_v0  ;;  %v3296_v48 = vmul.f32 %v6927_v24, %v6591_v49 }
 0x239   :  { %v5529_v37 = vpop.eup %5528  ;;  %v3483_v3 = vmul.f32 %v3291_v23, %v1435_v29  ;;  %4181 = vmatprep.subr.mxu1 %v3727_v28  ;;  %2084 = vmatmul.mubr.f32.gmra.mxu1 %v6105_v22  ;;  %v7237_v13 = vpop.f32.mrf.mxu0  ;;  %v2717_v18 = vadd.f32 1.0, %v5527_v10  ;;  %5558 = vpow2.f32 %v4993_v35  ;;  %v3723_v23 = vld [vmem:[#allocation8 + $0x248] sm:$0xff]  ;;  %v3722_v29 = vld [vmem:[#allocation8 + $0x240] sm:$0xff]  ;;  %v3721_v10 = vld [vmem:[#allocation8 + $0x238] sm:$0xff] }
 0x23a   :  { %v7235_v56 = vpop.eup %5530  ;;  %4182 = vmatpush1.msra.mxu1 %v3726_v55  ;;  %8845 = vst [vmem:[#allocation92_spill] sm:$0xff] %v7237_v13  ;;  %2089 = vmatprep.mubr.f32.mxu1 %v6106_v60  ;;  %v2719_v53 = vadd.f32 1.0, %v5529_v37  ;;  %5560 = vpow2.f32 %v4995_v15  ;;  %v1441_v28 = vpop.f32.mrf.mxu1  ;;  %v8848_v0 = vld [vmem:[#allocation98_spill] sm:$0xff]  ;;  %v8849_v49 = vld [vmem:[#allocation99_spill] sm:$0xff]  ;;  %v3303_v60 = vmul.f32 %v6963_v1, %v6603_v33 }
 0x23b   :  { %v7239_v30 = vpop.eup %5532  ;;  %4183 = vmatprep.subr.mxu1 %v3725_v14  ;;  %3994 = vmatprep.mubr.f32.mxu0 %v3483_v3  ;;  %v7245_v2 = vpop.f32.mrf.mxu0  ;;  %5562 = vrcp.f32 %v2716_v46  ;;  %v4998_v42 = vmul.f32 -1.442695, %v8848_v0  ;;  %v3489_v35 = vmul.f32 %v3297_v44, %v1441_v28  ;;  %v6107_v3 = vld [vmem:[#allocation3 + $0x1c0] sm:$0xff]  ;;  %v5000_v24 = vmul.f32 -1.442695, %v8849_v49  ;;  %v3720_v22 = vld [vmem:[#allocation8 + $0x230] sm:$0xff] }
 0x23c   :  { %8846 = vst [vmem:[#allocation23_spill] sm:$0xff] %v7239_v30  ;;  %v5535_v59 = vpop.eup %5534  ;;  %4184 = vmatpush1.msra.mxu1 %v3724_v61  ;;  %8847 = vst [vmem:[#allocation21_spill] sm:$0xff] %v7245_v2  ;;  %3995 = vmatmul.mubr.f32.gmra.mxu0 %v3482_v27  ;;  %5564 = vrcp.f32 %v2718_v4  ;;  %v3488_v61 = vmul.f32 %v3296_v48, %v1439_v54  ;;  %v1445_v15 = vpop.f32.mrf.mxu1  ;;  %v6108_v27 = vld [vmem:[#allocation3 + $0x1d8] sm:$0xff]  ;;  %v3302_v54 = vmul.f32 %v6955_v19, %v6599_v12  ;;  %v3716_v49 = vld [vmem:[#allocation8 + $0x210] sm:$0xff] }
 0x23d   :  { %v7247_v55 = vpop.eup %5536  ;;  %4185 = vmatprep.subr.mxu1 %v3723_v23  ;;  %2090 = vmatmul.mubr.f32.gmra.mxu1 %v6107_v3  ;;  %v7251_v37 = vpop.f32.mrf.mxu0  ;;  %5566 = vrcp.f32 %v2717_v18  ;;  %v2722_v44 = vadd.f32 1.0, %v5535_v59  ;;  %v3719_v23 = vld [vmem:[#allocation8 + $0x228] sm:$0xff]  ;;  %v8852_v48 = vld [vmem:[#allocation100_spill] sm:$0xff] }
 0x23e   :  { %v5539_v14 = vpop.eup %5538  ;;  %4186 = vmatpush1.msra.mxu1 %v3722_v29  ;;  %8850 = vst [vmem:[#allocation27_spill] sm:$0xff] %v7251_v37  ;;  %2095 = vmatprep.mubr.f32.mxu1 %v6108_v27  ;;  %5568 = vrcp.f32 %v2719_v53  ;;  %v4999_v28 = vmul.f32 -1.442695, %v8852_v48  ;;  %v1447_v29 = vpop.f32.mrf.mxu1  ;;  %v3718_v27 = vld [vmem:[#allocation8 + $0x220] sm:$0xff]  ;;  %v3717_v59 = vld [vmem:[#allocation8 + $0x218] sm:$0xff]  ;;  %v3494_v19 = vmul.f32 %v3302_v54, %v1445_v15  ;;  %v8879_v48 = vld [vmem:[#allocation110_spill] sm:$0xff] }
 0x23f   :  { %v5541_v46 = vpop.eup %5540  ;;  %4187 = vmatprep.subr.mxu1 %v3721_v10  ;;  %4000 = vmatprep.mubr.f32.mxu0 %v3489_v35  ;;  %v7260_v3 = vpop.f32.mrf.mxu0  ;;  %v2724_v1 = vadd.f32 1.0, %v5539_v14  ;;  %5570 = vpow2.f32 %v4998_v42  ;;  %v3495_v18 = vmul.f32 %v3303_v60, %v1447_v29  ;;  %v6109_v35 = vld [vmem:[#allocation3 + $0x1d0] sm:$0xff]  ;;  %v3309_v42 = vmul.f32 %v6991_v31, %v6611_v51  ;;  %v8855_v14 = vld [vmem:[#allocation101_spill] sm:$0xff]  ;;  %v8858_v15 = vld [vmem:[#allocation172_spill] sm:$0xff] }
 0x240   :  { %v7255_v4 = vpop.eup %5542  ;;  %4188 = vmatpush1.msra.mxu1 %v3720_v22  ;;  %8853 = vst [vmem:[#allocation31_spill] sm:$0xff] %v7260_v3  ;;  %4001 = vmatmul.mubr.f32.gmra.mxu0 %v3488_v61  ;;  %v2723_v12 = vadd.f32 1.0, %v5541_v46  ;;  %5572 = vpow2.f32 %v5000_v24  ;;  %v1451_v53 = vpop.f32.mrf.mxu1  ;;  %v6110_v61 = vld [vmem:[#allocation3 + $0x1e8] sm:$0xff]  ;;  %v5001_v60 = vmul.f32 -1.442695, %v8855_v14  ;;  %v8857_v24 = vld [vmem:[#allocation37_spill] sm:$0xff] }
 0x241   :  { %8851 = vst [vmem:[#allocation25_spill] sm:$0xff] %v7255_v4  ;;  %v5545_v33 = vpop.eup %5544  ;;  %4189 = vmatprep.subr.mxu1 %v3719_v23  ;;  %2096 = vmatmul.mubr.f32.gmra.mxu1 %v6109_v35  ;;  %v7264_v22 = vpop.f32.mrf.mxu0  ;;  %5574 = vrcp.f32 %v2722_v44  ;;  %v3715_v23 = vld [vmem:[#allocation8 + $0x208] sm:$0xff]  ;;  %v3308_v54 = vmul.f32 %v8858_v15, %v8857_v24  ;;  %v5011_v3 = vmul.f32 -1.442695, %v8879_v48 }
 0x242   :  { %v7262_v10 = vpop.eup %5546  ;;  %4190 = vmatpush1.msra.mxu1 %v3718_v27  ;;  %8854 = vst [vmem:[#allocation29_spill] sm:$0xff] %v7264_v22  ;;  %2101 = vmatprep.mubr.f32.mxu1 %v6110_v61  ;;  %v2725_v29 = vadd.f32 1.0, %v5545_v33  ;;  %5576 = vpow2.f32 %v4999_v28  ;;  %v1453_v27 = vpop.f32.mrf.mxu1  ;;  %v3714_v61 = vld [vmem:[#allocation8 + $0x200] sm:$0xff]  ;;  %v8860_v31 = vld [vmem:[#allocation102_spill] sm:$0xff] }
 0x243   :  { %v5549_v30 = vpop.eup %5548  ;;  %4191 = vmatprep.subr.mxu1 %v3717_v59  ;;  %4006 = vmatprep.mubr.f32.mxu0 %v3495_v18  ;;  %v7273_v35 = vpop.f32.mrf.mxu0  ;;  %5578 = vrcp.f32 %v2724_v1  ;;  %v5004_v44 = vmul.f32 -1.442695, %v8860_v31  ;;  %v3809_v59 = vld [vmem:[#allocation8 + $0x4f8] sm:$0xff]  ;;  %v3808_v18 = vld [vmem:[#allocation8 + $0x4f0] sm:$0xff]  ;;  %v3807_v14 = vld [vmem:[#allocation8 + $0x4e8] sm:$0xff]  ;;  %v3501_v4 = vmul.f32 %v3309_v42, %v1453_v27  ;;  %v3500_v33 = vmul.f32 %v3308_v54, %v1451_v53 }
 0x244   :  { %v7269_v46 = vpop.eup %5550  ;;  %4192 = vmatpush1.msra.mxu1 %v3716_v49  ;;  %8859 = vst [vmem:[#allocation37_spill] sm:$0xff] %v7273_v35  ;;  %4007 = vmatmul.mubr.f32.gmra.mxu0 %v3494_v19  ;;  %5580 = vrcp.f32 %v2723_v12  ;;  %v2728_v49 = vadd.f32 1.0, %v5549_v30  ;;  %v3806_v28 = vld [vmem:[#allocation8 + $0x4e0] sm:$0xff]  ;;  %v7278_v19 = vpop.f32.mrf.mxu1  ;;  %v8863_v31 = vld [vmem:[#allocation103_spill] sm:$0xff] }
 0x245   :  { %8856 = vst [vmem:[#allocation236_spill] sm:$0xff] %v7269_v46  ;;  %v5553_v51 = vpop.eup %5552  ;;  %4193 = vmatprep.subr.mxu1 %v3715_v23  ;;  %v6111_v46 = vld [vmem:[#allocation3 + $0x1e0] sm:$0xff]  ;;  %4420 = vmatprep.subr.mxu0 %v3809_v59  ;;  %v7280_v1 = vpop.f32.mrf.mxu0  ;;  %5582 = vpow2.f32 %v5001_v60  ;;  %v5006_v42 = vmul.f32 -1.442695, %v8863_v31  ;;  %v3805_v23 = vld [vmem:[#allocation8 + $0x4d8] sm:$0xff]  ;;  %v3804_v30 = vld [vmem:[#allocation8 + $0x4d0] sm:$0xff] }
 0x246   :  { %2102 = vmatmul.mubr.f32.gmra.mxu1 %v6111_v46  ;;  %v7276_v24 = vpop.eup %5554  ;;  %8861 = vst [vmem:[#allocation172_spill] sm:$0xff] %v7280_v1  ;;  %4421 = vmatpush1.msra.mxu0 %v3808_v18  ;;  %5584 = vrcp.f32 %v2725_v29  ;;  %v2730_v12 = vadd.f32 1.0, %v5553_v51  ;;  %v1459_v27 = vpop.f32.mrf.mxu1  ;;  %v8866_v60 = vld [vmem:[#allocation105_spill] sm:$0xff]  ;;  %v3803_v18 = vld [vmem:[#allocation8 + $0x4c8] sm:$0xff]  ;;  %v3777_v31 = vld [vmem:[#allocation8 + $0x3f8] sm:$0xff] }
 0x247   :  { %4194 = vmatpush1.msra.mxu1 %v3714_v61  ;;  %v7282_v15 = vpop.eup %5556  ;;  %4012 = vmatprep.mubr.f32.mxu0 %v3501_v4  ;;  %v7285_v53 = vpop.f32.mrf.mxu0  ;;  %v8865_v61 = vld [vmem:[#allocation42_spill] sm:$0xff]  ;;  %5586 = vpow2.f32 %v5004_v44  ;;  %v6112_v4 = vld [vmem:[#allocation3 + $0x1f8] sm:$0xff]  ;;  %v3802_v1 = vld [vmem:[#allocation8 + $0x4c0] sm:$0xff] }
 0x248   :  { %8862 = vst [vmem:[#allocation237_spill] sm:$0xff] %v7282_v15  ;;  %v5559_v46 = vpop.eup %5558  ;;  %4422 = vmatprep.subr.mxu0 %v3807_v14  ;;  %8864 = vst [vmem:[#allocation238_spill] sm:$0xff] %v7285_v53  ;;  %4013 = vmatmul.mubr.f32.gmra.mxu0 %v3500_v33  ;;  %v3315_v59 = vmul.f32 %v7019_v62, %v8865_v61  ;;  %v5005_v15 = vmul.f32 -1.442695, %v8866_v60  ;;  %5588 = vrcp.f32 %v2728_v49  ;;  %v8867_v14 = vld [vmem:[#allocation106_spill] sm:$0xff]  ;;  %v3776_v33 = vld [vmem:[#allocation8 + $0x3f0] sm:$0xff]  ;;  %v7293_v22 = vpop.f32.mrf.mxu1 }
 0x249   :  { %v5561_v54 = vpop.eup %5560  ;;  %4423 = vmatpush1.msra.mxu0 %v3806_v28  ;;  %2107 = vmatprep.mubr.f32.mxu1 %v6112_v4  ;;  %v5007_v51 = vmul.f32 -1.442695, %v8867_v14  ;;  %v3775_v53 = vld [vmem:[#allocation8 + $0x3e8] sm:$0xff]  ;;  %v7295_v62 = vpop.f32.mrf.mxu0  ;;  %v2729_v28 = vadd.f32 1.0, %v5559_v46  ;;  %5590 = vpow2.f32 %v5006_v42  ;;  %v3801_v61 = vld [vmem:[#allocation8 + $0x4b8] sm:$0xff]  ;;  %v3774_v49 = vld [vmem:[#allocation8 + $0x3e0] sm:$0xff] }
 0x24a   :  { %v7290_v29 = vpop.eup %5562  ;;  %4424 = vmatprep.subr.mxu0 %v3805_v23  ;;  %4195 = vmatprep.subr.mxu1 %v3777_v31  ;;  %8868 = vst [vmem:[#allocation42_spill] sm:$0xff] %v7295_v62  ;;  %v3507_v4 = vmul.f32 %v3315_v59, %v1459_v27  ;;  %v3773_v60 = vld [vmem:[#allocation8 + $0x3d8] sm:$0xff]  ;;  %5592 = vrcp.f32 %v2730_v12  ;;  %v2731_v31 = vadd.f32 1.0, %v5561_v54  ;;  %v3800_v23 = vld [vmem:[#allocation8 + $0x4b0] sm:$0xff]  ;;  %v1465_v0 = vpop.f32.mrf.mxu1  ;;  %v8875_v54 = vld [vmem:[#allocation109_spill] sm:$0xff] }
 0x24b   :  { %v7297_v44 = vpop.eup %5564  ;;  %4425 = vmatpush1.msra.mxu0 %v3804_v30  ;;  %4196 = vmatpush2.msra.mxu1 %v3776_v33  ;;  %v7301_v35 = vpop.f32.mrf.mxu0  ;;  %5594 = vpow2.f32 %v5005_v15  ;;  %v8872_v42 = vld [vmem:[#allocation108_spill] sm:$0xff]  ;;  %v3799_v30 = vld [vmem:[#allocation8 + $0x4a8] sm:$0xff]  ;;  %v3772_v27 = vld [vmem:[#allocation8 + $0x3d0] sm:$0xff] }
 0x24c   :  { %8869 = vst [vmem:[#allocation239_spill] sm:$0xff] %v7297_v44  ;;  %v7299_v14 = vpop.eup %5566  ;;  %4426 = vmatprep.subr.mxu0 %v3803_v18  ;;  %4197 = vmatprep.subr.mxu1 %v3775_v53  ;;  %8870 = vst [vmem:[#allocation240_spill] sm:$0xff] %v7301_v35  ;;  %v5010_v46 = vmul.f32 -1.442695, %v8872_v42  ;;  %v8873_v33 = vld [vmem:[#allocation40_spill] sm:$0xff]  ;;  %v8874_v44 = vld [vmem:[#allocation183_spill] sm:$0xff]  ;;  %5596 = vpow2.f32 %v5007_v51  ;;  %v7309_v37 = vpop.f32.mrf.mxu1 }
 0x24d   :  { %v7303_v62 = vpop.eup %5568  ;;  %4427 = vmatpush1.msra.mxu0 %v3802_v1  ;;  %4198 = vmatpush2.msra.mxu1 %v3774_v49  ;;  %v3314_v12 = vmul.f32 %v8874_v44, %v8873_v33  ;;  %v5012_v18 = vmul.f32 -1.442695, %v8875_v54  ;;  %v3798_v53 = vld [vmem:[#allocation8 + $0x4a0] sm:$0xff]  ;;  %v3771_v35 = vld [vmem:[#allocation8 + $0x3c8] sm:$0xff]  ;;  %v7311_v15 = vpop.f32.mrf.mxu0  ;;  %5598 = vrcp.f32 %v2729_v28  ;;  %v3797_v44 = vld [vmem:[#allocation8 + $0x498] sm:$0xff] }
 0x24e   :  { %8871 = vst [vmem:[#allocation241_spill] sm:$0xff] %v7303_v62  ;;  %v5571_v59 = vpop.eup %5570  ;;  %4428 = vmatprep.subr.mxu0 %v3801_v61  ;;  %4199 = vmatprep.subr.mxu1 %v3773_v60  ;;  %8876 = vst [vmem:[#allocation40_spill] sm:$0xff] %v7311_v15  ;;  %v8877_v1 = vld [vmem:[#allocation46_spill] sm:$0xff]  ;;  %5600 = vrcp.f32 %v2731_v31  ;;  %v8880_v61 = vld [vmem:[#allocation111_spill] sm:$0xff]  ;;  %v1471_v13 = vpop.f32.mrf.mxu1 }
 0x24f   :  { %v5573_v62 = vpop.eup %5572  ;;  %v8878_v42 = vld [vmem:[#allocation194_spill] sm:$0xff]  ;;  %4429 = vmatpush1.msra.mxu0 %v3800_v23  ;;  %4018 = vmatprep.mubr.f32.mxu0 %v3507_v4  ;;  %v5013_v60 = vmul.f32 -1.442695, %v8880_v61  ;;  %v3796_v33 = vld [vmem:[#allocation8 + $0x490] sm:$0xff]  ;;  %v3506_v54 = vmul.f32 %v3314_v12, %v7278_v19  ;;  %v3770_v15 = vld [vmem:[#allocation8 + $0x3c0] sm:$0xff]  ;;  %v7320_v2 = vpop.f32.mrf.mxu0  ;;  %5602 = vpow2.f32 %v5010_v46 }
 0x250   :  { %v3321_v49 = vmul.f32 %v8878_v42, %v8877_v1  ;;  %v7316_v51 = vpop.eup %5574  ;;  %4430 = vmatprep.subr.mxu0 %v3799_v30  ;;  %4200 = vmatpush2.msra.mxu1 %v3772_v27  ;;  %8881 = vst [vmem:[#allocation183_spill] sm:$0xff] %v7320_v2  ;;  %v2734_v42 = vadd.f32 1.0, %v5571_v59  ;;  %v3795_v23 = vld [vmem:[#allocation8 + $0x488] sm:$0xff]  ;;  %v3769_v1 = vld [vmem:[#allocation8 + $0x3b8] sm:$0xff]  ;;  %5604 = vpow2.f32 %v5012_v18  ;;  %v3794_v19 = vld [vmem:[#allocation8 + $0x480] sm:$0xff]  ;;  %v7325_v27 = vpop.f32.mrf.mxu1  ;;  %v2736_v46 = vadd.f32 1.0, %v5573_v62 }
 0x251   :  { %v5577_v28 = vpop.eup %5576  ;;  %4431 = vmatpush1.msra.mxu0 %v3798_v53  ;;  %4201 = vmatprep.subr.mxu1 %v3771_v35  ;;  %v8883_v30 = vld [vmem:[#allocation112_spill] sm:$0xff]  ;;  %v7327_v12 = vpop.f32.mrf.mxu0  ;;  %5606 = vpow2.f32 %v5011_v3  ;;  %v3768_v35 = vld [vmem:[#allocation8 + $0x3b0] sm:$0xff] }
 0x252   :  { %v3513_v4 = vmul.f32 %v3321_v49, %v1465_v0  ;;  %v7322_v31 = vpop.eup %5578  ;;  %v5016_v61 = vmul.f32 -1.442695, %v8883_v30  ;;  %4432 = vmatprep.subr.mxu0 %v3797_v44  ;;  %4019 = vmatmul.mubr.f32.gmra.mxu0 %v3506_v54  ;;  %8884 = vst [vmem:[#allocation194_spill] sm:$0xff] %v7327_v12  ;;  %v3793_v0 = vld [vmem:[#allocation8 + $0x478] sm:$0xff]  ;;  %v8886_v18 = vld [vmem:[#allocation191_spill] sm:$0xff]  ;;  %v2735_v54 = vadd.f32 1.0, %v5577_v28  ;;  %5608 = vpow2.f32 %v5013_v60  ;;  %v1477_v48 = vpop.f32.mrf.mxu1 }
 0x253   :  { %8882 = vst [vmem:[#allocation46_spill] sm:$0xff] %v7322_v31  ;;  %v7329_v2 = vpop.eup %5580  ;;  %4433 = vmatpush1.msra.mxu0 %v3796_v33  ;;  %4202 = vmatpush2.msra.mxu1 %v3770_v15  ;;  %v8885_v53 = vld [vmem:[#allocation44_spill] sm:$0xff]  ;;  %v8887_v31 = vld [vmem:[#allocation50_spill] sm:$0xff]  ;;  %v3792_v30 = vld [vmem:[#allocation8 + $0x470] sm:$0xff]  ;;  %v7335_v62 = vpop.f32.mrf.mxu0  ;;  %5610 = vrcp.f32 %v2734_v42 }
 0x254   :  { %v5583_v59 = vpop.eup %5582  ;;  %v3320_v49 = vmul.f32 %v8886_v18, %v8885_v53  ;;  %v3327_v44 = vmul.f32 %v7059_v45, %v8887_v31  ;;  %4434 = vmatprep.subr.mxu0 %v3795_v23  ;;  %4203 = vmatprep.subr.mxu1 %v3769_v1  ;;  %v3767_v12 = vld [vmem:[#allocation8 + $0x3a8] sm:$0xff]  ;;  %8888 = vst [vmem:[#allocation44_spill] sm:$0xff] %v7335_v62  ;;  %v8890_v15 = vld [vmem:[#allocation113_spill] sm:$0xff]  ;;  %5612 = vpow2.f32 %v5016_v61  ;;  %v8891_v45 = vld [vmem:[#allocation115_spill] sm:$0xff]  ;;  %v7342_v62 = vpop.f32.mrf.mxu1 }
 0x255   :  { %v7337_v3 = vpop.eup %5584  ;;  %v5018_v33 = vmul.f32 -1.442695, %v8890_v15  ;;  %4435 = vmatpush1.msra.mxu0 %v3794_v19  ;;  %4024 = vmatprep.mubr.f32.mxu0 %v3513_v4  ;;  %v3791_v53 = vld [vmem:[#allocation8 + $0x468] sm:$0xff]  ;;  %v5017_v28 = vmul.f32 -1.442695, %v8891_v45  ;;  %v3766_v1 = vld [vmem:[#allocation8 + $0x3a0] sm:$0xff]  ;;  %5614 = vrcp.f32 %v2736_v46 }
 0x256   :  { %8889 = vst [vmem:[#allocation191_spill] sm:$0xff] %v7337_v3  ;;  %v5587_v18 = vpop.eup %5586  ;;  %v3512_v60 = vmul.f32 %v3320_v49, %v7293_v22  ;;  %4436 = vmatprep.subr.mxu0 %v3793_v0  ;;  %4204 = vmatpush2.msra.mxu1 %v3768_v35  ;;  %v3519_v23 = vmul.f32 %v3327_v44, %v1471_v13  ;;  %v3790_v31 = vld [vmem:[#allocation8 + $0x460] sm:$0xff]  ;;  %v7344_v3 = vpop.f32.mrf.mxu0  ;;  %v2737_v4 = vadd.f32 1.0, %v5583_v59  ;;  %v3765_v61 = vld [vmem:[#allocation8 + $0x398] sm:$0xff]  ;;  %v8894_v0 = vld [vmem:[#allocation54_spill] sm:$0xff]  ;;  %5616 = vrcp.f32 %v2735_v54 }
 0x257   :  { %8892 = vst [vmem:[#allocation50_spill] sm:$0xff] %v7344_v3  ;;  %v7346_v42 = vpop.eup %5588  ;;  %4437 = vmatpush1.msra.mxu0 %v3792_v30  ;;  %4205 = vmatprep.subr.mxu1 %v3767_v12  ;;  %v8893_v15 = vld [vmem:[#allocation48_spill] sm:$0xff]  ;;  %v3333_v13 = vmul.f32 %v7079_v47, %v8894_v0  ;;  %v3764_v44 = vld [vmem:[#allocation8 + $0x390] sm:$0xff]  ;;  %v1483_v45 = vpop.f32.mrf.mxu1  ;;  %v2740_v12 = vadd.f32 1.0, %v5587_v18  ;;  %5618 = vpow2.f32 %v5018_v33  ;;  %v8898_v47 = vld [vmem:[#allocation118_spill] sm:$0xff] }
 0x258   :  { %v5591_v19 = vpop.eup %5590  ;;  %v3326_v22 = vmul.f32 %v7053_v11, %v8893_v15  ;;  %v8895_v35 = vld [vmem:[#allocation116_spill] sm:$0xff]  ;;  %4025 = vmatmul.mubr.f32.gmra.mxu0 %v3512_v60  ;;  %4438 = vmatprep.subr.mxu0 %v3791_v53  ;;  %v7353_v46 = vpop.f32.mrf.mxu0  ;;  %v3763_v11 = vld [vmem:[#allocation8 + $0x388] sm:$0xff]  ;;  %5620 = vpow2.f32 %v5017_v28  ;;  %v5022_v54 = vmul.f32 -1.442695, %v8898_v47  ;;  %v3762_v60 = vld [vmem:[#allocation8 + $0x380] sm:$0xff] }
 0x259   :  { %v5019_v49 = vmul.f32 -1.442695, %v8895_v35  ;;  %v3789_v3 = vld [vmem:[#allocation8 + $0x458] sm:$0xff]  ;;  %8896 = vst [vmem:[#allocation48_spill] sm:$0xff] %v7353_v46  ;;  %v7355_v30 = vpop.eup %5592  ;;  %4206 = vmatpush2.msra.mxu1 %v3766_v1  ;;  %4439 = vmatpush1.msra.mxu0 %v3790_v31  ;;  %v3525_v53 = vmul.f32 %v3333_v13, %v1477_v48  ;;  %v3788_v0 = vld [vmem:[#allocation8 + $0x450] sm:$0xff]  ;;  %v7359_v35 = vpop.f32.mrf.mxu1  ;;  %5622 = vrcp.f32 %v2737_v4  ;;  %v2742_v33 = vadd.f32 1.0, %v5591_v19 }
 0x25a   :  { %8897 = vst [vmem:[#allocation54_spill] sm:$0xff] %v7355_v30  ;;  %v5595_v59 = vpop.eup %5594  ;;  %v3518_v15 = vmul.f32 %v3326_v22, %v7309_v37  ;;  %4207 = vmatprep.subr.mxu1 %v3765_v61  ;;  %4030 = vmatprep.mubr.f32.mxu0 %v3519_v23  ;;  %v7361_v46 = vpop.f32.mrf.mxu0  ;;  %v3761_v1 = vld [vmem:[#allocation8 + $0x378] sm:$0xff]  ;;  %v8901_v61 = vld [vmem:[#allocation58_spill] sm:$0xff]  ;;  %v8902_v23 = vld [vmem:[#allocation119_spill] sm:$0xff] }
 0x25b   :  { %8899 = vst [vmem:[#allocation118_spill] sm:$0xff] %v7361_v46  ;;  %v5597_v18 = vpop.eup %5596  ;;  %4208 = vmatpush2.msra.mxu1 %v3764_v44  ;;  %4440 = vmatprep.subr.mxu0 %v3789_v3  ;;  %v8900_v31 = vld [vmem:[#allocation52_spill] sm:$0xff]  ;;  %v3339_v48 = vmul.f32 %v7100_v43, %v8901_v61  ;;  %5624 = vpow2.f32 %v5019_v49  ;;  %v5024_v22 = vmul.f32 -1.442695, %v8902_v23  ;;  %v3760_v13 = vld [vmem:[#allocation8 + $0x370] sm:$0xff]  ;;  %v3787_v30 = vld [vmem:[#allocation8 + $0x448] sm:$0xff]  ;;  %v1489_v4 = vpop.f32.mrf.mxu1 }
 0x25c   :  { %v7363_v28 = vpop.eup %5598  ;;  %v3332_v37 = vmul.f32 %v7073_v58, %v8900_v31  ;;  %4031 = vmatmul.mubr.f32.gmra.mxu0 %v3518_v15  ;;  %4209 = vmatprep.subr.mxu1 %v3763_v11  ;;  %v7370_v19 = vpop.f32.mrf.mxu0  ;;  %5626 = vrcp.f32 %v2740_v12  ;;  %v2741_v44 = vadd.f32 1.0, %v5595_v59  ;;  %v3759_v58 = vld [vmem:[#allocation8 + $0x368] sm:$0xff]  ;;  %v2743_v46 = vadd.f32 1.0, %v5597_v18  ;;  %v3758_v11 = vld [vmem:[#allocation8 + $0x360] sm:$0xff]  ;;  %v8906_v12 = vld [vmem:[#allocation120_spill] sm:$0xff] }
 0x25d   :  { %8903 = vst [vmem:[#allocation52_spill] sm:$0xff] %v7370_v19  ;;  %v7372_v3 = vpop.eup %5600  ;;  %4210 = vmatpush2.msra.mxu1 %v3762_v60  ;;  %4441 = vmatpush1.msra.mxu0 %v3788_v0  ;;  %5628 = vpow2.f32 %v5022_v54  ;;  %v3531_v49 = vmul.f32 %v3339_v48, %v1483_v45  ;;  %v3786_v15 = vld [vmem:[#allocation8 + $0x440] sm:$0xff]  ;;  %v7375_v61 = vpop.f32.mrf.mxu1  ;;  %v5023_v59 = vmul.f32 -1.442695, %v8906_v12  ;;  %v3757_v60 = vld [vmem:[#allocation8 + $0x358] sm:$0xff]  ;;  %v8908_v18 = vld [vmem:[#allocation62_spill] sm:$0xff] }
 0x25e   :  { %8904 = vst [vmem:[#allocation58_spill] sm:$0xff] %v7372_v3  ;;  %v5603_v31 = vpop.eup %5602  ;;  %v3524_v43 = vmul.f32 %v3332_v37, %v7325_v27  ;;  %4211 = vmatprep.subr.mxu1 %v3761_v1  ;;  %4036 = vmatprep.mubr.f32.mxu0 %v3525_v53  ;;  %v7377_v23 = vpop.f32.mrf.mxu0  ;;  %5630 = vrcp.f32 %v2742_v33  ;;  %v8907_v54 = vld [vmem:[#allocation56_spill] sm:$0xff]  ;;  %v3345_v45 = vmul.f32 %v7121_v36, %v8908_v18  ;;  %v8909_v53 = vld [vmem:[#allocation121_spill] sm:$0xff]  ;;  %v3756_v37 = vld [vmem:[#allocation8 + $0x350] sm:$0xff] }
 0x25f   :  { %8905 = vst [vmem:[#allocation242_spill] sm:$0xff] %v7377_v23  ;;  %v5605_v3 = vpop.eup %5604  ;;  %4212 = vmatpush2.msra.mxu1 %v3760_v13  ;;  %4442 = vmatprep.subr.mxu0 %v3787_v30  ;;  %v3338_v27 = vmul.f32 %v7093_v39, %v8907_v54  ;;  %5632 = vpow2.f32 %v5024_v22  ;;  %v5025_v1 = vmul.f32 -1.442695, %v8909_v53  ;;  %v3785_v48 = vld [vmem:[#allocation8 + $0x438] sm:$0xff]  ;;  %v1495_v33 = vpop.f32.mrf.mxu1  ;;  %v2746_v30 = vadd.f32 1.0, %v5603_v31  ;;  %v3755_v19 = vld [vmem:[#allocation8 + $0x348] sm:$0xff] }
 0x260   :  { %v5607_v0 = vpop.eup %5606  ;;  %4037 = vmatmul.mubr.f32.gmra.mxu0 %v3524_v43  ;;  %4213 = vmatprep.subr.mxu1 %v3759_v58  ;;  %v7385_v23 = vpop.f32.mrf.mxu0  ;;  %5634 = vrcp.f32 %v2741_v44  ;;  %v2748_v36 = vadd.f32 1.0, %v5605_v3  ;;  %v3537_v58 = vmul.f32 %v3345_v45, %v1489_v4  ;;  %v3754_v43 = vld [vmem:[#allocation8 + $0x340] sm:$0xff]  ;;  %v3784_v54 = vld [vmem:[#allocation8 + $0x430] sm:$0xff] }
 0x261   :  { %v5609_v13 = vpop.eup %5608  ;;  %4214 = vmatpush2.msra.mxu1 %v3758_v11  ;;  %4443 = vmatpush1.msra.mxu0 %v3786_v15  ;;  %5636 = vrcp.f32 %v2743_v46  ;;  %v3530_v22 = vmul.f32 %v3338_v27, %v7342_v62  ;;  %v7390_v18 = vpop.f32.mrf.mxu1  ;;  %v2747_v31 = vadd.f32 1.0, %v5607_v0  ;;  %v3753_v11 = vld [vmem:[#allocation8 + $0x338] sm:$0xff]  ;;  %v3752_v4 = vld [vmem:[#allocation8 + $0x330] sm:$0xff] }
 0x262   :  { %v7387_v39 = vpop.eup %5610  ;;  %4215 = vmatprep.subr.mxu1 %v3757_v60  ;;  %4042 = vmatprep.mubr.f32.mxu0 %v3531_v49  ;;  %v7392_v53 = vpop.f32.mrf.mxu0  ;;  %5638 = vpow2.f32 %v5023_v59  ;;  %v8912_v46 = vld [vmem:[#allocation60_spill] sm:$0xff]  ;;  %v2749_v3 = vadd.f32 1.0, %v5609_v13  ;;  %v3783_v49 = vld [vmem:[#allocation8 + $0x428] sm:$0xff] }
 0x263   :  { %8910 = vst [vmem:[#allocation120_spill] sm:$0xff] %v7392_v53  ;;  %v5613_v44 = vpop.eup %5612  ;;  %4216 = vmatpush2.msra.mxu1 %v3756_v37  ;;  %4444 = vmatprep.subr.mxu0 %v3785_v48  ;;  %v3344_v62 = vmul.f32 %v7115_v16, %v8912_v46  ;;  %5640 = vpow2.f32 %v5025_v1  ;;  %v1501_v60 = vpop.f32.mrf.mxu1  ;;  %v8914_v59 = vld [vmem:[#allocation66_spill] sm:$0xff]  ;;  %v3782_v46 = vld [vmem:[#allocation8 + $0x420] sm:$0xff] }
 0x264   :  { %v7394_v15 = vpop.eup %5614  ;;  %4043 = vmatmul.mubr.f32.gmra.mxu0 %v3530_v22  ;;  %4217 = vmatprep.subr.mxu1 %v3755_v19  ;;  %v7398_v27 = vpop.f32.mrf.mxu0  ;;  %v3351_v0 = vmul.f32 %v7144_v8, %v8914_v59  ;;  %5642 = vrcp.f32 %v2746_v30  ;;  %v8915_v37 = vld [vmem:[#allocation122_spill] sm:$0xff]  ;;  %v2752_v1 = vadd.f32 1.0, %v5613_v44  ;;  %v3750_v22 = vld [vmem:[#allocation8 + $0x320] sm:$0xff]  ;;  %v8916_v8 = vld [vmem:[#allocation123_spill] sm:$0xff] }
 0x265   :  { %8911 = vst [vmem:[#allocation56_spill] sm:$0xff] %v7394_v15  ;;  %8913 = vst [vmem:[#allocation62_spill] sm:$0xff] %v7398_v27  ;;  %v7400_v45 = vpop.eup %5616  ;;  %v5028_v48 = vmul.f32 -1.442695, %v8915_v37  ;;  %4218 = vmatpush2.msra.mxu1 %v3754_v43  ;;  %4445 = vmatpush1.msra.mxu0 %v3784_v54  ;;  %v3751_v16 = vld [vmem:[#allocation8 + $0x328] sm:$0xff]  ;;  %5644 = vrcp.f32 %v2748_v36  ;;  %v3536_v19 = vmul.f32 %v3344_v62, %v7359_v35  ;;  %v7406_v15 = vpop.f32.mrf.mxu1  ;;  %v3749_v43 = vld [vmem:[#allocation8 + $0x318] sm:$0xff] }
 0x266   :  { %v5619_v13 = vpop.eup %5618  ;;  %4219 = vmatprep.subr.mxu1 %v3753_v11  ;;  %4048 = vmatprep.mubr.f32.mxu0 %v3537_v58  ;;  %5646 = vrcp.f32 %v2747_v31  ;;  %v5030_v30 = vmul.f32 -1.442695, %v8916_v8  ;;  %v3543_v59 = vmul.f32 %v3351_v0, %v1495_v33  ;;  %v7409_v54 = vpop.f32.mrf.mxu0  ;;  %v8919_v44 = vld [vmem:[#allocation64_spill] sm:$0xff]  ;;  %v3269_v58 = vmul.f32 %v7188_v9, %v6693_v20  ;;  %v8920_v11 = vld [vmem:[#allocation125_spill] sm:$0xff]  ;;  %v3748_v31 = vld [vmem:[#allocation8 + $0x310] sm:$0xff] }
 0x267   :  { %v5621_v53 = vpop.eup %5620  ;;  %4220 = vmatpush2.msra.mxu1 %v3752_v4  ;;  %4446 = vmatprep.subr.mxu0 %v3783_v49  ;;  %8917 = vst [vmem:[#allocation60_spill] sm:$0xff] %v7409_v54  ;;  %v3350_v35 = vmul.f32 %v7135_v57, %v8919_v44  ;;  %5648 = vrcp.f32 %v2749_v3  ;;  %v5029_v62 = vmul.f32 -1.442695, %v8920_v11  ;;  %v1507_v4 = vpop.f32.mrf.mxu1  ;;  %v8921_v49 = vld [vmem:[#allocation16_spill] sm:$0xff]  ;;  %v8922_v0 = vld [vmem:[#allocation107_spill] sm:$0xff]  ;;  %v2754_v54 = vadd.f32 1.0, %v5619_v13 }
 0x268   :  { %v7411_v36 = vpop.eup %5622  ;;  %4049 = vmatmul.mubr.f32.gmra.mxu0 %v3536_v19  ;;  %4221 = vmatprep.subr.mxu1 %v3751_v16  ;;  %v3363_v8 = vmul.f32 %v8922_v0, %v8921_v49  ;;  %5650 = vpow2.f32 %v5028_v48  ;;  %v2753_v20 = vadd.f32 1.0, %v5621_v53  ;;  %v3461_v9 = vmul.f32 %v3269_v58, %v7177_v25  ;;  %v6113_v16 = vld [vmem:[#allocation3 + $0x1f0] sm:$0xff]  ;;  %v3747_v19 = vld [vmem:[#allocation8 + $0x308] sm:$0xff]  ;;  %v3781_v44 = vld [vmem:[#allocation8 + $0x418] sm:$0xff] }
 0x269   :  { %8918 = vst [vmem:[#allocation66_spill] sm:$0xff] %v7411_v36  ;;  %v5625_v33 = vpop.eup %5624  ;;  %v3357_v36 = vmul.f32 %v7161_v17, %v6677_v34  ;;  %4222 = vmatpush2.msra.mxu1 %v3750_v22  ;;  %4447 = vmatpush1.msra.mxu0 %v3782_v46  ;;  %5652 = vrcp.f32 %v2752_v1  ;;  %v3542_v3 = vmul.f32 %v3350_v35, %v7375_v61  ;;  %v7426_v49 = vpop.f32.mrf.mxu1  ;;  %v8923_v17 = vld [vmem:[#allocation71_spill] sm:$0xff]  ;;  %v8924_v13 = vld [vmem:[#allocation126_spill] sm:$0xff]  ;;  %v3746_v25 = vld [vmem:[#allocation8 + $0x300] sm:$0xff] }
 0x26a   :  { %v7422_v57 = vpop.eup %5626  ;;  %2108 = vmatmul.mubr.f32.gmra.mxu1 %v6113_v16  ;;  %4223 = vmatprep.subr.mxu1 %v3749_v43  ;;  %v3268_v48 = vmul.f32 %v7179_v7, %v8923_v17  ;;  %5654 = vpow2.f32 %v5030_v30  ;;  %v5031_v22 = vmul.f32 -1.442695, %v8924_v13  ;;  %v3780_v1 = vld [vmem:[#allocation8 + $0x410] sm:$0xff]  ;;  %v7431_v61 = vpop.f32.mrf.mxu0  ;;  %v8926_v43 = vld [vmem:[#allocation68_spill] sm:$0xff]  ;;  %v8927_v35 = vld [vmem:[#allocation230_spill] sm:$0xff]  ;;  %v2755_v27 = vadd.f32 1.0, %v5625_v33 }
 0x26b   :  { %v5629_v34 = vpop.eup %5628  ;;  %4054 = vmatprep.mubr.f32.mxu0 %v3543_v59  ;;  %4224 = vmatpush2.msra.mxu1 %v3748_v31  ;;  %v3549_v53 = vmul.f32 %v3357_v36, %v1501_v60  ;;  %v3356_v58 = vmul.f32 %v8927_v35, %v8926_v43  ;;  %v8928_v0 = vld [vmem:[#allocation76_spill] sm:$0xff]  ;;  %5656 = vpow2.f32 %v5029_v62  ;;  %v1513_v7 = vpop.f32.mrf.mxu1  ;;  %v8930_v36 = vld [vmem:[#allocation235_spill] sm:$0xff]  ;;  %v3555_v17 = vmul.f32 %v3363_v8, %v1507_v4  ;;  %v3779_v33 = vld [vmem:[#allocation8 + $0x408] sm:$0xff] }
 0x26c   :  { %v7433_v46 = vpop.eup %5630  ;;  %v3275_v16 = vmul.f32 %v7216_v21, %v8928_v0  ;;  %4227 = vmatprep.mubr.f32.mxu1 %v3461_v9  ;;  %4055 = vmatmul.mubr.f32.gmra.mxu0 %v3542_v3  ;;  %5658 = vrcp.f32 %v2754_v54  ;;  %v8929_v60 = vld [vmem:[#allocation128_spill] sm:$0xff]  ;;  %v3460_v31 = vmul.f32 %v3268_v48, %v8930_v36  ;;  %v2758_v43 = vadd.f32 1.0, %v5629_v34  ;;  %v8933_v48 = vld [vmem:[#allocation117_spill] sm:$0xff] }
 0x26d   :  { %8925 = vst [vmem:[#allocation122_spill] sm:$0xff] %v7433_v46  ;;  %v5633_v30 = vpop.eup %5632  ;;  %v5034_v59 = vmul.f32 -1.442695, %v8929_v60  ;;  %4225 = vmatprep.subr.mxu1 %v3747_v19  ;;  %4448 = vmatprep.subr.mxu0 %v3781_v44  ;;  %5660 = vrcp.f32 %v2753_v20  ;;  %v3548_v62 = vmul.f32 %v3356_v58, %v7390_v18  ;;  %v7445_v9 = vpop.f32.mrf.mxu1  ;;  %v8932_v3 = vld [vmem:[#allocation20_spill] sm:$0xff]  ;;  %v8934_v44 = vld [vmem:[#allocation74_spill] sm:$0xff]  ;;  %v8935_v4 = vld [vmem:[#allocation129_spill] sm:$0xff] }
 0x26e   :  { %v7441_v13 = vpop.eup %5634  ;;  %v3467_v21 = vmul.f32 %v3275_v16, %v7192_v63  ;;  %4226 = vmatpush2.msra.mxu1 %v3746_v25  ;;  %4449 = vmatpush1.msra.mxu0 %v3780_v1  ;;  %v3369_v19 = vmul.f32 %v8933_v48, %v8932_v3  ;;  %v3274_v8 = vmul.f32 %v7202_v32, %v8934_v44  ;;  %5662 = vpow2.f32 %v5031_v22  ;;  %v3778_v63 = vld [vmem:[#allocation8 + $0x400] sm:$0xff]  ;;  %v7454_v18 = vpop.f32.mrf.mxu0  ;;  %v8936_v25 = vld [vmem:[#allocation14_spill] sm:$0xff]  ;;  %v8937_v1 = vld [vmem:[#allocation104_spill] sm:$0xff] }
 0x26f   :  { %v7447_v54 = vpop.eup %5636  ;;  %v5036_v20 = vmul.f32 -1.442695, %v8935_v4  ;;  %4228 = vmatmul.mubr.f32.vlgmr.msra.gmra.mxu1 %v3460_v31  ;;  %4060 = vmatprep.mubr.f32.mxu0 %v3549_v53  ;;  %v3362_v35 = vmul.f32 %v8937_v1, %v8936_v25  ;;  %v8938_v58 = vld [vmem:[#allocation80_spill] sm:$0xff]  ;;  %5664 = vrcp.f32 %v2755_v27  ;;  %v2760_v16 = vadd.f32 1.0, %v5633_v30  ;;  %v1519_v22 = vpop.f32.mrf.mxu1  ;;  %v8939_v31 = vld [vmem:[#allocation130_spill] sm:$0xff]  ;;  %v8940_v25 = vld [vmem:[#allocation131_spill] sm:$0xff] }
 0x270   :  { %8931 = vst [vmem:[#allocation64_spill] sm:$0xff] %v7447_v54  ;;  %v5639_v34 = vpop.eup %5638  ;;  %v3281_v0 = vmul.f32 %v7247_v55, %v8938_v58  ;;  %4233 = vmatprep.mubr.f32.mxu1 %v3467_v21  ;;  %4061 = vmatmul.mubr.f32.gmra.mxu0 %v3548_v62  ;;  %v3841_v32 = vld [vmem:[#allocation8 + $0x5f8] sm:$0xff]  ;;  %5666 = vpow2.f32 %v5034_v59  ;;  %v5035_v53 = vmul.f32 -1.442695, %v8939_v31  ;;  %v3466_v3 = vmul.f32 %v3274_v8, %v7181_v40  ;;  %v3840_v21 = vld [vmem:[#allocation8 + $0x5f0] sm:$0xff]  ;;  %v8945_v8 = vld [vmem:[#allocation18_spill] sm:$0xff] }
 0x271   :  { %v5641_v36 = vpop.eup %5640  ;;  %4450 = vmatprep.subr.mxu0 %v3779_v33  ;;  %4066 = vmatprep.mubr.f32.mxu0 %v3555_v17  ;;  %v3561_v48 = vmul.f32 %v3369_v19, %v1513_v7  ;;  %5668 = vrcp.f32 %v2758_v43  ;;  %v5037_v55 = vmul.f32 -1.442695, %v8940_v25  ;;  %v3554_v30 = vmul.f32 %v3362_v35, %v7406_v15  ;;  %v7467_v62 = vpop.f32.mrf.mxu1  ;;  %v8942_v1 = vld [vmem:[#allocation24_spill] sm:$0xff]  ;;  %v8943_v40 = vld [vmem:[#allocation127_spill] sm:$0xff]  ;;  %v8944_v17 = vld [vmem:[#allocation78_spill] sm:$0xff] }
 0x272   :  { %v7462_v44 = vpop.eup %5642  ;;  %v3473_v27 = vmul.f32 %v3281_v0, %v7207_v38  ;;  %4451 = vmatpush1.msra.mxu0 %v3778_v63  ;;  %v3375_v33 = vmul.f32 %v8943_v40, %v8942_v1  ;;  %v3280_v7 = vmul.f32 %v7235_v56, %v8944_v17  ;;  %v2759_v19 = vadd.f32 1.0, %v5639_v34  ;;  %v7475_v43 = vpop.f32.mrf.mxu0  ;;  %v3839_v38 = vld [vmem:[#allocation8 + $0x5e8] sm:$0xff]  ;;  %v8947_v58 = vld [vmem:[#allocation84_spill] sm:$0xff]  ;;  %v3838_v56 = vld [vmem:[#allocation8 + $0x5e0] sm:$0xff] }
 0x273   :  { %v7469_v59 = vpop.eup %5644  ;;  %5670 = vpow2.f32 %v5036_v20  ;;  %4234 = vmatmul.mubr.f32.gmra.mxu1 %v3466_v3  ;;  %4452 = vmatprep.subr.mxu0 %v3841_v32  ;;  %v8946_v63 = vld [vmem:[#allocation114_spill] sm:$0xff]  ;;  %v3287_v0 = vmul.f32 %v7276_v24, %v8947_v58  ;;  %v2761_v1 = vadd.f32 1.0, %v5641_v36  ;;  %v1525_v34 = vpop.f32.mrf.mxu1  ;;  %v8949_v3 = vld [vmem:[#allocation132_spill] sm:$0xff]  ;;  %v8952_v4 = vld [vmem:[#allocation137_spill] sm:$0xff] }
 0x274   :  { %8941 = vst [vmem:[#allocation125_spill] sm:$0xff] %v7469_v59  ;;  %v7477_v15 = vpop.eup %5646  ;;  %v3368_v35 = vmul.f32 %v8946_v63, %v8945_v8  ;;  %5672 = vrcp.f32 %v2760_v16  ;;  %4239 = vmatprep.mubr.f32.mxu1 %v3473_v27  ;;  %4067 = vmatmul.mubr.f32.gmra.mxu0 %v3554_v30  ;;  %v5040_v32 = vmul.f32 -1.442695, %v8949_v3  ;;  %v3472_v40 = vmul.f32 %v3280_v7, %v7198_v50  ;;  %v8950_v63 = vld [vmem:[#allocation135_spill] sm:$0xff]  ;;  %v3837_v27 = vld [vmem:[#allocation8 + $0x5d8] sm:$0xff]  ;;  %v8955_v7 = vld [vmem:[#allocation22_spill] sm:$0xff] }
 0x275   :  { %v7483_v20 = vpop.eup %5648  ;;  %5674 = vpow2.f32 %v5035_v53  ;;  %4453 = vmatpush2.msra.mxu0 %v3840_v21  ;;  %4072 = vmatprep.mubr.f32.mxu0 %v3561_v48  ;;  %v3567_v17 = vmul.f32 %v3375_v33, %v1519_v22  ;;  %v5041_v24 = vmul.f32 -1.442695, %v8950_v63  ;;  %v3479_v16 = vmul.f32 %v3287_v0, %v7221_v52  ;;  %v7490_v30 = vpop.f32.mrf.mxu1  ;;  %v8951_v58 = vld [vmem:[#allocation28_spill] sm:$0xff]  ;;  %v8953_v21 = vld [vmem:[#allocation82_spill] sm:$0xff]  ;;  %v8954_v48 = vld [vmem:[#allocation133_spill] sm:$0xff] }
 0x276   :  { %8948 = vst [vmem:[#allocation16_spill] sm:$0xff] %v7483_v20  ;;  %v5651_v8 = vpop.eup %5650  ;;  %5676 = vpow2.f32 %v5037_v55  ;;  %v3560_v36 = vmul.f32 %v3368_v35, %v7426_v49  ;;  %4454 = vmatprep.subr.mxu0 %v3839_v38  ;;  %v3381_v50 = vmul.f32 %v8952_v4, %v8951_v58  ;;  %v3286_v22 = vmul.f32 %v7262_v10, %v8953_v21  ;;  %v7499_v33 = vpop.f32.mrf.mxu0  ;;  %v3836_v52 = vld [vmem:[#allocation8 + $0x5d0] sm:$0xff]  ;;  %v8956_v38 = vld [vmem:[#allocation124_spill] sm:$0xff]  ;;  %v8994_v20 = vld [vmem:[#allocation98_spill] sm:$0xff] }
 0x277   :  { %v7492_v53 = vpop.eup %5652  ;;  %5678 = vrcp.f32 %v2759_v19  ;;  %v5042_v55 = vmul.f32 -1.442695, %v8954_v48  ;;  %4240 = vmatmul.mubr.f32.gmra.mxu1 %v3472_v40  ;;  %4455 = vmatpush2.msra.mxu0 %v3838_v56  ;;  %v3374_v35 = vmul.f32 %v8956_v38, %v8955_v7  ;;  %v8957_v0 = vld [vmem:[#allocation88_spill] sm:$0xff]  ;;  %v1531_v10 = vpop.f32.mrf.mxu1  ;;  %v3835_v19 = vld [vmem:[#allocation8 + $0x5c8] sm:$0xff]  ;;  %v2764_v48 = vadd.f32 1.0, %v5651_v8 }
 0x278   :  { %v5655_v49 = vpop.eup %5654  ;;  %v3293_v25 = vmul.f32 %v7299_v14, %v8957_v0  ;;  %5680 = vrcp.f32 %v2761_v1  ;;  %v8958_v4 = vld [vmem:[#allocation136_spill] sm:$0xff]  ;;  %4245 = vmatprep.mubr.f32.mxu1 %v3479_v16  ;;  %4073 = vmatmul.mubr.f32.gmra.mxu0 %v3560_v36  ;;  %v3478_v56 = vmul.f32 %v3286_v22, %v7212_v26  ;;  %v3573_v40 = vmul.f32 %v3381_v50, %v1525_v34  ;;  %v3834_v36 = vld [vmem:[#allocation8 + $0x5c0] sm:$0xff]  ;;  %v8962_v26 = vld [vmem:[#allocation147_spill] sm:$0xff] }
 0x279   :  { %v5043_v58 = vmul.f32 -1.442695, %v8958_v4  ;;  %v5657_v21 = vpop.eup %5656  ;;  %5682 = vpow2.f32 %v5040_v32  ;;  %4078 = vmatprep.mubr.f32.mxu0 %v3567_v17  ;;  %4456 = vmatprep.subr.mxu0 %v3837_v27  ;;  %v8960_v7 = vld [vmem:[#allocation140_spill] sm:$0xff]  ;;  %v3566_v16 = vmul.f32 %v3374_v35, %v7445_v9  ;;  %v7512_v38 = vpop.f32.mrf.mxu1  ;;  %v8963_v34 = vld [vmem:[#allocation86_spill] sm:$0xff]  ;;  %v2766_v50 = vadd.f32 1.0, %v5655_v49  ;;  %v8971_v4 = vld [vmem:[#allocation157_spill] sm:$0xff] }
 0x27a   :  { %v7507_v59 = vpop.eup %5658  ;;  %5684 = vpow2.f32 %v5041_v24  ;;  %v5047_v14 = vmul.f32 -1.442695, %v8960_v7  ;;  %v3485_v1 = vmul.f32 %v3293_v25, %v7233_v6  ;;  %4457 = vmatpush2.msra.mxu0 %v3836_v52  ;;  %v8961_v32 = vld [vmem:[#allocation32_spill] sm:$0xff]  ;;  %v3292_v27 = vmul.f32 %v7290_v29, %v8963_v34  ;;  %v7520_v24 = vpop.f32.mrf.mxu0  ;;  %v8964_v25 = vld [vmem:[#allocation26_spill] sm:$0xff]  ;;  %v3832_v29 = vld [vmem:[#allocation8 + $0x5b0] sm:$0xff] }
 0x27b   :  { %8959 = vst [vmem:[#allocation107_spill] sm:$0xff] %v7507_v59  ;;  %v7514_v8 = vpop.eup %5660  ;;  %v3387_v17 = vmul.f32 %v8962_v26, %v8961_v32  ;;  %5686 = vpow2.f32 %v5042_v55  ;;  %4246 = vmatmul.mubr.f32.gmra.mxu1 %v3478_v56  ;;  %4458 = vmatprep.subr.mxu0 %v3835_v19  ;;  %v3833_v6 = vld [vmem:[#allocation8 + $0x5b8] sm:$0xff]  ;;  %v8965_v22 = vld [vmem:[#allocation134_spill] sm:$0xff]  ;;  %v3299_v35 = vmul.f32 %v7329_v2, %v8834_v41  ;;  %v2765_v0 = vadd.f32 1.0, %v5657_v21  ;;  %v1537_v32 = vpop.f32.mrf.mxu1  ;;  %v8969_v2 = vld [vmem:[#allocation21_spill] sm:$0xff] }
 0x27c   :  { %v5663_v9 = vpop.eup %5662  ;;  %v3380_v52 = vmul.f32 %v8965_v22, %v8964_v25  ;;  %5688 = vpow2.f32 %v5043_v58  ;;  %4251 = vmatprep.mubr.f32.mxu1 %v3485_v1  ;;  %4079 = vmatmul.mubr.f32.gmra.mxu0 %v3566_v16  ;;  %v8967_v55 = vld [vmem:[#allocation138_spill] sm:$0xff]  ;;  %v3484_v19 = vmul.f32 %v3292_v27, %v7225_v5  ;;  %v8968_v25 = vld [vmem:[#allocation145_spill] sm:$0xff]  ;;  %v8977_v59 = vld [vmem:[#allocation139_spill] sm:$0xff] }
 0x27d   :  { %v7526_v49 = vpop.eup %5664  ;;  %5690 = vrcp.f32 %v2764_v48  ;;  %v5046_v56 = vmul.f32 -1.442695, %v8967_v55  ;;  %4084 = vmatprep.mubr.f32.mxu0 %v3573_v40  ;;  %v3579_v26 = vmul.f32 %v3387_v17, %v1531_v10  ;;  %4459 = vmatpush2.msra.mxu0 %v3834_v36  ;;  %v5053_v41 = vmul.f32 -1.442695, %v8968_v25  ;;  %v7533_v1 = vpop.f32.mrf.mxu1  ;;  %v3831_v16 = vld [vmem:[#allocation8 + $0x5a8] sm:$0xff]  ;;  %v3830_v17 = vld [vmem:[#allocation8 + $0x5a0] sm:$0xff] }
 0x27e   :  { %8966 = vst [vmem:[#allocation71_spill] sm:$0xff] %v7526_v49  ;;  %v5667_v34 = vpop.eup %5666  ;;  %5692 = vpow2.f32 %v5047_v14  ;;  %v3491_v58 = vmul.f32 %v3299_v35, %v8969_v2  ;;  %v3572_v21 = vmul.f32 %v3380_v52, %v7467_v62  ;;  %4460 = vmatprep.subr.mxu0 %v3833_v6  ;;  %v8970_v22 = vld [vmem:[#allocation34_spill] sm:$0xff]  ;;  %v2767_v14 = vadd.f32 1.0, %v5663_v9  ;;  %v7541_v36 = vpop.f32.mrf.mxu0  ;;  %v8975_v6 = vld [vmem:[#allocation144_spill] sm:$0xff] }
 0x27f   :  { %v7535_v48 = vpop.eup %5668  ;;  %v3393_v5 = vmul.f32 %v8971_v4, %v8970_v22  ;;  %v8972_v40 = vld [vmem:[#allocation90_spill] sm:$0xff]  ;;  %5694 = vrcp.f32 %v2766_v50  ;;  %8973 = vst [vmem:[#allocation68_spill] sm:$0xff] %v7541_v36  ;;  %4252 = vmatmul.mubr.f32.gmra.mxu1 %v3484_v19  ;;  %4461 = vmatpush2.msra.mxu0 %v3832_v29  ;;  %v8976_v35 = vld [vmem:[#allocation96_spill] sm:$0xff]  ;;  %v5048_v4 = vmul.f32 -1.442695, %v8977_v59  ;;  %v2770_v22 = vadd.f32 1.0, %v5667_v34 }
 0x280   :  { %v3298_v10 = vmul.f32 %v7316_v51, %v8972_v40  ;;  %v5671_v62 = vpop.eup %5670  ;;  %v8974_v27 = vld [vmem:[#allocation30_spill] sm:$0xff]  ;;  %v3305_v2 = vmul.f32 %v7363_v28, %v8976_v35  ;;  %5696 = vrcp.f32 %v2765_v0  ;;  %4257 = vmatprep.mubr.f32.mxu1 %v3491_v58  ;;  %4085 = vmatmul.mubr.f32.gmra.mxu0 %v3572_v21  ;;  %v1543_v51 = vpop.f32.mrf.mxu1  ;;  %v3829_v50 = vld [vmem:[#allocation8 + $0x598] sm:$0xff]  ;;  %v8981_v28 = vld [vmem:[#allocation31_spill] sm:$0xff] }
 0x281   :  { %v3386_v52 = vmul.f32 %v8975_v6, %v8974_v27  ;;  %v7548_v9 = vpop.eup %5672  ;;  %5698 = vpow2.f32 %v5046_v56  ;;  %v8979_v29 = vld [vmem:[#allocation92_spill] sm:$0xff]  ;;  %4090 = vmatprep.mubr.f32.mxu0 %v3579_v26  ;;  %v3585_v40 = vmul.f32 %v3393_v5, %v1537_v32  ;;  %4462 = vmatprep.subr.mxu0 %v3831_v16  ;;  %v8980_v6 = vld [vmem:[#allocation142_spill] sm:$0xff]  ;;  %v3828_v35 = vld [vmem:[#allocation8 + $0x590] sm:$0xff]  ;;  %v2772_v26 = vadd.f32 1.0, %v5671_v62  ;;  %v7560_v16 = vpop.f32.mrf.mxu0 }
 0x282   :  { %8978 = vst [vmem:[#allocation230_spill] sm:$0xff] %v7548_v9  ;;  %v3490_v19 = vmul.f32 %v3298_v10, %v8979_v29  ;;  %v5675_v27 = vpop.eup %5674  ;;  %v5052_v49 = vmul.f32 -1.442695, %v8980_v6  ;;  %5700 = vpow2.f32 %v5053_v41  ;;  %v3497_v0 = vmul.f32 %v3305_v2, %v8981_v28  ;;  %4463 = vmatpush2.msra.mxu0 %v3830_v17  ;;  %v7554_v21 = vpop.f32.mrf.mxu1  ;;  %v8982_v34 = vld [vmem:[#allocation36_spill] sm:$0xff]  ;;  %v8983_v56 = vld [vmem:[#allocation167_spill] sm:$0xff]  ;;  %v8984_v10 = vld [vmem:[#allocation94_spill] sm:$0xff] }
 0x283   :  { %v3578_v58 = vmul.f32 %v3386_v52, %v7490_v30  ;;  %v5677_v59 = vpop.eup %5676  ;;  %v3399_v9 = vmul.f32 %v8983_v56, %v8982_v34  ;;  %v3304_v32 = vmul.f32 %v7346_v42, %v8984_v10  ;;  %5702 = vrcp.f32 %v2767_v14  ;;  %4464 = vmatprep.subr.mxu0 %v3829_v50  ;;  %v3827_v41 = vld [vmem:[#allocation8 + $0x588] sm:$0xff]  ;;  %v8985_v30 = vld [vmem:[#allocation33_spill] sm:$0xff]  ;;  %v8987_v2 = vld [vmem:[#allocation100_spill] sm:$0xff] }
 0x284   :  { %4258 = vmatmul.mubr.f32.gmra.mxu1 %v3490_v19  ;;  %v7562_v5 = vpop.eup %5678  ;;  %v8986_v17 = vld [vmem:[#allocation154_spill] sm:$0xff]  ;;  %v3311_v29 = vmul.f32 %v7400_v45, %v8987_v2  ;;  %5704 = vpow2.f32 %v5048_v4  ;;  %v1549_v42 = vpop.f32.mrf.mxu1  ;;  %v3826_v14 = vld [vmem:[#allocation8 + $0x580] sm:$0xff]  ;;  %v2771_v50 = vadd.f32 1.0, %v5675_v27  ;;  %v8990_v19 = vld [vmem:[#allocation27_spill] sm:$0xff]  ;;  %4465 = vmatpush2.msra.mxu0 %v3828_v35 }
 0x285   :  { %v3392_v52 = vmul.f32 %v8986_v17, %v8985_v30  ;;  %v8988_v28 = vld [vmem:[#allocation150_spill] sm:$0xff]  ;;  %4263 = vmatprep.mubr.f32.mxu1 %v3497_v0  ;;  %4091 = vmatmul.mubr.f32.gmra.mxu0 %v3578_v58  ;;  %v7569_v62 = vpop.eup %5680  ;;  %5706 = vrcp.f32 %v2770_v22  ;;  %v3496_v56 = vmul.f32 %v3304_v32, %v8990_v19  ;;  %v3591_v10 = vmul.f32 %v3399_v9, %v1543_v51  ;;  %v8991_v45 = vld [vmem:[#allocation37_spill] sm:$0xff]  ;;  %v3825_v58 = vld [vmem:[#allocation8 + $0x578] sm:$0xff] }
 0x286   :  { %v5059_v34 = vmul.f32 -1.442695, %v8988_v28  ;;  %8989 = vst [vmem:[#allocation76_spill] sm:$0xff] %v7569_v62  ;;  %4096 = vmatprep.mubr.f32.mxu0 %v3585_v40  ;;  %v5683_v30 = vpop.eup %5682  ;;  %v2773_v17 = vadd.f32 1.0, %v5677_v59  ;;  %5708 = vpow2.f32 %v5052_v49  ;;  %v3503_v4 = vmul.f32 %v3311_v29, %v8991_v45  ;;  %v7574_v0 = vpop.f32.mrf.mxu1  ;;  %4466 = vmatprep.subr.mxu0 %v3827_v41  ;;  %v8992_v62 = vld [vmem:[#allocation39_spill] sm:$0xff]  ;;  %v8993_v22 = vld [vmem:[#allocation178_spill] sm:$0xff] }
 0x287   :  { %v3584_v2 = vmul.f32 %v3392_v52, %v7512_v38  ;;  %v5685_v46 = vpop.eup %5684  ;;  %v3405_v27 = vmul.f32 %v8993_v22, %v8992_v62  ;;  %v3310_v40 = vmul.f32 %v7387_v39, %v8994_v20  ;;  %5710 = vrcp.f32 %v2772_v26  ;;  %v8995_v51 = vld [vmem:[#allocation148_spill] sm:$0xff]  ;;  %v7581_v59 = vpop.f32.mrf.mxu0  ;;  %4467 = vmatpush2.msra.mxu0 %v3826_v14  ;;  %v3824_v49 = vld [vmem:[#allocation8 + $0x570] sm:$0xff]  ;;  %v9000_v52 = vld [vmem:[#allocation105_spill] sm:$0xff] }
 0x288   :  { %v5058_v9 = vmul.f32 -1.442695, %v8995_v51  ;;  %8996 = vst [vmem:[#allocation128_spill] sm:$0xff] %v7581_v59  ;;  %4264 = vmatmul.mubr.f32.gmra.mxu1 %v3496_v56  ;;  %v7583_v38 = vpop.eup %5686  ;;  %v8998_v35 = vld [vmem:[#allocation35_spill] sm:$0xff]  ;;  %v8999_v32 = vld [vmem:[#allocation164_spill] sm:$0xff]  ;;  %v3317_v29 = vmul.f32 %v7441_v13, %v9000_v52  ;;  %5712 = vpow2.f32 %v5059_v34  ;;  %v1555_v39 = vpop.f32.mrf.mxu1  ;;  %v3823_v20 = vld [vmem:[#allocation8 + $0x568] sm:$0xff]  ;;  %4468 = vmatprep.subr.mxu0 %v3825_v58 }
 0x289   :  { %8997 = vst [vmem:[#allocation235_spill] sm:$0xff] %v7583_v38  ;;  %v3398_v41 = vmul.f32 %v8999_v32, %v8998_v35  ;;  %v9001_v62 = vld [vmem:[#allocation155_spill] sm:$0xff]  ;;  %4269 = vmatprep.mubr.f32.mxu1 %v3503_v4  ;;  %4097 = vmatmul.mubr.f32.gmra.mxu0 %v3584_v2  ;;  %v7590_v26 = vpop.eup %5688  ;;  %5714 = vrcp.f32 %v2771_v50  ;;  %v9003_v14 = vld [vmem:[#allocation141_spill] sm:$0xff]  ;;  %v3597_v54 = vmul.f32 %v3405_v27, %v1549_v42  ;;  %v2777_v13 = vadd.f32 1.0, %v5685_v46  ;;  %v9005_v34 = vld [vmem:[#allocation238_spill] sm:$0xff] }
 0x28a   :  { %v5065_v19 = vmul.f32 -1.442695, %v9001_v62  ;;  %9002 = vst [vmem:[#allocation20_spill] sm:$0xff] %v7590_v26  ;;  %v5049_v56 = vmul.f32 -1.442695, %v9003_v14  ;;  %v9004_v45 = vld [vmem:[#allocation29_spill] sm:$0xff]  ;;  %4102 = vmatprep.mubr.f32.mxu0 %v3591_v10  ;;  %v7594_v35 = vpop.eup %5690  ;;  %5716 = vrcp.f32 %v2773_v17  ;;  %v3509_v32 = vmul.f32 %v3317_v29, %v9005_v34  ;;  %v7598_v2 = vpop.f32.mrf.mxu1  ;;  %4469 = vmatpush2.msra.mxu0 %v3824_v49 }
 0x28b   :  { %v3502_v22 = vmul.f32 %v3310_v40, %v9004_v45  ;;  %v3590_v4 = vmul.f32 %v3398_v41, %v7533_v1  ;;  %v3822_v52 = vld [vmem:[#allocation8 + $0x560] sm:$0xff]  ;;  %v5693_v50 = vpop.eup %5692  ;;  %v9006_v26 = vld [vmem:[#allocation43_spill] sm:$0xff]  ;;  %v9007_v14 = vld [vmem:[#allocation188_spill] sm:$0xff]  ;;  %5718 = vpow2.f32 %v5058_v9  ;;  %v7605_v17 = vpop.f32.mrf.mxu0  ;;  %4470 = vmatprep.subr.mxu0 %v3823_v20 }
 0x28c   :  { %v3411_v59 = vmul.f32 %v9007_v14, %v9006_v26  ;;  %v9008_v40 = vld [vmem:[#allocation102_spill] sm:$0xff]  ;;  %v9009_v10 = vld [vmem:[#allocation152_spill] sm:$0xff]  ;;  %9010 = vst [vmem:[#allocation117_spill] sm:$0xff] %v7605_v17  ;;  %v7607_v1 = vpop.eup %5694  ;;  %v9013_v49 = vld [vmem:[#allocation175_spill] sm:$0xff]  ;;  %5720 = vpow2.f32 %v5065_v19  ;;  %4471 = vmatpush2.msra.mxu0 %v3822_v52 }
 0x28d   :  { %v3316_v42 = vmul.f32 %v7422_v57, %v9008_v40  ;;  %v5064_v58 = vmul.f32 -1.442695, %v9009_v10  ;;  %4270 = vmatmul.mubr.f32.gmra.mxu1 %v3502_v22  ;;  %v3821_v46 = vld [vmem:[#allocation8 + $0x558] sm:$0xff]  ;;  %9011 = vst [vmem:[#allocation74_spill] sm:$0xff] %v7607_v1  ;;  %v9012_v27 = vld [vmem:[#allocation38_spill] sm:$0xff]  ;;  %4103 = vmatmul.mubr.f32.gmra.mxu0 %v3590_v4  ;;  %v1561_v57 = vpop.f32.mrf.mxu1  ;;  %v3820_v9 = vld [vmem:[#allocation8 + $0x550] sm:$0xff]  ;;  %v7614_v34 = vpop.eup %5696  ;;  %5722 = vpow2.f32 %v5049_v56 }
 0x28e   :  { %v3404_v41 = vmul.f32 %v9013_v49, %v9012_v27  ;;  %v9014_v29 = vld [vmem:[#allocation110_spill] sm:$0xff]  ;;  %v9015_v26 = vld [vmem:[#allocation160_spill] sm:$0xff]  ;;  %4275 = vmatprep.mubr.f32.mxu1 %v3509_v32  ;;  %v2776_v22 = vadd.f32 1.0, %v5683_v30  ;;  %4108 = vmatprep.mubr.f32.mxu0 %v3597_v54  ;;  %v3603_v1 = vmul.f32 %v3411_v59, %v1555_v39  ;;  %v5699_v27 = vpop.eup %5698  ;;  %5724 = vrcp.f32 %v2777_v13  ;;  %v9018_v17 = vld [vmem:[#allocation47_spill] sm:$0xff]  ;;  %v7626_v13 = vpop.f32.mrf.mxu0 }
 0x28f   :  { %v3323_v45 = vmul.f32 %v7477_v15, %v9014_v29  ;;  %v5071_v14 = vmul.f32 -1.442695, %v9015_v26  ;;  %v9016_v20 = vld [vmem:[#allocation172_spill] sm:$0xff]  ;;  %v2783_v49 = vadd.f32 1.0, %v5693_v50  ;;  %v7619_v32 = vpop.f32.mrf.mxu1  ;;  %4472 = vmatprep.subr.mxu0 %v3821_v46  ;;  %v3819_v4 = vld [vmem:[#allocation8 + $0x548] sm:$0xff]  ;;  %v5701_v38 = vpop.eup %5700  ;;  %5726 = vpow2.f32 %v5064_v58  ;;  %9022 = vst [vmem:[#allocation14_spill] sm:$0xff] %v7626_v13 }
 0x290   :  { %v3508_v40 = vmul.f32 %v3316_v42, %v9016_v20  ;;  %v9017_v15 = vld [vmem:[#allocation240_spill] sm:$0xff]  ;;  %v3596_v29 = vmul.f32 %v3404_v41, %v7554_v21  ;;  %v9021_v59 = vld [vmem:[#allocation158_spill] sm:$0xff]  ;;  %4473 = vmatpush2.msra.mxu0 %v3820_v9  ;;  %v3818_v52 = vld [vmem:[#allocation8 + $0x540] sm:$0xff]  ;;  %v7628_v21 = vpop.eup %5702  ;;  %v2782_v9 = vadd.f32 1.0, %v5699_v27 }
 0x291   :  { %v3515_v19 = vmul.f32 %v3323_v45, %v9017_v15  ;;  %v9019_v30 = vld [vmem:[#allocation196_spill] sm:$0xff]  ;;  %v5070_v39 = vmul.f32 -1.442695, %v9021_v59  ;;  %9023 = vst [vmem:[#allocation104_spill] sm:$0xff] %v7628_v21  ;;  %v9024_v50 = vld [vmem:[#allocation41_spill] sm:$0xff]  ;;  %v9025_v42 = vld [vmem:[#allocation186_spill] sm:$0xff]  ;;  %5728 = vpow2.f32 %v5071_v14  ;;  %v7635_v58 = vpop.eup %5704  ;;  %4474 = vmatprep.subr.mxu0 %v3819_v4 }
 0x292   :  { %v3417_v56 = vmul.f32 %v9019_v30, %v9018_v17  ;;  %v9020_v36 = vld [vmem:[#allocation108_spill] sm:$0xff]  ;;  %4276 = vmatmul.mubr.f32.gmra.mxu1 %v3508_v40  ;;  %v3410_v46 = vmul.f32 %v9025_v42, %v9024_v50  ;;  %v9026_v41 = vld [vmem:[#allocation115_spill] sm:$0xff]  ;;  %v9027_v17 = vld [vmem:[#allocation165_spill] sm:$0xff]  ;;  %4109 = vmatmul.mubr.f32.gmra.mxu0 %v3596_v29  ;;  %9028 = vst [vmem:[#allocation80_spill] sm:$0xff] %v7635_v58  ;;  %5730 = vrcp.f32 %v2776_v22  ;;  %v7638_v50 = vpop.eup %5706 }
 0x293   :  { %v3322_v54 = vmul.f32 %v7462_v44, %v9020_v36  ;;  %v3329_v45 = vmul.f32 %v7514_v8, %v9026_v41  ;;  %v5077_v20 = vmul.f32 -1.442695, %v9027_v17  ;;  %4281 = vmatprep.mubr.f32.mxu1 %v3515_v19  ;;  %v1567_v44 = vpop.f32.mrf.mxu1  ;;  %v3817_v36 = vld [vmem:[#allocation8 + $0x538] sm:$0xff]  ;;  %v9029_v40 = vld [vmem:[#allocation42_spill] sm:$0xff]  ;;  %4114 = vmatprep.mubr.f32.mxu0 %v3603_v1  ;;  %5732 = vrcp.f32 %v2783_v49  ;;  %v9030_v14 = vld [vmem:[#allocation183_spill] sm:$0xff]  ;;  %v5709_v21 = vpop.eup %5708 }
 0x294   :  { %v3609_v30 = vmul.f32 %v3417_v56, %v1561_v57  ;;  %v2789_v8 = vadd.f32 1.0, %v5701_v38  ;;  %v3602_v19 = vmul.f32 %v3410_v46, %v7574_v0  ;;  %4475 = vmatpush2.msra.mxu0 %v3818_v52  ;;  %v3816_v41 = vld [vmem:[#allocation8 + $0x530] sm:$0xff]  ;;  %v9032_v27 = vld [vmem:[#allocation202_spill] sm:$0xff]  ;;  %5734 = vpow2.f32 %v5070_v39  ;;  %v7649_v49 = vpop.f32.mrf.mxu0  ;;  %v7651_v0 = vpop.eup %5710  ;;  %v9037_v56 = vld [vmem:[#allocation45_spill] sm:$0xff] }
 0x295   :  { %v3514_v15 = vmul.f32 %v3322_v54, %v9029_v40  ;;  %v3521_v42 = vmul.f32 %v3329_v45, %v9030_v14  ;;  %v7642_v29 = vpop.f32.mrf.mxu1  ;;  %v9031_v22 = vld [vmem:[#allocation51_spill] sm:$0xff]  ;;  %v9033_v54 = vld [vmem:[#allocation112_spill] sm:$0xff]  ;;  %v9034_v57 = vld [vmem:[#allocation162_spill] sm:$0xff]  ;;  %9035 = vst [vmem:[#allocation130_spill] sm:$0xff] %v7649_v49  ;;  %4476 = vmatprep.subr.mxu0 %v3817_v36  ;;  %v3335_v45 = vmul.f32 %v7562_v5, %v8906_v12  ;;  %5736 = vpow2.f32 %v5077_v20 }
 0x296   :  { %v3423_v58 = vmul.f32 %v9032_v27, %v9031_v22  ;;  %v3328_v1 = vmul.f32 %v7492_v53, %v9033_v54  ;;  %v5076_v4 = vmul.f32 -1.442695, %v9034_v57  ;;  %v3815_v38 = vld [vmem:[#allocation8 + $0x528] sm:$0xff]  ;;  %9036 = vst [vmem:[#allocation24_spill] sm:$0xff] %v7651_v0  ;;  %v9038_v52 = vld [vmem:[#allocation193_spill] sm:$0xff]  ;;  %4115 = vmatmul.mubr.f32.gmra.mxu0 %v3602_v19  ;;  %v5713_v22 = vpop.eup %5712  ;;  %5738 = vrcp.f32 %v2782_v9  ;;  %v9041_v27 = vld [vmem:[#allocation40_spill] sm:$0xff] }
 0x297   :  { %4282 = vmatmul.mubr.f32.gmra.mxu1 %v3514_v15  ;;  %v3416_v46 = vmul.f32 %v9038_v52, %v9037_v56  ;;  %v9039_v40 = vld [vmem:[#allocation170_spill] sm:$0xff]  ;;  %v1573_v53 = vpop.f32.mrf.mxu1  ;;  %v3814_v39 = vld [vmem:[#allocation8 + $0x520] sm:$0xff]  ;;  %v9040_v15 = vld [vmem:[#allocation168_spill] sm:$0xff]  ;;  %4120 = vmatprep.mubr.f32.mxu0 %v3609_v30  ;;  %v5715_v56 = vpop.eup %5714  ;;  %v2788_v52 = vadd.f32 1.0, %v5709_v21  ;;  %5740 = vrcp.f32 %v2789_v8 }
 0x298   :  { %v5083_v14 = vmul.f32 -1.442695, %v9039_v40  ;;  %4287 = vmatprep.mubr.f32.mxu1 %v3521_v42  ;;  %v5082_v36 = vmul.f32 -1.442695, %v9040_v15  ;;  %v3520_v54 = vmul.f32 %v3328_v1, %v9041_v27  ;;  %v3615_v0 = vmul.f32 %v3423_v58, %v1567_v44  ;;  %4477 = vmatpush2.msra.mxu0 %v3816_v41  ;;  %v9042_v12 = vld [vmem:[#allocation44_spill] sm:$0xff]  ;;  %v7664_v13 = vpop.eup %5716  ;;  %v9044_v9 = vld [vmem:[#allocation55_spill] sm:$0xff]  ;;  %v7671_v30 = vpop.f32.mrf.mxu0 }
 0x299   :  { %v3527_v5 = vmul.f32 %v3335_v45, %v9042_v12  ;;  %v3608_v20 = vmul.f32 %v3416_v46, %v7598_v2  ;;  %v7662_v42 = vpop.f32.mrf.mxu1  ;;  %4478 = vmatprep.subr.mxu0 %v3815_v38  ;;  %v3813_v19 = vld [vmem:[#allocation8 + $0x518] sm:$0xff]  ;;  %9043 = vst [vmem:[#allocation127_spill] sm:$0xff] %v7664_v13  ;;  %v3334_v44 = vmul.f32 %v7535_v48, %v8898_v47  ;;  %5742 = vpow2.f32 %v5076_v4  ;;  %v3812_v2 = vld [vmem:[#allocation8 + $0x510] sm:$0xff]  ;;  %v5719_v8 = vpop.eup %5718  ;;  %v9047_v41 = vld [vmem:[#allocation49_spill] sm:$0xff] }
 0x29a   :  { %v9045_v15 = vld [vmem:[#allocation208_spill] sm:$0xff]  ;;  %4479 = vmatpush2.msra.mxu0 %v3814_v39  ;;  %v3341_v46 = vmul.f32 %v7614_v34, %v8920_v11  ;;  %v2795_v45 = vadd.f32 1.0, %v5713_v22  ;;  %5744 = vpow2.f32 %v5083_v14  ;;  %v3811_v48 = vld [vmem:[#allocation8 + $0x508] sm:$0xff]  ;;  %v5721_v4 = vpop.eup %5720  ;;  %v9054_v13 = vld [vmem:[#allocation215_spill] sm:$0xff] }
 0x29b   :  { %v3429_v49 = vmul.f32 %v9045_v15, %v9044_v9  ;;  %v9046_v58 = vld [vmem:[#allocation176_spill] sm:$0xff]  ;;  %4288 = vmatmul.mubr.f32.gmra.mxu1 %v3520_v54  ;;  %4121 = vmatmul.mubr.f32.gmra.mxu0 %v3608_v20  ;;  %v1579_v47 = vpop.f32.mrf.mxu1  ;;  %5746 = vpow2.f32 %v5082_v36  ;;  %v9049_v15 = vld [vmem:[#allocation173_spill] sm:$0xff]  ;;  %v9050_v54 = vld [vmem:[#allocation194_spill] sm:$0xff]  ;;  %v7679_v9 = vpop.eup %5722 }
 0x29c   :  { %v5089_v21 = vmul.f32 -1.442695, %v9046_v58  ;;  %v9048_v1 = vld [vmem:[#allocation200_spill] sm:$0xff]  ;;  %4293 = vmatprep.mubr.f32.mxu1 %v3527_v5  ;;  %v5088_v27 = vmul.f32 -1.442695, %v9049_v15  ;;  %v3526_v39 = vmul.f32 %v3334_v44, %v9050_v54  ;;  %4126 = vmatprep.mubr.f32.mxu0 %v3615_v0  ;;  %5748 = vrcp.f32 %v2788_v52  ;;  %v3810_v36 = vld [vmem:[#allocation8 + $0x500] sm:$0xff]  ;;  %v5725_v20 = vpop.eup %5724 }
 0x29d   :  { %v3422_v38 = vmul.f32 %v9048_v1, %v9047_v41  ;;  %v3621_v12 = vmul.f32 %v3429_v49, %v1573_v53  ;;  %4480 = vmatprep.subr.mxu0 %v3813_v19  ;;  %v9051_v41 = vld [vmem:[#allocation181_spill] sm:$0xff]  ;;  %v9052_v34 = vld [vmem:[#allocation48_spill] sm:$0xff]  ;;  %v7684_v5 = vpop.f32.mrf.mxu1  ;;  %v9053_v1 = vld [vmem:[#allocation59_spill] sm:$0xff]  ;;  %v3340_v49 = vmul.f32 %v7594_v35, %v8915_v37  ;;  %v2794_v0 = vadd.f32 1.0, %v5719_v8  ;;  %v7690_v53 = vpop.f32.mrf.mxu0 }
 0x29e   :  { %v5095_v11 = vmul.f32 -1.442695, %v9051_v41  ;;  %v3533_v14 = vmul.f32 %v3341_v46, %v9052_v34  ;;  %4481 = vmatpush2.msra.mxu0 %v3812_v2  ;;  %v3435_v44 = vmul.f32 %v9054_v13, %v9053_v1  ;;  %5750 = vpow2.f32 %v5089_v21  ;;  %v5727_v52 = vpop.eup %5726  ;;  %v9055_v19 = vld [vmem:[#allocation53_spill] sm:$0xff]  ;;  %v9057_v37 = vld [vmem:[#allocation179_spill] sm:$0xff]  ;;  %v9058_v21 = vld [vmem:[#allocation50_spill] sm:$0xff] }
 0x29f   :  { %v3614_v22 = vmul.f32 %v3422_v38, %v7619_v32  ;;  %4294 = vmatmul.mubr.f32.gmra.mxu1 %v3526_v39  ;;  %4482 = vmatprep.subr.mxu0 %v3811_v48  ;;  %v9056_v32 = vld [vmem:[#allocation206_spill] sm:$0xff]  ;;  %v3347_v2 = vmul.f32 %v5715_v56, %v8939_v31  ;;  %5752 = vrcp.f32 %v2795_v45  ;;  %v2801_v46 = vadd.f32 1.0, %v5721_v4  ;;  %v1585_v13 = vpop.f32.mrf.mxu1  ;;  %v5729_v54 = vpop.eup %5728  ;;  %v9059_v34 = vld [vmem:[#allocation187_spill] sm:$0xff] }
 0x2a0   :  { %v3428_v38 = vmul.f32 %v9056_v32, %v9055_v19  ;;  %4299 = vmatprep.mubr.f32.mxu1 %v3533_v14  ;;  %5754 = vpow2.f32 %v5088_v27  ;;  %v5094_v35 = vmul.f32 -1.442695, %v9057_v37  ;;  %v3532_v8 = vmul.f32 %v3340_v49, %v9058_v21  ;;  %4483 = vmatpush2.msra.mxu0 %v3810_v36  ;;  %v5731_v48 = vpop.eup %5730  ;;  %v9060_v19 = vld [vmem:[#allocation52_spill] sm:$0xff]  ;;  %v9061_v14 = vld [vmem:[#allocation63_spill] sm:$0xff]  ;;  %v9062_v27 = vld [vmem:[#allocation221_spill] sm:$0xff] }
 0x2a1   :  { %4127 = vmatmul.mubr.f32.gmra.mxu0 %v3614_v22  ;;  %v3627_v39 = vmul.f32 %v3435_v44, %v1579_v47  ;;  %5756 = vpow2.f32 %v5095_v11  ;;  %v5101_v1 = vmul.f32 -1.442695, %v9059_v34  ;;  %v3539_v31 = vmul.f32 %v3347_v2, %v9060_v19  ;;  %v7700_v45 = vpop.f32.mrf.mxu1  ;;  %v5733_v4 = vpop.eup %5732  ;;  %v9063_v36 = vld [vmem:[#allocation57_spill] sm:$0xff]  ;;  %v9064_v44 = vld [vmem:[#allocation212_spill] sm:$0xff] }
 0x2a2   :  { %4132 = vmatprep.mubr.f32.mxu0 %v3621_v12  ;;  %v3620_v56 = vmul.f32 %v3428_v38, %v7642_v29  ;;  %v3441_v22 = vmul.f32 %v9062_v27, %v9061_v14  ;;  %v3346_v49 = vmul.f32 %v7638_v50, %v8929_v60  ;;  %5758 = vrcp.f32 %v2794_v0  ;;  %v7706_v12 = vpop.f32.mrf.mxu0  ;;  %v5735_v11 = vpop.eup %5734  ;;  %v9065_v19 = vld [vmem:[#allocation184_spill] sm:$0xff]  ;;  %v9066_v50 = vld [vmem:[#allocation118_spill] sm:$0xff]  ;;  %v9067_v14 = vld [vmem:[#allocation195_spill] sm:$0xff] }
 0x2a3   :  { %v2800_v47 = vadd.f32 1.0, %v5727_v52  ;;  %4300 = vmatmul.mubr.f32.gmra.mxu1 %v3532_v8  ;;  %v3434_v32 = vmul.f32 %v9064_v44, %v9063_v36  ;;  %v3353_v29 = vmul.f32 %v5725_v20, %v8950_v63  ;;  %5760 = vrcp.f32 %v2801_v46  ;;  %v1591_v2 = vpop.f32.mrf.mxu1  ;;  %v5737_v21 = vpop.eup %5736 }
 0x2a4   :  { %v2807_v38 = vadd.f32 1.0, %v5729_v54  ;;  %4305 = vmatprep.mubr.f32.mxu1 %v3539_v31  ;;  %5762 = vpow2.f32 %v5094_v35  ;;  %v5100_v60 = vmul.f32 -1.442695, %v9065_v19  ;;  %v3538_v0 = vmul.f32 %v3346_v49, %v9066_v50  ;;  %v5739_v8 = vpop.eup %5738  ;;  %v9068_v54 = vld [vmem:[#allocation67_spill] sm:$0xff]  ;;  %v9069_v31 = vld [vmem:[#allocation228_spill] sm:$0xff]  ;;  %v9072_v50 = vld [vmem:[#allocation190_spill] sm:$0xff] }
 0x2a5   :  { %4133 = vmatmul.mubr.f32.gmra.mxu0 %v3620_v56  ;;  %v3633_v52 = vmul.f32 %v3441_v22, %v1585_v13  ;;  %5764 = vpow2.f32 %v5101_v1  ;;  %v5107_v27 = vmul.f32 -1.442695, %v9067_v14  ;;  %v3545_v36 = vmul.f32 %v3353_v29, %v7385_v23  ;;  %v7716_v20 = vpop.f32.mrf.mxu1  ;;  %v5741_v46 = vpop.eup %5740  ;;  %v9070_v1 = vld [vmem:[#allocation61_spill] sm:$0xff]  ;;  %v9071_v22 = vld [vmem:[#allocation219_spill] sm:$0xff] }
 0x2a6   :  { %4138 = vmatprep.mubr.f32.mxu0 %v3627_v39  ;;  %v3626_v63 = vmul.f32 %v3434_v32, %v7662_v42  ;;  %v3447_v35 = vmul.f32 %v9069_v31, %v9068_v54  ;;  %v3352_v56 = vmul.f32 %v5731_v48, %v8949_v3  ;;  %5766 = vrcp.f32 %v2800_v47  ;;  %v7721_v39 = vpop.f32.mrf.mxu0  ;;  %v5743_v13 = vpop.eup %5742  ;;  %v9073_v48 = vld [vmem:[#allocation242_spill] sm:$0xff]  ;;  %v9074_v54 = vld [vmem:[#allocation201_spill] sm:$0xff] }
 0x2a7   :  { %v2806_v49 = vadd.f32 1.0, %v5735_v11  ;;  %4306 = vmatmul.mubr.f32.gmra.mxu1 %v3538_v0  ;;  %v3440_v44 = vmul.f32 %v9071_v22, %v9070_v1  ;;  %v3359_v23 = vmul.f32 %v5733_v4, %v8960_v7  ;;  %5768 = vrcp.f32 %v2807_v38  ;;  %v1597_v32 = vpop.f32.mrf.mxu1  ;;  %v5745_v29 = vpop.eup %5744  ;;  %v9075_v1 = vld [vmem:[#allocation62_spill] sm:$0xff] }
 0x2a8   :  { %v2813_v42 = vadd.f32 1.0, %v5737_v21  ;;  %4311 = vmatprep.mubr.f32.mxu1 %v3545_v36  ;;  %5770 = vpow2.f32 %v5100_v60  ;;  %v5106_v3 = vmul.f32 -1.442695, %v9072_v50  ;;  %v3544_v47 = vmul.f32 %v3352_v56, %v9073_v48  ;;  %v5747_v0 = vpop.eup %5746  ;;  %v9076_v21 = vld [vmem:[#allocation70_spill] sm:$0xff] }
 0x2a9   :  { %4139 = vmatmul.mubr.f32.gmra.mxu0 %v3626_v63  ;;  %v3639_v11 = vmul.f32 %v3447_v35, %v1591_v2  ;;  %5772 = vpow2.f32 %v5107_v27  ;;  %v5113_v31 = vmul.f32 -1.442695, %v9074_v54  ;;  %v3551_v22 = vmul.f32 %v3359_v23, %v9075_v1  ;;  %v7731_v4 = vpop.f32.mrf.mxu1  ;;  %v5749_v38 = vpop.eup %5748  ;;  %v9077_v36 = vld [vmem:[#allocation234_spill] sm:$0xff]  ;;  %v9078_v27 = vld [vmem:[#allocation65_spill] sm:$0xff] }
 0x2aa   :  { %4144 = vmatprep.mubr.f32.mxu0 %v3633_v52  ;;  %v3632_v7 = vmul.f32 %v3440_v44, %v7684_v5  ;;  %v3453_v60 = vmul.f32 %v9077_v36, %v9076_v21  ;;  %v3358_v63 = vmul.f32 %v5739_v8, %v8967_v55  ;;  %5774 = vrcp.f32 %v2806_v49  ;;  %v7736_v52 = vpop.f32.mrf.mxu0  ;;  %v9079_v35 = vld [vmem:[#allocation225_spill] sm:$0xff]  ;;  %v9080_v55 = vld [vmem:[#allocation120_spill] sm:$0xff] }
 0x2ab   :  { %v2812_v56 = vadd.f32 1.0, %v5743_v13  ;;  %4312 = vmatmul.mubr.f32.gmra.mxu1 %v3544_v47  ;;  %v5751_v2 = vpop.eup %5750  ;;  %v3446_v48 = vmul.f32 %v9079_v35, %v9078_v27  ;;  %v3365_v23 = vmul.f32 %v5741_v46, %v8968_v25  ;;  %5776 = vrcp.f32 %v2813_v42  ;;  %v1925_v44 = vpop.f32.mrf.mxu1  ;;  %v9081_v47 = vld [vmem:[#allocation198_spill] sm:$0xff] }
 0x2ac   :  { %v2819_v5 = vadd.f32 1.0, %v5745_v29  ;;  %4317 = vmatprep.mubr.f32.mxu1 %v3551_v22  ;;  %v5753_v1 = vpop.eup %5752  ;;  %v2818_v21 = vadd.f32 1.0, %v5747_v0  ;;  %5778 = vpow2.f32 %v5106_v3  ;;  %v3550_v8 = vmul.f32 %v3358_v63, %v9080_v55  ;;  %v9082_v29 = vld [vmem:[#allocation73_spill] sm:$0xff] }
 0x2ad   :  { %4145 = vmatmul.mubr.f32.gmra.mxu0 %v3632_v7  ;;  %v3645_v49 = vmul.f32 %v3453_v60, %v1597_v32  ;;  %v5755_v13 = vpop.eup %5754  ;;  %v5112_v36 = vmul.f32 -1.442695, %v9081_v47  ;;  %5780 = vpow2.f32 %v5113_v31  ;;  %v3557_v27 = vmul.f32 %v3365_v23, %v7431_v61  ;;  %v7745_v46 = vpop.f32.mrf.mxu1  ;;  %v9083_v22 = vld [vmem:[#allocation13_spill] sm:$0xff]  ;;  %v9085_v31 = vld [vmem:[#allocation232_spill] sm:$0xff] }
 0x2ae   :  { %4150 = vmatprep.mubr.f32.mxu0 %v3639_v11  ;;  %v3638_v25 = vmul.f32 %v3446_v48, %v7700_v45  ;;  %v5757_v42 = vpop.eup %5756  ;;  %v3271_v7 = vmul.f32 %v9083_v22, %v9082_v29  ;;  %v3364_v3 = vmul.f32 %v5749_v38, %v8980_v6  ;;  %5782 = vrcp.f32 %v2812_v56  ;;  %v7750_v11 = vpop.f32.mrf.mxu0  ;;  %v9084_v60 = vld [vmem:[#allocation69_spill] sm:$0xff]  ;;  %v9086_v45 = vld [vmem:[#allocation207_spill] sm:$0xff]  ;;  %v9087_v38 = vld [vmem:[#allocation60_spill] sm:$0xff] }
 0x2af   :  { %v2825_v0 = vadd.f32 1.0, %v5751_v2  ;;  %4318 = vmatmul.mubr.f32.gmra.mxu1 %v3550_v8  ;;  %v5759_v32 = vpop.eup %5758  ;;  %v3452_v63 = vmul.f32 %v9085_v31, %v9084_v60  ;;  %v3371_v61 = vmul.f32 %v5753_v1, %v8988_v28  ;;  %5784 = vrcp.f32 %v2819_v5  ;;  %v1931_v48 = vpop.f32.mrf.mxu1 }
 0x2b0   :  { %v5119_v35 = vmul.f32 -1.442695, %v9086_v45  ;;  %4323 = vmatprep.mubr.f32.mxu1 %v3557_v27  ;;  %v5761_v23 = vpop.eup %5760  ;;  %5786 = vrcp.f32 %v2818_v21  ;;  %v2824_v6 = vadd.f32 1.0, %v5755_v13  ;;  %v3556_v56 = vmul.f32 %v3364_v3, %v9087_v38  ;;  %v9088_v27 = vld [vmem:[#allocation77_spill] sm:$0xff]  ;;  %v9090_v13 = vld [vmem:[#allocation204_spill] sm:$0xff] }
 0x2b1   :  { %4151 = vmatmul.mubr.f32.gmra.mxu0 %v3638_v25  ;;  %v3463_v2 = vmul.f32 %v3271_v7, %v1925_v44  ;;  %v5763_v55 = vpop.eup %5762  ;;  %v2831_v8 = vadd.f32 1.0, %v5757_v42  ;;  %5788 = vpow2.f32 %v5112_v36  ;;  %v3563_v29 = vmul.f32 %v3371_v61, %v7475_v43  ;;  %v7759_v5 = vpop.f32.mrf.mxu1  ;;  %v9089_v25 = vld [vmem:[#allocation17_spill] sm:$0xff]  ;;  %v9091_v36 = vld [vmem:[#allocation72_spill] sm:$0xff]  ;;  %v9092_v42 = vld [vmem:[#allocation15_spill] sm:$0xff] }
 0x2b2   :  { %4156 = vmatprep.mubr.f32.mxu0 %v3645_v49  ;;  %v3644_v28 = vmul.f32 %v3452_v63, %v7716_v20  ;;  %v5765_v1 = vpop.eup %5764  ;;  %v3277_v22 = vmul.f32 %v9089_v25, %v9088_v27  ;;  %v3370_v21 = vmul.f32 %v5759_v32, %v8995_v51  ;;  %5790 = vrcp.f32 %v2825_v0  ;;  %v7765_v49 = vpop.f32.mrf.mxu0  ;;  %v9093_v7 = vld [vmem:[#allocation213_spill] sm:$0xff]  ;;  %v9099_v25 = vld [vmem:[#allocation218_spill] sm:$0xff] }
 0x2b3   :  { %v5118_v3 = vmul.f32 -1.442695, %v9090_v13  ;;  %4324 = vmatmul.mubr.f32.gmra.mxu1 %v3556_v56  ;;  %v5767_v44 = vpop.eup %5766  ;;  %v3270_v43 = vmul.f32 %v9092_v42, %v9091_v36  ;;  %v3377_v20 = vmul.f32 %v5761_v23, %v9001_v62  ;;  %5792 = vpow2.f32 %v5119_v35  ;;  %v1937_v31 = vpop.f32.mrf.mxu1 }
 0x2b4   :  { %v5125_v60 = vmul.f32 -1.442695, %v9093_v7  ;;  %4329 = vmatprep.mubr.f32.mxu1 %v3563_v29  ;;  %v5769_v63 = vpop.eup %5768  ;;  %5794 = vrcp.f32 %v2824_v6  ;;  %v2830_v51 = vadd.f32 1.0, %v5763_v55  ;;  %v3562_v0 = vmul.f32 %v3370_v21, %v7454_v18  ;;  %v9094_v29 = vld [vmem:[#allocation81_spill] sm:$0xff]  ;;  %v9096_v55 = vld [vmem:[#allocation210_spill] sm:$0xff] }
 0x2b5   :  { %4157 = vmatmul.mubr.f32.gmra.mxu0 %v3644_v28  ;;  %v3469_v32 = vmul.f32 %v3277_v22, %v1931_v48  ;;  %v5771_v61 = vpop.eup %5770  ;;  %5796 = vrcp.f32 %v2831_v8  ;;  %v2837_v38 = vadd.f32 1.0, %v5765_v1  ;;  %v3569_v56 = vmul.f32 %v3377_v20, %v7520_v24  ;;  %v7774_v35 = vpop.f32.mrf.mxu1  ;;  %v9095_v28 = vld [vmem:[#allocation25_spill] sm:$0xff]  ;;  %v9097_v8 = vld [vmem:[#allocation75_spill] sm:$0xff] }
 0x2b6   :  { %4484 = vmatprep.mubr.f32.mxu0 %v3463_v2  ;;  %v3462_v62 = vmul.f32 %v3270_v43, %v7731_v4  ;;  %v5773_v23 = vpop.eup %5772  ;;  %v3283_v27 = vmul.f32 %v9095_v28, %v9094_v29  ;;  %v3376_v6 = vmul.f32 %v5767_v44, %v9009_v10  ;;  %5798 = vpow2.f32 %v5118_v3  ;;  %v7780_v2 = vpop.f32.mrf.mxu0  ;;  %v9098_v1 = vld [vmem:[#allocation19_spill] sm:$0xff]  ;;  %v9105_v29 = vld [vmem:[#allocation224_spill] sm:$0xff] }
 0x2b7   :  { %v5124_v18 = vmul.f32 -1.442695, %v9096_v55  ;;  %4330 = vmatmul.mubr.f32.gmra.mxu1 %v3562_v0  ;;  %v5775_v48 = vpop.eup %5774  ;;  %v3276_v24 = vmul.f32 %v9098_v1, %v9097_v8  ;;  %v3383_v4 = vmul.f32 %v5769_v63, %v9015_v26  ;;  %5800 = vpow2.f32 %v5125_v60  ;;  %v1943_v21 = vpop.f32.mrf.mxu1  ;;  %v9100_v0 = vld [vmem:[#allocation85_spill] sm:$0xff] }
 0x2b8   :  { %v5131_v22 = vmul.f32 -1.442695, %v9099_v25  ;;  %4335 = vmatprep.mubr.f32.mxu1 %v3569_v56  ;;  %v5777_v36 = vpop.eup %5776  ;;  %5802 = vrcp.f32 %v2830_v51  ;;  %v2836_v10 = vadd.f32 1.0, %v5771_v61  ;;  %v3568_v3 = vmul.f32 %v3376_v6, %v7499_v33  ;;  %v9101_v56 = vld [vmem:[#allocation237_spill] sm:$0xff]  ;;  %v9102_v61 = vld [vmem:[#allocation216_spill] sm:$0xff] }
 0x2b9   :  { %4485 = vmatmul.mubr.f32.vlgmr.msra.gmra.mxu0 %v3462_v62  ;;  %v3475_v44 = vmul.f32 %v3283_v27, %v1937_v31  ;;  %v5779_v42 = vpop.eup %5778  ;;  %5804 = vrcp.f32 %v2837_v38  ;;  %v2843_v43 = vadd.f32 1.0, %v5773_v23  ;;  %v3575_v20 = vmul.f32 %v3383_v4, %v7560_v16  ;;  %v7789_v60 = vpop.f32.mrf.mxu1  ;;  %v9103_v38 = vld [vmem:[#allocation79_spill] sm:$0xff]  ;;  %v9107_v4 = vld [vmem:[#allocation117_spill] sm:$0xff] }
 0x2ba   :  { %4490 = vmatprep.mubr.f32.mxu0 %v3469_v32  ;;  %v3468_v26 = vmul.f32 %v3276_v24, %v7745_v46  ;;  %v5781_v63 = vpop.eup %5780  ;;  %v3289_v62 = vmul.f32 %v9101_v56, %v9100_v0  ;;  %v3382_v51 = vmul.f32 %v5775_v48, %v9021_v59  ;;  %5806 = vpow2.f32 %v5124_v18  ;;  %v7795_v32 = vpop.f32.mrf.mxu0  ;;  %v9104_v23 = vld [vmem:[#allocation23_spill] sm:$0xff]  ;;  %v9106_v18 = vld [vmem:[#allocation68_spill] sm:$0xff] }
 0x2bb   :  { %v5130_v33 = vmul.f32 -1.442695, %v9102_v61  ;;  %4336 = vmatmul.mubr.f32.gmra.mxu1 %v3568_v3  ;;  %v5783_v31 = vpop.eup %5782  ;;  %v3282_v16 = vmul.f32 %v9104_v23, %v9103_v38  ;;  %v3389_v46 = vmul.f32 %v5777_v36, %v9027_v17  ;;  %5808 = vpow2.f32 %v5131_v22  ;;  %v1949_v27 = vpop.f32.mrf.mxu1 }
 0x2bc   :  { %v5137_v28 = vmul.f32 -1.442695, %v9105_v29  ;;  %4341 = vmatprep.mubr.f32.mxu1 %v3575_v20  ;;  %v5785_v6 = vpop.eup %5784  ;;  %5810 = vrcp.f32 %v2836_v10  ;;  %v2842_v59 = vadd.f32 1.0, %v5779_v42  ;;  %v3574_v48 = vmul.f32 %v3382_v51, %v9106_v18  ;;  %v9108_v20 = vld [vmem:[#allocation89_spill] sm:$0xff]  ;;  %v9110_v42 = vld [vmem:[#allocation222_spill] sm:$0xff]  ;;  %v9113_v51 = vld [vmem:[#allocation231_spill] sm:$0xff] }
 0x2bd   :  { %4491 = vmatmul.mubr.f32.gmra.mxu0 %v3468_v26  ;;  %v3481_v8 = vmul.f32 %v3289_v62, %v1943_v21  ;;  %v5787_v1 = vpop.eup %5786  ;;  %5812 = vrcp.f32 %v2843_v43  ;;  %v2849_v24 = vadd.f32 1.0, %v5781_v63  ;;  %v3581_v3 = vmul.f32 %v3389_v46, %v9107_v4  ;;  %v7804_v22 = vpop.f32.mrf.mxu1  ;;  %v9109_v26 = vld [vmem:[#allocation241_spill] sm:$0xff]  ;;  %v9111_v43 = vld [vmem:[#allocation83_spill] sm:$0xff]  ;;  %v9112_v63 = vld [vmem:[#allocation236_spill] sm:$0xff] }
 0x2be   :  { %4496 = vmatprep.mubr.f32.mxu0 %v3475_v44  ;;  %v3474_v17 = vmul.f32 %v3282_v16, %v7759_v5  ;;  %v5789_v36 = vpop.eup %5788  ;;  %v3295_v0 = vmul.f32 %v9109_v26, %v9108_v20  ;;  %v3388_v10 = vmul.f32 %v5783_v31, %v9034_v57  ;;  %5814 = vpow2.f32 %v5130_v33  ;;  %v7810_v44 = vpop.f32.mrf.mxu0  ;;  %v9114_v57 = vld [vmem:[#allocation235_spill] sm:$0xff]  ;;  %v9115_v31 = vld [vmem:[#allocation128_spill] sm:$0xff]  ;;  %v9116_v20 = vld [vmem:[#allocation130_spill] sm:$0xff] }
 0x2bf   :  { %v5136_v56 = vmul.f32 -1.442695, %v9110_v42  ;;  %4342 = vmatmul.mubr.f32.gmra.mxu1 %v3574_v48  ;;  %v5791_v21 = vpop.eup %5790  ;;  %v3288_v62 = vmul.f32 %v9112_v63, %v9111_v43  ;;  %v3395_v5 = vmul.f32 %v5785_v6, %v9039_v40  ;;  %5816 = vpow2.f32 %v5137_v28  ;;  %v1955_v23 = vpop.f32.mrf.mxu1  ;;  %v9119_v63 = vld [vmem:[#allocation168_spill] sm:$0xff] }
 0x2c0   :  { %v5143_v38 = vmul.f32 -1.442695, %v9113_v51  ;;  %4347 = vmatprep.mubr.f32.mxu1 %v3581_v3  ;;  %v5793_v16 = vpop.eup %5792  ;;  %v2778_v33 = vadd.f32 1.0, %v9114_v57  ;;  %5818 = vrcp.f32 %v2842_v59  ;;  %v3580_v46 = vmul.f32 %v3388_v10, %v9115_v31  ;;  %v9117_v3 = vld [vmem:[#allocation93_spill] sm:$0xff]  ;;  %v9120_v59 = vld [vmem:[#allocation227_spill] sm:$0xff] }
 0x2c1   :  { %4497 = vmatmul.mubr.f32.gmra.mxu0 %v3474_v17  ;;  %v3487_v18 = vmul.f32 %v3295_v0, %v1949_v27  ;;  %v5795_v48 = vpop.eup %5794  ;;  %v2848_v4 = vadd.f32 1.0, %v5789_v36  ;;  %5820 = vrcp.f32 %v2849_v24  ;;  %v3587_v26 = vmul.f32 %v3395_v5, %v9116_v20  ;;  %v7820_v28 = vpop.f32.mrf.mxu1  ;;  %v9118_v17 = vld [vmem:[#allocation191_spill] sm:$0xff]  ;;  %v9124_v20 = vld [vmem:[#allocation14_spill] sm:$0xff] }
 0x2c2   :  { %4502 = vmatprep.mubr.f32.mxu0 %v3481_v8  ;;  %v3480_v40 = vmul.f32 %v3288_v62, %v7774_v35  ;;  %v5797_v6 = vpop.eup %5796  ;;  %v3301_v43 = vmul.f32 %v9118_v17, %v9117_v3  ;;  %v3394_v57 = vmul.f32 %v5787_v1, %v9119_v63  ;;  %5822 = vpow2.f32 %v5136_v56  ;;  %v7826_v8 = vpop.f32.mrf.mxu0  ;;  %v9121_v24 = vld [vmem:[#allocation87_spill] sm:$0xff]  ;;  %v9123_v1 = vld [vmem:[#allocation20_spill] sm:$0xff]  ;;  %v9125_v63 = vld [vmem:[#allocation146_spill] sm:$0xff] }
 0x2c3   :  { %v5142_v10 = vmul.f32 -1.442695, %v9120_v59  ;;  %4348 = vmatmul.mubr.f32.gmra.mxu1 %v3580_v46  ;;  %v5799_v27 = vpop.eup %5798  ;;  %v9122_v36 = vld [vmem:[#allocation239_spill] sm:$0xff]  ;;  %v3401_v35 = vmul.f32 %v5791_v21, %v9046_v58  ;;  %v2855_v62 = vadd.f32 1.0, %v5793_v16  ;;  %5824 = vpow2.f32 %v5143_v38  ;;  %v1961_v5 = vpop.f32.mrf.mxu1  ;;  %v9126_v16 = vld [vmem:[#allocation97_spill] sm:$0xff] }
 0x2c4   :  { %v3294_v0 = vmul.f32 %v9122_v36, %v9121_v24  ;;  %4353 = vmatprep.mubr.f32.mxu1 %v3587_v26  ;;  %v5801_v31 = vpop.eup %5800  ;;  %5826 = vrcp.f32 %v2778_v33  ;;  %v2779_v56 = vadd.f32 1.0, %v9123_v1  ;;  %v3586_v3 = vmul.f32 %v3394_v57, %v9124_v20  ;;  %v9127_v26 = vld [vmem:[#allocation58_spill] sm:$0xff]  ;;  %v9130_v1 = vld [vmem:[#allocation143_spill] sm:$0xff] }
 0x2c5   :  { %4503 = vmatmul.mubr.f32.gmra.mxu0 %v3480_v40  ;;  %v3493_v17 = vmul.f32 %v3301_v43, %v1955_v23  ;;  %v5803_v46 = vpop.eup %5802  ;;  %v5055_v59 = vmul.f32 -1.442695, %v9125_v63  ;;  %5828 = vrcp.f32 %v2848_v4  ;;  %v3593_v24 = vmul.f32 %v3401_v35, %v7690_v53  ;;  %v7836_v21 = vpop.f32.mrf.mxu1  ;;  %v9128_v43 = vld [vmem:[#allocation91_spill] sm:$0xff]  ;;  %v9129_v4 = vld [vmem:[#allocation46_spill] sm:$0xff] }
 0x2c6   :  { %4508 = vmatprep.mubr.f32.mxu0 %v3487_v18  ;;  %v3486_v58 = vmul.f32 %v3294_v0, %v7789_v60  ;;  %v5805_v38 = vpop.eup %5804  ;;  %v3307_v33 = vmul.f32 %v9127_v26, %v9126_v16  ;;  %v3400_v40 = vmul.f32 %v5795_v48, %v9049_v15  ;;  %v2854_v36 = vadd.f32 1.0, %v5799_v27  ;;  %v7841_v18 = vpop.f32.mrf.mxu0  ;;  %v9131_v20 = vld [vmem:[#allocation151_spill] sm:$0xff]  ;;  %v9135_v26 = vld [vmem:[#allocation54_spill] sm:$0xff] }
 0x2c7   :  { %5830 = vpow2.f32 %v5142_v10  ;;  %4354 = vmatmul.mubr.f32.gmra.mxu1 %v3586_v3  ;;  %v5807_v23 = vpop.eup %5806  ;;  %v3300_v57 = vmul.f32 %v9129_v4, %v9128_v43  ;;  %v3407_v53 = vmul.f32 %v5797_v6, %v9051_v41  ;;  %v2861_v60 = vadd.f32 1.0, %v5801_v31  ;;  %v1967_v0 = vpop.f32.mrf.mxu1  ;;  %v9132_v31 = vld [vmem:[#allocation101_spill] sm:$0xff] }
 0x2c8   :  { %5832 = vrcp.f32 %v2855_v62  ;;  %4359 = vmatprep.mubr.f32.mxu1 %v3593_v24  ;;  %v5809_v35 = vpop.eup %5808  ;;  %v5054_v15 = vmul.f32 -1.442695, %v9130_v1  ;;  %v3592_v48 = vmul.f32 %v3400_v40, %v7671_v30  ;;  %v3499_v10 = vmul.f32 %v3307_v33, %v1961_v5  ;;  %v9133_v24 = vld [vmem:[#allocation66_spill] sm:$0xff]  ;;  %v9134_v5 = vld [vmem:[#allocation95_spill] sm:$0xff]  ;;  %v9136_v4 = vld [vmem:[#allocation149_spill] sm:$0xff] }
 0x2c9   :  { %4509 = vmatmul.mubr.f32.gmra.mxu0 %v3486_v58  ;;  %5834 = vrcp.f32 %v2779_v56  ;;  %v5811_v27 = vpop.eup %5810  ;;  %v5061_v3 = vmul.f32 -1.442695, %v9131_v20  ;;  %v3599_v16 = vmul.f32 %v3407_v53, %v7721_v39  ;;  %v3492_v41 = vmul.f32 %v3300_v57, %v7804_v22  ;;  %v7851_v6 = vpop.f32.mrf.mxu1  ;;  %v9137_v57 = vld [vmem:[#allocation156_spill] sm:$0xff] }
 0x2ca   :  { %4514 = vmatprep.mubr.f32.mxu0 %v3493_v17  ;;  %5836 = vpow2.f32 %v5055_v59  ;;  %v5813_v62 = vpop.eup %5812  ;;  %v3313_v56 = vmul.f32 %v9133_v24, %v9132_v31  ;;  %v3406_v58 = vmul.f32 %v5803_v46, %v9057_v37  ;;  %v2860_v30 = vadd.f32 1.0, %v5807_v23  ;;  %v7856_v17 = vpop.f32.mrf.mxu0  ;;  %v9141_v31 = vld [vmem:[#allocation56_spill] sm:$0xff] }
 0x2cb   :  { %5838 = vrcp.f32 %v2854_v36  ;;  %4360 = vmatmul.mubr.f32.gmra.mxu1 %v3592_v48  ;;  %v5815_v59 = vpop.eup %5814  ;;  %v3306_v33 = vmul.f32 %v9135_v26, %v9134_v5  ;;  %v3413_v39 = vmul.f32 %v5805_v38, %v9059_v34  ;;  %v2867_v22 = vadd.f32 1.0, %v5809_v35  ;;  %v1973_v40 = vpop.f32.mrf.mxu1  ;;  %v9143_v26 = vld [vmem:[#allocation161_spill] sm:$0xff] }
 0x2cc   :  { %5840 = vrcp.f32 %v2861_v60  ;;  %4365 = vmatprep.mubr.f32.mxu1 %v3599_v16  ;;  %v5817_v43 = vpop.eup %5816  ;;  %v5060_v37 = vmul.f32 -1.442695, %v9136_v4  ;;  %v3598_v46 = vmul.f32 %v3406_v58, %v7706_v12  ;;  %v3505_v36 = vmul.f32 %v3313_v56, %v1967_v0  ;;  %v7869_v16 = vpop.f32.mrf.mxu0  ;;  %v9138_v12 = vld [vmem:[#allocation106_spill] sm:$0xff]  ;;  %v9139_v0 = vld [vmem:[#allocation64_spill] sm:$0xff] }
 0x2cd   :  { %4515 = vmatmul.mubr.f32.gmra.mxu0 %v3492_v41  ;;  %5842 = vpow2.f32 %v5054_v15  ;;  %v5819_v23 = vpop.eup %5818  ;;  %v5067_v53 = vmul.f32 -1.442695, %v9137_v57  ;;  %v3605_v48 = vmul.f32 %v3413_v39, %v7750_v11  ;;  %v3498_v34 = vmul.f32 %v3306_v33, %v7820_v28  ;;  %v7866_v38 = vpop.f32.mrf.mxu1  ;;  %v9140_v41 = vld [vmem:[#allocation99_spill] sm:$0xff] }
 0x2ce   :  { %4520 = vmatprep.mubr.f32.mxu0 %v3499_v10  ;;  %5844 = vpow2.f32 %v5061_v3  ;;  %v5821_v60 = vpop.eup %5820  ;;  %v3412_v35 = vmul.f32 %v5811_v27, %v9065_v19  ;;  %v2866_v15 = vadd.f32 1.0, %v5815_v59  ;;  %v3319_v10 = vmul.f32 %v9139_v0, %v9138_v12  ;;  %v9142_v27 = vld [vmem:[#allocation153_spill] sm:$0xff] }
 0x2cf   :  { %5846 = vrcp.f32 %v2860_v30  ;;  %4366 = vmatmul.mubr.f32.gmra.mxu1 %v3598_v46  ;;  %v5823_v3 = vpop.eup %5822  ;;  %v3312_v24 = vmul.f32 %v9141_v31, %v9140_v41  ;;  %v3419_v11 = vmul.f32 %v5813_v62, %v9067_v14  ;;  %v2873_v28 = vadd.f32 1.0, %v5817_v43  ;;  %v1979_v56 = vpop.f32.mrf.mxu1 }
 0x2d0   :  { %5848 = vrcp.f32 %v2867_v22  ;;  %4371 = vmatprep.mubr.f32.mxu1 %v3605_v48  ;;  %v5825_v19 = vpop.eup %5824  ;;  %v5066_v58 = vmul.f32 -1.442695, %v9142_v27  ;;  %v3604_v30 = vmul.f32 %v3412_v35, %v7736_v52  ;;  %v3511_v59 = vmul.f32 %v3319_v10, %v1973_v40  ;;  %v7886_v46 = vpop.f32.mrf.mxu0  ;;  %v9144_v52 = vld [vmem:[#allocation111_spill] sm:$0xff]  ;;  %v9145_v40 = vld [vmem:[#allocation16_spill] sm:$0xff] }
 0x2d1   :  { %4521 = vmatmul.mubr.f32.gmra.mxu0 %v3498_v34  ;;  %5850 = vpow2.f32 %v5060_v37  ;;  %v7878_v5 = vpop.eup %5826  ;;  %v5073_v33 = vmul.f32 -1.442695, %v9143_v26  ;;  %v3611_v14 = vmul.f32 %v3419_v11, %v7780_v2  ;;  %v3504_v62 = vmul.f32 %v3312_v24, %v7836_v21  ;;  %v7883_v39 = vpop.f32.mrf.mxu1  ;;  %v9146_v48 = vld [vmem:[#allocation103_spill] sm:$0xff]  ;;  %v9147_v34 = vld [vmem:[#allocation122_spill] sm:$0xff] }
 0x2d2   :  { %4526 = vmatprep.mubr.f32.mxu0 %v3505_v36  ;;  %5852 = vpow2.f32 %v5067_v53  ;;  %v5829_v22 = vpop.eup %5828  ;;  %v3418_v43 = vmul.f32 %v5819_v23, %v9072_v50  ;;  %v2872_v37 = vadd.f32 1.0, %v5823_v3  ;;  %v3325_v36 = vmul.f32 %v9145_v40, %v9144_v52  ;;  %v9148_v3 = vld [vmem:[#allocation166_spill] sm:$0xff] }
 0x2d3   :  { %5854 = vrcp.f32 %v2866_v15  ;;  %4372 = vmatmul.mubr.f32.gmra.mxu1 %v3604_v30  ;;  %v3318_v35 = vmul.f32 %v9147_v34, %v9146_v48  ;;  %v3425_v2 = vmul.f32 %v5821_v60, %v9074_v54  ;;  %v2879_v21 = vadd.f32 1.0, %v5825_v19  ;;  %v1985_v12 = vpop.f32.mrf.mxu1  ;;  %v9151_v30 = vld [vmem:[#allocation109_spill] sm:$0xff] }
 0x2d4   :  { %v5831_v53 = vpop.eup %5830  ;;  %5856 = vrcp.f32 %v2873_v28  ;;  %4377 = vmatprep.mubr.f32.mxu1 %v3611_v14  ;;  %v2785_v23 = vadd.f32 1.0, %v7679_v9  ;;  %v3610_v15 = vmul.f32 %v3418_v43, %v7765_v49  ;;  %v3517_v0 = vmul.f32 %v3325_v36, %v1979_v56  ;;  %v7903_v28 = vpop.f32.mrf.mxu0  ;;  %v9149_v49 = vld [vmem:[#allocation116_spill] sm:$0xff]  ;;  %v9150_v56 = vld [vmem:[#allocation71_spill] sm:$0xff] }
 0x2d5   :  { %4527 = vmatmul.mubr.f32.gmra.mxu0 %v3504_v62  ;;  %v5833_v50 = vpop.eup %5832  ;;  %5858 = vpow2.f32 %v5066_v58  ;;  %v5079_v41 = vmul.f32 -1.442695, %v9148_v3  ;;  %v3617_v54 = vmul.f32 %v3425_v2, %v7810_v44  ;;  %v3510_v60 = vmul.f32 %v3318_v35, %v7851_v6  ;;  %v7900_v31 = vpop.f32.mrf.mxu1  ;;  %v9153_v44 = vld [vmem:[#allocation159_spill] sm:$0xff]  ;;  %v9155_v36 = vld [vmem:[#allocation80_spill] sm:$0xff] }
 0x2d6   :  { %4532 = vmatprep.mubr.f32.mxu0 %v3511_v59  ;;  %v7895_v10 = vpop.eup %5834  ;;  %5860 = vpow2.f32 %v5073_v33  ;;  %v3424_v11 = vmul.f32 %v5829_v22, %v9081_v47  ;;  %v2878_v9 = vadd.f32 1.0, %v5831_v53  ;;  %v3331_v19 = vmul.f32 %v9150_v56, %v9149_v49  ;;  %v9152_v59 = vld [vmem:[#allocation125_spill] sm:$0xff]  ;;  %v9154_v22 = vld [vmem:[#allocation171_spill] sm:$0xff] }
 0x2d7   :  { %v5837_v24 = vpop.eup %5836  ;;  %5862 = vrcp.f32 %v2872_v37  ;;  %4378 = vmatmul.mubr.f32.gmra.mxu1 %v3610_v15  ;;  %v3324_v33 = vmul.f32 %v9152_v59, %v9151_v30  ;;  %v5072_v14 = vmul.f32 -1.442695, %v9153_v44  ;;  %v3431_v6 = vmul.f32 %v5833_v50, %v9086_v45  ;;  %v1991_v47 = vpop.f32.mrf.mxu1 }
 0x2d8   :  { %v5839_v58 = vpop.eup %5838  ;;  %5864 = vrcp.f32 %v2879_v21  ;;  %4383 = vmatprep.mubr.f32.mxu1 %v3617_v54  ;;  %v5085_v43 = vmul.f32 -1.442695, %v9154_v22  ;;  %v3616_v37 = vmul.f32 %v3424_v11, %v7795_v32  ;;  %v3523_v52 = vmul.f32 %v3331_v19, %v1985_v12  ;;  %v7919_v50 = vpop.f32.mrf.mxu0  ;;  %v9156_v32 = vld [vmem:[#allocation121_spill] sm:$0xff]  ;;  %v9157_v12 = vld [vmem:[#allocation76_spill] sm:$0xff] }
 0x2d9   :  { %4533 = vmatmul.mubr.f32.gmra.mxu0 %v3510_v60  ;;  %v5841_v62 = vpop.eup %5840  ;;  %5866 = vrcp.f32 %v2785_v23  ;;  %v2784_v53 = vadd.f32 1.0, %v9155_v36  ;;  %v3623_v48 = vmul.f32 %v3431_v6, %v7841_v18  ;;  %v3516_v45 = vmul.f32 %v3324_v33, %v7866_v38  ;;  %v7916_v34 = vpop.f32.mrf.mxu1  ;;  %v9160_v18 = vld [vmem:[#allocation163_spill] sm:$0xff]  ;;  %v9161_v33 = vld [vmem:[#allocation177_spill] sm:$0xff] }
 0x2da   :  { %4538 = vmatprep.mubr.f32.mxu0 %v3517_v0  ;;  %v5843_v40 = vpop.eup %5842  ;;  %5868 = vpow2.f32 %v5079_v41  ;;  %v2791_v2 = vadd.f32 1.0, %v5837_v24  ;;  %v3430_v21 = vmul.f32 %v5839_v58, %v9090_v13  ;;  %v3337_v23 = vmul.f32 %v9157_v12, %v9156_v32  ;;  %v9158_v0 = vld [vmem:[#allocation113_spill] sm:$0xff]  ;;  %v9159_v41 = vld [vmem:[#allocation107_spill] sm:$0xff]  ;;  %v9168_v12 = vld [vmem:[#allocation182_spill] sm:$0xff] }
 0x2db   :  { %v5845_v35 = vpop.eup %5844  ;;  %5870 = vrcp.f32 %v2878_v9  ;;  %4384 = vmatmul.mubr.f32.gmra.mxu1 %v3616_v37  ;;  %v3330_v54 = vmul.f32 %v9159_v41, %v9158_v0  ;;  %v5078_v38 = vmul.f32 -1.442695, %v9160_v18  ;;  %v3437_v60 = vmul.f32 %v5841_v62, %v9093_v7  ;;  %v1997_v24 = vpop.f32.mrf.mxu1 }
 0x2dc   :  { %v5847_v15 = vpop.eup %5846  ;;  %5872 = vpow2.f32 %v5072_v14  ;;  %4389 = vmatprep.mubr.f32.mxu1 %v3623_v48  ;;  %v2790_v11 = vadd.f32 1.0, %v5843_v40  ;;  %v3622_v9 = vmul.f32 %v3430_v21, %v7826_v8  ;;  %v3529_v49 = vmul.f32 %v3337_v23, %v1991_v47  ;;  %v1848_v62 = vpop.f32.mrf.mxu0  ;;  %v9162_v8 = vld [vmem:[#allocation126_spill] sm:$0xff] }
 0x2dd   :  { %4539 = vmatmul.mubr.f32.gmra.mxu0 %v3516_v45  ;;  %v5849_v13 = vpop.eup %5848  ;;  %5874 = vpow2.f32 %v5085_v43  ;;  %v2797_v19 = vadd.f32 1.0, %v5845_v35  ;;  %v3629_v58 = vmul.f32 %v3437_v60, %v7869_v16  ;;  %v3522_v30 = vmul.f32 %v3330_v54, %v7883_v39  ;;  %v7930_v59 = vpop.f32.mrf.mxu1  ;;  %v9163_v43 = vld [vmem:[#allocation104_spill] sm:$0xff]  ;;  %v9165_v40 = vld [vmem:[#allocation230_spill] sm:$0xff]  ;;  %v9166_v16 = vld [vmem:[#allocation169_spill] sm:$0xff] }
 0x2de   :  { %4544 = vmatprep.mubr.f32.mxu0 %v3523_v52  ;;  %v5851_v56 = vpop.eup %5850  ;;  %5876 = vrcp.f32 %v2784_v53  ;;  %v5091_v14 = vmul.f32 -1.442695, %v9161_v33  ;;  %v3436_v6 = vmul.f32 %v5847_v15, %v9096_v55  ;;  %v3343_v47 = vmul.f32 %v9163_v43, %v9162_v8  ;;  %v9164_v52 = vld [vmem:[#allocation119_spill] sm:$0xff]  ;;  %v9167_v55 = vld [vmem:[#allocation174_spill] sm:$0xff]  ;;  %v7948_v60 = vpop.f32.mrf.mxu0  ;;  %v9174_v43 = vld [vmem:[#allocation189_spill] sm:$0xff] }
 0x2df   :  { %v5853_v7 = vpop.eup %5852  ;;  %5878 = vrcp.f32 %v2791_v2  ;;  %4390 = vmatmul.mubr.f32.gmra.mxu1 %v3622_v9  ;;  %v3336_v36 = vmul.f32 %v9165_v40, %v9164_v52  ;;  %v5084_v39 = vmul.f32 -1.442695, %v9166_v16  ;;  %v3443_v53 = vmul.f32 %v5849_v13, %v9099_v25  ;;  %v2003_v48 = vpop.f32.mrf.mxu1  ;;  %v9171_v9 = vld [vmem:[#allocation123_spill] sm:$0xff] }
 0x2e0   :  { %v5855_v37 = vpop.eup %5854  ;;  %5880 = vpow2.f32 %v5078_v38  ;;  %4395 = vmatprep.mubr.f32.mxu1 %v3629_v58  ;;  %v5090_v35 = vmul.f32 -1.442695, %v9167_v55  ;;  %v3628_v2 = vmul.f32 %v3436_v6, %v7856_v17  ;;  %v3535_v21 = vmul.f32 %v3343_v47, %v1997_v24  ;;  %v9169_v17 = vld [vmem:[#allocation131_spill] sm:$0xff] }
 0x2e1   :  { %4545 = vmatmul.mubr.f32.gmra.mxu0 %v3522_v30  ;;  %v5857_v45 = vpop.eup %5856  ;;  %5882 = vrcp.f32 %v2790_v11  ;;  %v5097_v23 = vmul.f32 -1.442695, %v9168_v12  ;;  %v3635_v15 = vmul.f32 %v3443_v53, %v7903_v28  ;;  %v3528_v0 = vmul.f32 %v3336_v36, %v7900_v31  ;;  %v7945_v25 = vpop.f32.mrf.mxu1  ;;  %v9170_v24 = vld [vmem:[#allocation127_spill] sm:$0xff]  ;;  %v9175_v53 = vld [vmem:[#allocation136_spill] sm:$0xff] }
 0x2e2   :  { %4550 = vmatprep.mubr.f32.mxu0 %v3529_v49  ;;  %v5859_v32 = vpop.eup %5858  ;;  %5884 = vrcp.f32 %v2797_v19  ;;  %v2803_v54 = vadd.f32 1.0, %v5853_v7  ;;  %v3442_v38 = vmul.f32 %v5855_v37, %v9102_v61  ;;  %v3349_v13 = vmul.f32 %v9170_v24, %v9169_v17  ;;  %v9172_v49 = vld [vmem:[#allocation74_spill] sm:$0xff]  ;;  %v9173_v61 = vld [vmem:[#allocation180_spill] sm:$0xff] }
 0x2e3   :  { %v5861_v41 = vpop.eup %5860  ;;  %5886 = vpow2.f32 %v5091_v14  ;;  %4396 = vmatmul.mubr.f32.gmra.mxu1 %v3628_v2  ;;  %v3342_v19 = vmul.f32 %v9172_v49, %v9171_v9  ;;  %v2796_v28 = vadd.f32 1.0, %v5851_v56  ;;  %v3449_v31 = vmul.f32 %v5857_v45, %v9105_v29  ;;  %v2009_v58 = vpop.f32.mrf.mxu1  ;;  %v9176_v45 = vld [vmem:[#allocation129_spill] sm:$0xff] }
 0x2e4   :  { %v5863_v11 = vpop.eup %5862  ;;  %5888 = vpow2.f32 %v5084_v39  ;;  %4401 = vmatprep.mubr.f32.mxu1 %v3635_v15  ;;  %v5096_v7 = vmul.f32 -1.442695, %v9173_v61  ;;  %v3634_v14 = vmul.f32 %v3442_v38, %v7886_v46  ;;  %v3541_v6 = vmul.f32 %v3349_v13, %v2003_v48  ;;  %v1854_v39 = vpop.f32.mrf.mxu0  ;;  %v9178_v15 = vld [vmem:[#allocation185_spill] sm:$0xff] }
 0x2e5   :  { %4551 = vmatmul.mubr.f32.gmra.mxu0 %v3528_v0  ;;  %v5865_v30 = vpop.eup %5864  ;;  %5890 = vpow2.f32 %v5090_v35  ;;  %v5103_v47 = vmul.f32 -1.442695, %v9174_v43  ;;  %v3641_v37 = vmul.f32 %v3449_v31, %v1848_v62  ;;  %v3534_v56 = vmul.f32 %v3342_v19, %v7916_v34  ;;  %v7959_v52 = vpop.f32.mrf.mxu1  ;;  %v9177_v35 = vld [vmem:[#allocation24_spill] sm:$0xff]  ;;  %v9181_v49 = vld [vmem:[#allocation141_spill] sm:$0xff] }
 0x2e6   :  { %4556 = vmatprep.mubr.f32.mxu0 %v3535_v21  ;;  %v5867_v8 = vpop.eup %5866  ;;  %5892 = vpow2.f32 %v5097_v23  ;;  %v2809_v40 = vadd.f32 1.0, %v5861_v41  ;;  %v3448_v36 = vmul.f32 %v5863_v11, %v9110_v42  ;;  %v3355_v46 = vmul.f32 %v7895_v10, %v9175_v53  ;;  %v9180_v11 = vld [vmem:[#allocation227_spill] sm:$0xff] }
 0x2e7   :  { %v5869_v29 = vpop.eup %5868  ;;  %5894 = vrcp.f32 %v2803_v54  ;;  %4402 = vmatmul.mubr.f32.gmra.mxu1 %v3634_v14  ;;  %v3348_v2 = vmul.f32 %v9177_v35, %v9176_v45  ;;  %v2802_v62 = vadd.f32 1.0, %v5859_v32  ;;  %v3455_v34 = vmul.f32 %v5865_v30, %v9113_v51  ;;  %v2015_v21 = vpop.f32.mrf.mxu1  ;;  %v9179_v54 = vld [vmem:[#allocation197_spill] sm:$0xff] }
 0x2e8   :  { %v5871_v48 = vpop.eup %5870  ;;  %5896 = vrcp.f32 %v2796_v28  ;;  %4407 = vmatprep.mubr.f32.mxu1 %v3641_v37  ;;  %v5102_v42 = vmul.f32 -1.442695, %v9178_v15  ;;  %v3640_v0 = vmul.f32 %v3448_v36, %v7919_v50  ;;  %v3547_v41 = vmul.f32 %v3355_v46, %v2009_v58  ;;  %v9182_v28 = vld [vmem:[#allocation133_spill] sm:$0xff]  ;;  %v9183_v37 = vld [vmem:[#allocation192_spill] sm:$0xff]  ;;  %v9185_v46 = vld [vmem:[#allocation139_spill] sm:$0xff] }
 0x2e9   :  { %4557 = vmatmul.mubr.f32.gmra.mxu0 %v3534_v56  ;;  %v5873_v23 = vpop.eup %5872  ;;  %5898 = vpow2.f32 %v5096_v7  ;;  %v5109_v38 = vmul.f32 -1.442695, %v9179_v54  ;;  %v3647_v17 = vmul.f32 %v3455_v34, %v1854_v39  ;;  %v3540_v32 = vmul.f32 %v3348_v2, %v7930_v59  ;;  %v7971_v24 = vpop.f32.mrf.mxu1 }
 0x2ea   :  { %4562 = vmatprep.mubr.f32.mxu0 %v3541_v6  ;;  %v5875_v10 = vpop.eup %5874  ;;  %5900 = vpow2.f32 %v5103_v47  ;;  %v2815_v13 = vadd.f32 1.0, %v5869_v29  ;;  %v3454_v9 = vmul.f32 %v5871_v48, %v9180_v11  ;;  %v3361_v19 = vmul.f32 %v5867_v8, %v9181_v49 }
 0x2eb   :  { %v5877_v51 = vpop.eup %5876  ;;  %5902 = vrcp.f32 %v2809_v40  ;;  %4408 = vmatmul.mubr.f32.gmra.mxu1 %v3640_v0  ;;  %v3354_v31 = vmul.f32 %v7878_v5, %v9182_v28  ;;  %v2808_v58 = vadd.f32 1.0, %v5873_v23  ;;  %v2021_v30 = vpop.f32.mrf.mxu1  ;;  %v2821_v7 = vadd.f32 1.0, %v5875_v10  ;;  %v9184_v40 = vld [vmem:[#allocation203_spill] sm:$0xff]  ;;  %v9187_v23 = vld [vmem:[#allocation209_spill] sm:$0xff] }
 0x2ec   :  { %v5879_v50 = vpop.eup %5878  ;;  %5904 = vrcp.f32 %v2802_v62  ;;  %4413 = vmatprep.mubr.f32.mxu1 %v3647_v17  ;;  %v3646_v14 = vmul.f32 %v3454_v9, %v7948_v60  ;;  %v3553_v6 = vmul.f32 %v3361_v19, %v2015_v21  ;;  %v5108_v56 = vmul.f32 -1.442695, %v9183_v37  ;;  %v7985_v35 = vpop.f32.mrf.mxu0 }
 0x2ed   :  { %4563 = vmatmul.mubr.f32.gmra.mxu0 %v3540_v32  ;;  %v5881_v59 = vpop.eup %5880  ;;  %5906 = vpow2.f32 %v5102_v42  ;;  %v3546_v8 = vmul.f32 %v3354_v31, %v7945_v25  ;;  %v7980_v29 = vpop.f32.mrf.mxu1  ;;  %v5115_v36 = vmul.f32 -1.442695, %v9184_v40  ;;  %v3367_v39 = vmul.f32 %v5879_v50, %v9125_v63  ;;  %v9186_v25 = vld [vmem:[#allocation199_spill] sm:$0xff] }
 0x2ee   :  { %4568 = vmatprep.mubr.f32.mxu0 %v3547_v41  ;;  %v5883_v47 = vpop.eup %5882  ;;  %5908 = vpow2.f32 %v5109_v38  ;;  %v3360_v60 = vmul.f32 %v5877_v51, %v9185_v46  ;;  %v2814_v48 = vadd.f32 1.0, %v5881_v59  ;;  %v5114_v62 = vmul.f32 -1.442695, %v9186_v25  ;;  %v7992_v41 = vpop.f32.mrf.mxu0 }
 0x2ef   :  { %v5885_v5 = vpop.eup %5884  ;;  %5910 = vrcp.f32 %v2815_v13  ;;  %4414 = vmatmul.mubr.f32.gmra.mxu1 %v3646_v14  ;;  %v2027_v45 = vpop.f32.mrf.mxu1  ;;  %v3559_v34 = vmul.f32 %v3367_v39, %v2021_v30  ;;  %v5121_v42 = vmul.f32 -1.442695, %v9187_v23  ;;  %v3366_v51 = vmul.f32 %v5883_v47, %v9130_v1  ;;  %v9188_v30 = vld [vmem:[#allocation214_spill] sm:$0xff]  ;;  %v9189_v47 = vld [vmem:[#allocation205_spill] sm:$0xff] }
 0x2f0   :  { %v5887_v53 = vpop.eup %5886  ;;  %5912 = vrcp.f32 %v2808_v58  ;;  %v3552_v63 = vmul.f32 %v3360_v60, %v7959_v52  ;;  %v3373_v17 = vmul.f32 %v5885_v5, %v9131_v20  ;;  %v7996_v9 = vpop.f32.mrf.mxu0  ;;  %v5127_v59 = vmul.f32 -1.442695, %v9188_v30 }
 0x2f1   :  { %4569 = vmatmul.mubr.f32.gmra.mxu0 %v3546_v8  ;;  %v5889_v2 = vpop.eup %5888  ;;  %5914 = vrcp.f32 %v2821_v7  ;;  %v7990_v0 = vpop.f32.mrf.mxu1  ;;  %v2827_v38 = vadd.f32 1.0, %v5887_v53  ;;  %v3558_v31 = vmul.f32 %v3366_v51, %v7971_v24 }
 0x2f2   :  { %4574 = vmatprep.mubr.f32.mxu0 %v3553_v6  ;;  %v5891_v21 = vpop.eup %5890  ;;  %5916 = vpow2.f32 %v5108_v56  ;;  %v2820_v13 = vadd.f32 1.0, %v5889_v2  ;;  %v3565_v19 = vmul.f32 %v3373_v17, %v2027_v45  ;;  %v8001_v58 = vpop.f32.mrf.mxu0  ;;  %v5120_v56 = vmul.f32 -1.442695, %v9189_v47  ;;  %v9190_v45 = vld [vmem:[#allocation220_spill] sm:$0xff] }
 0x2f3   :  { %v5893_v10 = vpop.eup %5892  ;;  %5918 = vpow2.f32 %v5115_v36  ;;  %v2033_v11 = vpop.f32.mrf.mxu1  ;;  %v2826_v52 = vadd.f32 1.0, %v5891_v21  ;;  %v5133_v2 = vmul.f32 -1.442695, %v9190_v45 }
 0x2f4   :  { %v5895_v32 = vpop.eup %5894  ;;  %5920 = vrcp.f32 %v2814_v48  ;;  %v2833_v28 = vadd.f32 1.0, %v5893_v10  ;;  %v8007_v5 = vpop.f32.mrf.mxu0 }
 0x2f5   :  { %4575 = vmatmul.mubr.f32.gmra.mxu0 %v3552_v63  ;;  %v5897_v49 = vpop.eup %5896  ;;  %5922 = vpow2.f32 %v5114_v62  ;;  %v7999_v20 = vpop.f32.mrf.mxu1  ;;  %v3379_v7 = vmul.f32 %v5895_v32, %v9137_v57 }
 0x2f6   :  { %4580 = vmatprep.mubr.f32.mxu0 %v3559_v34  ;;  %v5899_v50 = vpop.eup %5898  ;;  %5924 = vpow2.f32 %v5121_v42  ;;  %v3372_v6 = vmul.f32 %v5897_v49, %v9136_v4  ;;  %v8012_v4 = vpop.f32.mrf.mxu0  ;;  %v9191_v42 = vld [vmem:[#allocation211_spill] sm:$0xff] }
 0x2f7   :  { %v5901_v1 = vpop.eup %5900  ;;  %5926 = vrcp.f32 %v2827_v38  ;;  %v2039_v8 = vpop.f32.mrf.mxu1  ;;  %v2832_v36 = vadd.f32 1.0, %v5899_v50  ;;  %v3571_v39 = vmul.f32 %v3379_v7, %v2033_v11  ;;  %v5126_v63 = vmul.f32 -1.442695, %v9191_v42 }
 0x2f8   :  { %v5903_v14 = vpop.eup %5902  ;;  %5928 = vrcp.f32 %v2820_v13  ;;  %v2839_v46 = vadd.f32 1.0, %v5901_v1  ;;  %v3564_v57 = vmul.f32 %v3372_v6, %v7980_v29  ;;  %v8018_v38 = vpop.f32.mrf.mxu0  ;;  %v9193_v1 = vld [vmem:[#allocation217_spill] sm:$0xff] }
 0x2f9   :  { %4581 = vmatmul.mubr.f32.gmra.mxu0 %v3558_v31  ;;  %v5905_v24 = vpop.eup %5904  ;;  %5930 = vrcp.f32 %v2826_v52  ;;  %v8010_v60 = vpop.f32.mrf.mxu1  ;;  %v3385_v62 = vmul.f32 %v5903_v14, %v9143_v26  ;;  %v9192_v52 = vld [vmem:[#allocation226_spill] sm:$0xff] }
 0x2fa   :  { %4586 = vmatprep.mubr.f32.mxu0 %v3565_v19  ;;  %v5907_v53 = vpop.eup %5906  ;;  %5932 = vrcp.f32 %v2833_v28  ;;  %v3378_v21 = vmul.f32 %v5905_v24, %v9142_v27  ;;  %v8021_v49 = vpop.f32.mrf.mxu0  ;;  %v5139_v19 = vmul.f32 -1.442695, %v9192_v52 }
 0x2fb   :  { %v5909_v48 = vpop.eup %5908  ;;  %5934 = vpow2.f32 %v5127_v59  ;;  %v2045_v10 = vpop.f32.mrf.mxu1  ;;  %v2838_v17 = vadd.f32 1.0, %v5907_v53  ;;  %v3577_v32 = vmul.f32 %v3385_v62, %v2039_v8  ;;  %v5132_v59 = vmul.f32 -1.442695, %v9193_v1 }
 0x2fc   :  { %v5911_v34 = vpop.eup %5910  ;;  %5936 = vpow2.f32 %v5120_v56  ;;  %v2845_v13 = vadd.f32 1.0, %v5909_v48  ;;  %v3570_v26 = vmul.f32 %v3378_v21, %v7990_v0  ;;  %v8027_v14 = vpop.f32.mrf.mxu0  ;;  %v9194_v48 = vld [vmem:[#allocation223_spill] sm:$0xff] }
 0x2fd   :  { %4587 = vmatmul.mubr.f32.gmra.mxu0 %v3564_v57  ;;  %v5913_v29 = vpop.eup %5912  ;;  %5938 = vrcp.f32 %v2832_v36  ;;  %v2049_v11 = vpop.f32.mrf.mxu1  ;;  %v3391_v50 = vmul.f32 %v5911_v34, %v9148_v3 }
 0x2fe   :  { %4592 = vmatprep.mubr.f32.mxu0 %v3571_v39  ;;  %v5915_v51 = vpop.eup %5914  ;;  %5940 = vrcp.f32 %v2839_v46  ;;  %v3384_v31 = vmul.f32 %v5913_v29, %v9153_v44  ;;  %v8030_v36 = vpop.f32.mrf.mxu0 }
 0x2ff   :  { %v5917_v27 = vpop.eup %5916  ;;  %5942 = vpow2.f32 %v5133_v2  ;;  %v2051_v7 = vpop.f32.mrf.mxu1  ;;  %v3583_v6 = vmul.f32 %v3391_v50, %v2045_v10  ;;  %v3397_v53 = vmul.f32 %v5915_v51, %v9154_v22  ;;  %v5138_v2 = vmul.f32 -1.442695, %v9194_v48  ;;  %v9195_v51 = vld [vmem:[#allocation233_spill] sm:$0xff] }
 0x300   :  { %v5919_v28 = vpop.eup %5918  ;;  %5944 = vpow2.f32 %v5126_v63  ;;  %v2844_v8 = vadd.f32 1.0, %v5917_v27  ;;  %v3576_v24 = vmul.f32 %v3384_v31, %v7999_v20  ;;  %v8035_v34 = vpop.f32.mrf.mxu0  ;;  %v9196_v50 = vld [vmem:[#allocation229_spill] sm:$0xff] }
 0x301   :  { %4593 = vmatmul.mubr.f32.gmra.mxu0 %v3570_v26  ;;  %v5921_v0 = vpop.eup %5920  ;;  %5946 = vrcp.f32 %v2838_v17  ;;  %v2055_v3 = vpop.f32.mrf.mxu1  ;;  %v2851_v39 = vadd.f32 1.0, %v5919_v28  ;;  %v3589_v63 = vmul.f32 %v3397_v53, %v2051_v7  ;;  %v5144_v28 = vmul.f32 -1.442695, %v9196_v50 }
 0x302   :  { %4598 = vmatprep.mubr.f32.mxu0 %v3577_v32  ;;  %v5923_v56 = vpop.eup %5922  ;;  %5948 = vrcp.f32 %v2845_v13  ;;  %v3390_v57 = vmul.f32 %v5921_v0, %v9160_v18  ;;  %v8038_v32 = vpop.f32.mrf.mxu0  ;;  %v5145_v13 = vmul.f32 -1.442695, %v9195_v51 }
 0x303   :  { %v5925_v44 = vpop.eup %5924  ;;  %5950 = vpow2.f32 %v5139_v19  ;;  %v2057_v62 = vpop.f32.mrf.mxu1  ;;  %v2850_v20 = vadd.f32 1.0, %v5923_v56 }
 0x304   :  { %v5927_v46 = vpop.eup %5926  ;;  %5952 = vpow2.f32 %v5132_v59  ;;  %v2857_v29 = vadd.f32 1.0, %v5925_v44  ;;  %v3582_v17 = vmul.f32 %v3390_v57, %v8010_v60  ;;  %v8044_v59 = vpop.f32.mrf.mxu0 }
 0x305   :  { %4599 = vmatmul.mubr.f32.gmra.mxu0 %v3576_v24  ;;  %v5929_v21 = vpop.eup %5928  ;;  %5954 = vrcp.f32 %v2844_v8  ;;  %v2061_v22 = vpop.f32.mrf.mxu1  ;;  %v3403_v26 = vmul.f32 %v5927_v46, %v9161_v33 }
 0x306   :  { %4604 = vmatprep.mubr.f32.mxu0 %v3583_v6  ;;  %v5931_v10 = vpop.eup %5930  ;;  %5956 = vrcp.f32 %v2851_v39  ;;  %v3396_v19 = vmul.f32 %v5929_v21, %v9166_v16  ;;  %v8046_v8 = vpop.f32.mrf.mxu0 }
 0x307   :  { %v5933_v18 = vpop.eup %5932  ;;  %5958 = vpow2.f32 %v5138_v2  ;;  %v2063_v31 = vpop.f32.mrf.mxu1  ;;  %v3595_v7 = vmul.f32 %v3403_v26, %v2057_v62  ;;  %v3402_v39 = vmul.f32 %v5931_v10, %v9167_v55 }
 0x308   :  { %v5935_v27 = vpop.eup %5934  ;;  %5960 = vrcp.f32 %v2850_v20  ;;  %v3588_v6 = vmul.f32 %v3396_v19, %v2049_v11  ;;  %v3409_v16 = vmul.f32 %v5933_v18, %v9168_v12  ;;  %v8050_v21 = vpop.f32.mrf.mxu0 }
 0x309   :  { %4605 = vmatmul.mubr.f32.gmra.mxu0 %v3582_v17  ;;  %v5937_v60 = vpop.eup %5936  ;;  %5962 = vrcp.f32 %v2857_v29  ;;  %v2067_v56 = vpop.f32.mrf.mxu1  ;;  %v2863_v24 = vadd.f32 1.0, %v5935_v27  ;;  %v3594_v11 = vmul.f32 %v3402_v39, %v2055_v3 }
 0x30a   :  { %4610 = vmatprep.mubr.f32.mxu0 %v3589_v63  ;;  %v5939_v0 = vpop.eup %5938  ;;  %5964 = vpow2.f32 %v5145_v13  ;;  %v2856_v53 = vadd.f32 1.0, %v5937_v60  ;;  %v3601_v2 = vmul.f32 %v3409_v16, %v2063_v31  ;;  %v8054_v3 = vpop.f32.mrf.mxu0 }
 0x30b   :  { %v5941_v33 = vpop.eup %5940  ;;  %5966 = vpow2.f32 %v5144_v28  ;;  %v2069_v46 = vpop.f32.mrf.mxu1  ;;  %v3408_v55 = vmul.f32 %v5939_v0, %v9173_v61 }
 0x30c   :  { %v5943_v44 = vpop.eup %5942  ;;  %5968 = vrcp.f32 %v2863_v24  ;;  %v3415_v12 = vmul.f32 %v5941_v33, %v9174_v43 }
 0x30d   :  { %4611 = vmatmul.mubr.f32.gmra.mxu0 %v3588_v6  ;;  %v5945_v57 = vpop.eup %5944  ;;  %v2073_v20 = vpop.f32.mrf.mxu1  ;;  %v2869_v29 = vadd.f32 1.0, %v5943_v44  ;;  %5970 = vrcp.f32 %v2856_v53  ;;  %v3600_v27 = vmul.f32 %v3408_v55, %v2061_v22 }
 0x30e   :  { %4616 = vmatprep.mubr.f32.mxu0 %v3595_v7  ;;  %v5947_v62 = vpop.eup %5946  ;;  %v2862_v10 = vadd.f32 1.0, %v5945_v57  ;;  %v3607_v26 = vmul.f32 %v3415_v12, %v2069_v46 }
 0x30f   :  { %v5949_v63 = vpop.eup %5948  ;;  %v2075_v18 = vpop.f32.mrf.mxu1  ;;  %5972 = vrcp.f32 %v2869_v29  ;;  %v3414_v7 = vmul.f32 %v5947_v62, %v9178_v15 }
 0x310   :  { %v5951_v17 = vpop.eup %5950  ;;  %v3421_v60 = vmul.f32 %v5949_v63, %v9179_v54  ;;  %5974 = vrcp.f32 %v2862_v10 }
 0x311   :  { %4617 = vmatmul.mubr.f32.gmra.mxu0 %v3594_v11  ;;  %v5953_v13 = vpop.eup %5952  ;;  %v2079_v19 = vpop.f32.mrf.mxu1  ;;  %v2875_v31 = vadd.f32 1.0, %v5951_v17  ;;  %v3606_v22 = vmul.f32 %v3414_v7, %v2067_v56 }
 0x312   :  { %4622 = vmatprep.mubr.f32.mxu0 %v3601_v2  ;;  %v5955_v28 = vpop.eup %5954  ;;  %v2868_v61 = vadd.f32 1.0, %v5953_v13  ;;  %v3613_v33 = vmul.f32 %v3421_v60, %v2075_v18  ;;  %v8058_v16 = vpop.f32.mrf.mxu0 }
 0x313   :  { %v5957_v43 = vpop.eup %5956  ;;  %v2081_v0 = vpop.f32.mrf.mxu1  ;;  %5976 = vrcp.f32 %v2875_v31  ;;  %v3420_v46 = vmul.f32 %v5955_v28, %v9183_v37 }
 0x314   :  { %v5959_v6 = vpop.eup %5958  ;;  %v3427_v53 = vmul.f32 %v5957_v43, %v9184_v40  ;;  %5978 = vrcp.f32 %v2868_v61  ;;  %v8062_v57 = vpop.f32.mrf.mxu0 }
 0x315   :  { %4623 = vmatmul.mubr.f32.gmra.mxu0 %v3600_v27  ;;  %v5961_v24 = vpop.eup %5960  ;;  %v2085_v44 = vpop.f32.mrf.mxu1  ;;  %v2874_v15 = vadd.f32 1.0, %v5959_v6  ;;  %v3612_v56 = vmul.f32 %v3420_v46, %v2073_v20 }
 0x316   :  { %4628 = vmatprep.mubr.f32.mxu0 %v3607_v26  ;;  %v5963_v39 = vpop.eup %5962  ;;  %v3619_v11 = vmul.f32 %v3427_v53, %v2081_v0  ;;  %v3426_v40 = vmul.f32 %v5961_v24, %v9186_v25 }
 0x317   :  { %v5965_v54 = vpop.eup %5964  ;;  %v2087_v2 = vpop.f32.mrf.mxu1  ;;  %v3433_v12 = vmul.f32 %v5963_v39, %v9187_v23  ;;  %5980 = vrcp.f32 %v2874_v15 }
 0x318   :  { %v5967_v62 = vpop.eup %5966  ;;  %v2881_v29 = vadd.f32 1.0, %v5965_v54  ;;  %v8066_v37 = vpop.f32.mrf.mxu0  ;;  %v3618_v26 = vmul.f32 %v3426_v40, %v2079_v19 }
 0x319   :  { %4629 = vmatmul.mubr.f32.gmra.mxu0 %v3606_v22  ;;  %v2091_v63 = vpop.f32.mrf.mxu1  ;;  %v5969_v17 = vpop.eup %5968  ;;  %v2880_v55 = vadd.f32 1.0, %v5967_v62  ;;  %v3625_v13 = vmul.f32 %v3433_v12, %v2087_v2 }
 0x31a   :  { %4634 = vmatprep.mubr.f32.mxu0 %v3613_v33  ;;  %v5971_v18 = vpop.eup %5970  ;;  %v8068_v27 = vpop.f32.mrf.mxu0  ;;  %5982 = vrcp.f32 %v2881_v29  ;;  %v3439_v28 = vmul.f32 %v5969_v17, %v9188_v30 }
 0x31b   :  { %v2093_v10 = vpop.f32.mrf.mxu1  ;;  %v3432_v31 = vmul.f32 %v5971_v18, %v9189_v47  ;;  %5984 = vrcp.f32 %v2880_v55 }
 0x31c   :  { %v5973_v23 = vpop.eup %5972  ;;  %v8072_v25 = vpop.f32.mrf.mxu0  ;;  %v3631_v7 = vmul.f32 %v3439_v28, %v2093_v10 }
 0x31d   :  { %4635 = vmatmul.mubr.f32.gmra.mxu0 %v3612_v56  ;;  %v2097_v20 = vpop.f32.mrf.mxu1  ;;  %v5975_v43 = vpop.eup %5974  ;;  %v3624_v61 = vmul.f32 %v3432_v31, %v2085_v44  ;;  %v3445_v6 = vmul.f32 %v5973_v23, %v9190_v45 }
 0x31e   :  { %4640 = vmatprep.mubr.f32.mxu0 %v3619_v11  ;;  %v8074_v0 = vpop.f32.mrf.mxu0  ;;  %v3438_v30 = vmul.f32 %v5975_v43, %v9191_v42 }
 0x31f   :  { %v2099_v60 = vpop.f32.mrf.mxu1 }
 0x320   :  { %v5977_v33 = vpop.eup %5976  ;;  %v8078_v24 = vpop.f32.mrf.mxu0  ;;  %v3637_v22 = vmul.f32 %v3445_v6, %v2099_v60  ;;  %v3630_v39 = vmul.f32 %v3438_v30, %v2091_v63 }
 0x321   :  { %4641 = vmatmul.mubr.f32.gmra.mxu0 %v3618_v26  ;;  %v2103_v19 = vpop.f32.mrf.mxu1  ;;  %v5979_v47 = vpop.eup %5978  ;;  %v3451_v44 = vmul.f32 %v5977_v33, %v9192_v52 }
 0x322   :  { %4646 = vmatprep.mubr.f32.mxu0 %v3625_v13  ;;  %v8080_v53 = vpop.f32.mrf.mxu0  ;;  %v3444_v46 = vmul.f32 %v5979_v47, %v9193_v1 }
 0x323   :  { %v2105_v54 = vpop.f32.mrf.mxu1 }
 0x324   :  { %v8084_v15 = vpop.f32.mrf.mxu0  ;;  %v5981_v45 = vpop.eup %5980  ;;  %v3643_v42 = vmul.f32 %v3451_v44, %v2105_v54  ;;  %v3636_v2 = vmul.f32 %v3444_v46, %v2097_v20 }
 0x325   :  { %4647 = vmatmul.mubr.f32.gmra.mxu0 %v3624_v61  ;;  %v3450_v56 = vmul.f32 %v5981_v45, %v9194_v48 }
 0x326   :  { %4652 = vmatprep.mubr.f32.mxu0 %v3631_v7  ;;  %v8086_v62 = vpop.f32.mrf.mxu0 }
 0x327   :  { %v5983_v11 = vpop.eup %5982  ;;  %v3642_v52 = vmul.f32 %v3450_v56, %v2103_v19 }
 0x328   :  { %v8089_v63 = vpop.f32.mrf.mxu0  ;;  %v5985_v29 = vpop.eup %5984  ;;  %v3457_v17 = vmul.f32 %v5983_v11, %v9195_v51 }
 0x329   :  { %4653 = vmatmul.mubr.f32.gmra.mxu0 %v3630_v39  ;;  %v3456_v40 = vmul.f32 %v5985_v29, %v9196_v50 }
 0x32a   :  { %4658 = vmatprep.mubr.f32.mxu0 %v3637_v22  ;;  %v2109_v12 = vpop.f32.mrf.mxu1  ;;  %v8091_v1 = vpop.f32.mrf.mxu0 }
 0x32b   :  { %9197 = vst [vmem:[#allocation78_spill] sm:$0xff] %v8091_v1  ;;  %v3648_v13 = vmul.f32 %v3456_v40, %v2109_v12 }
 0x32c   :  { %v2111_v55 = vpop.f32.mrf.mxu1  ;;  %v8095_v10 = vpop.f32.mrf.mxu0 }
 0x32d   :  { %4659 = vmatmul.mubr.f32.gmra.mxu0 %v3636_v2  ;;  %9198 = vst [vmem:[#allocation18_spill] sm:$0xff] %v8095_v10  ;;  %v3649_v18 = vmul.f32 %v3457_v17, %v2111_v55 }
 0x32e   :  { %4664 = vmatprep.mubr.f32.mxu0 %v3643_v42  ;;  %v8097_v48 = vpop.f32.mrf.mxu0 }
 0x32f   :  { %9199 = vst [vmem:[#allocation114_spill] sm:$0xff] %v8097_v48  ;;  %v8099_v26 = vpop.f32.mrf.mxu1 }
 0x330   :  { %v8101_v20 = vpop.f32.mrf.mxu0 }
 0x331   :  { %4665 = vmatmul.mubr.f32.gmra.mxu0 %v3642_v52  ;;  %9200 = vst [vmem:[#allocation84_spill] sm:$0xff] %v8101_v20  ;;  %v8103_v28 = vpop.f32.mrf.mxu1 }
 0x332   :  { %4670 = vmatprep.mubr.f32.mxu0 %v3649_v18  ;;  %v8105_v23 = vpop.f32.mrf.mxu0 }
 0x333   :  { %9201 = vst [vmem:[#allocation132_spill] sm:$0xff] %v8105_v23  ;;  %v8107_v51 = vpop.f32.mrf.mxu1 }
 0x334   :  { %v8109_v50 = vpop.f32.mrf.mxu0 }
 0x335   :  { %4671 = vmatmul.mubr.f32.gmra.mxu0 %v3648_v13  ;;  %9202 = vst [vmem:[#allocation135_spill] sm:$0xff] %v8109_v50  ;;  %v8111_v31 = vpop.f32.mrf.mxu1 }
 0x336   :  { %v8113_v60 = vpop.f32.mrf.mxu0 }
 0x337   :  { %9203 = vst [vmem:[#allocation28_spill] sm:$0xff] %v8113_v60  ;;  %v8115_v43 = vpop.f32.mrf.mxu1 }
 0x338   :  { %v8117_v7 = vpop.f32.mrf.mxu0 }
 0x339   :  { %9204 = vst [vmem:[#allocation137_spill] sm:$0xff] %v8117_v7  ;;  %v8119_v61 = vpop.f32.mrf.mxu1 }
 0x33a   :  { %v8121_v19 = vpop.f32.mrf.mxu0 }
 0x33b   :  { %9205 = vst [vmem:[#allocation82_spill] sm:$0xff] %v8121_v19  ;;  %v8123_v6 = vpop.f32.mrf.mxu1 }
 0x33c   :  { %v8125_v33 = vpop.f32.mrf.mxu0 }
 0x33d   :  { %9206 = vst [vmem:[#allocation22_spill] sm:$0xff] %v8125_v33  ;;  %v8127_v30 = vpop.f32.mrf.mxu1 }
 0x33e   :  { %v8129_v47 = vpop.f32.mrf.mxu0 }
 0x33f   :  { %9207 = vst [vmem:[#allocation124_spill] sm:$0xff] %v8129_v47  ;;  %v8131_v22 = vpop.f32.mrf.mxu1 }
 0x340   :  { %v8133_v39 = vpop.f32.mrf.mxu0 }
 0x341   :  { %9208 = vst [vmem:[#allocation88_spill] sm:$0xff] %v8133_v39  ;;  %v8135_v54 = vpop.f32.mrf.mxu1 }
 0x342   :  { %v8137_v44 = vpop.f32.mrf.mxu0 }
 0x343   :  { %9209 = vst [vmem:[#allocation140_spill] sm:$0xff] %v8137_v44 }
 0x344   :  { %v8139_v46 = vpop.f32.mrf.mxu1 }
 0x345   :  { %v8141_v45 = vpop.f32.mrf.mxu0 }
 0x346   :  { %9210 = vst [vmem:[#allocation32_spill] sm:$0xff] %v8141_v45  ;;  %v8143_v42 = vpop.f32.mrf.mxu1 }
 0x347   :  { %v8145_v2 = vpop.f32.mrf.mxu0 }
 0x348   :  { %9211 = vst [vmem:[#allocation147_spill] sm:$0xff] %v8145_v2  ;;  %v8147_v11 = vpop.f32.mrf.mxu1 }
 0x349   :  { %v8149_v56 = vpop.f32.mrf.mxu0 }
 0x34a   :  { %9212 = vst [vmem:[#allocation86_spill] sm:$0xff] %v8149_v56  ;;  %v8151_v29 = vpop.f32.mrf.mxu1 }
 0x34b   :  { %v8153_v52 = vpop.f32.mrf.mxu0 }
 0x34c   :  { %9213 = vst [vmem:[#allocation26_spill] sm:$0xff] %v8153_v52 }
 0x34d   :  { %v8155_v12 = vpop.f32.mrf.mxu1  ;;  %v8157_v17 = vpop.f32.mrf.mxu0 }
 0x34e   :  { %9214 = vst [vmem:[#allocation134_spill] sm:$0xff] %v8157_v17 }
 0x34f   :  { %v8159_v40 = vpop.f32.mrf.mxu1  ;;  %v8161_v55 = vpop.f32.mrf.mxu0 }
 0x350   :  { %9215 = vst [vmem:[#allocation138_spill] sm:$0xff] %v8161_v55 }
 0x352   :  { %v8163_v18 = vpop.f32.mrf.mxu1  ;;  %v8165_v13 = vpop.f32.mrf.mxu0 }
 0x353   :  { %9216 = vst [vmem:[#allocation145_spill] sm:$0xff] %v8165_v13 }
 0x354   :  { %v8167_v2 = vpop.f32.mrf.mxu1  ;;  %v8169_v45 = vpop.f32.mrf.mxu0 }
 0x355   :  { %9217 = vst [vmem:[#allocation21_spill] sm:$0xff] %v8169_v45 }
 0x356   :  { %v8173_v44 = vpop.f32.mrf.mxu0 }
 0x357   :  { %v8171_v56 = vpop.f32.mrf.mxu1  ;;  %9218 = vst [vmem:[#allocation34_spill] sm:$0xff] %v8173_v44 }
 0x358   :  { %v8177_v39 = vpop.f32.mrf.mxu0 }
 0x359   :  { %v8175_v52 = vpop.f32.mrf.mxu1  ;;  %9219 = vst [vmem:[#allocation157_spill] sm:$0xff] %v8177_v39 }
 0x35b   :  { %v8179_v17 = vpop.f32.mrf.mxu1  ;;  %v8181_v47 = vpop.f32.mrf.mxu0 }
 0x35c   :  { %9220 = vst [vmem:[#allocation90_spill] sm:$0xff] %v8181_v47 }
 0x35d   :  { %v8183_v55 = vpop.f32.mrf.mxu1  ;;  %v8185_v33 = vpop.f32.mrf.mxu0 }
 0x35e   :  { %9221 = vst [vmem:[#allocation30_spill] sm:$0xff] %v8185_v33 }
 0x35f   :  { %v8187_v13 = vpop.f32.mrf.mxu1 }
 0x361   :  { %v8189_v19 = vpop.f32.mrf.mxu0  ;;  %v8191_v45 = vpop.f32.mrf.mxu1 }
 0x362   :  { %9222 = vst [vmem:[#allocation144_spill] sm:$0xff] %v8189_v19 }
 0x363   :  { %v8193_v7 = vpop.f32.mrf.mxu0  ;;  %v8195_v44 = vpop.f32.mrf.mxu1 }
 0x364   :  { %9223 = vst [vmem:[#allocation96_spill] sm:$0xff] %v8193_v7 }
 0x365   :  { %v8197_v60 = vpop.f32.mrf.mxu0  ;;  %v8199_v39 = vpop.f32.mrf.mxu1 }
 0x366   :  { %9224 = vst [vmem:[#allocation92_spill] sm:$0xff] %v8197_v60 }
 0x367   :  { %v8201_v50 = vpop.f32.mrf.mxu0  ;;  %v8203_v47 = vpop.f32.mrf.mxu1 }
 0x368   :  { %9225 = vst [vmem:[#allocation142_spill] sm:$0xff] %v8201_v50  ;;  %9226 = vst [vmem:[#allocation31_spill] sm:$0xff] %v8203_v47 }
 0x369   :  { %v8205_v23 = vpop.f32.mrf.mxu0  ;;  %v8207_v33 = vpop.f32.mrf.mxu1 }
 0x36a   :  { %9227 = vst [vmem:[#allocation36_spill] sm:$0xff] %v8205_v23  ;;  %9228 = vst [vmem:[#allocation167_spill] sm:$0xff] %v8207_v33 }
 0x36b   :  { %v8209_v20 = vpop.f32.mrf.mxu0  ;;  %v8211_v19 = vpop.f32.mrf.mxu1 }
 0x36c   :  { %9229 = vst [vmem:[#allocation94_spill] sm:$0xff] %v8209_v20  ;;  %9230 = vst [vmem:[#allocation33_spill] sm:$0xff] %v8211_v19 }
 0x36d   :  { %v8213_v48 = vpop.f32.mrf.mxu0  ;;  %v8215_v7 = vpop.f32.mrf.mxu1 }
 0x36e   :  { %9231 = vst [vmem:[#allocation154_spill] sm:$0xff] %v8213_v48  ;;  %9232 = vst [vmem:[#allocation100_spill] sm:$0xff] %v8215_v7  ;;  %v4230_v48 = vadd.f32 %v8099_v26, %v7985_v35 }
 0x36f   :  { %v8217_v10 = vpop.f32.mrf.mxu0  ;;  %v8219_v60 = vpop.f32.mrf.mxu1 }
 0x370   :  { %9233 = vst [vmem:[#allocation150_spill] sm:$0xff] %v8217_v10  ;;  %9234 = vst [vmem:[#allocation27_spill] sm:$0xff] %v8219_v60  ;;  %v4232_v10 = vadd.f32 %v8103_v28, %v7992_v41  ;;  %v4242_v41 = vadd.f32 %v8115_v43, %v8007_v5  ;;  %v4250_v5 = vadd.f32 %v8127_v30, %v8021_v49 }
 0x371   :  { %v8221_v1 = vpop.f32.mrf.mxu0  ;;  %v8223_v50 = vpop.f32.mrf.mxu1  ;;  %v4260_v49 = vadd.f32 %v8139_v46, %v8035_v34  ;;  %v4268_v34 = vadd.f32 %v8151_v29, %v8046_v8  ;;  %v4278_v8 = vadd.f32 %v8163_v18, %v8058_v16  ;;  %v4286_v16 = vadd.f32 %v8175_v52, %v8068_v27 }
 0x372   :  { %9235 = vst [vmem:[#allocation37_spill] sm:$0xff] %v8221_v1  ;;  %9236 = vst [vmem:[#allocation39_spill] sm:$0xff] %v8223_v50  ;;  %v4296_v27 = vadd.f32 %v8187_v13, %v8078_v24  ;;  %v4304_v24 = vadd.f32 %v8199_v39, %v8086_v62  ;;  %v9244_v62 = vld [vmem:[#allocation18_spill] sm:$0xff] }
 0x373   :  { %v8225_v47 = vpop.f32.mrf.mxu0  ;;  %v8229_v33 = vpop.f32.mrf.mxu1  ;;  %v9245_v39 = vld [vmem:[#allocation33_spill] sm:$0xff] }
 0x374   :  { %9237 = vst [vmem:[#allocation178_spill] sm:$0xff] %v8225_v47  ;;  %9239 = vst [vmem:[#allocation148_spill] sm:$0xff] %v8229_v33  ;;  %v4236_v47 = vadd.f32 %v8107_v51, %v7996_v9  ;;  %v4244_v9 = vadd.f32 %v8119_v61, %v8012_v4  ;;  %v4254_v4 = vadd.f32 %v8131_v22, %v8027_v14 }
 0x375   :  { %v8227_v23 = vpop.f32.mrf.mxu0  ;;  %v8237_v19 = vpop.f32.mrf.mxu1  ;;  %v4262_v14 = vadd.f32 %v8143_v42, %v8038_v32  ;;  %v4272_v32 = vadd.f32 %v8155_v12, %v8050_v21  ;;  %v4280_v21 = vadd.f32 %v8167_v2, %v8062_v57  ;;  %v4290_v57 = vadd.f32 %v8179_v17, %v8072_v25 }
 0x376   :  { %9238 = vst [vmem:[#allocation98_spill] sm:$0xff] %v8227_v23  ;;  %v4298_v25 = vadd.f32 %v8191_v45, %v8080_v53  ;;  %v9241_v53 = vld [vmem:[#allocation31_spill] sm:$0xff] }
 0x377   :  { %v8231_v20 = vpop.f32.mrf.mxu0  ;;  %v8243_v35 = vpop.f32.mrf.mxu1  ;;  %v4308_v45 = vadd.f32 %v9241_v53, %v8089_v63 }
 0x378   :  { %9240 = vst [vmem:[#allocation35_spill] sm:$0xff] %v8231_v20  ;;  %v4238_v20 = vadd.f32 %v8111_v31, %v8001_v58  ;;  %v4248_v58 = vadd.f32 %v8123_v6, %v8018_v38  ;;  %v4256_v38 = vadd.f32 %v8135_v54, %v8030_v36  ;;  %v4266_v36 = vadd.f32 %v8147_v11, %v8044_v59 }
 0x379   :  { %v4486_v7 = vpop.f32.mrf.mxu0  ;;  %v4274_v59 = vadd.f32 %v8159_v40, %v8054_v3  ;;  %v4284_v3 = vadd.f32 %v8171_v56, %v8066_v37  ;;  %v4292_v37 = vadd.f32 %v8183_v55, %v8074_v0  ;;  %v4302_v0 = vadd.f32 %v8195_v44, %v8084_v15 }
 0x37a   :  { %v4487_v60 = vadd.f32 %v4486_v7, %v4230_v48 }
 0x37b   :  { %v4488_v1 = vpop.f32.mrf.mxu0 }
 0x37c   :  { %4872 = vst [vmem:[#allocation9] sm:$0xff] %v4487_v60  ;;  %v4489_v23 = vadd.f32 %v4488_v1, %v4232_v10  ;;  %v8249_v10 = vpop.f32.mrf.mxu1 }
 0x37d   :  { %v4492_v50 = vpop.f32.mrf.mxu0 }
 0x37e   :  { %4873 = vst [vmem:[#allocation9 + $0x8] sm:$0xff] %v4489_v23  ;;  %v4493_v33 = vadd.f32 %v4492_v50, %v4236_v47  ;;  %v8255_v31 = vpop.f32.mrf.mxu1 }
 0x37f   :  { %v4494_v26 = vpop.f32.mrf.mxu0 }
 0x380   :  { %4874 = vst [vmem:[#allocation9 + $0x10] sm:$0xff] %v4493_v33  ;;  %v4495_v48 = vadd.f32 %v4494_v26, %v4238_v20  ;;  %v8261_v6 = vpop.f32.mrf.mxu1 }
 0x381   :  { %v4498_v28 = vpop.f32.mrf.mxu0 }
 0x382   :  { %4875 = vst [vmem:[#allocation9 + $0x18] sm:$0xff] %v4495_v48  ;;  %v4499_v1 = vadd.f32 %v4498_v28, %v4242_v41  ;;  %v8267_v26 = vpop.f32.mrf.mxu1 }
 0x383   :  { %v4500_v51 = vpop.f32.mrf.mxu0 }
 0x384   :  { %4876 = vst [vmem:[#allocation9 + $0x20] sm:$0xff] %v4499_v1  ;;  %v4501_v23 = vadd.f32 %v4500_v51, %v4244_v9  ;;  %v8273_v28 = vpop.f32.mrf.mxu1 }
 0x385   :  { %v4504_v50 = vpop.f32.mrf.mxu0 }
 0x386   :  { %4877 = vst [vmem:[#allocation9 + $0x28] sm:$0xff] %v4501_v23  ;;  %v4505_v20 = vadd.f32 %v4504_v50, %v4248_v58  ;;  %v8279_v51 = vpop.f32.mrf.mxu1 }
 0x387   :  { %v4506_v60 = vpop.f32.mrf.mxu0 }
 0x388   :  { %4878 = vst [vmem:[#allocation9 + $0x30] sm:$0xff] %v4505_v20  ;;  %v4507_v43 = vadd.f32 %v4506_v60, %v4250_v5  ;;  %v8285_v50 = vpop.f32.mrf.mxu1 }
 0x389   :  { %v4510_v7 = vpop.f32.mrf.mxu0 }
 0x38a   :  { %4879 = vst [vmem:[#allocation9 + $0x38] sm:$0xff] %v4507_v43  ;;  %v4511_v61 = vadd.f32 %v4510_v7, %v4254_v4  ;;  %v8291_v60 = vpop.f32.mrf.mxu1 }
 0x38b   :  { %v4512_v33 = vpop.f32.mrf.mxu0 }
 0x38c   :  { %4880 = vst [vmem:[#allocation9 + $0x40] sm:$0xff] %v4511_v61  ;;  %v4513_v30 = vadd.f32 %v4512_v33, %v4256_v38  ;;  %v8297_v7 = vpop.f32.mrf.mxu1 }
 0x38d   :  { %v4516_v47 = vpop.f32.mrf.mxu0 }
 0x38e   :  { %4881 = vst [vmem:[#allocation9 + $0x48] sm:$0xff] %v4513_v30  ;;  %v4517_v22 = vadd.f32 %v4516_v47, %v4260_v49  ;;  %v8303_v33 = vpop.f32.mrf.mxu1 }
 0x38f   :  { %v4518_v41 = vpop.f32.mrf.mxu0 }
 0x390   :  { %4882 = vst [vmem:[#allocation9 + $0x50] sm:$0xff] %v4517_v22  ;;  %v4519_v54 = vadd.f32 %v4518_v41, %v4262_v14  ;;  %v8309_v47 = vpop.f32.mrf.mxu1 }
 0x391   :  { %v4522_v48 = vpop.f32.mrf.mxu0 }
 0x392   :  { %4883 = vst [vmem:[#allocation9 + $0x58] sm:$0xff] %v4519_v54  ;;  %v4523_v46 = vadd.f32 %v4522_v48, %v4266_v36  ;;  %v9242_v36 = vld [vmem:[#allocation78_spill] sm:$0xff]  ;;  %v9243_v54 = vld [vmem:[#allocation167_spill] sm:$0xff]  ;;  %v8315_v48 = vpop.f32.mrf.mxu1 }
 0x393   :  { %v4524_v9 = vpop.f32.mrf.mxu0  ;;  %v4310_v15 = vadd.f32 %v9243_v54, %v9242_v36 }
 0x394   :  { %4884 = vst [vmem:[#allocation9 + $0x60] sm:$0xff] %v4523_v46  ;;  %v4525_v42 = vadd.f32 %v4524_v9, %v4268_v34  ;;  %v4314_v46 = vadd.f32 %v9245_v39, %v9244_v62  ;;  %v9260_v39 = vld [vmem:[#allocation140_spill] sm:$0xff] }
 0x395   :  { %v4528_v1 = vpop.f32.mrf.mxu0 }
 0x396   :  { %4885 = vst [vmem:[#allocation9 + $0x68] sm:$0xff] %v4525_v42  ;;  %v4529_v11 = vadd.f32 %v4528_v1, %v4272_v32  ;;  %v9246_v42 = vld [vmem:[#allocation114_spill] sm:$0xff]  ;;  %v9247_v1 = vld [vmem:[#allocation100_spill] sm:$0xff] }
 0x397   :  { %v4530_v58 = vpop.f32.mrf.mxu0  ;;  %v4316_v63 = vadd.f32 %v9247_v1, %v9246_v42  ;;  %v9261_v42 = vld [vmem:[#allocation32_spill] sm:$0xff] }
 0x398   :  { %4886 = vst [vmem:[#allocation9 + $0x70] sm:$0xff] %v4529_v11  ;;  %v4531_v29 = vadd.f32 %v4530_v58, %v4274_v59  ;;  %v8321_v11 = vpop.f32.mrf.mxu1 }
 0x399   :  { %v4534_v23 = vpop.f32.mrf.mxu0 }
 0x39a   :  { %4887 = vst [vmem:[#allocation9 + $0x78] sm:$0xff] %v4531_v29  ;;  %v4535_v12 = vadd.f32 %v4534_v23, %v4278_v8  ;;  %v9248_v8 = vld [vmem:[#allocation84_spill] sm:$0xff]  ;;  %v9249_v29 = vld [vmem:[#allocation27_spill] sm:$0xff] }
 0x39b   :  { %v4536_v5 = vpop.f32.mrf.mxu0  ;;  %v4320_v23 = vadd.f32 %v9249_v29, %v9248_v8 }
 0x39c   :  { %4888 = vst [vmem:[#allocation9 + $0x80] sm:$0xff] %v4535_v12  ;;  %v4537_v40 = vadd.f32 %v4536_v5, %v4280_v21  ;;  %v9250_v5 = vld [vmem:[#allocation132_spill] sm:$0xff] }
 0x39d   :  { %v4540_v20 = vpop.f32.mrf.mxu0 }
 0x39e   :  { %4889 = vst [vmem:[#allocation9 + $0x88] sm:$0xff] %v4537_v40  ;;  %v4541_v18 = vadd.f32 %v4540_v20, %v4284_v3  ;;  %v9251_v3 = vld [vmem:[#allocation39_spill] sm:$0xff] }
 0x39f   :  { %v4542_v4 = vpop.f32.mrf.mxu0  ;;  %v4322_v40 = vadd.f32 %v9251_v3, %v9250_v5  ;;  %v9264_v5 = vld [vmem:[#allocation26_spill] sm:$0xff] }
 0x3a0   :  { %4890 = vst [vmem:[#allocation9 + $0x90] sm:$0xff] %v4541_v18  ;;  %v4543_v2 = vadd.f32 %v4542_v4, %v4286_v16  ;;  %v8327_v16 = vpop.f32.mrf.mxu1  ;;  %v9252_v4 = vld [vmem:[#allocation135_spill] sm:$0xff]  ;;  %v4358_v3 = vadd.f32 %v8297_v7, %v9264_v5 }
 0x3a1   :  { %v4546_v43 = vpop.f32.mrf.mxu0 }
 0x3a2   :  { %4891 = vst [vmem:[#allocation9 + $0x98] sm:$0xff] %v4543_v2  ;;  %v4547_v56 = vadd.f32 %v4546_v43, %v4290_v57  ;;  %v9253_v57 = vld [vmem:[#allocation148_spill] sm:$0xff] }
 0x3a3   :  { %v4548_v38 = vpop.f32.mrf.mxu0  ;;  %v4326_v2 = vadd.f32 %v9253_v57, %v9252_v4 }
 0x3a4   :  { %4892 = vst [vmem:[#allocation9 + $0xa0] sm:$0xff] %v4547_v56  ;;  %v4549_v52 = vadd.f32 %v4548_v38, %v4292_v37  ;;  %v9254_v56 = vld [vmem:[#allocation28_spill] sm:$0xff] }
 0x3a5   :  { %v4552_v61 = vpop.f32.mrf.mxu0  ;;  %v4328_v38 = vadd.f32 %v8237_v19, %v9254_v56  ;;  %v9257_v19 = vld [vmem:[#allocation22_spill] sm:$0xff] }
 0x3a6   :  { %4893 = vst [vmem:[#allocation9 + $0xa8] sm:$0xff] %v4549_v52  ;;  %v4553_v17 = vadd.f32 %v4552_v61, %v4296_v27  ;;  %v8333_v52 = vpop.f32.mrf.mxu1  ;;  %v4338_v53 = vadd.f32 %v8255_v31, %v9257_v19 }
 0x3a7   :  { %v4554_v49 = vpop.f32.mrf.mxu0 }
 0x3a8   :  { %4894 = vst [vmem:[#allocation9 + $0xb0] sm:$0xff] %v4553_v17  ;;  %v4555_v55 = vadd.f32 %v4554_v49, %v4298_v25  ;;  %v9255_v25 = vld [vmem:[#allocation137_spill] sm:$0xff] }
 0x3a9   :  { %v4558_v30 = vpop.f32.mrf.mxu0  ;;  %v4332_v17 = vadd.f32 %v8243_v35, %v9255_v25  ;;  %v9268_v25 = vld [vmem:[#allocation21_spill] sm:$0xff] }
 0x3aa   :  { %4895 = vst [vmem:[#allocation9 + $0xb8] sm:$0xff] %v4555_v55  ;;  %v4559_v13 = vadd.f32 %v4558_v30, %v4302_v0  ;;  %v9256_v55 = vld [vmem:[#allocation82_spill] sm:$0xff] }
 0x3ab   :  { %v4560_v14 = vpop.f32.mrf.mxu0  ;;  %v4334_v30 = vadd.f32 %v8249_v10, %v9256_v55  ;;  %v9269_v55 = vld [vmem:[#allocation34_spill] sm:$0xff] }
 0x3ac   :  { %4896 = vst [vmem:[#allocation9 + $0xc0] sm:$0xff] %v4559_v13  ;;  %v4561_v22 = vadd.f32 %v4560_v14, %v4304_v24  ;;  %v8339_v13 = vpop.f32.mrf.mxu1 }
 0x3ad   :  { %v4564_v41 = vpop.f32.mrf.mxu0 }
 0x3ae   :  { %4897 = vst [vmem:[#allocation9 + $0xc8] sm:$0xff] %v4561_v22  ;;  %v4565_v44 = vadd.f32 %v4564_v41, %v4308_v45  ;;  %v9258_v41 = vld [vmem:[#allocation124_spill] sm:$0xff]  ;;  %v4381_v54 = vpop.f32.mrf.mxu1 }
 0x3af   :  { %v4566_v34 = vpop.f32.mrf.mxu0  ;;  %v4340_v35 = vadd.f32 %v8261_v6, %v9258_v41  ;;  %v4350_v6 = vadd.f32 %v8279_v51, %v9261_v42 }
 0x3b0   :  { %4898 = vst [vmem:[#allocation9 + $0xd0] sm:$0xff] %v4565_v44  ;;  %v4567_v9 = vadd.f32 %v4566_v34, %v4310_v15  ;;  %v9259_v44 = vld [vmem:[#allocation88_spill] sm:$0xff] }
 0x3b1   :  { %v4570_v32 = vpop.f32.mrf.mxu0  ;;  %v4344_v10 = vadd.f32 %v8267_v26, %v9259_v44 }
 0x3b2   :  { %4899 = vst [vmem:[#allocation9 + $0xd8] sm:$0xff] %v4567_v9  ;;  %v4571_v59 = vadd.f32 %v4570_v32, %v4314_v46  ;;  %v4346_v46 = vadd.f32 %v8273_v28, %v9260_v39  ;;  %v4385_v9 = vpop.f32.mrf.mxu1 }
 0x3b3   :  { %v4572_v58 = vpop.f32.mrf.mxu0 }
 0x3b4   :  { %4900 = vst [vmem:[#allocation9 + $0xe0] sm:$0xff] %v4571_v59  ;;  %v4573_v21 = vadd.f32 %v4572_v58, %v4316_v63  ;;  %v9262_v59 = vld [vmem:[#allocation147_spill] sm:$0xff]  ;;  %v4387_v8 = vpop.f32.mrf.mxu1 }
 0x3b5   :  { %v4576_v12 = vpop.f32.mrf.mxu0  ;;  %v4352_v58 = vadd.f32 %v8285_v50, %v9262_v59  ;;  %v9276_v59 = vld [vmem:[#allocation142_spill] sm:$0xff] }
 0x3b6   :  { %4901 = vst [vmem:[#allocation9 + $0xe8] sm:$0xff] %v4573_v21  ;;  %v4577_v20 = vadd.f32 %v4576_v12, %v4320_v23  ;;  %v9263_v23 = vld [vmem:[#allocation86_spill] sm:$0xff] }
 0x3b7   :  { %v4578_v18 = vpop.f32.mrf.mxu0  ;;  %v4356_v28 = vadd.f32 %v8291_v60, %v9263_v23  ;;  %v9277_v23 = vld [vmem:[#allocation36_spill] sm:$0xff] }
 0x3b8   :  { %4902 = vst [vmem:[#allocation9 + $0xf0] sm:$0xff] %v4577_v20  ;;  %v4579_v43 = vadd.f32 %v4578_v18, %v4322_v40  ;;  %v4391_v40 = vpop.f32.mrf.mxu1  ;;  %v9265_v18 = vld [vmem:[#allocation134_spill] sm:$0xff] }
 0x3b9   :  { %v4582_v37 = vpop.f32.mrf.mxu0  ;;  %v4362_v50 = vadd.f32 %v8303_v33, %v9265_v18 }
 0x3ba   :  { %4903 = vst [vmem:[#allocation9 + $0xf8] sm:$0xff] %v4579_v43  ;;  %v4583_v27 = vadd.f32 %v4582_v37, %v4326_v2  ;;  %v9266_v2 = vld [vmem:[#allocation138_spill] sm:$0xff]  ;;  %v4393_v37 = vpop.f32.mrf.mxu1 }
 0x3bb   :  { %v4584_v61 = vpop.f32.mrf.mxu0  ;;  %v4364_v43 = vadd.f32 %v8309_v47, %v9266_v2  ;;  %v4374_v47 = vadd.f32 %v8327_v16, %v9269_v55 }
 0x3bc   :  { %4904 = vst [vmem:[#allocation9 + $0x100] sm:$0xff] %v4583_v27  ;;  %v4585_v49 = vadd.f32 %v4584_v61, %v4328_v38  ;;  %v9267_v38 = vld [vmem:[#allocation145_spill] sm:$0xff] }
 0x3bd   :  { %v4588_v0 = vpop.f32.mrf.mxu0  ;;  %v4368_v7 = vadd.f32 %v8315_v48, %v9267_v38 }
 0x3be   :  { %4905 = vst [vmem:[#allocation9 + $0x108] sm:$0xff] %v4585_v49  ;;  %v4589_v24 = vadd.f32 %v4588_v0, %v4332_v17  ;;  %v4370_v17 = vadd.f32 %v8321_v11, %v9268_v25  ;;  %v4397_v49 = vpop.f32.mrf.mxu1 }
 0x3bf   :  { %v4590_v14 = vpop.f32.mrf.mxu0 }
 0x3c0   :  { %4906 = vst [vmem:[#allocation9 + $0x110] sm:$0xff] %v4589_v24  ;;  %v4591_v45 = vadd.f32 %v4590_v14, %v4334_v30  ;;  %v9270_v14 = vld [vmem:[#allocation157_spill] sm:$0xff] }
 0x3c1   :  { %v4594_v22 = vpop.f32.mrf.mxu0  ;;  %v4376_v19 = vadd.f32 %v8333_v52, %v9270_v14 }
 0x3c2   :  { %4907 = vst [vmem:[#allocation9 + $0x118] sm:$0xff] %v4591_v45  ;;  %v4595_v36 = vadd.f32 %v4594_v22, %v4338_v53  ;;  %v4399_v53 = vpop.f32.mrf.mxu1  ;;  %v9271_v22 = vld [vmem:[#allocation90_spill] sm:$0xff] }
 0x3c3   :  { %v4596_v15 = vpop.f32.mrf.mxu0  ;;  %v4380_v11 = vadd.f32 %v8339_v13, %v9271_v22 }
 0x3c4   :  { %4908 = vst [vmem:[#allocation9 + $0x120] sm:$0xff] %v4595_v36  ;;  %v4597_v34 = vadd.f32 %v4596_v15, %v4340_v35  ;;  %v9272_v36 = vld [vmem:[#allocation30_spill] sm:$0xff]  ;;  %v4403_v44 = vpop.f32.mrf.mxu1 }
 0x3c5   :  { %v4600_v62 = vpop.f32.mrf.mxu0  ;;  %v4382_v15 = vadd.f32 %v4381_v54, %v9272_v36 }
 0x3c6   :  { %4909 = vst [vmem:[#allocation9 + $0x128] sm:$0xff] %v4597_v34  ;;  %v4601_v31 = vadd.f32 %v4600_v62, %v4344_v10  ;;  %v9273_v34 = vld [vmem:[#allocation144_spill] sm:$0xff]  ;;  %v4405_v42 = vpop.f32.mrf.mxu1 }
 0x3c7   :  { %v4602_v32 = vpop.f32.mrf.mxu0  ;;  %v4386_v62 = vadd.f32 %v4385_v9, %v9273_v34 }
 0x3c8   :  { %4910 = vst [vmem:[#allocation9 + $0x130] sm:$0xff] %v4601_v31  ;;  %v4603_v1 = vadd.f32 %v4602_v32, %v4346_v46  ;;  %v9274_v46 = vld [vmem:[#allocation96_spill] sm:$0xff] }
 0x3c9   :  { %v4606_v63 = vpop.f32.mrf.mxu0  ;;  %v4388_v31 = vadd.f32 %v4387_v8, %v9274_v46 }
 0x3ca   :  { %4911 = vst [vmem:[#allocation9 + $0x138] sm:$0xff] %v4603_v1  ;;  %v4607_v26 = vadd.f32 %v4606_v63, %v4350_v6  ;;  %v9275_v6 = vld [vmem:[#allocation92_spill] sm:$0xff] }
 0x3cb   :  { %v4608_v29 = vpop.f32.mrf.mxu0  ;;  %v4392_v1 = vadd.f32 %v4391_v40, %v9275_v6 }
 0x3cc   :  { %4912 = vst [vmem:[#allocation9 + $0x140] sm:$0xff] %v4607_v26  ;;  %v4609_v21 = vadd.f32 %v4608_v29, %v4352_v58  ;;  %v4394_v58 = vadd.f32 %v4393_v37, %v9276_v59  ;;  %v4409_v29 = vpop.f32.mrf.mxu1 }
 0x3cd   :  { %v4612_v12 = vpop.f32.mrf.mxu0 }
 0x3ce   :  { %4913 = vst [vmem:[#allocation9 + $0x148] sm:$0xff] %v4609_v21  ;;  %v4613_v51 = vadd.f32 %v4612_v12, %v4356_v28  ;;  %v4398_v28 = vadd.f32 %v4397_v49, %v9277_v23  ;;  %v9278_v12 = vld [vmem:[#allocation94_spill] sm:$0xff] }
 0x3cf   :  { %v4614_v20 = vpop.f32.mrf.mxu0  ;;  %v4400_v5 = vadd.f32 %v4399_v53, %v9278_v12 }
 0x3d0   :  { %4914 = vst [vmem:[#allocation9 + $0x150] sm:$0xff] %v4613_v51  ;;  %v4615_v4 = vadd.f32 %v4614_v20, %v4358_v3  ;;  %v4411_v51 = vpop.f32.mrf.mxu1  ;;  %v9279_v20 = vld [vmem:[#allocation154_spill] sm:$0xff] }
 0x3d1   :  { %v4618_v57 = vpop.f32.mrf.mxu0  ;;  %v4404_v18 = vadd.f32 %v4403_v44, %v9279_v20 }
 0x3d2   :  { %4915 = vst [vmem:[#allocation9 + $0x158] sm:$0xff] %v4615_v4  ;;  %v4619_v60 = vadd.f32 %v4618_v57, %v4362_v50  ;;  %v9280_v57 = vld [vmem:[#allocation150_spill] sm:$0xff] }
 0x3d3   :  { %v4620_v56 = vpop.f32.mrf.mxu0  ;;  %v4406_v2 = vadd.f32 %v4405_v42, %v9280_v57 }
 0x3d4   :  { %4916 = vst [vmem:[#allocation9 + $0x160] sm:$0xff] %v4619_v60  ;;  %v4621_v27 = vadd.f32 %v4620_v56, %v4364_v43  ;;  %v4415_v60 = vpop.f32.mrf.mxu1  ;;  %v9281_v56 = vld [vmem:[#allocation37_spill] sm:$0xff] }
 0x3d5   :  { %v4624_v61 = vpop.f32.mrf.mxu0  ;;  %v4410_v38 = vadd.f32 %v4409_v29, %v9281_v56 }
 0x3d6   :  { %4917 = vst [vmem:[#allocation9 + $0x168] sm:$0xff] %v4621_v27  ;;  %v4625_v33 = vadd.f32 %v4624_v61, %v4368_v7  ;;  %v9282_v61 = vld [vmem:[#allocation178_spill] sm:$0xff] }
 0x3d7   :  { %v4626_v0 = vpop.f32.mrf.mxu0  ;;  %v4412_v25 = vadd.f32 %v4411_v51, %v9282_v61 }
 0x3d8   :  { %4918 = vst [vmem:[#allocation9 + $0x170] sm:$0xff] %v4625_v33  ;;  %v4627_v30 = vadd.f32 %v4626_v0, %v4370_v17  ;;  %v4417_v33 = vpop.f32.mrf.mxu1  ;;  %v9283_v0 = vld [vmem:[#allocation98_spill] sm:$0xff] }
 0x3d9   :  { %v4630_v24 = vpop.f32.mrf.mxu0  ;;  %v4416_v55 = vadd.f32 %v4415_v60, %v9283_v0 }
 0x3da   :  { %4919 = vst [vmem:[#allocation9 + $0x178] sm:$0xff] %v4627_v30  ;;  %v4631_v48 = vadd.f32 %v4630_v24, %v4374_v47  ;;  %v9284_v24 = vld [vmem:[#allocation35_spill] sm:$0xff] }
 0x3db   :  { %v4632_v45 = vpop.f32.mrf.mxu0  ;;  %v4418_v14 = vadd.f32 %v4417_v33, %v9284_v24 }
 0x3dc   :  { %4920 = vst [vmem:[#allocation9 + $0x180] sm:$0xff] %v4631_v48  ;;  %v4633_v41 = vadd.f32 %v4632_v45, %v4376_v19 }
 0x3dd   :  { %v4636_v35 = vpop.f32.mrf.mxu0 }
 0x3de   :  { %4921 = vst [vmem:[#allocation9 + $0x188] sm:$0xff] %v4633_v41  ;;  %v4637_v16 = vadd.f32 %v4636_v35, %v4380_v11 }
 0x3df   :  { %v4638_v10 = vpop.f32.mrf.mxu0 }
 0x3e0   :  { %4922 = vst [vmem:[#allocation9 + $0x190] sm:$0xff] %v4637_v16  ;;  %v4639_v52 = vadd.f32 %v4638_v10, %v4382_v15 }
 0x3e1   :  { %v4642_v39 = vpop.f32.mrf.mxu0 }
 0x3e2   :  { %4923 = vst [vmem:[#allocation9 + $0x198] sm:$0xff] %v4639_v52  ;;  %v4643_v32 = vadd.f32 %v4642_v39, %v4386_v62 }
 0x3e3   :  { %v4644_v13 = vpop.f32.mrf.mxu0 }
 0x3e4   :  { %4924 = vst [vmem:[#allocation9 + $0x1a0] sm:$0xff] %v4643_v32  ;;  %v4645_v63 = vadd.f32 %v4644_v13, %v4388_v31 }
 0x3e5   :  { %v4648_v54 = vpop.f32.mrf.mxu0 }
 0x3e6   :  { %4925 = vst [vmem:[#allocation9 + $0x1a8] sm:$0xff] %v4645_v63  ;;  %v4649_v26 = vadd.f32 %v4648_v54, %v4392_v1 }
 0x3e7   :  { %v4650_v9 = vpop.f32.mrf.mxu0 }
 0x3e8   :  { %4926 = vst [vmem:[#allocation9 + $0x1b0] sm:$0xff] %v4649_v26  ;;  %v4651_v21 = vadd.f32 %v4650_v9, %v4394_v58 }
 0x3e9   :  { %v4654_v8 = vpop.f32.mrf.mxu0 }
 0x3ea   :  { %4927 = vst [vmem:[#allocation9 + $0x1b8] sm:$0xff] %v4651_v21  ;;  %v4655_v3 = vadd.f32 %v4654_v8, %v4398_v28 }
 0x3eb   :  { %v4656_v40 = vpop.f32.mrf.mxu0 }
 0x3ec   :  { %4928 = vst [vmem:[#allocation9 + $0x1c0] sm:$0xff] %v4655_v3  ;;  %v4657_v50 = vadd.f32 %v4656_v40, %v4400_v5 }
 0x3ed   :  { %v4660_v4 = vpop.f32.mrf.mxu0 }
 0x3ee   :  { %4929 = vst [vmem:[#allocation9 + $0x1c8] sm:$0xff] %v4657_v50  ;;  %v4661_v43 = vadd.f32 %v4660_v4, %v4404_v18 }
 0x3ef   :  { %v4662_v37 = vpop.f32.mrf.mxu0 }
 0x3f0   :  { %4930 = vst [vmem:[#allocation9 + $0x1d0] sm:$0xff] %v4661_v43  ;;  %v4663_v7 = vadd.f32 %v4662_v37, %v4406_v2 }
 0x3f1   :  { %v4666_v27 = vpop.f32.mrf.mxu0 }
 0x3f2   :  { %4931 = vst [vmem:[#allocation9 + $0x1d8] sm:$0xff] %v4663_v7  ;;  %v4667_v17 = vadd.f32 %v4666_v27, %v4410_v38 }
 0x3f3   :  { %v4668_v49 = vpop.f32.mrf.mxu0 }
 0x3f4   :  { %4932 = vst [vmem:[#allocation9 + $0x1e0] sm:$0xff] %v4667_v17  ;;  %v4669_v47 = vadd.f32 %v4668_v49, %v4412_v25 }
 0x3f5   :  { %v4672_v30 = vpop.f32.mrf.mxu0 }
 0x3f6   :  { %4933 = vst [vmem:[#allocation9 + $0x1e8] sm:$0xff] %v4669_v47  ;;  %v4673_v19 = vadd.f32 %v4672_v30, %v4416_v55 }
 0x3f7   :  { %v4674_v48 = vpop.f32.mrf.mxu0 }
 0x3f8   :  { %4934 = vst [vmem:[#allocation9 + $0x1f0] sm:$0xff] %v4673_v19  ;;  %v4675_v53 = vadd.f32 %v4674_v48, %v4418_v14 }
 0x3fa   :  { %4935 = vst [vmem:[#allocation9 + $0x1f8] sm:$0xff] %v4675_v53 }
 0x3fb   :  { %6185 = shalt.err (!%p6182_p5)
}
 0x3fc   :  { %4947 = dma.vmem_to_hbm [thread:$0]  %s4942_s2, 8192, %s8393_s3, [#allocation5], %s6204_s22, %s6204_s22, %s6205_s23  }
 0x3fd   :  { %6198 = dma.done.wait [#allocation5], 8192  }
 0x3fe   :  { %6199 = vsyncadd [#allocation5], 4294959104 }
 0x3ff   :  { %4951 = vsyncpa [#allocation4], 1 }
 0x400   :  { %4952 = vsyncpa [#allocation7], 1 }
 0x401   :  { %4953 = vsyncpa [#allocation5], 1 }

</bundles_post_ra>
